<compile_context>
chip_gen: v5e
topology: v5e:2x2
jax: 0.10.0
libtpu: 0.0.40
codegen_flags: <defaults>
</compile_context>

<pallas_src>
import functools

import jax
import jax.numpy as jnp
from jax.experimental import pallas as pl
from jax.experimental.pallas import tpu as pltpu

K_MAX = 7  # all inception branch kernels are embedded into a 7x7x7 tap grid


# ----------------------------- Pallas kernels -----------------------------

def _matmul_bn_relu_kernel(x_ref, w_ref, shift_ref, o_ref):
    """out = relu(x @ W_scaled + shift)  == Conv3d (as matmul) + BN(eval) + ReLU."""
    acc = jnp.dot(x_ref[...], w_ref[...], preferred_element_type=jnp.float32)
    o_ref[...] = jnp.maximum(acc + shift_ref[...], 0.0).astype(o_ref.dtype)


def _fused_inception_kernel(p_ref, w_ref, shift_ref, p3_ref, p5_ref,
                            o_ref, acc_ref, *, groups, cout):
    """K-blocked matmul of the shared k=7 patches against the 4 concatenated branch
    weight matrices.  Epilogue (last K step): per-branch shift + ReLU, sum the branch
    groups and add the two max-pool branches, then store.  One call per block."""
    k = pl.program_id(1)

    @pl.when(k == 0)
    def _():
        acc_ref[...] = jnp.zeros_like(acc_ref)

    acc_ref[...] += jnp.dot(p_ref[...], w_ref[...],
                            preferred_element_type=jnp.float32)

    @pl.when(k == pl.num_programs(1) - 1)
    def _():
        y = jnp.maximum(acc_ref[...] + shift_ref[...], 0.0)   # per-branch BN shift + ReLU
        s = y[:, 0:cout]
        for g in range(1, groups):                            # sum the 4 conv branches
            s = s + y[:, g * cout:(g + 1) * cout]
        o_ref[...] = (s + p3_ref[...] + p5_ref[...]).astype(o_ref.dtype)


def _pool3_pool5_kernel(xp_ref, p3_ref, p5_ref):
    """MaxPool3d(3,1,1) and MaxPool3d(5,1,2) from one -inf pad-2 input block.
    Separable 1-D max passes (9 taps instead of 27); the 5-pool is two stacked 3-pools."""
    _, d, h, w, _ = p3_ref.shape
    x = xp_ref[...]                                           # (1, d+4, h+4, w+4, c)

    def pool3_sep(v, dd, hh, ww):
        v = jnp.maximum(jnp.maximum(v[:, 0:dd], v[:, 1:dd + 1]), v[:, 2:dd + 2])
        v = jnp.maximum(jnp.maximum(v[:, :, 0:hh], v[:, :, 1:hh + 1]), v[:, :, 2:hh + 2])
        v = jnp.maximum(jnp.maximum(v[:, :, :, 0:ww], v[:, :, :, 1:ww + 1]),
                        v[:, :, :, 2:ww + 2])
        return v

    y = pool3_sep(x, d + 2, h + 2, w + 2)                     # 3-pool on the pad-2 array
    p3_ref[...] = y[:, 1:d + 1, 1:h + 1, 1:w + 1, :]          # center crop == pool3(x)
    p5_ref[...] = pool3_sep(y, d, h, w)                       # stacked == pool5(x)


# ----------------------------- wrappers (glue) -----------------------------

def _pick_tile(m):
    # largest tile that divides m while keeping grid extent >= 2 (both v7x TCs get work);
    # multiples of 16 keep bf16 sublane packing happy.
    for t in (256, 128, 64, 32, 16, 8):
        if m % t == 0 and m // t >= 2:
            return t
    return m


def _im2col_3d(x, k):
    """x: (N, D, H, W, C) -> (N*D*H*W, k^3*C); tap-major then channel ordering."""
    n, d, h, w, c = x.shape
    p = (k - 1) // 2
    xp = jnp.pad(x, ((0, 0), (p, p), (p, p), (p, p), (0, 0)))
    cols = []
    for kd in range(k):
        for kh in range(k):
            for kw in range(k):
                cols.append(xp[:, kd:kd + d, kh:kh + h, kw:kw + w, :])
    patches = jnp.stack(cols, axis=4)                         # (N, D, H, W, k^3, C)
    return patches.reshape(n * d * h * w, k * k * k * c)


def conv_bn_relu(x, params):
    """Conv3d(k, pad=(k-1)//2) + BN(eval) + ReLU, channels-last.  Used for the 1x1
    bottleneck (no im2col) and the non-inception path."""
    n, d, h, w, cin = x.shape
    k = params["w"].shape[0]
    cout = params["w"].shape[-1]
    w_folded = (params["w"] * params["scale"]).reshape(k ** 3 * cin, cout)
    shift = params["shift"].reshape(1, cout)

    xb = x.astype(jnp.bfloat16)
    lhs = xb.reshape(n * d * h * w, cin) if k == 1 else _im2col_3d(xb, k)
    m, kdim = lhs.shape
    tm = _pick_tile(m)

    out = pl.pallas_call(
        _matmul_bn_relu_kernel,
        out_shape=jax.ShapeDtypeStruct((m, cout), jnp.float32),
        grid_spec=pltpu.PrefetchScalarGridSpec(
            num_scalar_prefetch=0,
            grid=(m // tm,),
            in_specs=[
                pl.BlockSpec((tm, kdim), lambda i: (i, 0)),
                pl.BlockSpec((kdim, cout), lambda i: (0, 0)),
                pl.BlockSpec((1, cout), lambda i: (0, 0)),
            ],
            out_specs=pl.BlockSpec((tm, cout), lambda i: (i, 0)),
        ),
        compiler_params=pltpu.CompilerParams(dimension_semantics=("parallel",)),
    )(lhs, w_folded.astype(jnp.bfloat16), shift)
    return out.reshape(n, d, h, w, cout)


def _embed_kernel_7(wk, scale):
    """Zero-pad a (k,k,k,cin,cout) kernel to 7x7x7 (centered) and fold the BN scale."""
    k = wk.shape[0]
    off = (K_MAX - k) // 2
    w7 = jnp.zeros((K_MAX, K_MAX, K_MAX) + wk.shape[3:], wk.dtype)
    w7 = w7.at[off:off + k, off:off + k, off:off + k].set(wk)
    return w7 * scale


def fused_inception_branches(bn, p3, p5, branch_params, chs):
    """conv1+conv3+conv5+conv7 of `bn` (each +BN+ReLU), summed with the two pool
    branches -- all in a single pallas_call fed by one shared k=7 im2col."""
    n, d, h, w, cin = bn.shape
    m = n * d * h * w
    groups = len(branch_params)

    # Concatenated, BN-scale-folded weights: (343*cin, groups*chs); matching shifts.
    w_cat = jnp.concatenate(
        [_embed_kernel_7(p["w"], p["scale"]).reshape(K_MAX ** 3 * cin, chs)
         for p in branch_params], axis=1)
    shift = jnp.concatenate(
        [p["shift"] for p in branch_params]).reshape(1, groups * chs)

    patches = _im2col_3d(bn.astype(jnp.bfloat16), K_MAX)      # (M, 343*cin), bf16
    kdim = patches.shape[1]

    # Pad the reduction dim with zeros to a multiple of the K tile (no-op math).
    tk = 256 if kdim > 256 else kdim
    kpad = (-kdim) % tk
    if kpad:
        patches = jnp.pad(patches, ((0, 0), (0, kpad)))
        w_cat = jnp.pad(w_cat, ((0, kpad), (0, 0)))
    kdim_p = kdim + kpad

    tm = _pick_tile(m)
    p3f = p3.reshape(m, chs)
    p5f = p5.reshape(m, chs)

    out = pl.pallas_call(
        functools.partial(_fused_inception_kernel, groups=groups, cout=chs),
        out_shape=jax.ShapeDtypeStruct((m, chs), jnp.float32),
        grid_spec=pltpu.PrefetchScalarGridSpec(
            num_scalar_prefetch=0,
            grid=(m // tm, kdim_p // tk),
            in_specs=[
                pl.BlockSpec((tm, tk), lambda i, k: (i, k)),
                pl.BlockSpec((tk, groups * chs), lambda i, k: (k, 0)),
                pl.BlockSpec((1, groups * chs), lambda i, k: (0, 0)),
                pl.BlockSpec((tm, chs), lambda i, k: (i, 0)),
                pl.BlockSpec((tm, chs), lambda i, k: (i, 0)),
            ],
            out_specs=pl.BlockSpec((tm, chs), lambda i, k: (i, 0)),
            scratch_shapes=[pltpu.VMEM((tm, groups * chs), jnp.float32)],
        ),
        compiler_params=pltpu.CompilerParams(
            dimension_semantics=("parallel", "arbitrary")),
    )(patches, w_cat.astype(jnp.bfloat16), shift, p3f, p5f)
    return out.reshape(n, d, h, w, chs)


def maxpool_3_and_5(x):
    """Returns (MaxPool3d(3,1,1)(x), MaxPool3d(5,1,2)(x)) from one kernel, blocked over N."""
    n, d, h, w, c = x.shape
    xp = jnp.pad(x, ((0, 0), (2, 2), (2, 2), (2, 2), (0, 0)),
                 constant_values=-jnp.inf)
    return pl.pallas_call(
        _pool3_pool5_kernel,
        out_shape=[jax.ShapeDtypeStruct(x.shape, x.dtype),
                   jax.ShapeDtypeStruct(x.shape, x.dtype)],
        grid_spec=pltpu.PrefetchScalarGridSpec(
            num_scalar_prefetch=0,
            grid=(n,),
            in_specs=[pl.BlockSpec((1, d + 4, h + 4, w + 4, c),
                                   lambda i: (i, 0, 0, 0, 0))],
            out_specs=[pl.BlockSpec((1, d, h, w, c), lambda i: (i, 0, 0, 0, 0)),
                       pl.BlockSpec((1, d, h, w, c), lambda i: (i, 0, 0, 0, 0))],
        ),
        compiler_params=pltpu.CompilerParams(dimension_semantics=("parallel",)),
    )(xp)


# ----------------------------- parameters -----------------------------

def _init_conv_bn(key, cin, cout, k):
    """Deterministic synthetic params; conv bias + eval-mode BN folded into scale/shift."""
    kw, kb, kg, kbe, km, kv = jax.random.split(key, 6)
    fan_in = cin * k ** 3
    w = jax.random.normal(kw, (k, k, k, cin, cout), jnp.float32) / jnp.sqrt(float(fan_in))
    b = 0.1 * jax.random.normal(kb, (cout,), jnp.float32)
    gamma = 1.0 + 0.1 * jax.random.normal(kg, (cout,), jnp.float32)
    beta = 0.1 * jax.random.normal(kbe, (cout,), jnp.float32)
    mean = 0.1 * jax.random.normal(km, (cout,), jnp.float32)
    var = 1.0 + 0.1 * jnp.abs(jax.random.normal(kv, (cout,), jnp.float32))
    eps = 1e-5
    scale = gamma / jnp.sqrt(var + eps)
    shift = (b - mean) * scale + beta
    return {"w": w, "scale": scale, "shift": shift}


def init_encoder_params(key, chs, repeat_num, use_inception):
    assert chs % 2 == 0
    params = []
    for _ in range(repeat_num):
        key, sub = jax.random.split(key)
        if use_inception:
            ks = jax.random.split(sub, 5)
            bn_ch = chs // 2
            params.append({
                "bottleneck": _init_conv_bn(ks[0], chs, bn_ch, 1),
                "conv1": _init_conv_bn(ks[1], bn_ch, chs, 1),
                "conv3": _init_conv_bn(ks[2], bn_ch, chs, 3),
                "conv5": _init_conv_bn(ks[3], bn_ch, chs, 5),
                "conv7": _init_conv_bn(ks[4], bn_ch, chs, 7),
            })
        else:
            params.append({"conv3": _init_conv_bn(sub, chs, chs, 3)})
    return params


# ----------------------------- forward -----------------------------

def inception_block(x, p, chs):
    bn = conv_bn_relu(x, p["bottleneck"])          # 1x1x1 conv + BN + ReLU
    p3, p5 = maxpool_3_and_5(x)                    # both pool branches, one call
    return fused_inception_branches(
        bn, p3, p5, [p["conv1"], p["conv3"], p["conv5"], p["conv7"]], chs)


def encoder_forward(x_ncdhw, params, use_inception=True):
    # PyTorch NCDHW -> channels-last NDHWC for the kernels, back to NCDHW at the end.
    x = jnp.transpose(x_ncdhw, (0, 2, 3, 4, 1))
    chs = x.shape[-1]
    for p in params:
        if use_inception:
            x = inception_block(x, p, chs)
        else:
            x = conv_bn_relu(x, p["conv3"])
    return jnp.transpose(x, (0, 4, 1, 2, 3))


# ----------------------------- main -----------------------------

if __name__ == "__main__":
    chs, repeat_num, use_inception = 4, 2, True
    n, dd = 2, 8  # (N, C, D, H, W) = (2, 4, 8, 8, 8)

    key = jax.random.PRNGKey(0)
    kx, kp = jax.random.split(key)
    x = jax.random.normal(kx, (n, chs, dd, dd, dd), jnp.float32)
    params = init_encoder_params(kp, chs, repeat_num, use_inception)

    fwd = jax.jit(functools.partial(encoder_forward, use_inception=use_inception))
    out = fwd(x, params)
    jax.block_until_ready(out)

    assert out.shape == x.shape, out.shape
    assert bool(jnp.all(jnp.isfinite(out)))
    print("KERNEL_OK")
</pallas_src>

<mosaic_0001>
module attributes {stable_mosaic.version = 11 : i64} {
  func.func @_matmul_bn_relu_kernel(%arg0: i32, %arg1: memref<256x4xbf16, #tpu.memory_space<vmem>>, %arg2: memref<4x2xbf16, #tpu.memory_space<vmem>>, %arg3: memref<1x2xf32, #tpu.memory_space<vmem>>, %arg4: memref<256x2xf32, #tpu.memory_space<vmem>>) attributes {dimension_semantics = [#tpu.dimension_semantics<parallel>], iteration_bounds = array<i64: 4>, scalar_prefetch = 0 : i64, scratch_operands = 0 : i64, tpu.core_type = #tpu.core_type<tc>, window_params = [{transform_indices = @transform_0, window_bounds = array<i64: 256, 4>}, {pipeline_mode = #tpu.pipeline_mode<synchronous>, transform_indices = @transform_1, window_bounds = array<i64: 4, 2>}, {pipeline_mode = #tpu.pipeline_mode<synchronous>, transform_indices = @transform_2, window_bounds = array<i64: 1, 2>}, {transform_indices = @transform_3, window_bounds = array<i64: 256, 2>}]} {
    %c0 = arith.constant 0 : index
    %c0_0 = arith.constant 0 : index
    %0 = vector.load %arg1[%c0, %c0_0] : memref<256x4xbf16, #tpu.memory_space<vmem>>, vector<256x4xbf16>
    %c0_1 = arith.constant 0 : index
    %c0_2 = arith.constant 0 : index
    %1 = vector.load %arg2[%c0_1, %c0_2] : memref<4x2xbf16, #tpu.memory_space<vmem>>, vector<4x2xbf16>
    %cst = arith.constant dense<0.000000e+00> : vector<256x2xf32>
    %2 = tpu.matmul %0, %1, %cst {dimension_numbers = #tpu.dot_dimension_numbers<[1], [0], [0], [1], [0, 0, 1, 1], [], []>} : vector<256x4xbf16>, vector<4x2xbf16>, vector<256x2xf32> -> vector<256x2xf32>
    %c0_3 = arith.constant 0 : index
    %c0_4 = arith.constant 0 : index
    %3 = vector.load %arg3[%c0_3, %c0_4] : memref<1x2xf32, #tpu.memory_space<vmem>>, vector<1x2xf32>
    %4 = vector.broadcast %3 : vector<1x2xf32> to vector<256x2xf32>
    %5 = arith.addf %2, %4 : vector<256x2xf32>
    %cst_5 = arith.constant 0.000000e+00 : f32
    %6 = vector.broadcast %cst_5 : f32 to vector<256x2xf32>
    %7 = arith.maximumf %5, %6 : vector<256x2xf32>
    %c0_6 = arith.constant 0 : index
    %c0_7 = arith.constant 0 : index
    %8 = vector.load %arg4[%c0_6, %c0_7] : memref<256x2xf32, #tpu.memory_space<vmem>>, vector<256x2xf32>
    tpu.vector_store %arg4[%c0_6, %c0_7], %7 {strides = array<i32>} : memref<256x2xf32, #tpu.memory_space<vmem>>, vector<256x2xf32>,
    return
  }
  func.func @transform_0(%arg0: i32) -> (i32, i32) {
    %c0_i32 = arith.constant 0 : i32
    %c0_i32_0 = arith.constant 0 : i32
    return %arg0, %c0_i32 : i32, i32
  }
  func.func @transform_1(%arg0: i32) -> (i32, i32) {
    %c0_i32 = arith.constant 0 : i32
    %c0_i32_0 = arith.constant 0 : i32
    %c0_i32_1 = arith.constant 0 : i32
    return %c0_i32, %c0_i32_0 : i32, i32
  }
  func.func @transform_2(%arg0: i32) -> (i32, i32) {
    %c0_i32 = arith.constant 0 : i32
    %c0_i32_0 = arith.constant 0 : i32
    %c0_i32_1 = arith.constant 0 : i32
    return %c0_i32, %c0_i32_0 : i32, i32
  }
  func.func @transform_3(%arg0: i32) -> (i32, i32) {
    %c0_i32 = arith.constant 0 : i32
    %c0_i32_0 = arith.constant 0 : i32
    return %arg0, %c0_i32 : i32, i32
  }
}

module attributes {stable_mosaic.version = 11 : i64} {
  func.func @_pool3_pool5_kernel(%arg0: i32, %arg1: memref<1x12x12x12x4xf32, #tpu.memory_space<vmem>>, %arg2: memref<1x8x8x8x4xf32, #tpu.memory_space<vmem>>, %arg3: memref<1x8x8x8x4xf32, #tpu.memory_space<vmem>>) attributes {dimension_semantics = [#tpu.dimension_semantics<parallel>], iteration_bounds = array<i64: 2>, scalar_prefetch = 0 : i64, scratch_operands = 0 : i64, tpu.core_type = #tpu.core_type<tc>, window_params = [{transform_indices = @transform_0, window_bounds = array<i64: 1, 12, 12, 12, 4>}, {transform_indices = @transform_1, window_bounds = array<i64: 1, 8, 8, 8, 4>}, {transform_indices = @transform_2, window_bounds = array<i64: 1, 8, 8, 8, 4>}]} {
    %c0 = arith.constant 0 : index
    %c0_0 = arith.constant 0 : index
    %c0_1 = arith.constant 0 : index
    %c0_2 = arith.constant 0 : index
    %c0_3 = arith.constant 0 : index
    %0 = vector.load %arg1[%c0, %c0_0, %c0_1, %c0_2, %c0_3] : memref<1x12x12x12x4xf32, #tpu.memory_space<vmem>>, vector<1x12x12x12x4xf32>
    %1 = vector.extract_strided_slice %0 {offsets = [0, 0, 0, 0, 0], sizes = [1, 10, 12, 12, 4], strides = [1, 1, 1, 1, 1]} : vector<1x12x12x12x4xf32> to vector<1x10x12x12x4xf32>
    %2 = vector.extract_strided_slice %0 {offsets = [0, 1, 0, 0, 0], sizes = [1, 10, 12, 12, 4], strides = [1, 1, 1, 1, 1]} : vector<1x12x12x12x4xf32> to vector<1x10x12x12x4xf32>
    %3 = arith.maximumf %1, %2 : vector<1x10x12x12x4xf32>
    %4 = vector.extract_strided_slice %0 {offsets = [0, 2, 0, 0, 0], sizes = [1, 10, 12, 12, 4], strides = [1, 1, 1, 1, 1]} : vector<1x12x12x12x4xf32> to vector<1x10x12x12x4xf32>
    %5 = arith.maximumf %3, %4 : vector<1x10x12x12x4xf32>
    %6 = vector.extract_strided_slice %5 {offsets = [0, 0, 0, 0, 0], sizes = [1, 10, 10, 12, 4], strides = [1, 1, 1, 1, 1]} : vector<1x10x12x12x4xf32> to vector<1x10x10x12x4xf32>
    %7 = vector.extract_strided_slice %5 {offsets = [0, 0, 1, 0, 0], sizes = [1, 10, 10, 12, 4], strides = [1, 1, 1, 1, 1]} : vector<1x10x12x12x4xf32> to vector<1x10x10x12x4xf32>
    %8 = arith.maximumf %6, %7 : vector<1x10x10x12x4xf32>
    %9 = vector.extract_strided_slice %5 {offsets = [0, 0, 2, 0, 0], sizes = [1, 10, 10, 12, 4], strides = [1, 1, 1, 1, 1]} : vector<1x10x12x12x4xf32> to vector<1x10x10x12x4xf32>
    %10 = arith.maximumf %8, %9 : vector<1x10x10x12x4xf32>
    %11 = vector.extract_strided_slice %10 {offsets = [0, 0, 0, 0, 0], sizes = [1, 10, 10, 10, 4], strides = [1, 1, 1, 1, 1]} : vector<1x10x10x12x4xf32> to vector<1x10x10x10x4xf32>
    %12 = vector.extract_strided_slice %10 {offsets = [0, 0, 0, 1, 0], sizes = [1, 10, 10, 10, 4], strides = [1, 1, 1, 1, 1]} : vector<1x10x10x12x4xf32> to vector<1x10x10x10x4xf32>
    %13 = arith.maximumf %11, %12 : vector<1x10x10x10x4xf32>
    %14 = vector.extract_strided_slice %10 {offsets = [0, 0, 0, 2, 0], sizes = [1, 10, 10, 10, 4], strides = [1, 1, 1, 1, 1]} : vector<1x10x10x12x4xf32> to vector<1x10x10x10x4xf32>
    %15 = arith.maximumf %13, %14 : vector<1x10x10x10x4xf32>
    %16 = vector.extract_strided_slice %15 {offsets = [0, 1, 1, 1, 0], sizes = [1, 8, 8, 8, 4], strides = [1, 1, 1, 1, 1]} : vector<1x10x10x10x4xf32> to vector<1x8x8x8x4xf32>
    %c0_4 = arith.constant 0 : index
    %c0_5 = arith.constant 0 : index
    %c0_6 = arith.constant 0 : index
    %c0_7 = arith.constant 0 : index
    %c0_8 = arith.constant 0 : index
    %17 = vector.load %arg2[%c0_4, %c0_5, %c0_6, %c0_7, %c0_8] : memref<1x8x8x8x4xf32, #tpu.memory_space<vmem>>, vector<1x8x8x8x4xf32>
    tpu.vector_store %arg2[%c0_4, %c0_5, %c0_6, %c0_7, %c0_8], %16 {strides = array<i32>} : memref<1x8x8x8x4xf32, #tpu.memory_space<vmem>>, vector<1x8x8x8x4xf32>,
    %18 = vector.extract_strided_slice %15 {offsets = [0, 0, 0, 0, 0], sizes = [1, 8, 10, 10, 4], strides = [1, 1, 1, 1, 1]} : vector<1x10x10x10x4xf32> to vector<1x8x10x10x4xf32>
    %19 = vector.extract_strided_slice %15 {offsets = [0, 1, 0, 0, 0], sizes = [1, 8, 10, 10, 4], strides = [1, 1, 1, 1, 1]} : vector<1x10x10x10x4xf32> to vector<1x8x10x10x4xf32>
    %20 = arith.maximumf %18, %19 : vector<1x8x10x10x4xf32>
    %21 = vector.extract_strided_slice %15 {offsets = [0, 2, 0, 0, 0], sizes = [1, 8, 10, 10, 4], strides = [1, 1, 1, 1, 1]} : vector<1x10x10x10x4xf32> to vector<1x8x10x10x4xf32>
    %22 = arith.maximumf %20, %21 : vector<1x8x10x10x4xf32>
    %23 = vector.extract_strided_slice %22 {offsets = [0, 0, 0, 0, 0], sizes = [1, 8, 8, 10, 4], strides = [1, 1, 1, 1, 1]} : vector<1x8x10x10x4xf32> to vector<1x8x8x10x4xf32>
    %24 = vector.extract_strided_slice %22 {offsets = [0, 0, 1, 0, 0], sizes = [1, 8, 8, 10, 4], strides = [1, 1, 1, 1, 1]} : vector<1x8x10x10x4xf32> to vector<1x8x8x10x4xf32>
    %25 = arith.maximumf %23, %24 : vector<1x8x8x10x4xf32>
    %26 = vector.extract_strided_slice %22 {offsets = [0, 0, 2, 0, 0], sizes = [1, 8, 8, 10, 4], strides = [1, 1, 1, 1, 1]} : vector<1x8x10x10x4xf32> to vector<1x8x8x10x4xf32>
    %27 = arith.maximumf %25, %26 : vector<1x8x8x10x4xf32>
    %28 = vector.extract_strided_slice %27 {offsets = [0, 0, 0, 0, 0], sizes = [1, 8, 8, 8, 4], strides = [1, 1, 1, 1, 1]} : vector<1x8x8x10x4xf32> to vector<1x8x8x8x4xf32>
    %29 = vector.extract_strided_slice %27 {offsets = [0, 0, 0, 1, 0], sizes = [1, 8, 8, 8, 4], strides = [1, 1, 1, 1, 1]} : vector<1x8x8x10x4xf32> to vector<1x8x8x8x4xf32>
    %30 = arith.maximumf %28, %29 : vector<1x8x8x8x4xf32>
    %31 = vector.extract_strided_slice %27 {offsets = [0, 0, 0, 2, 0], sizes = [1, 8, 8, 8, 4], strides = [1, 1, 1, 1, 1]} : vector<1x8x8x10x4xf32> to vector<1x8x8x8x4xf32>
    %32 = arith.maximumf %30, %31 : vector<1x8x8x8x4xf32>
    %c0_9 = arith.constant 0 : index
    %c0_10 = arith.constant 0 : index
    %c0_11 = arith.constant 0 : index
    %c0_12 = arith.constant 0 : index
    %c0_13 = arith.constant 0 : index
    %33 = vector.load %arg3[%c0_9, %c0_10, %c0_11, %c0_12, %c0_13] : memref<1x8x8x8x4xf32, #tpu.memory_space<vmem>>, vector<1x8x8x8x4xf32>
    tpu.vector_store %arg3[%c0_9, %c0_10, %c0_11, %c0_12, %c0_13], %32 {strides = array<i32>} : memref<1x8x8x8x4xf32, #tpu.memory_space<vmem>>, vector<1x8x8x8x4xf32>,
    return
  }
  func.func @transform_0(%arg0: i32) -> (i32, i32, i32, i32, i32) {
    %c0_i32 = arith.constant 0 : i32
    %c0_i32_0 = arith.constant 0 : i32
    %c0_i32_1 = arith.constant 0 : i32
    %c0_i32_2 = arith.constant 0 : i32
    %c0_i32_3 = arith.constant 0 : i32
    return %arg0, %c0_i32, %c0_i32_0, %c0_i32_1, %c0_i32_2 : i32, i32, i32, i32, i32
  }
  func.func @transform_1(%arg0: i32) -> (i32, i32, i32, i32, i32) {
    %c0_i32 = arith.constant 0 : i32
    %c0_i32_0 = arith.constant 0 : i32
    %c0_i32_1 = arith.constant 0 : i32
    %c0_i32_2 = arith.constant 0 : i32
    %c0_i32_3 = arith.constant 0 : i32
    return %arg0, %c0_i32, %c0_i32_0, %c0_i32_1, %c0_i32_2 : i32, i32, i32, i32, i32
  }
  func.func @transform_2(%arg0: i32) -> (i32, i32, i32, i32, i32) {
    %c0_i32 = arith.constant 0 : i32
    %c0_i32_0 = arith.constant 0 : i32
    %c0_i32_1 = arith.constant 0 : i32
    %c0_i32_2 = arith.constant 0 : i32
    %c0_i32_3 = arith.constant 0 : i32
    return %arg0, %c0_i32, %c0_i32_0, %c0_i32_1, %c0_i32_2 : i32, i32, i32, i32, i32
  }
}

module attributes {stable_mosaic.version = 11 : i64} {
  func.func @_fused_inception_kernel(%arg0: i32, %arg1: i32, %arg2: memref<256x256xbf16, #tpu.memory_space<vmem>>, %arg3: memref<256x16xbf16, #tpu.memory_space<vmem>>, %arg4: memref<1x16xf32, #tpu.memory_space<vmem>>, %arg5: memref<256x4xf32, #tpu.memory_space<vmem>>, %arg6: memref<256x4xf32, #tpu.memory_space<vmem>>, %arg7: memref<256x4xf32, #tpu.memory_space<vmem>>, %arg8: memref<256x16xf32, #tpu.memory_space<vmem>>) attributes {dimension_semantics = [#tpu.dimension_semantics<parallel>, #tpu.dimension_semantics<arbitrary>], iteration_bounds = array<i64: 4, 3>, scalar_prefetch = 0 : i64, scratch_operands = 1 : i64, tpu.core_type = #tpu.core_type<tc>, window_params = [{transform_indices = @transform_0, window_bounds = array<i64: 256, 256>}, {transform_indices = @transform_1, window_bounds = array<i64: 256, 16>}, {pipeline_mode = #tpu.pipeline_mode<synchronous>, transform_indices = @transform_2, window_bounds = array<i64: 1, 16>}, {transform_indices = @transform_3, window_bounds = array<i64: 256, 4>}, {transform_indices = @transform_4, window_bounds = array<i64: 256, 4>}, {transform_indices = @transform_5, window_bounds = array<i64: 256, 4>}]} {
    %c0_i32 = arith.constant 0 : i32
    %0 = arith.cmpi eq, %arg1, %c0_i32 : i32
    %1 = arith.extui %0 : i1 to i32
    %c0_i32_0 = arith.constant 0 : i32
    %2 = arith.cmpi ne, %1, %c0_i32_0 : i32
    scf.if %2 {
      %cst_9 = arith.constant 0.000000e+00 : f32
      %12 = vector.broadcast %cst_9 : f32 to vector<256x16xf32>
      %c0_10 = arith.constant 0 : index
      %c0_11 = arith.constant 0 : index
      %13 = vector.load %arg8[%c0_10, %c0_11] : memref<256x16xf32, #tpu.memory_space<vmem>>, vector<256x16xf32>
      tpu.vector_store %arg8[%c0_10, %c0_11], %12 {strides = array<i32>} : memref<256x16xf32, #tpu.memory_space<vmem>>, vector<256x16xf32>,
    } else {
    }
    %c0 = arith.constant 0 : index
    %c0_1 = arith.constant 0 : index
    %3 = vector.load %arg8[%c0, %c0_1] : memref<256x16xf32, #tpu.memory_space<vmem>>, vector<256x16xf32>
    %c0_2 = arith.constant 0 : index
    %c0_3 = arith.constant 0 : index
    %4 = vector.load %arg2[%c0_2, %c0_3] : memref<256x256xbf16, #tpu.memory_space<vmem>>, vector<256x256xbf16>
    %c0_4 = arith.constant 0 : index
    %c0_5 = arith.constant 0 : index
    %5 = vector.load %arg3[%c0_4, %c0_5] : memref<256x16xbf16, #tpu.memory_space<vmem>>, vector<256x16xbf16>
    %cst = arith.constant dense<0.000000e+00> : vector<256x16xf32>
    %6 = tpu.matmul %4, %5, %cst {dimension_numbers = #tpu.dot_dimension_numbers<[1], [0], [0], [1], [0, 0, 1, 1], [], []>} : vector<256x256xbf16>, vector<256x16xbf16>, vector<256x16xf32> -> vector<256x16xf32>
    %7 = arith.addf %3, %6 : vector<256x16xf32>
    %c0_6 = arith.constant 0 : index
    %c0_7 = arith.constant 0 : index
    %8 = vector.load %arg8[%c0_6, %c0_7] : memref<256x16xf32, #tpu.memory_space<vmem>>, vector<256x16xf32>
    tpu.vector_store %arg8[%c0_6, %c0_7], %7 {strides = array<i32>} : memref<256x16xf32, #tpu.memory_space<vmem>>, vector<256x16xf32>,
    %c2_i32 = arith.constant 2 : i32
    %9 = arith.cmpi eq, %arg1, %c2_i32 : i32
    %10 = arith.extui %9 : i1 to i32
    %c0_i32_8 = arith.constant 0 : i32
    %11 = arith.cmpi ne, %10, %c0_i32_8 : i32
    scf.if %11 {
      %c0_9 = arith.constant 0 : index
      %c0_10 = arith.constant 0 : index
      %12 = vector.load %arg8[%c0_9, %c0_10] : memref<256x16xf32, #tpu.memory_space<vmem>>, vector<256x16xf32>
      %c0_11 = arith.constant 0 : index
      %c0_12 = arith.constant 0 : index
      %13 = vector.load %arg4[%c0_11, %c0_12] : memref<1x16xf32, #tpu.memory_space<vmem>>, vector<1x16xf32>
      %14 = vector.broadcast %13 : vector<1x16xf32> to vector<256x16xf32>
      %15 = arith.addf %12, %14 : vector<256x16xf32>
      %cst_13 = arith.constant 0.000000e+00 : f32
      %16 = vector.broadcast %cst_13 : f32 to vector<256x16xf32>
      %17 = arith.maximumf %15, %16 : vector<256x16xf32>
      %18 = vector.extract_strided_slice %17 {offsets = [0, 0], sizes = [256, 4], strides = [1, 1]} : vector<256x16xf32> to vector<256x4xf32>
      %19 = vector.extract_strided_slice %17 {offsets = [0, 4], sizes = [256, 4], strides = [1, 1]} : vector<256x16xf32> to vector<256x4xf32>
      %20 = arith.addf %18, %19 : vector<256x4xf32>
      %21 = vector.extract_strided_slice %17 {offsets = [0, 8], sizes = [256, 4], strides = [1, 1]} : vector<256x16xf32> to vector<256x4xf32>
      %22 = arith.addf %20, %21 : vector<256x4xf32>
      %23 = vector.extract_strided_slice %17 {offsets = [0, 12], sizes = [256, 4], strides = [1, 1]} : vector<256x16xf32> to vector<256x4xf32>
      %24 = arith.addf %22, %23 : vector<256x4xf32>
      %c0_14 = arith.constant 0 : index
      %c0_15 = arith.constant 0 : index
      %25 = vector.load %arg5[%c0_14, %c0_15] : memref<256x4xf32, #tpu.memory_space<vmem>>, vector<256x4xf32>
      %26 = arith.addf %24, %25 : vector<256x4xf32>
      %c0_16 = arith.constant 0 : index
      %c0_17 = arith.constant 0 : index
      %27 = vector.load %arg6[%c0_16, %c0_17] : memref<256x4xf32, #tpu.memory_space<vmem>>, vector<256x4xf32>
      %28 = arith.addf %26, %27 : vector<256x4xf32>
      %c0_18 = arith.constant 0 : index
      %c0_19 = arith.constant 0 : index
      %29 = vector.load %arg7[%c0_18, %c0_19] : memref<256x4xf32, #tpu.memory_space<vmem>>, vector<256x4xf32>
      tpu.vector_store %arg7[%c0_18, %c0_19], %28 {strides = array<i32>} : memref<256x4xf32, #tpu.memory_space<vmem>>, vector<256x4xf32>,
    } else {
    }
    return
  }
  func.func @transform_0(%arg0: i32, %arg1: i32) -> (i32, i32) {
    %c0_i32 = arith.constant 0 : i32
    return %arg0, %arg1 : i32, i32
  }
  func.func @transform_1(%arg0: i32, %arg1: i32) -> (i32, i32) {
    %c0_i32 = arith.constant 0 : i32
    %c0_i32_0 = arith.constant 0 : i32
    return %arg1, %c0_i32 : i32, i32
  }
  func.func @transform_2(%arg0: i32, %arg1: i32) -> (i32, i32) {
    %c0_i32 = arith.constant 0 : i32
    %c0_i32_0 = arith.constant 0 : i32
    %c0_i32_1 = arith.constant 0 : i32
    return %c0_i32, %c0_i32_0 : i32, i32
  }
  func.func @transform_3(%arg0: i32, %arg1: i32) -> (i32, i32) {
    %c0_i32 = arith.constant 0 : i32
    %c0_i32_0 = arith.constant 0 : i32
    return %arg0, %c0_i32 : i32, i32
  }
  func.func @transform_4(%arg0: i32, %arg1: i32) -> (i32, i32) {
    %c0_i32 = arith.constant 0 : i32
    %c0_i32_0 = arith.constant 0 : i32
    return %arg0, %c0_i32 : i32, i32
  }
  func.func @transform_5(%arg0: i32, %arg1: i32) -> (i32, i32) {
    %c0_i32 = arith.constant 0 : i32
    %c0_i32_0 = arith.constant 0 : i32
    return %arg0, %c0_i32 : i32, i32
  }
}

module attributes {stable_mosaic.version = 11 : i64} {
  func.func @_matmul_bn_relu_kernel(%arg0: i32, %arg1: memref<256x4xbf16, #tpu.memory_space<vmem>>, %arg2: memref<4x2xbf16, #tpu.memory_space<vmem>>, %arg3: memref<1x2xf32, #tpu.memory_space<vmem>>, %arg4: memref<256x2xf32, #tpu.memory_space<vmem>>) attributes {dimension_semantics = [#tpu.dimension_semantics<parallel>], iteration_bounds = array<i64: 4>, scalar_prefetch = 0 : i64, scratch_operands = 0 : i64, tpu.core_type = #tpu.core_type<tc>, window_params = [{transform_indices = @transform_0, window_bounds = array<i64: 256, 4>}, {pipeline_mode = #tpu.pipeline_mode<synchronous>, transform_indices = @transform_1, window_bounds = array<i64: 4, 2>}, {pipeline_mode = #tpu.pipeline_mode<synchronous>, transform_indices = @transform_2, window_bounds = array<i64: 1, 2>}, {transform_indices = @transform_3, window_bounds = array<i64: 256, 2>}]} {
    %c0 = arith.constant 0 : index
    %c0_0 = arith.constant 0 : index
    %0 = vector.load %arg1[%c0, %c0_0] : memref<256x4xbf16, #tpu.memory_space<vmem>>, vector<256x4xbf16>
    %c0_1 = arith.constant 0 : index
    %c0_2 = arith.constant 0 : index
    %1 = vector.load %arg2[%c0_1, %c0_2] : memref<4x2xbf16, #tpu.memory_space<vmem>>, vector<4x2xbf16>
    %cst = arith.constant dense<0.000000e+00> : vector<256x2xf32>
    %2 = tpu.matmul %0, %1, %cst {dimension_numbers = #tpu.dot_dimension_numbers<[1], [0], [0], [1], [0, 0, 1, 1], [], []>} : vector<256x4xbf16>, vector<4x2xbf16>, vector<256x2xf32> -> vector<256x2xf32>
    %c0_3 = arith.constant 0 : index
    %c0_4 = arith.constant 0 : index
    %3 = vector.load %arg3[%c0_3, %c0_4] : memref<1x2xf32, #tpu.memory_space<vmem>>, vector<1x2xf32>
    %4 = vector.broadcast %3 : vector<1x2xf32> to vector<256x2xf32>
    %5 = arith.addf %2, %4 : vector<256x2xf32>
    %cst_5 = arith.constant 0.000000e+00 : f32
    %6 = vector.broadcast %cst_5 : f32 to vector<256x2xf32>
    %7 = arith.maximumf %5, %6 : vector<256x2xf32>
    %c0_6 = arith.constant 0 : index
    %c0_7 = arith.constant 0 : index
    %8 = vector.load %arg4[%c0_6, %c0_7] : memref<256x2xf32, #tpu.memory_space<vmem>>, vector<256x2xf32>
    tpu.vector_store %arg4[%c0_6, %c0_7], %7 {strides = array<i32>} : memref<256x2xf32, #tpu.memory_space<vmem>>, vector<256x2xf32>,
    return
  }
  func.func @transform_0(%arg0: i32) -> (i32, i32) {
    %c0_i32 = arith.constant 0 : i32
    %c0_i32_0 = arith.constant 0 : i32
    return %arg0, %c0_i32 : i32, i32
  }
  func.func @transform_1(%arg0: i32) -> (i32, i32) {
    %c0_i32 = arith.constant 0 : i32
    %c0_i32_0 = arith.constant 0 : i32
    %c0_i32_1 = arith.constant 0 : i32
    return %c0_i32, %c0_i32_0 : i32, i32
  }
  func.func @transform_2(%arg0: i32) -> (i32, i32) {
    %c0_i32 = arith.constant 0 : i32
    %c0_i32_0 = arith.constant 0 : i32
    %c0_i32_1 = arith.constant 0 : i32
    return %c0_i32, %c0_i32_0 : i32, i32
  }
  func.func @transform_3(%arg0: i32) -> (i32, i32) {
    %c0_i32 = arith.constant 0 : i32
    %c0_i32_0 = arith.constant 0 : i32
    return %arg0, %c0_i32 : i32, i32
  }
}

</mosaic_0001>

<bundles_post_ra>
// kernel: encoder_forward.6
= control target key start
LH: loop header
LB: loop body
LE: loop exit
PB: predicated region body
PF: predicated region fallthrough
CT: control target
= control target key end

     0   :  { %8 = vsyncpa [#allocation3], 0  ;;  %s777_s12 = smov 0   ;;  %s938_s0 = inlined_call_operand.vmem [shape: bf16[1024,4], index: 0, kind: input, shape index: {}]   ;;  %s939_s1 = inlined_call_operand.vmem [shape: bf16[4,2], index: 1, kind: input, shape index: {}]   ;;  %s940_s2 = inlined_call_operand.hbm [shape: f32[1,2], index: 2, kind: input, shape index: {}]   ;;  %s941_s3 = inlined_call_operand.vmem [shape: f32[1024,2], index: 3, kind: output, shape index: {}]  }
   0x1 LB: > { %s582_s13 = sadd.s32 4294967295, %s754_s12   ;;  %p584_p0 = scmp.ge.s32.totalorder %s754_s12, 1  ;;  %s754_s12 = sphi %s777_s12, %s14_s12  }
   0x2   : > { %p113_p1 = scmp.lt.s32.totalorder %s754_s12, 5  ;;  %s128_s16 = sshll.u32 %s940_s2, 4  ;;  %s129_s16 = int_to_ptr.hbm [resolvable:$true] %s128_s16 }
   0x3   : > { %p702_p3 = scmp.eq.s32.totalorder %s582_s13, 0  ;;  %s756_s17 = smov [#allocation2]  }
   0x4   : > { %p114_p2 = pnand %p584_p0, %p113_p1  ;;  %s130_s18 = sshll.u32 %s756_s17, 4  ;;  %s131_s18 = int_to_ptr.vmem [resolvable:$true] %s130_s18 }
   0x6   : > { %p698_p4 = pneg %p114_p2  ;;  %152 = sbr.rel (%p114_p2) target bundleno = 215 (0xd7), region = 32 }
   0x8   : > { %p699_p5 = pnand %p702_p3, %p698_p4 }
   0xa   : > { %701 = dma.hbm_to_vmem [thread:$0]  (!%p699_p5), %s129_s16, 16, %s131_s18, [#allocation3]  }
   0xb   : > { %749 = dma.done.wait (%p702_p3), [#allocation3], 16  }
   0xc   : > { %751 = vsyncadd (%p702_p3), [#allocation3], 4294967280  ;;  %s589_s19 = sshll.u32 %s582_s13, 5  ;;  %vm356_vm0 = vcmask 1041408   ;;  %v222_v0 = vld [vmem:[%s939_s1] sm:$0x3] }
   0xd   : > { %p178_p6 = scmp.lt.s32.totalorder %s589_s19, 127  ;;  %v358_v1 = vsel %vm356_vm0, %v222_v0, 0  ;;  %vm307_vm1 = vcmask 31744   ;;  %v831_v18 = vld [vmem:[#allocation2] ss:$0 sm:$0xff]  ;;  %vm481_vm2 = vcmask 15360  }
   0xe   : > { %367 = vmatpush.bf16.msra.mxu0 %v358_v1  ;;  %691 = vmatpush.bf16.msra.mxu1 %v358_v1 }
   0xf   : > { %s943_s19 = smov (!%p178_p6, %s589_s19), 127  ;;  %692 = vmatpush.bf16.msra.mxu2 %v358_v1  ;;  %693 = vmatpush.bf16.msra.mxu3 %v358_v1 }
  0x10   : > { %s590_s20 = sshll.u32 %s943_s19, 2  ;;  %s592_s26 = sshll.u32 %s943_s19, 3 }
  0x11   : > { %s794_s23 = scalar_lea.vmem %s938_s0, %s590_s20  ;;  %s839_s29 = scalar_lea.vmem %s941_s3, %s592_s26 }
  0x12   : > { %v675_v2 = vld [vmem:[%s794_s23] sm:$0xff]  ;;  %v676_v6 = vld [vmem:[%s794_s23 + $0x8] sm:$0xff]  ;;  %v677_v10 = vld [vmem:[%s794_s23 + $0x10] sm:$0xff] }
  0x13   : > { %v679_v3 = vld [vmem:[%s794_s23 + $0x20] sm:$0xff]  ;;  %657 = vmatmul.msk.bf16.vlgmr.msra.gmra.mxu0 %vm307_vm1, %v675_v2  ;;  %v680_v7 = vld [vmem:[%s794_s23 + $0x28] sm:$0xff]  ;;  %v681_v11 = vld [vmem:[%s794_s23 + $0x30] sm:$0xff] }
  0x14   : > { %v683_v4 = vld [vmem:[%s794_s23 + $0x40] sm:$0xff]  ;;  %661 = vmatmul.msk.bf16.vlgmr.msra.gmra.mxu1 %vm307_vm1, %v679_v3  ;;  %v684_v8 = vld [vmem:[%s794_s23 + $0x48] sm:$0xff]  ;;  %v685_v12 = vld [vmem:[%s794_s23 + $0x50] sm:$0xff] }
  0x15   : > { %v687_v5 = vld [vmem:[%s794_s23 + $0x60] sm:$0xff]  ;;  %665 = vmatmul.msk.bf16.vlgmr.msra.gmra.mxu2 %vm307_vm1, %v683_v4  ;;  %v688_v9 = vld [vmem:[%s794_s23 + $0x68] sm:$0xff]  ;;  %v689_v13 = vld [vmem:[%s794_s23 + $0x70] sm:$0xff] }
  0x16   : > { %669 = vmatmul.msk.bf16.vlgmr.msra.gmra.mxu3 %vm307_vm1, %v687_v5  ;;  %v678_v14 = vld [vmem:[%s794_s23 + $0x18] sm:$0xff] }
  0x17   : > { %v682_v15 = vld [vmem:[%s794_s23 + $0x38] sm:$0xff] }
  0x18   : > { %v686_v16 = vld [vmem:[%s794_s23 + $0x58] sm:$0xff] }
  0x19   : > { %v690_v17 = vld [vmem:[%s794_s23 + $0x78] sm:$0xff] }
  0x23   : > { %658 = vmatmul.msk.bf16.gmra.mxu0 %vm307_vm1, %v676_v6 }
  0x24   : > { %662 = vmatmul.msk.bf16.gmra.mxu1 %vm307_vm1, %v680_v7 }
  0x25   : > { %666 = vmatmul.msk.bf16.gmra.mxu2 %vm307_vm1, %v684_v8 }
  0x26   : > { %670 = vmatmul.msk.bf16.gmra.mxu3 %vm307_vm1, %v688_v9 }
  0x33   : > { %659 = vmatmul.msk.bf16.gmra.mxu0 %vm307_vm1, %v677_v10 }
  0x34   : > { %663 = vmatmul.msk.bf16.gmra.mxu1 %vm307_vm1, %v681_v11 }
  0x35   : > { %667 = vmatmul.msk.bf16.gmra.mxu2 %vm307_vm1, %v685_v12 }
  0x36   : > { %671 = vmatmul.msk.bf16.gmra.mxu3 %vm307_vm1, %v689_v13 }
  0x43   : > { %660 = vmatmul.msk.bf16.gmra.mxu0 %vm307_vm1, %v678_v14 }
  0x44   : > { %664 = vmatmul.msk.bf16.gmra.mxu1 %vm307_vm1, %v682_v15 }
  0x45   : > { %668 = vmatmul.msk.bf16.gmra.mxu2 %vm307_vm1, %v686_v16 }
  0x46   : > { %672 = vmatmul.msk.bf16.gmra.mxu3 %vm307_vm1, %v690_v17 }
  0x90   : > { %v369_v19 = vpop.f32.mrf.mxu0 }
  0x91   : > { %v389_v20 = vpop.f32.mrf.mxu1  ;;  %v370_v21 = vadd.f32 %v831_v18, %v369_v19 }
  0x92   : > { %v390_v22 = vadd.f32 %v831_v18, %v389_v20 }
  0x93   : > { %v449_v23 = vmax.f32 %v370_v21, 0.0 }
  0x94   : > { %v457_v24 = vmax.f32 %v390_v22, 0.0 }
  0x95   : > { %482 = vst.msk [vmem:[%s839_s29] sm:$0xff] %vm481_vm2, %v449_v23 }
  0x96   : > { %490 = vst.msk [vmem:[%s839_s29 + $0x40] sm:$0xff] %vm481_vm2, %v457_v24 }
  0x98   : > { %v409_v25 = vpop.f32.mrf.mxu2  ;;  %v371_v29 = vpop.f32.mrf.mxu0 }
  0x99   : > { %v429_v26 = vpop.f32.mrf.mxu3  ;;  %v410_v27 = vadd.f32 %v831_v18, %v409_v25  ;;  %v391_v30 = vpop.f32.mrf.mxu1  ;;  %v372_v31 = vadd.f32 %v831_v18, %v371_v29 }
  0x9a   : > { %v430_v28 = vadd.f32 %v831_v18, %v429_v26  ;;  %v392_v32 = vadd.f32 %v831_v18, %v391_v30 }
  0x9b   : > { %v465_v33 = vmax.f32 %v410_v27, 0.0  ;;  %v450_v35 = vmax.f32 %v372_v31, 0.0 }
  0x9c   : > { %v473_v34 = vmax.f32 %v430_v28, 0.0  ;;  %v458_v36 = vmax.f32 %v392_v32, 0.0 }
  0x9d   : > { %498 = vst.msk [vmem:[%s839_s29 + $0x80] sm:$0xff] %vm481_vm2, %v465_v33 }
  0x9e   : > { %506 = vst.msk [vmem:[%s839_s29 + $0xc0] sm:$0xff] %vm481_vm2, %v473_v34 }
  0x9f   : > { %483 = vst.msk [vmem:[%s839_s29 + $0x8] sm:$0xff] %vm481_vm2, %v450_v35 }
  0xa0   : > { %491 = vst.msk [vmem:[%s839_s29 + $0x48] sm:$0xff] %vm481_vm2, %v458_v36  ;;  %v411_v37 = vpop.f32.mrf.mxu2  ;;  %v374_v41 = vpop.f32.mrf.mxu0 }
  0xa1   : > { %v431_v38 = vpop.f32.mrf.mxu3  ;;  %v412_v39 = vadd.f32 %v831_v18, %v411_v37  ;;  %v394_v42 = vpop.f32.mrf.mxu1  ;;  %v375_v43 = vadd.f32 %v831_v18, %v374_v41 }
  0xa2   : > { %v432_v40 = vadd.f32 %v831_v18, %v431_v38  ;;  %v395_v44 = vadd.f32 %v831_v18, %v394_v42 }
  0xa3   : > { %v466_v45 = vmax.f32 %v412_v39, 0.0  ;;  %v451_v47 = vmax.f32 %v375_v43, 0.0 }
  0xa4   : > { %v474_v46 = vmax.f32 %v432_v40, 0.0  ;;  %v459_v48 = vmax.f32 %v395_v44, 0.0 }
  0xa5   : > { %499 = vst.msk [vmem:[%s839_s29 + $0x88] sm:$0xff] %vm481_vm2, %v466_v45 }
  0xa6   : > { %507 = vst.msk [vmem:[%s839_s29 + $0xc8] sm:$0xff] %vm481_vm2, %v474_v46 }
  0xa7   : > { %484 = vst.msk [vmem:[%s839_s29 + $0x10] sm:$0xff] %vm481_vm2, %v451_v47 }
  0xa8   : > { %492 = vst.msk [vmem:[%s839_s29 + $0x50] sm:$0xff] %vm481_vm2, %v459_v48  ;;  %v414_v49 = vpop.f32.mrf.mxu2  ;;  %v376_v53 = vpop.f32.mrf.mxu0 }
  0xa9   : > { %v434_v50 = vpop.f32.mrf.mxu3  ;;  %v415_v51 = vadd.f32 %v831_v18, %v414_v49  ;;  %v396_v54 = vpop.f32.mrf.mxu1  ;;  %v377_v55 = vadd.f32 %v831_v18, %v376_v53 }
  0xaa   : > { %v435_v52 = vadd.f32 %v831_v18, %v434_v50  ;;  %v397_v56 = vadd.f32 %v831_v18, %v396_v54 }
  0xab   : > { %v467_v57 = vmax.f32 %v415_v51, 0.0  ;;  %v452_v59 = vmax.f32 %v377_v55, 0.0 }
  0xac   : > { %v475_v58 = vmax.f32 %v435_v52, 0.0  ;;  %v460_v60 = vmax.f32 %v397_v56, 0.0 }
  0xad   : > { %500 = vst.msk [vmem:[%s839_s29 + $0x90] sm:$0xff] %vm481_vm2, %v467_v57 }
  0xae   : > { %508 = vst.msk [vmem:[%s839_s29 + $0xd0] sm:$0xff] %vm481_vm2, %v475_v58 }
  0xaf   : > { %485 = vst.msk [vmem:[%s839_s29 + $0x18] sm:$0xff] %vm481_vm2, %v452_v59 }
  0xb0   : > { %493 = vst.msk [vmem:[%s839_s29 + $0x58] sm:$0xff] %vm481_vm2, %v460_v60  ;;  %v416_v61 = vpop.f32.mrf.mxu2  ;;  %v379_v1 = vpop.f32.mrf.mxu0 }
  0xb1   : > { %v436_v62 = vpop.f32.mrf.mxu3  ;;  %v417_v63 = vadd.f32 %v831_v18, %v416_v61  ;;  %v399_v2 = vpop.f32.mrf.mxu1  ;;  %v380_v3 = vadd.f32 %v831_v18, %v379_v1 }
  0xb2   : > { %v437_v0 = vadd.f32 %v831_v18, %v436_v62  ;;  %v400_v4 = vadd.f32 %v831_v18, %v399_v2 }
  0xb3   : > { %v468_v5 = vmax.f32 %v417_v63, 0.0  ;;  %v453_v7 = vmax.f32 %v380_v3, 0.0 }
  0xb4   : > { %v476_v6 = vmax.f32 %v437_v0, 0.0  ;;  %v461_v8 = vmax.f32 %v400_v4, 0.0 }
  0xb5   : > { %501 = vst.msk [vmem:[%s839_s29 + $0x98] sm:$0xff] %vm481_vm2, %v468_v5 }
  0xb6   : > { %509 = vst.msk [vmem:[%s839_s29 + $0xd8] sm:$0xff] %vm481_vm2, %v476_v6 }
  0xb7   : > { %486 = vst.msk [vmem:[%s839_s29 + $0x20] sm:$0xff] %vm481_vm2, %v453_v7 }
  0xb8   : > { %494 = vst.msk [vmem:[%s839_s29 + $0x60] sm:$0xff] %vm481_vm2, %v461_v8  ;;  %v419_v9 = vpop.f32.mrf.mxu2  ;;  %v381_v13 = vpop.f32.mrf.mxu0 }
  0xb9   : > { %v439_v10 = vpop.f32.mrf.mxu3  ;;  %v420_v11 = vadd.f32 %v831_v18, %v419_v9  ;;  %v401_v14 = vpop.f32.mrf.mxu1  ;;  %v382_v15 = vadd.f32 %v831_v18, %v381_v13 }
  0xba   : > { %v440_v12 = vadd.f32 %v831_v18, %v439_v10  ;;  %v402_v16 = vadd.f32 %v831_v18, %v401_v14 }
  0xbb   : > { %v469_v17 = vmax.f32 %v420_v11, 0.0  ;;  %v454_v20 = vmax.f32 %v382_v15, 0.0 }
  0xbc   : > { %v477_v19 = vmax.f32 %v440_v12, 0.0  ;;  %v462_v21 = vmax.f32 %v402_v16, 0.0 }
  0xbd   : > { %502 = vst.msk [vmem:[%s839_s29 + $0xa0] sm:$0xff] %vm481_vm2, %v469_v17 }
  0xbe   : > { %510 = vst.msk [vmem:[%s839_s29 + $0xe0] sm:$0xff] %vm481_vm2, %v477_v19 }
  0xbf   : > { %487 = vst.msk [vmem:[%s839_s29 + $0x28] sm:$0xff] %vm481_vm2, %v454_v20 }
  0xc0   : > { %495 = vst.msk [vmem:[%s839_s29 + $0x68] sm:$0xff] %vm481_vm2, %v462_v21  ;;  %v421_v22 = vpop.f32.mrf.mxu2  ;;  %v384_v26 = vpop.f32.mrf.mxu0 }
  0xc1   : > { %v441_v23 = vpop.f32.mrf.mxu3  ;;  %v422_v24 = vadd.f32 %v831_v18, %v421_v22  ;;  %v404_v27 = vpop.f32.mrf.mxu1  ;;  %v385_v28 = vadd.f32 %v831_v18, %v384_v26 }
  0xc2   : > { %v442_v25 = vadd.f32 %v831_v18, %v441_v23  ;;  %v405_v29 = vadd.f32 %v831_v18, %v404_v27 }
  0xc3   : > { %v470_v30 = vmax.f32 %v422_v24, 0.0  ;;  %v455_v32 = vmax.f32 %v385_v28, 0.0 }
  0xc4   : > { %v478_v31 = vmax.f32 %v442_v25, 0.0  ;;  %v463_v33 = vmax.f32 %v405_v29, 0.0 }
  0xc5   : > { %503 = vst.msk [vmem:[%s839_s29 + $0xa8] sm:$0xff] %vm481_vm2, %v470_v30 }
  0xc6   : > { %511 = vst.msk [vmem:[%s839_s29 + $0xe8] sm:$0xff] %vm481_vm2, %v478_v31 }
  0xc7   : > { %488 = vst.msk [vmem:[%s839_s29 + $0x30] sm:$0xff] %vm481_vm2, %v455_v32 }
  0xc8   : > { %496 = vst.msk [vmem:[%s839_s29 + $0x70] sm:$0xff] %vm481_vm2, %v463_v33  ;;  %v424_v34 = vpop.f32.mrf.mxu2  ;;  %v386_v38 = vpop.f32.mrf.mxu0 }
  0xc9   : > { %v444_v35 = vpop.f32.mrf.mxu3  ;;  %v425_v36 = vadd.f32 %v831_v18, %v424_v34  ;;  %v406_v39 = vpop.f32.mrf.mxu1  ;;  %v387_v40 = vadd.f32 %v831_v18, %v386_v38 }
  0xca   : > { %v445_v37 = vadd.f32 %v831_v18, %v444_v35  ;;  %v407_v41 = vadd.f32 %v831_v18, %v406_v39 }
  0xcb   : > { %v471_v42 = vmax.f32 %v425_v36, 0.0  ;;  %v456_v44 = vmax.f32 %v387_v40, 0.0 }
  0xcc   : > { %v479_v43 = vmax.f32 %v445_v37, 0.0  ;;  %v464_v45 = vmax.f32 %v407_v41, 0.0 }
  0xcd   : > { %504 = vst.msk [vmem:[%s839_s29 + $0xb0] sm:$0xff] %vm481_vm2, %v471_v42 }
  0xce   : > { %512 = vst.msk [vmem:[%s839_s29 + $0xf0] sm:$0xff] %vm481_vm2, %v479_v43 }
  0xcf   : > { %489 = vst.msk [vmem:[%s839_s29 + $0x38] sm:$0xff] %vm481_vm2, %v456_v44 }
  0xd0   : > { %497 = vst.msk [vmem:[%s839_s29 + $0x78] sm:$0xff] %vm481_vm2, %v464_v45  ;;  %v426_v46 = vpop.f32.mrf.mxu2 }
  0xd1   : > { %v446_v47 = vpop.f32.mrf.mxu3  ;;  %v427_v48 = vadd.f32 %v831_v18, %v426_v46 }
  0xd2   : > { %v447_v49 = vadd.f32 %v831_v18, %v446_v47 }
  0xd3   : > { %v472_v50 = vmax.f32 %v427_v48, 0.0 }
  0xd4   : > { %v480_v51 = vmax.f32 %v447_v49, 0.0 }
  0xd5   : > { %505 = vst.msk [vmem:[%s839_s29 + $0xb8] sm:$0xff] %vm481_vm2, %v472_v50 }
  0xd6   : > { %513 = vst.msk [vmem:[%s839_s29 + $0xf8] sm:$0xff] %vm481_vm2, %v480_v51 }
  0xd7 PF: > { %s14_s12 = sadd.s32 1, %s754_s12  }
  0xd8   : > { %p11_p7 = scmp.ge.s32.totalorder %s14_s12, 6  }
  0xda   :  { %13 = sbr.rel (!%p11_p7) target bundleno = 1 (0x1), region = 67 }
  0xdf   :  { %536 = vsyncpa [#allocation3], 1 }
  0xe0   :  { %538 = vsyncpa [#allocation3 + $0x1], 1 }

// kernel: encoder_forward.7
= control target key start
LH: loop header
LB: loop body
LE: loop exit
PB: predicated region body
PF: predicated region fallthrough
CT: control target
= control target key end

     0   :  { %s4641_s9 = smov 0   ;;  %s9168_s0 = inlined_call_operand.vmem [shape: f32[2,12,12,12,4], index: 0, kind: input, shape index: {}]   ;;  %s9169_s1 = inlined_call_operand.vmem [shape: f32[2,8,8,8,4], index: 1, kind: output, shape index: {0}]   ;;  %s9170_s2 = inlined_call_operand.vmem [shape: f32[2,8,8,8,4], index: 2, kind: output, shape index: {1}]  }
   0x1 LB: > { %s4554_s10 = sadd.s32 4294967295, %s4624_s9   ;;  %p4558_p0 = scmp.ge.s32.totalorder %s4624_s9, 1  ;;  %s4624_s9 = sphi %s4641_s9, %s13_s9  }
   0x2   : > { %p115_p1 = scmp.lt.s32.totalorder %s4624_s9, 3 }
   0x4   : > { %p116_p2 = pnand %p4558_p0, %p115_p1 }
   0x6   : > { %119 = sbr.rel (%p116_p2) target bundleno = 837 (0x345), region = 24 }
   0xb   : > { %p142_p3 = scmp.lt.s32.totalorder %s4554_s10, 1  ;;  %vm1525_vm0 = vcmask 1046528   ;;  %vm2226_vm1 = vcmask 1045504   ;;  %vm2929_vm2 = vcmask 24576   ;;  %vm2927_vm3 = vcmask 31745  }
   0xc   : > { %vm4401_vm4 = vcmask 31744  }
   0xd   : > { %s10578_s10 = smov (!%p142_p3, %s4554_s10), 1 }
   0xe   : > { %s4568_s11 = smul.u32 2304, %s10578_s10  ;;  %s4566_s15 = sshll.u32 %s10578_s10, 9 }
   0xf   : > { %s4913_s18 = scalar_lea.vmem %s9169_s1, %s4566_s15  ;;  %s8221_s21 = scalar_lea.vmem %s9170_s2, %s4566_s15 }
  0x10   : > { %s4655_s14 = scalar_lea.vmem %s9168_s0, %s4568_s11 }
  0x11   : > { %v157_v0 = vld [vmem:[%s4655_s14] sm:$0xff]  ;;  %v158_v1 = vld [vmem:[%s4655_s14 + $0x8] sm:$0xf]  ;;  %v159_v2 = vld [vmem:[%s4655_s14 + $0x10] sm:$0xff] }
  0x12   : > { %v160_v3 = vld [vmem:[%s4655_s14 + $0x18] sm:$0xf]  ;;  %v161_v4 = vld [vmem:[%s4655_s14 + $0x20] sm:$0xff]  ;;  %v162_v5 = vld [vmem:[%s4655_s14 + $0x28] sm:$0xf] }
  0x13   : > { %v4664_v6 = vld [vmem:[%s4655_s14 + $0x30] sm:$0xff]  ;;  %v4667_v7 = vld [vmem:[%s4655_s14 + $0x38] sm:$0xf]  ;;  %v4670_v8 = vld [vmem:[%s4655_s14 + $0xc0] sm:$0xff] }
  0x14   : > { %v4673_v9 = vld [vmem:[%s4655_s14 + $0xc8] sm:$0xf]  ;;  %v4676_v10 = vld [vmem:[%s4655_s14 + $0xd0] sm:$0xff]  ;;  %v4679_v11 = vld [vmem:[%s4655_s14 + $0xd8] sm:$0xf]  ;;  %v445_v12 = vmax.f32 %v157_v0, %v4670_v8 }
  0x15   : > { %v4683_v13 = vld [vmem:[%s4655_s14 + $0xe0] sm:$0xff]  ;;  %v4686_v14 = vld [vmem:[%s4655_s14 + $0xe8] sm:$0xf]  ;;  %v4689_v15 = vld [vmem:[%s4655_s14 + $0xf0] sm:$0xff]  ;;  %v446_v16 = vmax.f32 %v158_v1, %v4673_v9  ;;  %v447_v17 = vmax.f32 %v159_v2, %v4676_v10  ;;  %v448_v21 = vmax.f32 %v160_v3, %v4679_v11 }
  0x16   : > { %v4694_v18 = vld [vmem:[%s4655_s14 + $0xf8] sm:$0xf]  ;;  %v4697_v19 = vld [vmem:[%s4655_s14 + $0x180] sm:$0xff]  ;;  %v4700_v20 = vld [vmem:[%s4655_s14 + $0x188] sm:$0xf]  ;;  %v449_v22 = vmax.f32 %v161_v4, %v4683_v13  ;;  %v450_v23 = vmax.f32 %v162_v5, %v4686_v14  ;;  %v451_v27 = vmax.f32 %v4664_v6, %v4689_v15 }
  0x17   : > { %v4706_v24 = vld [vmem:[%s4655_s14 + $0x190] sm:$0xff]  ;;  %v4709_v25 = vld [vmem:[%s4655_s14 + $0x198] sm:$0xf]  ;;  %v4712_v26 = vld [vmem:[%s4655_s14 + $0x1a0] sm:$0xff]  ;;  %v452_v28 = vmax.f32 %v4667_v7, %v4694_v18  ;;  %v469_v29 = vmax.f32 %v4670_v8, %v4697_v19  ;;  %v470_v30 = vmax.f32 %v4673_v9, %v4700_v20  ;;  %v4738_v37 = vmax.f32 %v445_v12, %v4697_v19 }
  0x18   : > { %v4723_v31 = vld [vmem:[%s4655_s14 + $0x1a8] sm:$0xf]  ;;  %v4726_v32 = vld [vmem:[%s4655_s14 + $0x1b0] sm:$0xff]  ;;  %v4729_v33 = vld [vmem:[%s4655_s14 + $0x1b8] sm:$0xf]  ;;  %v471_v34 = vmax.f32 %v4676_v10, %v4706_v24  ;;  %v472_v35 = vmax.f32 %v4679_v11, %v4709_v25  ;;  %v473_v36 = vmax.f32 %v4683_v13, %v4712_v26  ;;  %v4754_v43 = vmax.f32 %v446_v16, %v4700_v20 }
  0x19   : > { %9677 = vst [vmem:[#allocation2_spill] sm:$0xff] %v4729_v33  ;;  %v4741_v38 = vld [vmem:[%s4655_s14 + $0x240] sm:$0xff]  ;;  %v4744_v39 = vld [vmem:[%s4655_s14 + $0x248] sm:$0xf]  ;;  %v4747_v40 = vld [vmem:[%s4655_s14 + $0x250] sm:$0xff]  ;;  %v474_v41 = vmax.f32 %v4686_v14, %v4723_v31  ;;  %v475_v42 = vmax.f32 %v4689_v15, %v4726_v32  ;;  %v687_v44 = vmax.f32 %v447_v17, %v4706_v24  ;;  %v476_v48 = vmax.f32 %v4694_v18, %v4729_v33 }
  0x1a   : > { %9678 = vst [vmem:[#allocation3_spill] sm:$0xff] %v4754_v43  ;;  %v4758_v45 = vld [vmem:[%s4655_s14 + $0x258] sm:$0xf]  ;;  %v4761_v46 = vld [vmem:[%s4655_s14 + $0x260] sm:$0xff]  ;;  %v4764_v47 = vld [vmem:[%s4655_s14 + $0x268] sm:$0xf]  ;;  %v4773_v51 = vmax.f32 %v448_v21, %v4709_v25  ;;  %v4791_v58 = vmax.f32 %v449_v22, %v4712_v26  ;;  %v4809_v1 = vmax.f32 %v450_v23, %v4723_v31  ;;  %v4827_v8 = vmax.f32 %v451_v27, %v4726_v32 }
  0x1b   : > { %v4776_v52 = vld [vmem:[%s4655_s14 + $0x270] sm:$0xff]  ;;  %v4779_v53 = vld [vmem:[%s4655_s14 + $0x278] sm:$0xf]  ;;  %v4782_v54 = vld [vmem:[%s4655_s14 + $0x300] sm:$0xff]  ;;  %v4839_v13 = vmax.f32 %v452_v28, %v4729_v33  ;;  %v709_v15 = vmax.f32 %v469_v29, %v4741_v38  ;;  %v710_v16 = vmax.f32 %v470_v30, %v4744_v39  ;;  %v711_v17 = vmax.f32 %v471_v34, %v4747_v40 }
  0x1c   : > { %9679 = vst [vmem:[#allocation4_spill] sm:$0xff] %v4773_v51  ;;  %v4794_v59 = vld [vmem:[%s4655_s14 + $0x308] sm:$0xf]  ;;  %v4797_v60 = vld [vmem:[%s4655_s14 + $0x310] sm:$0xff]  ;;  %v4800_v61 = vld [vmem:[%s4655_s14 + $0x318] sm:$0xf]  ;;  %v712_v21 = vmax.f32 %v472_v35, %v4758_v45  ;;  %v4850_v22 = vmax.f32 %v473_v36, %v4761_v46  ;;  %v4853_v23 = vmax.f32 %v474_v41, %v4764_v47  ;;  %v4856_v27 = vmax.f32 %v475_v42, %v4776_v52 }
  0x1d   : > { %9680 = vst [vmem:[#allocation5_spill] sm:$0xff] %v4779_v53  ;;  %v4812_v2 = vld [vmem:[%s4655_s14 + $0x320] sm:$0xff]  ;;  %v4815_v3 = vld [vmem:[%s4655_s14 + $0x328] sm:$0xf]  ;;  %v4818_v4 = vld [vmem:[%s4655_s14 + $0x330] sm:$0xff]  ;;  %v4859_v28 = vmax.f32 %v476_v48, %v4779_v53  ;;  %v925_v29 = vmax.f32 %v4738_v37, %v687_v44  ;;  %v927_v30 = vmax.f32 %v687_v44, %v4791_v58  ;;  %v928_v34 = vmax.f32 %v4773_v51, %v4809_v1 }
  0x1e   : > { %9681 = vst [vmem:[#allocation6_spill] sm:$0xff] %v4809_v1  ;;  %v4830_v9 = vld [vmem:[%s4655_s14 + $0x338] sm:$0xf]  ;;  %v945_v35 = vmax.f32 %v709_v15, %v711_v17  ;;  %v946_v36 = vmax.f32 %v710_v16, %v712_v21  ;;  %v947_v41 = vmax.f32 %v711_v17, %v4850_v22  ;;  %v165_v18 = vld [vmem:[%s4655_s14 + $0x40] sm:$0xff]  ;;  %v948_v14 = vmax.f32 %v712_v21, %v4853_v23  ;;  %v166_v15 = vld [vmem:[%s4655_s14 + $0x48] sm:$0xf] }
  0x1f   : > { %v189_v42 = vld [vmem:[%s4655_s14 + $0x100] sm:$0xff]  ;;  %v4872_v37 = vmax.f32 %v925_v29, %v4791_v58  ;;  %v1127_v44 = vmax.f32 %v927_v30, %v4827_v8  ;;  %v190_v16 = vld [vmem:[%s4655_s14 + $0x108] sm:$0xf]  ;;  %v1128_v17 = vmax.f32 %v928_v34, %v4839_v13  ;;  %v4987_v51 = vld [vmem:[%s4655_s14 + $0x350] sm:$0xff] }
  0x20   : > { %v4879_v12 = vmax.f32 %v945_v35, %v4850_v22  ;;  %v4882_v11 = vmax.f32 %v946_v36, %v4853_v23  ;;  %v1147_v21 = vmax.f32 %v947_v41, %v4856_v27  ;;  %v1148_v29 = vmax.f32 %v948_v14, %v4859_v28  ;;  %v4887_v10 = vld [vmem:[%s4655_s14 + $0x1c0] sm:$0xff]  ;;  %v4890_v0 = vld [vmem:[%s4655_s14 + $0x1c8] sm:$0xf]  ;;  %9699 = vst [vmem:[#allocation24_spill] sm:$0xff] %v4987_v51  ;;  %v5424_v33 = vld [vmem:[%s4655_s14 + $0x2f8] sm:$0xf] }
  0x21   : > { %9682 = vst [vmem:[#allocation7_spill] sm:$0xff] %v4872_v37  ;;  %v1529_v48 = vrot.slane %v1127_v44, 1  ;;  %v2230_v30 = vrot.slane %v1127_v44, 2  ;;  %v453_v7 = vmax.f32 %v165_v18, %v189_v42  ;;  %v1530_v6 = vrot.slane %v1128_v17, 1  ;;  %v4895_v57 = vld [vmem:[%s4655_s14 + $0x280] sm:$0xff] }
  0x22   : > { %9683 = vst [vmem:[#allocation8_spill] sm:$0xff] %v4879_v12  ;;  %v1559_v5 = vrot.slane %v1147_v21, 1  ;;  %v2231_v34 = vrot.slane %v1128_v17, 2  ;;  %v454_v35 = vmax.f32 %v166_v15, %v190_v16  ;;  %v1560_v41 = vrot.slane %v1148_v29, 1  ;;  %v4900_v50 = vld [vmem:[%s4655_s14 + $0x288] sm:$0xf] }
  0x23   : > { %9684 = vst [vmem:[#allocation9_spill] sm:$0xff] %v4882_v11  ;;  %v2260_v63 = vrot.slane %v1147_v21, 2  ;;  %v2261_v14 = vrot.slane %v1148_v29, 2  ;;  %v1531_v56 = vsel %vm1525_vm0, %v1529_v48, %v1530_v6  ;;  %v2029_v55 = vmax.f32 %v1128_v17, %v1530_v6  ;;  %v4906_v37 = vld [vmem:[%s4655_s14 + $0x340] sm:$0xff] }
  0x24   : > { %9685 = vst [vmem:[#allocation10_spill] sm:$0xff] %v4887_v10  ;;  %v2232_v18 = vsel %vm2226_vm1, %v2230_v30, %v2231_v34  ;;  %v477_v15 = vmax.f32 %v189_v42, %v4887_v10  ;;  %v1561_v62 = vsel %vm1525_vm0, %v1559_v5, %v1560_v41  ;;  %v2028_v49 = vmax.f32 %v1127_v44, %v1531_v56  ;;  %v4918_v5 = vld [vmem:[%s4655_s14 + $0x348] sm:$0xf]  ;;  %v191_v30 = vld [vmem:[%s4655_s14 + $0x110] sm:$0xff]  ;;  %v169_v53 = vld [vmem:[%s4655_s14 + $0x60] sm:$0xff] }
  0x25   : > { %9686 = vst [vmem:[#allocation11_spill] sm:$0xff] %v4890_v0  ;;  %v2262_v36 = vsel %vm2226_vm1, %v2260_v63, %v2261_v14  ;;  %v2049_v11 = vmax.f32 %v1148_v29, %v1560_v41  ;;  %v2048_v6 = vmax.f32 %v1147_v21, %v1561_v62  ;;  %v4915_v42 = vmax.f32 %v2029_v55, %v2231_v34  ;;  %v167_v62 = vld [vmem:[%s4655_s14 + $0x50] sm:$0xff]  ;;  %v192_v34 = vld [vmem:[%s4655_s14 + $0x118] sm:$0xf] }
  0x26   : > { %9687 = vst [vmem:[#allocation12_spill] sm:$0xff] %v4895_v57  ;;  %v478_v56 = vmax.f32 %v190_v16, %v4890_v0  ;;  %v4924_v44 = vmax.f32 %v2028_v49, %v2232_v18  ;;  %v4936_v29 = vmax.f32 %v453_v7, %v4887_v10  ;;  %v4939_v49 = vmax.f32 %v454_v35, %v4890_v0  ;;  %v4960_v18 = vld [vmem:[%s4655_s14 + $0x1d8] sm:$0xf] }
  0x27   : > { %9688 = vst [vmem:[#allocation13_spill] sm:$0xff] %v4900_v50  ;;  %v4926_v17 = vmax.f32 %v2049_v11, %v2261_v14  ;;  %v4931_v21 = vmax.f32 %v2048_v6, %v2262_v36  ;;  %v168_v11 = vld [vmem:[%s4655_s14 + $0x58] sm:$0xf]  ;;  %v4952_v7 = vmax.f32 %v477_v15, %v4895_v57  ;;  %v929_v35 = vmax.f32 %v4791_v58, %v4827_v8  ;;  %v4957_v14 = vld [vmem:[%s4655_s14 + $0x1d0] sm:$0xff] }
  0x28   : > { %9689 = vst [vmem:[#allocation14_spill] sm:$0xff] %v4906_v37  ;;  %v4966_v6 = vmax.f32 %v478_v56, %v4900_v50  ;;  %v930_v48 = vmax.f32 %v4809_v1, %v4839_v13  ;;  %v949_v15 = vmax.f32 %v4850_v22, %v4856_v27  ;;  %v950_v58 = vmax.f32 %v4853_v23, %v4859_v28  ;;  %v4975_v36 = vld [vmem:[%s4655_s14 + $0x290] sm:$0xff]  ;;  %v4978_v41 = vld [vmem:[%s4655_s14 + $0x298] sm:$0xf] }
  0x29   : > { %9690 = vst [vmem:[#allocation15_spill] sm:$0xff] %v4915_v42  ;;  %v1129_v55 = vmax.f32 %v929_v35, %v4936_v29  ;;  %v455_v56 = vmax.f32 %v167_v62, %v191_v30  ;;  %v456_v63 = vmax.f32 %v168_v11, %v192_v34  ;;  %v479_v23 = vmax.f32 %v191_v30, %v4957_v14 }
  0x2a   : > { %9691 = vst [vmem:[#allocation16_spill] sm:$0xff] %v4918_v5  ;;  %v1130_v42 = vmax.f32 %v930_v48, %v4939_v49  ;;  %v1149_v12 = vmax.f32 %v949_v15, %v4952_v7  ;;  %v1150_v22 = vmax.f32 %v950_v58, %v4966_v6  ;;  %v4995_v58 = vld [vmem:[%s4655_s14 + $0x358] sm:$0xf]  ;;  %v480_v30 = vmax.f32 %v192_v34, %v4960_v18 }
  0x2b   : > { %9692 = vst [vmem:[#allocation17_spill] sm:$0xff] %v4924_v44  ;;  %v1532_v43 = vrot.slane %v1129_v55, 1  ;;  %v2233_v1 = vrot.slane %v1129_v55, 2 }
  0x2c   : > { %9693 = vst [vmem:[#allocation18_spill] sm:$0xff] %v4926_v17  ;;  %v1533_v11 = vrot.slane %v1130_v42, 1  ;;  %v1562_v35 = vrot.slane %v1149_v12, 1  ;;  %v1563_v48 = vrot.slane %v1150_v22, 1  ;;  %v2234_v44 = vrot.slane %v1130_v42, 2 }
  0x2d   : > { %9694 = vst [vmem:[#allocation19_spill] sm:$0xff] %v4931_v21  ;;  %v2263_v15 = vrot.slane %v1149_v12, 2 }
  0x2e   : > { %2930 = vst.msk [vmem:[%s4913_s18 + $0x7] sm:$0x1] %vm2929_vm2, %v4926_v17  ;;  %v1534_v16 = vsel %vm1525_vm0, %v1532_v43, %v1533_v11  ;;  %v1564_v62 = vsel %vm1525_vm0, %v1562_v35, %v1563_v48  ;;  %v2235_v50 = vsel %vm2226_vm1, %v2233_v1, %v2234_v44  ;;  %v2031_v0 = vmax.f32 %v1130_v42, %v1533_v11  ;;  %v193_v42 = vld [vmem:[%s4655_s14 + $0x120] sm:$0xff] }
  0x2f   : > { %9695 = vst [vmem:[#allocation20_spill] sm:$0xff] %v4957_v14  ;;  %v2030_v5 = vmax.f32 %v1129_v55, %v1534_v16  ;;  %v2050_v57 = vmax.f32 %v1149_v12, %v1564_v62  ;;  %v2051_v37 = vmax.f32 %v1150_v22, %v1563_v48  ;;  %v5008_v17 = vmax.f32 %v455_v56, %v4957_v14  ;;  %v170_v12 = vld [vmem:[%s4655_s14 + $0x68] sm:$0xf] }
  0x30   : > { %9696 = vst [vmem:[#allocation21_spill] sm:$0xff] %v4960_v18  ;;  %v5011_v43 = vmax.f32 %v456_v63, %v4960_v18  ;;  %v5014_v1 = vmax.f32 %v479_v23, %v4975_v36  ;;  %v5019_v55 = vld [vmem:[%s4655_s14 + $0x128] sm:$0xf]  ;;  %v5028_v62 = vmax.f32 %v480_v30, %v4978_v41  ;;  %v5031_v63 = vld [vmem:[%s4655_s14 + $0x1e0] sm:$0xff]  ;;  %v931_v23 = vmax.f32 %v4827_v8, %v4936_v29 }
  0x31   : > { %2928 = vst.msk [vmem:[%s4913_s18 - $0x1] sm:$0xfe] %vm2927_vm3, %v4931_v21  ;;  %v2264_v21 = vrot.slane %v1150_v22, 2  ;;  %v5021_v16 = vmax.f32 %v2030_v5, %v2235_v50  ;;  %v932_v11 = vmax.f32 %v4839_v13, %v4939_v49  ;;  %v951_v50 = vmax.f32 %v4856_v27, %v4952_v7  ;;  %v5048_v5 = vld [vmem:[%s4655_s14 + $0x2a8] sm:$0xf] }
  0x32   : > { %9697 = vst [vmem:[#allocation22_spill] sm:$0xff] %v4975_v36  ;;  %v457_v13 = vmax.f32 %v169_v53, %v193_v42  ;;  %v458_v27 = vmax.f32 %v170_v12, %v5019_v55  ;;  %v481_v30 = vmax.f32 %v193_v42, %v5031_v63  ;;  %v5073_v42 = vld [vmem:[%s4655_s14 + $0x360] sm:$0xff]  ;;  %v5080_v14 = vld [vmem:[%s4655_s14 + $0x368] sm:$0xf] }
  0x33   : > { %9698 = vst [vmem:[#allocation23_spill] sm:$0xff] %v4978_v41  ;;  %v2265_v10 = vsel %vm2226_vm1, %v2263_v15, %v2264_v21  ;;  %v5025_v56 = vmax.f32 %v2051_v37, %v2264_v21  ;;  %v5045_v37 = vld [vmem:[%s4655_s14 + $0x2a0] sm:$0xff]  ;;  %v5055_v21 = vmax.f32 %v2031_v0, %v2234_v44  ;;  %v1132_v35 = vmax.f32 %v932_v11, %v5011_v43 }
  0x34   : > { %9700 = vst [vmem:[#allocation25_spill] sm:$0xff] %v4995_v58  ;;  %v5023_v22 = vmax.f32 %v2050_v57, %v2265_v10  ;;  %v952_v57 = vmax.f32 %v4859_v28, %v4966_v6  ;;  %v5042_v10 = vld [vmem:[%s4655_s14 + $0x1e8] sm:$0xf]  ;;  %v1131_v28 = vmax.f32 %v931_v23, %v5008_v17  ;;  %v1151_v48 = vmax.f32 %v951_v50, %v5014_v1 }
  0x35   : > { %9701 = vst [vmem:[#allocation26_spill] sm:$0xff] %v5021_v16  ;;  %v482_v0 = vmax.f32 %v5019_v55, %v5042_v10  ;;  %v1536_v23 = vrot.slane %v1132_v35, 1  ;;  %v2237_v50 = vrot.slane %v1132_v35, 2 }
  0x36   : > { %9702 = vst [vmem:[#allocation27_spill] sm:$0xff] %v5023_v22  ;;  %v1152_v15 = vmax.f32 %v952_v57, %v5028_v62  ;;  %v1535_v12 = vrot.slane %v1131_v28, 1  ;;  %v1565_v8 = vrot.slane %v1151_v48, 1  ;;  %v2236_v34 = vrot.slane %v1131_v28, 2 }
  0x37   : > { %9703 = vst [vmem:[#allocation28_spill] sm:$0xff] %v5025_v56  ;;  %v2266_v16 = vrot.slane %v1151_v48, 2  ;;  %v2033_v53 = vmax.f32 %v1132_v35, %v1536_v23 }
  0x38   : > { %9704 = vst [vmem:[#allocation29_spill] sm:$0xff] %v5031_v63  ;;  %v1566_v11 = vrot.slane %v1152_v15, 1  ;;  %v2267_v57 = vrot.slane %v1152_v15, 2  ;;  %v1537_v55 = vsel %vm1525_vm0, %v1535_v12, %v1536_v23  ;;  %v2238_v58 = vsel %vm2226_vm1, %v2236_v34, %v2237_v50 }
  0x39   : > { %9705 = vst [vmem:[#allocation30_spill] sm:$0xff] %v5042_v10  ;;  %v2032_v44 = vmax.f32 %v1131_v28, %v1537_v55  ;;  %v5084_v12 = vmax.f32 %v2033_v53, %v2237_v50  ;;  %v196_v53 = vld [vmem:[%s4655_s14 + $0x138] sm:$0xf]  ;;  %v934_v23 = vmax.f32 %v4939_v49, %v5011_v43  ;;  %v5135_v50 = vld [vmem:[%s4655_s14 + $0x2b0] sm:$0xff] }
  0x3a   : > { %9706 = vst [vmem:[#allocation31_spill] sm:$0xff] %v5045_v37  ;;  %v2053_v41 = vmax.f32 %v1152_v15, %v1566_v11  ;;  %v2268_v36 = vsel %vm2226_vm1, %v2266_v16, %v2267_v57  ;;  %v5096_v16 = vmax.f32 %v457_v13, %v5031_v63  ;;  %v172_v15 = vld [vmem:[%s4655_s14 + $0x78] sm:$0xf]  ;;  %v933_v13 = vmax.f32 %v4936_v29, %v5008_v17 }
  0x3b   : > { %9707 = vst [vmem:[#allocation32_spill] sm:$0xff] %v5048_v5  ;;  %v5091_v35 = vmax.f32 %v2032_v44, %v2238_v58  ;;  %v5123_v44 = vmax.f32 %v482_v0, %v5048_v5  ;;  %v5132_v29 = vld [vmem:[%s4655_s14 + $0x1f8] sm:$0xf] }
  0x3c   : > { %2931 = vst.msk [vmem:[%s4913_s18 + $0x7] sm:$0xfe] %vm2927_vm3, %v5023_v22  ;;  %v1567_v22 = vsel %vm1525_vm0, %v1565_v8, %v1566_v11  ;;  %v5086_v8 = vmax.f32 %v2053_v41, %v2267_v57  ;;  %v195_v41 = vld [vmem:[%s4655_s14 + $0x130] sm:$0xff]  ;;  %v954_v11 = vmax.f32 %v4966_v6, %v5028_v62  ;;  %v1133_v55 = vmax.f32 %v933_v13, %v5096_v16  ;;  %v5144_v58 = vld [vmem:[%s4655_s14 + $0x2b8] sm:$0xf] }
  0x3d   : > { %9708 = vst [vmem:[#allocation33_spill] sm:$0xff] %v5055_v21  ;;  %v2052_v18 = vmax.f32 %v1151_v48, %v1567_v22  ;;  %v171_v22 = vld [vmem:[%s4655_s14 + $0x70] sm:$0xff]  ;;  %v5099_v48 = vmax.f32 %v458_v27, %v5042_v10  ;;  %v484_v57 = vmax.f32 %v196_v53, %v5132_v29 }
  0x3e   : > { %2932 = vst.msk [vmem:[%s4913_s18 + $0xf] sm:$0x1] %vm2929_vm2, %v5025_v56  ;;  %v5117_v27 = vld [vmem:[%s4655_s14 + $0x1f0] sm:$0xff]  ;;  %v459_v0 = vmax.f32 %v171_v22, %v195_v41 }
  0x3f   : > { %9709 = vst [vmem:[#allocation34_spill] sm:$0xff] %v5073_v42  ;;  %v5093_v34 = vmax.f32 %v2052_v18, %v2268_v36  ;;  %v5112_v18 = vmax.f32 %v481_v30, %v5045_v37  ;;  %v953_v30 = vmax.f32 %v4952_v7, %v5014_v1  ;;  %v460_v36 = vmax.f32 %v172_v15, %v196_v53  ;;  %v5147_v6 = vld [vmem:[%s4655_s14 + $0x370] sm:$0xff]  ;;  %v5418_v42 = vld [vmem:[%s4655_s14 + $0x2e8] sm:$0xf] }
  0x40   : > { %9710 = vst [vmem:[#allocation35_spill] sm:$0xff] %v5080_v14  ;;  %v1134_v28 = vmax.f32 %v934_v23, %v5099_v48  ;;  %v1154_v7 = vmax.f32 %v954_v11, %v5123_v44  ;;  %v483_v51 = vmax.f32 %v195_v41, %v5117_v27  ;;  %v5167_v41 = vmax.f32 %v459_v0, %v5117_v27 }
  0x41   : > { %9711 = vst [vmem:[#allocation36_spill] sm:$0xff] %v5084_v12  ;;  %v1153_v49 = vmax.f32 %v953_v30, %v5112_v18  ;;  %v2239_v12 = vrot.slane %v1133_v55, 2  ;;  %v5184_v0 = vmax.f32 %v484_v57, %v5144_v58  ;;  %v5203_v57 = vld [vmem:[%s4655_s14 + $0x2c0] sm:$0xff] }
  0x42   : > { %9712 = vst [vmem:[#allocation37_spill] sm:$0xff] %v5086_v8  ;;  %v1539_v15 = vrot.slane %v1134_v28, 1  ;;  %v1569_v23 = vrot.slane %v1154_v7, 1  ;;  %v2240_v30 = vrot.slane %v1134_v28, 2  ;;  %v2270_v11 = vrot.slane %v1154_v7, 2 }
  0x43   : > { %9713 = vst [vmem:[#allocation38_spill] sm:$0xff] %v5091_v35  ;;  %v1568_v13 = vrot.slane %v1153_v49, 1  ;;  %v2269_v35 = vrot.slane %v1153_v49, 2 }
  0x44   : > { %9714 = vst [vmem:[#allocation39_spill] sm:$0xff] %v5093_v34  ;;  %v2241_v22 = vsel %vm2226_vm1, %v2239_v12, %v2240_v30  ;;  %v2035_v21 = vmax.f32 %v1134_v28, %v1539_v15  ;;  %v2055_v37 = vmax.f32 %v1154_v7, %v1569_v23  ;;  %v5173_v12 = vmax.f32 %v483_v51, %v5135_v50  ;;  %v197_v28 = vld [vmem:[%s4655_s14 + $0x140] sm:$0xff] }
  0x45   : > { %2934 = vst.msk [vmem:[%s4913_s18 + $0x17] sm:$0x1] %vm2929_vm2, %v5086_v8  ;;  %v1538_v8 = vrot.slane %v1133_v55, 1  ;;  %v1570_v56 = vsel %vm1525_vm0, %v1568_v13, %v1569_v23  ;;  %v2271_v14 = vsel %vm2226_vm1, %v2269_v35, %v2270_v11  ;;  %v935_v51 = vmax.f32 %v5008_v17, %v5096_v16 }
  0x46   : > { %9715 = vst [vmem:[#allocation40_spill] sm:$0xff] %v5117_v27  ;;  %v2054_v10 = vmax.f32 %v1153_v49, %v1570_v56  ;;  %v5161_v63 = vmax.f32 %v2035_v21, %v2240_v30  ;;  %v173_v56 = vld [vmem:[%s4655_s14 + $0x80] sm:$0xff]  ;;  %v174_v49 = vld [vmem:[%s4655_s14 + $0x88] sm:$0xf]  ;;  %v936_v7 = vmax.f32 %v5011_v43, %v5099_v48 }
  0x47   : > { %2933 = vst.msk [vmem:[%s4913_s18 + $0xf] sm:$0xfe] %vm2927_vm3, %v5093_v34  ;;  %v1540_v53 = vsel %vm1525_vm0, %v1538_v8, %v1539_v15  ;;  %v5164_v34 = vld [vmem:[%s4655_s14 + $0x378] sm:$0xf]  ;;  %v5170_v8 = vmax.f32 %v460_v36, %v5132_v29  ;;  %v5188_v36 = vld [vmem:[%s4655_s14 + $0x200] sm:$0xff] }
  0x48   : > { %9716 = vst [vmem:[#allocation41_spill] sm:$0xff] %v5132_v29  ;;  %v2034_v5 = vmax.f32 %v1133_v55, %v1540_v53  ;;  %v5179_v21 = vmax.f32 %v2054_v10, %v2271_v14  ;;  %v5181_v55 = vmax.f32 %v2055_v37, %v2270_v11  ;;  %v956_v14 = vmax.f32 %v5028_v62, %v5123_v44  ;;  %v198_v10 = vld [vmem:[%s4655_s14 + $0x148] sm:$0xf] }
  0x49   : > { %9717 = vst [vmem:[#allocation42_spill] sm:$0xff] %v5135_v50  ;;  %v5200_v37 = vld [vmem:[%s4655_s14 + $0x208] sm:$0xf]  ;;  %v1135_v62 = vmax.f32 %v935_v51, %v5167_v41  ;;  %v1136_v15 = vmax.f32 %v936_v7, %v5170_v8  ;;  %v462_v30 = vmax.f32 %v174_v49, %v198_v10  ;;  %v485_v11 = vmax.f32 %v197_v28, %v5188_v36  ;;  %v5229_v49 = vld [vmem:[%s4655_s14 + $0x380] sm:$0xff] }
  0x4a   : > { %9718 = vst [vmem:[#allocation43_spill] sm:$0xff] %v5144_v58  ;;  %v5177_v35 = vmax.f32 %v2034_v5, %v2241_v22  ;;  %v955_v5 = vmax.f32 %v5014_v1, %v5112_v18  ;;  %v461_v22 = vmax.f32 %v173_v56, %v197_v28  ;;  %v1156_v23 = vmax.f32 %v956_v14, %v5184_v0  ;;  %v5226_v51 = vld [vmem:[%s4655_s14 + $0x2c8] sm:$0xf] }
  0x4b   : > { %9719 = vst [vmem:[#allocation44_spill] sm:$0xff] %v5147_v6  ;;  %v486_v53 = vmax.f32 %v198_v10, %v5200_v37  ;;  %v1541_v17 = vrot.slane %v1135_v62, 1  ;;  %v1542_v1 = vrot.slane %v1136_v15, 1  ;;  %v2242_v7 = vrot.slane %v1135_v62, 2  ;;  %v5240_v6 = vld [vmem:[%s4655_s14 + $0x388] sm:$0xf] }
  0x4c   : > { %9720 = vst [vmem:[#allocation45_spill] sm:$0xff] %v5161_v63  ;;  %v1155_v13 = vmax.f32 %v955_v5, %v5173_v12  ;;  %v2273_v14 = vrot.slane %v1156_v23, 2 }
  0x4d   : > { %9721 = vst [vmem:[#allocation46_spill] sm:$0xff] %v5164_v34  ;;  %v1543_v28 = vsel %vm1525_vm0, %v1541_v17, %v1542_v1 }
  0x4e   : > { %9722 = vst [vmem:[#allocation47_spill] sm:$0xff] %v5177_v35  ;;  %v1571_v43 = vrot.slane %v1155_v13, 1  ;;  %v1572_v35 = vrot.slane %v1156_v23, 1  ;;  %v2272_v5 = vrot.slane %v1155_v13, 2  ;;  %v2036_v63 = vmax.f32 %v1135_v62, %v1543_v28 }
  0x4f   : > { %9723 = vst [vmem:[#allocation48_spill] sm:$0xff] %v5179_v21 }
  0x50   : > { %9724 = vst [vmem:[#allocation49_spill] sm:$0xff] %v5181_v55  ;;  %v1573_v10 = vsel %vm1525_vm0, %v1571_v43, %v1572_v35  ;;  %v2057_v56 = vmax.f32 %v1156_v23, %v1572_v35  ;;  %v2274_v34 = vsel %vm2226_vm1, %v2272_v5, %v2273_v14  ;;  %v175_v43 = vld [vmem:[%s4655_s14 + $0x90] sm:$0xff]  ;;  %v200_v23 = vld [vmem:[%s4655_s14 + $0x158] sm:$0xf] }
  0x51   : > { %9725 = vst [vmem:[#allocation50_spill] sm:$0xff] %v5188_v36  ;;  %v2056_v58 = vmax.f32 %v1155_v13, %v1573_v10  ;;  %v199_v13 = vld [vmem:[%s4655_s14 + $0x150] sm:$0xff]  ;;  %v5300_v35 = vld [vmem:[%s4655_s14 + $0x2d8] sm:$0xf] }
  0x52   : > { %9726 = vst [vmem:[#allocation51_spill] sm:$0xff] %v5200_v37  ;;  %v5237_v27 = vmax.f32 %v2057_v56, %v2273_v14  ;;  %v958_v56 = vmax.f32 %v5123_v44, %v5184_v0  ;;  %v463_v28 = vmax.f32 %v175_v43, %v199_v13  ;;  %v5303_v44 = vld [vmem:[%s4655_s14 + $0x390] sm:$0xff] }
  0x53   : > { %9727 = vst [vmem:[#allocation52_spill] sm:$0xff] %v5203_v57  ;;  %v5249_v62 = vmax.f32 %v2056_v58, %v2274_v34  ;;  %v5266_v34 = vmax.f32 %v485_v11, %v5203_v57  ;;  %v5269_v58 = vmax.f32 %v486_v53, %v5226_v51  ;;  %v938_v11 = vmax.f32 %v5099_v48, %v5170_v8 }
  0x54   : > { %2935 = vst.msk [vmem:[%s4913_s18 + $0x17] sm:$0xfe] %vm2927_vm3, %v5179_v21  ;;  %v2243_v21 = vrot.slane %v1136_v15, 2  ;;  %v957_v53 = vmax.f32 %v5112_v18, %v5173_v12 }
  0x55   : > { %2936 = vst.msk [vmem:[%s4913_s18 + $0x1f] sm:$0x1] %vm2929_vm2, %v5181_v55  ;;  %v2037_v55 = vmax.f32 %v1136_v15, %v1542_v1  ;;  %v176_v15 = vld [vmem:[%s4655_s14 + $0x98] sm:$0xf]  ;;  %v1158_v18 = vmax.f32 %v958_v56, %v5269_v58 }
  0x56   : > { %9728 = vst [vmem:[#allocation53_spill] sm:$0xff] %v5226_v51  ;;  %v2244_v29 = vsel %vm2226_vm1, %v2242_v7, %v2243_v21  ;;  %v5291_v7 = vld [vmem:[%s4655_s14 + $0x2d0] sm:$0xff]  ;;  %v464_v10 = vmax.f32 %v176_v15, %v200_v23  ;;  %v1157_v48 = vmax.f32 %v957_v53, %v5266_v34 }
  0x57   : > { %9729 = vst [vmem:[#allocation54_spill] sm:$0xff] %v5229_v49  ;;  %v5235_v50 = vmax.f32 %v2037_v55, %v2243_v21  ;;  %v5247_v1 = vmax.f32 %v2036_v63, %v2244_v29  ;;  %v5252_v21 = vmax.f32 %v461_v22, %v5188_v36  ;;  %v5255_v55 = vmax.f32 %v462_v30, %v5200_v37  ;;  %v5274_v22 = vld [vmem:[%s4655_s14 + $0x210] sm:$0xff]  ;;  %v5318_v36 = vld [vmem:[%s4655_s14 + $0x398] sm:$0xf] }
  0x58   : > { %9731 = vst [vmem:[#allocation56_spill] sm:$0xff] %v5237_v27  ;;  %v937_v29 = vmax.f32 %v5096_v16, %v5167_v41  ;;  %v5288_v16 = vld [vmem:[%s4655_s14 + $0x218] sm:$0xf]  ;;  %v487_v63 = vmax.f32 %v199_v13, %v5274_v22  ;;  %v2276_v56 = vrot.slane %v1158_v18, 2  ;;  %v5323_v13 = vmax.f32 %v463_v28, %v5274_v22 }
  0x59   : > { %9730 = vst [vmem:[#allocation55_spill] sm:$0xff] %v5235_v50  ;;  %v1138_v30 = vmax.f32 %v938_v11, %v5255_v55  ;;  %v488_v5 = vmax.f32 %v200_v23, %v5288_v16  ;;  %v1575_v11 = vrot.slane %v1158_v18, 1 }
  0x5a   : > { %9732 = vst [vmem:[#allocation57_spill] sm:$0xff] %v5240_v6  ;;  %v1137_v14 = vmax.f32 %v937_v29, %v5252_v21  ;;  %v1574_v29 = vrot.slane %v1157_v48, 1 }
  0x5b   : > { %9733 = vst [vmem:[#allocation58_spill] sm:$0xff] %v5247_v1  ;;  %v1545_v15 = vrot.slane %v1138_v30, 1  ;;  %v2246_v53 = vrot.slane %v1138_v30, 2  ;;  %v2059_v50 = vmax.f32 %v1158_v18, %v1575_v11  ;;  %v5353_v18 = vld [vmem:[%s4655_s14 + $0x168] sm:$0xf] }
  0x5c   : > { %9734 = vst [vmem:[#allocation59_spill] sm:$0xff] %v5249_v62  ;;  %v1544_v17 = vrot.slane %v1137_v14, 1  ;;  %v2245_v1 = vrot.slane %v1137_v14, 2  ;;  %v1576_v43 = vsel %vm1525_vm0, %v1574_v29, %v1575_v11 }
  0x5d   : > { %2938 = vst.msk [vmem:[%s4913_s18 + $0x27] sm:$0x1] %vm2929_vm2, %v5237_v27  ;;  %v2039_v51 = vmax.f32 %v1138_v30, %v1545_v15  ;;  %v2058_v6 = vmax.f32 %v1157_v48, %v1576_v43  ;;  %v5332_v30 = vld [vmem:[%s4655_s14 + $0xa0] sm:$0xff] }
  0x5e   : > { %9735 = vst [vmem:[#allocation60_spill] sm:$0xff] %v5274_v22  ;;  %v1546_v23 = vsel %vm1525_vm0, %v1544_v17, %v1545_v15  ;;  %v2247_v27 = vsel %vm2226_vm1, %v2245_v1, %v2246_v53  ;;  %v5326_v17 = vmax.f32 %v464_v10, %v5288_v16  ;;  %v5329_v1 = vmax.f32 %v487_v63, %v5291_v7  ;;  %v5350_v63 = vld [vmem:[%s4655_s14 + $0xb0] sm:$0xff]  ;;  %v5356_v43 = vld [vmem:[%s4655_s14 + $0x220] sm:$0xff] }
  0x5f   : > { %2937 = vst.msk [vmem:[%s4913_s18 + $0x1f] sm:$0xfe] %vm2927_vm3, %v5249_v62  ;;  %v2275_v62 = vrot.slane %v1157_v48, 2  ;;  %v2038_v37 = vmax.f32 %v1137_v14, %v1546_v23  ;;  %v5320_v49 = vmax.f32 %v2039_v51, %v2246_v53  ;;  %v5338_v14 = vld [vmem:[%s4655_s14 + $0x160] sm:$0xff]  ;;  %v5344_v48 = vmax.f32 %v2059_v50, %v2276_v56 }
  0x60   : > { %9736 = vst [vmem:[#allocation61_spill] sm:$0xff] %v5288_v16  ;;  %v5347_v10 = vmax.f32 %v488_v5, %v5300_v35  ;;  %v939_v15 = vmax.f32 %v5167_v41, %v5252_v21  ;;  %v959_v50 = vmax.f32 %v5173_v12, %v5266_v34  ;;  %v5373_v5 = vld [vmem:[%s4655_s14 + $0x178] sm:$0xf]  ;;  %v5413_v16 = vld [vmem:[%s4655_s14 + $0x2e0] sm:$0xff] }
  0x61   : > { %9737 = vst [vmem:[#allocation62_spill] sm:$0xff] %v5291_v7  ;;  %v2277_v57 = vsel %vm2226_vm1, %v2275_v62, %v2276_v56  ;;  %v5335_v62 = vld [vmem:[%s4655_s14 + $0xa8] sm:$0xf]  ;;  %v5340_v51 = vmax.f32 %v2038_v37, %v2247_v27  ;;  %v940_v27 = vmax.f32 %v5170_v8, %v5255_v55  ;;  %v5367_v37 = vld [vmem:[%s4655_s14 + $0xb8] sm:$0xf] }
  0x62   : > { %9738 = vst [vmem:[#allocation63_spill] sm:$0xff] %v5300_v35  ;;  %v5342_v28 = vmax.f32 %v2058_v6, %v2277_v57  ;;  %v960_v6 = vmax.f32 %v5184_v0, %v5269_v58  ;;  %v5370_v57 = vld [vmem:[%s4655_s14 + $0x170] sm:$0xff]  ;;  %v465_v0 = vmax.f32 %v5332_v30, %v5338_v14  ;;  %v1139_v29 = vmax.f32 %v939_v15, %v5323_v13  ;;  %v5410_v35 = vld [vmem:[%s4655_s14 + $0x238] sm:$0xf] }
  0x63   : > { %9739 = vst [vmem:[#allocation64_spill] sm:$0xff] %v5303_v44  ;;  %v1140_v11 = vmax.f32 %v940_v27, %v5326_v17  ;;  %v1159_v53 = vmax.f32 %v959_v50, %v5329_v1  ;;  %v466_v23 = vmax.f32 %v5335_v62, %v5353_v18  ;;  %v467_v41 = vmax.f32 %v5350_v63, %v5370_v57 }
  0x64   : > { %9740 = vst [vmem:[#allocation65_spill] sm:$0xff] %v5318_v36  ;;  %v1160_v56 = vmax.f32 %v960_v6, %v5347_v10  ;;  %v489_v15 = vmax.f32 %v5338_v14, %v5356_v43  ;;  %v1547_v27 = vrot.slane %v1139_v29, 1  ;;  %v2248_v6 = vrot.slane %v1139_v29, 2 }
  0x65   : > { %9741 = vst [vmem:[#allocation66_spill] sm:$0xff] %v5320_v49  ;;  %v1548_v12 = vrot.slane %v1140_v11, 1  ;;  %v1577_v8 = vrot.slane %v1159_v53, 1  ;;  %v2249_v62 = vrot.slane %v1140_v11, 2  ;;  %v2278_v63 = vrot.slane %v1159_v53, 2  ;;  %v5405_v49 = vld [vmem:[%s4655_s14 + $0x230] sm:$0xff] }
  0x66   : > { %9742 = vst [vmem:[#allocation67_spill] sm:$0xff] %v5326_v17  ;;  %v1578_v50 = vrot.slane %v1160_v56, 1 }
  0x67   : > { %9743 = vst [vmem:[#allocation68_spill] sm:$0xff] %v5340_v51  ;;  %v5402_v51 = vld [vmem:[%s4655_s14 + $0x228] sm:$0xf]  ;;  %v1549_v30 = vsel %vm1525_vm0, %v1547_v27, %v1548_v12  ;;  %v2250_v22 = vsel %vm2226_vm1, %v2248_v6, %v2249_v62  ;;  %v5421_v27 = vld [vmem:[%s4655_s14 + $0x2f0] sm:$0xff] }
  0x68   : > { %9744 = vst [vmem:[#allocation69_spill] sm:$0xff] %v5342_v28  ;;  %v1579_v14 = vsel %vm1525_vm0, %v1577_v8, %v1578_v50  ;;  %v2040_v36 = vmax.f32 %v1139_v29, %v1549_v30  ;;  %v5434_v29 = vld [vmem:[%s4655_s14 + $0x3a8] sm:$0xf]  ;;  %v491_v30 = vmax.f32 %v5370_v57, %v5405_v49 }
  0x69   : > { %9745 = vst [vmem:[#allocation70_spill] sm:$0xff] %v5344_v48  ;;  %v2060_v7 = vmax.f32 %v1159_v53, %v1579_v14  ;;  %v5437_v53 = vld [vmem:[%s4655_s14 + $0x3b0] sm:$0xff]  ;;  %v5475_v14 = vmax.f32 %v466_v23, %v5402_v51 }
  0x6a   : > { %9746 = vst [vmem:[#allocation71_spill] sm:$0xff] %v5367_v37  ;;  %v2041_v37 = vmax.f32 %v1140_v11, %v1548_v12  ;;  %v5431_v11 = vld [vmem:[%s4655_s14 + $0x3a0] sm:$0xff] }
  0x6b   : > { %9747 = vst [vmem:[#allocation72_spill] sm:$0xff] %v5373_v5 }
  0x6c   : > { %2939 = vst.msk [vmem:[%s4913_s18 + $0x27] sm:$0xfe] %vm2927_vm3, %v5342_v28  ;;  %v2279_v28 = vrot.slane %v1160_v56, 2  ;;  %v5426_v8 = vmax.f32 %v2041_v37, %v2249_v62  ;;  %v941_v62 = vmax.f32 %v5252_v21, %v5323_v13 }
  0x6d   : > { %2940 = vst.msk [vmem:[%s4913_s18 + $0x2f] sm:$0x1] %vm2929_vm2, %v5344_v48  ;;  %v2061_v48 = vmax.f32 %v1160_v56, %v1578_v50  ;;  %v490_v56 = vmax.f32 %v5353_v18, %v5402_v51  ;;  %v5443_v50 = vmax.f32 %v2040_v36, %v2250_v22  ;;  %v707_v18 = vmax.f32 %v467_v41, %v5405_v49  ;;  %v5480_v36 = vld [vmem:[%s4655_s14 + $0x3b8] sm:$0xf] }
  0x6e   : > { %v2280_v44 = vsel %vm2226_vm1, %v2278_v63, %v2279_v28  ;;  %v705_v63 = vmax.f32 %v465_v0, %v5356_v43  ;;  %9750 = vst [vmem:[#allocation75_spill] sm:$0xff] %v5475_v14  ;;  %v729_v22 = vmax.f32 %v489_v15, %v5413_v16  ;;  %v942_v0 = vmax.f32 %v5255_v55, %v5326_v17 }
  0x6f   : > { %v5428_v12 = vmax.f32 %v2061_v48, %v2279_v28  ;;  %9748 = vst [vmem:[#allocation73_spill] sm:$0xff] %v5443_v50  ;;  %v5445_v6 = vmax.f32 %v2060_v7, %v2280_v44  ;;  %v492_v28 = vmax.f32 %v5373_v5, %v5410_v35  ;;  %v730_v7 = vmax.f32 %v490_v56, %v5418_v42 }
  0x70   : > { %v731_v44 = vmax.f32 %v491_v30, %v5421_v27  ;;  %v943_v23 = vmax.f32 %v5323_v13, %v705_v63  ;;  %v961_v15 = vmax.f32 %v5266_v34, %v5329_v1  ;;  %v962_v56 = vmax.f32 %v5269_v58, %v5347_v10 }
  0x71   : > { %9749 = vst [vmem:[#allocation74_spill] sm:$0xff] %v5445_v6  ;;  %v732_v57 = vmax.f32 %v492_v28, %v5424_v33  ;;  %v963_v30 = vmax.f32 %v5329_v1, %v729_v22  ;;  %v964_v28 = vmax.f32 %v5347_v10, %v730_v7  ;;  %v1141_v37 = vmax.f32 %v941_v62, %v705_v63 }
  0x72   : > { %2942 = vst.msk [vmem:[%s4913_s18 + $0x37] sm:$0x1] %vm2929_vm2, %v5428_v12  ;;  %v1142_v55 = vmax.f32 %v942_v0, %v5475_v14  ;;  %v5501_v13 = vmax.f32 %v943_v23, %v707_v18  ;;  %v1161_v48 = vmax.f32 %v961_v15, %v729_v22  ;;  %v1162_v41 = vmax.f32 %v962_v56, %v730_v7 }
  0x73   : > { %2941 = vst.msk [vmem:[%s4913_s18 + $0x2f] sm:$0xfe] %vm2927_vm3, %v5445_v6  ;;  %v5503_v17 = vmax.f32 %v963_v30, %v731_v44  ;;  %v1550_v34 = vrot.slane %v1141_v37, 1  ;;  %v9753_v58 = vmax.f32 %v4697_v19, %v4741_v38  ;;  %v2251_v62 = vrot.slane %v1141_v37, 2 }
  0x74   : > { %9751 = vst [vmem:[#allocation76_spill] sm:$0xff] %v5501_v13  ;;  %v1551_v5 = vrot.slane %v1142_v55, 1  ;;  %v1580_v10 = vrot.slane %v1161_v48, 1  ;;  %v2252_v63 = vrot.slane %v1142_v55, 2  ;;  %v5509_v50 = vmax.f32 %v964_v28, %v732_v57 }
  0x75   : > { %9752 = vst [vmem:[#allocation77_spill] sm:$0xff] %v5503_v17  ;;  %v733_v1 = vmax.f32 %v9753_v58, %v4782_v54  ;;  %v1581_v21 = vrot.slane %v1162_v41, 1  ;;  %v2281_v0 = vrot.slane %v1161_v48, 2  ;;  %v2282_v18 = vrot.slane %v1162_v41, 2  ;;  %v9780_v17 = vld [vmem:[#allocation22_spill] sm:$0xff] }
  0x76   : > { %9754 = vst [vmem:[#allocation78_spill] sm:$0xff] %v5509_v50  ;;  %v1552_v22 = vsel %vm1525_vm0, %v1550_v34, %v1551_v5  ;;  %v2253_v44 = vsel %vm2226_vm1, %v2251_v62, %v2252_v63  ;;  %v2043_v23 = vmax.f32 %v1142_v55, %v1551_v5  ;;  %v9756_v28 = vmax.f32 %v4700_v20, %v4744_v39 }
  0x77   : > { %v1582_v15 = vsel %vm1525_vm0, %v1580_v10, %v1581_v21  ;;  %v2042_v19 = vmax.f32 %v1141_v37, %v1552_v22  ;;  %v2283_v56 = vsel %vm2226_vm1, %v2281_v0, %v2282_v18  ;;  %v2063_v30 = vmax.f32 %v1162_v41, %v1581_v21  ;;  %v9766_v22 = vld [vmem:[#allocation5_spill] sm:$0xff] }
  0x78   : > { %v2062_v58 = vmax.f32 %v1161_v48, %v1582_v15  ;;  %v5516_v57 = vmax.f32 %v2043_v23, %v2252_v63  ;;  %v734_v34 = vmax.f32 %v9756_v28, %v4794_v59  ;;  %v9757_v5 = vmax.f32 %v4706_v24, %v4747_v40  ;;  %v9770_v28 = vld [vmem:[#allocation12_spill] sm:$0xff] }
  0x79   : > { %v5526_v10 = vmax.f32 %v2042_v19, %v2253_v44  ;;  %v5528_v37 = vmax.f32 %v2063_v30, %v2282_v18  ;;  %v9760_v48 = vmax.f32 %v4709_v25, %v4758_v45  ;;  %v9761_v20 = vmax.f32 %v4712_v26, %v4761_v46  ;;  %v9765_v25 = vld [vmem:[#allocation2_spill] sm:$0xff] }
  0x7a   : > { %9755 = vst [vmem:[#allocation79_spill] sm:$0xff] %v5516_v57  ;;  %v735_v55 = vmax.f32 %v9757_v5, %v4797_v60  ;;  %v5538_v62 = vmax.f32 %v2062_v58, %v2283_v56  ;;  %v9763_v24 = vmax.f32 %v4723_v31, %v4764_v47  ;;  %v9764_v0 = vmax.f32 %v4726_v32, %v4776_v52  ;;  %v9768_v30 = vld [vmem:[#allocation14_spill] sm:$0xff]  ;;  %v9783_v57 = vld [vmem:[#allocation21_spill] sm:$0xff] }
  0x7b   : > { %9758 = vst [vmem:[#allocation80_spill] sm:$0xff] %v5526_v10  ;;  %v736_v41 = vmax.f32 %v9760_v48, %v4800_v61  ;;  %v737_v21 = vmax.f32 %v9761_v20, %v4812_v2  ;;  %v9767_v44 = vmax.f32 %v9765_v25, %v9766_v22  ;;  %v9769_v58 = vld [vmem:[#allocation10_spill] sm:$0xff]  ;;  %v9772_v20 = vld [vmem:[#allocation16_spill] sm:$0xff] }
  0x7c   : > { %9759 = vst [vmem:[#allocation81_spill] sm:$0xff] %v5528_v37  ;;  %v738_v63 = vmax.f32 %v9763_v24, %v4815_v3  ;;  %v739_v18 = vmax.f32 %v9764_v0, %v4818_v4  ;;  %v965_v15 = vmax.f32 %v733_v1, %v735_v55  ;;  %v9771_v5 = vmax.f32 %v9769_v58, %v9770_v28  ;;  %v9773_v24 = vld [vmem:[#allocation11_spill] sm:$0xff]  ;;  %v9774_v0 = vld [vmem:[#allocation13_spill] sm:$0xff]  ;;  %v9778_v58 = vld [vmem:[#allocation24_spill] sm:$0xff] }
  0x7d   : > { %9762 = vst [vmem:[#allocation82_spill] sm:$0xff] %v5538_v62  ;;  %v740_v23 = vmax.f32 %v9767_v44, %v4830_v9  ;;  %v966_v19 = vmax.f32 %v734_v34, %v736_v41  ;;  %v967_v56 = vmax.f32 %v735_v55, %v737_v21  ;;  %v9775_v25 = vmax.f32 %v9773_v24, %v9774_v0 }
  0x7e   : > { %2944 = vst.msk [vmem:[%s4913_s18 + $0x3f] sm:$0x1] %vm2929_vm2, %v5528_v37  ;;  %v968_v32 = vmax.f32 %v736_v41, %v738_v63  ;;  %v5565_v48 = vmax.f32 %v9771_v5, %v9768_v30  ;;  %v5573_v34 = vmax.f32 %v965_v15, %v737_v21  ;;  %v969_v26 = vmax.f32 %v737_v21, %v739_v18  ;;  %v9779_v5 = vld [vmem:[#allocation20_spill] sm:$0xff]  ;;  %v9782_v37 = vld [vmem:[#allocation25_spill] sm:$0xff] }
  0x7f   : > { %2943 = vst.msk [vmem:[%s4913_s18 + $0x37] sm:$0xfe] %vm2927_vm3, %v5538_v62  ;;  %v5571_v1 = vmax.f32 %v9775_v25, %v9772_v20  ;;  %v5575_v55 = vmax.f32 %v966_v19, %v738_v63  ;;  %v1167_v44 = vmax.f32 %v967_v56, %v739_v18  ;;  %v970_v31 = vmax.f32 %v738_v63, %v740_v23  ;;  %v9784_v62 = vld [vmem:[#allocation23_spill] sm:$0xff] }
  0x80   : > { %9776 = vst [vmem:[#allocation2_spill] sm:$0xff] %v5573_v34  ;;  %v1168_v7 = vmax.f32 %v968_v32, %v740_v23  ;;  %v9781_v50 = vmax.f32 %v9779_v5, %v9780_v17  ;;  %v1169_v15 = vmax.f32 %v969_v26, %v5565_v48  ;;  %v971_v19 = vmax.f32 %v739_v18, %v5565_v48 }
  0x81   : > { %9777 = vst [vmem:[#allocation5_spill] sm:$0xff] %v5575_v55  ;;  %v1589_v24 = vrot.slane %v1167_v44, 1  ;;  %v2290_v25 = vrot.slane %v1167_v44, 2  ;;  %v1170_v21 = vmax.f32 %v970_v31, %v5571_v1  ;;  %v972_v41 = vmax.f32 %v740_v23, %v5571_v1 }
  0x82   : > { %v5583_v14 = vmax.f32 %v9781_v50, %v9778_v58  ;;  %v1590_v13 = vrot.slane %v1168_v7, 1  ;;  %v2291_v56 = vrot.slane %v1168_v7, 2  ;;  %v1592_v32 = vrot.slane %v1169_v15, 1 }
  0x83   : > { %v2293_v63 = vrot.slane %v1169_v15, 2  ;;  %v9785_v5 = vmax.f32 %v9783_v57, %v9784_v62  ;;  %v1593_v34 = vrot.slane %v1170_v21, 1  ;;  %v2294_v31 = vrot.slane %v1170_v21, 2  ;;  %v9829_v62 = vld [vmem:[#allocation60_spill] sm:$0xff] }
  0x84   : > { %v1171_v10 = vmax.f32 %v971_v19, %v5583_v14  ;;  %v1591_v55 = vsel %vm1525_vm0, %v1589_v24, %v1590_v13  ;;  %v2292_v18 = vsel %vm2226_vm1, %v2290_v25, %v2291_v56  ;;  %v2069_v26 = vmax.f32 %v1168_v7, %v1590_v13 }
  0x85   : > { %v744_v50 = vmax.f32 %v9785_v5, %v9782_v37  ;;  %v2068_v58 = vmax.f32 %v1167_v44, %v1591_v55  ;;  %v1594_v20 = vsel %vm1525_vm0, %v1592_v32, %v1593_v34  ;;  %v2071_v57 = vmax.f32 %v1170_v21, %v1593_v34  ;;  %v9791_v34 = vld [vmem:[#allocation29_spill] sm:$0xff] }
  0x86   : > { %v1595_v17 = vrot.slane %v1171_v10, 1  ;;  %v5596_v6 = vmax.f32 %v2069_v26, %v2291_v56  ;;  %v2296_v5 = vrot.slane %v1171_v10, 2  ;;  %v2070_v24 = vmax.f32 %v1169_v15, %v1594_v20  ;;  %v9792_v56 = vld [vmem:[#allocation31_spill] sm:$0xff]  ;;  %v9797_v26 = vld [vmem:[#allocation32_spill] sm:$0xff] }
  0x87   : > { %v1172_v23 = vmax.f32 %v972_v41, %v744_v50  ;;  %v5599_v19 = vmax.f32 %v2068_v58, %v2292_v18  ;;  %v2295_v37 = vsel %vm2226_vm1, %v2293_v63, %v2294_v31  ;;  %v5607_v55 = vmax.f32 %v2071_v57, %v2294_v31  ;;  %v9790_v41 = vld [vmem:[#allocation34_spill] sm:$0xff]  ;;  %v9795_v63 = vld [vmem:[#allocation35_spill] sm:$0xff] }
  0x88   : > { %9786 = vst [vmem:[#allocation14_spill] sm:$0xff] %v5596_v6  ;;  %v9793_v21 = vmax.f32 %v9791_v34, %v9792_v56  ;;  %v5616_v20 = vmax.f32 %v2070_v24, %v2295_v37  ;;  %v9796_v18 = vld [vmem:[#allocation30_spill] sm:$0xff]  ;;  %v9800_v34 = vld [vmem:[#allocation33_spill] sm:$0xff]  ;;  %v974_v13 = vmax.f32 %v5571_v1, %v744_v50 }
  0x89   : > { %9787 = vst [vmem:[#allocation10_spill] sm:$0xff] %v5599_v19  ;;  %v1596_v25 = vrot.slane %v1172_v23, 1  ;;  %v2297_v44 = vrot.slane %v1172_v23, 2  ;;  %v9798_v7 = vmax.f32 %v9796_v18, %v9797_v26  ;;  %v973_v18 = vmax.f32 %v5565_v48, %v5583_v14  ;;  %v9811_v48 = vld [vmem:[#allocation36_spill] sm:$0xff]  ;;  %v9824_v56 = vld [vmem:[#allocation57_spill] sm:$0xff] }
  0x8a   : > { %2946 = vst.msk [vmem:[%s4913_s18 + $0x47] sm:$0x1] %vm2929_vm2, %v5596_v6  ;;  %v745_v58 = vmax.f32 %v9793_v21, %v9790_v41  ;;  %v9801_v21 = vld [vmem:[#allocation28_spill] sm:$0xff]  ;;  %v9825_v6 = vld [vmem:[#allocation51_spill] sm:$0xff] }
  0x8b   : > { %9789 = vst [vmem:[#allocation12_spill] sm:$0xff] %v5607_v55  ;;  %v1597_v15 = vsel %vm1525_vm0, %v1595_v17, %v1596_v25  ;;  %v2073_v32 = vmax.f32 %v1172_v23, %v1596_v25  ;;  %v746_v31 = vmax.f32 %v9798_v7, %v9795_v63  ;;  %v9802_v37 = vmax.f32 %v9800_v34, %v9801_v21  ;;  %v9816_v34 = vld [vmem:[#allocation41_spill] sm:$0xff] }
  0x8c   : > { %2945 = vst.msk [vmem:[%s4913_s18 + $0x3f] sm:$0xfe] %vm2927_vm3, %v5599_v19  ;;  %v2072_v17 = vmax.f32 %v1171_v10, %v1597_v15  ;;  %v2298_v23 = vsel %vm2226_vm1, %v2296_v5, %v2297_v44  ;;  %v9807_v15 = vld [vmem:[#allocation44_spill] sm:$0xff]  ;;  %v975_v25 = vmax.f32 %v5583_v14, %v745_v58 }
  0x8d   : > { %9794 = vst [vmem:[#allocation11_spill] sm:$0xff] %v5616_v20  ;;  %v5632_v24 = vmax.f32 %v9802_v37, %v5607_v55  ;;  %v5640_v7 = vmax.f32 %v2073_v32, %v2297_v44  ;;  %v9808_v5 = vld [vmem:[#allocation40_spill] sm:$0xff]  ;;  %v9812_v44 = vld [vmem:[#allocation37_spill] sm:$0xff]  ;;  %v1173_v37 = vmax.f32 %v973_v18, %v745_v58 }
  0x8e   : > { %2948 = vst.msk [vmem:[%s4913_s18 + $0x4f] sm:$0x1] %vm2929_vm2, %v5607_v55  ;;  %v5647_v10 = vmax.f32 %v2072_v17, %v2298_v23  ;;  %v9813_v1 = vmax.f32 %v9811_v48, %v9812_v44  ;;  %v1174_v17 = vmax.f32 %v974_v13, %v746_v31  ;;  %v9815_v23 = vld [vmem:[#allocation46_spill] sm:$0xff] }
  0x8f   : > { %9803 = vst [vmem:[#allocation13_spill] sm:$0xff] %v5632_v24  ;;  %v9809_v24 = vld [vmem:[#allocation42_spill] sm:$0xff]  ;;  %v2299_v13 = vrot.slane %v1173_v37, 2 }
  0x90   : > { %2947 = vst.msk [vmem:[%s4913_s18 + $0x47] sm:$0xfe] %vm2927_vm3, %v5616_v20  ;;  %v9810_v57 = vmax.f32 %v9808_v5, %v9809_v24  ;;  %v5663_v32 = vmax.f32 %v9813_v1, %v5640_v7  ;;  %v9817_v20 = vld [vmem:[#allocation43_spill] sm:$0xff]  ;;  %v976_v24 = vmax.f32 %v744_v50, %v746_v31  ;;  %v1598_v1 = vrot.slane %v1173_v37, 1 }
  0x91   : > { %9804 = vst [vmem:[#allocation20_spill] sm:$0xff] %v5640_v7  ;;  %v9818_v21 = vmax.f32 %v9816_v34, %v9817_v20  ;;  %v1599_v18 = vrot.slane %v1174_v17, 1  ;;  %v9822_v20 = vld [vmem:[#allocation52_spill] sm:$0xff] }
  0x92   : > { %9806 = vst [vmem:[#allocation21_spill] sm:$0xff] %v5647_v10  ;;  %v5653_v19 = vmax.f32 %v9810_v57, %v9807_v15 }
  0x93   : > { %2950 = vst.msk [vmem:[%s4913_s18 + $0x57] sm:$0x1] %vm2929_vm2, %v5640_v7  ;;  %v748_v5 = vmax.f32 %v9818_v21, %v9815_v23  ;;  %v9820_v21 = vld [vmem:[#allocation54_spill] sm:$0xff]  ;;  %v1600_v57 = vsel %vm1525_vm0, %v1598_v1, %v1599_v18  ;;  %v2075_v15 = vmax.f32 %v1174_v17, %v1599_v18 }
  0x94   : > { %9814 = vst [vmem:[#allocation29_spill] sm:$0xff] %v5663_v32  ;;  %v1175_v48 = vmax.f32 %v975_v25, %v5653_v19  ;;  %v2300_v32 = vrot.slane %v1174_v17, 2  ;;  %v9821_v23 = vld [vmem:[#allocation50_spill] sm:$0xff]  ;;  %v977_v25 = vmax.f32 %v745_v58, %v5653_v19  ;;  %v2074_v14 = vmax.f32 %v1173_v37, %v1600_v57 }
  0x95   : > { %2949 = vst.msk [vmem:[%s4913_s18 + $0x4f] sm:$0xfe] %vm2927_vm3, %v5647_v10  ;;  %v1176_v55 = vmax.f32 %v976_v24, %v748_v5  ;;  %v9823_v26 = vmax.f32 %v9821_v23, %v9822_v20  ;;  %v978_v44 = vmax.f32 %v746_v31, %v748_v5  ;;  %v9826_v23 = vld [vmem:[#allocation53_spill] sm:$0xff]  ;;  %v9828_v20 = vld [vmem:[#allocation64_spill] sm:$0xff] }
  0x96   : > { %v1601_v63 = vrot.slane %v1175_v48, 1  ;;  %v2302_v34 = vrot.slane %v1175_v48, 2  ;;  %v2301_v50 = vsel %vm2226_vm1, %v2299_v13, %v2300_v32  ;;  %v5686_v7 = vmax.f32 %v2075_v15, %v2300_v32  ;;  %v9830_v13 = vld [vmem:[#allocation62_spill] sm:$0xff]  ;;  %v9834_v32 = vld [vmem:[#allocation49_spill] sm:$0xff] }
  0x97   : > { %v5681_v41 = vmax.f32 %v9823_v26, %v9820_v21  ;;  %v1602_v10 = vrot.slane %v1176_v55, 1  ;;  %v2303_v24 = vrot.slane %v1176_v55, 2  ;;  %v9827_v26 = vmax.f32 %v9825_v6, %v9826_v23  ;;  %v9833_v6 = vld [vmem:[#allocation45_spill] sm:$0xff] }
  0x98   : > { %v9831_v17 = vmax.f32 %v9829_v62, %v9830_v13  ;;  %v5697_v58 = vmax.f32 %v2074_v14, %v2301_v50  ;;  %2952 = vst.msk [vmem:[%s4913_s18 + $0x5f] sm:$0x1] %vm2929_vm2, %v5686_v7  ;;  %v9835_v57 = vmax.f32 %v9833_v6, %v9834_v32  ;;  %v9838_v14 = vld [vmem:[#allocation61_spill] sm:$0xff]  ;;  %v9839_v50 = vld [vmem:[#allocation63_spill] sm:$0xff] }
  0x99   : > { %v750_v21 = vmax.f32 %v9827_v26, %v9824_v56  ;;  %v1177_v1 = vmax.f32 %v977_v25, %v5681_v41  ;;  %v1603_v37 = vsel %vm1525_vm0, %v1601_v63, %v1602_v10  ;;  %v2304_v31 = vsel %vm2226_vm1, %v2302_v34, %v2303_v24 }
  0x9a   : > { %v751_v18 = vmax.f32 %v9831_v17, %v9828_v20  ;;  %9832 = vst [vmem:[#allocation30_spill] sm:$0xff] %v5697_v58  ;;  %v2077_v15 = vmax.f32 %v1176_v55, %v1602_v10  ;;  %v5708_v25 = vmax.f32 %v9835_v57, %v5686_v7  ;;  %v2076_v26 = vmax.f32 %v1175_v48, %v1603_v37  ;;  %v9837_v17 = vld [vmem:[#allocation65_spill] sm:$0xff] }
  0x9b   : > { %v1178_v62 = vmax.f32 %v978_v44, %v750_v21  ;;  %v9840_v20 = vmax.f32 %v9838_v14, %v9839_v50  ;;  %2951 = vst.msk [vmem:[%s4913_s18 + $0x57] sm:$0xfe] %vm2927_vm3, %v5697_v58  ;;  %v1604_v34 = vrot.slane %v1177_v1, 1  ;;  %v2305_v6 = vrot.slane %v1177_v1, 2 }
  0x9c   : > { %9836 = vst [vmem:[#allocation33_spill] sm:$0xff] %v5708_v25  ;;  %v5721_v10 = vmax.f32 %v2077_v15, %v2303_v24  ;;  %v5723_v57 = vmax.f32 %v2076_v26, %v2304_v31  ;;  %v979_v37 = vmax.f32 %v5653_v19, %v5681_v41  ;;  %v9843_v25 = vld [vmem:[#allocation56_spill] sm:$0xff]  ;;  %v9844_v24 = vld [vmem:[#allocation55_spill] sm:$0xff]  ;;  %v980_v26 = vmax.f32 %v748_v5, %v750_v21 }
  0x9d   : > { %v5714_v63 = vmax.f32 %v9840_v20, %v9837_v17  ;;  %v1605_v44 = vrot.slane %v1178_v62, 1  ;;  %v2306_v48 = vrot.slane %v1178_v62, 2  ;;  %v9845_v15 = vmax.f32 %v9844_v24, %v9843_v25 }
  0x9e   : > { %9841 = vst [vmem:[#allocation40_spill] sm:$0xff] %v5723_v57  ;;  %v9847_v55 = vmax.f32 %v5356_v43, %v5413_v16  ;;  %v1179_v5 = vmax.f32 %v979_v37, %v751_v18  ;;  %v9850_v43 = vmax.f32 %v5405_v49, %v5421_v27 }
  0x9f   : > { %2954 = vst.msk [vmem:[%s4913_s18 + $0x67] sm:$0x1] %vm2929_vm2, %v5721_v10  ;;  %v5738_v31 = vmax.f32 %v9845_v15, %v5721_v10  ;;  %v1606_v19 = vsel %vm1525_vm0, %v1604_v34, %v1605_v44  ;;  %v2307_v14 = vsel %vm2226_vm1, %v2305_v6, %v2306_v48  ;;  %v2079_v20 = vmax.f32 %v1178_v62, %v1605_v44 }
  0xa0   : > { %2953 = vst.msk [vmem:[%s4913_s18 + $0x5f] sm:$0xfe] %vm2927_vm3, %v5723_v57  ;;  %v753_v58 = vmax.f32 %v9847_v55, %v5431_v11  ;;  %v2078_v15 = vmax.f32 %v1177_v1, %v1606_v19  ;;  %v9849_v34 = vmax.f32 %v5402_v51, %v5418_v42  ;;  %v755_v55 = vmax.f32 %v9850_v43, %v5437_v53  ;;  %v9853_v51 = vld [vmem:[#allocation66_spill] sm:$0xff]  ;;  %v4586_v57 = vld [vmem:[%s4655_s14 + $0x348] sm:$0xf] }
  0xa1   : > { %9846 = vst [vmem:[#allocation36_spill] sm:$0xff] %v5738_v31  ;;  %v1180_v31 = vmax.f32 %v980_v26, %v5714_v63  ;;  %v5752_v25 = vmax.f32 %v2079_v20, %v2306_v48  ;;  %v981_v6 = vmax.f32 %v5681_v41, %v751_v18  ;;  %v1607_v1 = vrot.slane %v1179_v5, 1  ;;  %v9852_v48 = vld [vmem:[#allocation70_spill] sm:$0xff] }
  0xa2   : > { %v754_v62 = vmax.f32 %v9849_v34, %v5434_v29  ;;  %v5763_v44 = vmax.f32 %v2078_v15, %v2307_v14  ;;  %v2308_v19 = vrot.slane %v1179_v5, 2  ;;  %v9854_v26 = vmax.f32 %v9853_v51, %v9852_v48 }
  0xa3   : > { %v1608_v37 = vrot.slane %v1180_v31, 1  ;;  %2956 = vst.msk [vmem:[%s4913_s18 + $0x6f] sm:$0x1] %vm2929_vm2, %v5752_v25  ;;  %v2309_v49 = vrot.slane %v1180_v31, 2  ;;  %v982_v41 = vmax.f32 %v750_v21, %v5714_v63  ;;  %v9856_v43 = vmax.f32 %v5410_v35, %v5424_v33  ;;  %v5794_v35 = vld [vmem:[%s4655_s14 + $0x3c0] sm:$0xff] }
  0xa4   : > { %9851 = vst [vmem:[#allocation41_spill] sm:$0xff] %v5763_v44  ;;  %v5774_v34 = vmax.f32 %v9854_v26, %v5752_v25  ;;  %v983_v51 = vmax.f32 %v751_v18, %v753_v58  ;;  %v984_v21 = vmax.f32 %v5714_v63, %v754_v62  ;;  %v9860_v63 = vmax.f32 %v4741_v38, %v4782_v54  ;;  %v5828_v54 = vld [vmem:[%s4655_s14 + $0x3e0] sm:$0xff] }
  0xa5   : > { %2955 = vst.msk [vmem:[%s4913_s18 + $0x67] sm:$0xfe] %vm2927_vm3, %v5763_v44  ;;  %v1609_v14 = vsel %vm1525_vm0, %v1607_v1, %v1608_v37  ;;  %v2081_v15 = vmax.f32 %v1180_v31, %v1608_v37  ;;  %v756_v24 = vmax.f32 %v9856_v43, %v5480_v36  ;;  %v2310_v20 = vsel %vm2226_vm1, %v2308_v19, %v2309_v49 }
  0xa6   : > { %9855 = vst [vmem:[#allocation50_spill] sm:$0xff] %v5774_v34  ;;  %v2080_v26 = vmax.f32 %v1179_v5, %v1609_v14  ;;  %v1181_v34 = vmax.f32 %v981_v6, %v753_v58  ;;  %v1182_v31 = vmax.f32 %v982_v41, %v754_v62  ;;  %v5791_v37 = vmax.f32 %v983_v51, %v755_v55  ;;  %v5799_v14 = vld [vmem:[%s4655_s14 + $0x3c8] sm:$0xf]  ;;  %v5802_v58 = vld [vmem:[%s4655_s14 + $0x3d0] sm:$0xff] }
  0xa7   : > { %v5789_v1 = vmax.f32 %v2081_v15, %v2309_v49  ;;  %v757_v6 = vmax.f32 %v9860_v63, %v5794_v35  ;;  %v9861_v55 = vmax.f32 %v5426_v8, %v5428_v12  ;;  %v5820_v15 = vld [vmem:[%s4655_s14 + $0x3d8] sm:$0xf]  ;;  %v5825_v38 = vmax.f32 %v984_v21, %v756_v24  ;;  %v5845_v62 = vld [vmem:[%s4655_s14 + $0x3e8] sm:$0xf] }
  0xa8   : > { %9858 = vst [vmem:[#allocation57_spill] sm:$0xff] %v5791_v37  ;;  %v5796_v18 = vmax.f32 %v2080_v26, %v2310_v20  ;;  %v1610_v5 = vrot.slane %v1181_v34, 1  ;;  %v2311_v19 = vrot.slane %v1181_v34, 2  ;;  %v1611_v49 = vrot.slane %v1182_v31, 1 }
  0xa9   : > { %2958 = vst.msk [vmem:[%s4913_s18 + $0x77] sm:$0x1] %vm2929_vm2, %v5789_v1  ;;  %v5817_v20 = vmax.f32 %v9861_v55, %v5789_v1  ;;  %v2312_v41 = vrot.slane %v1182_v31, 2  ;;  %v9864_v43 = vmax.f32 %v4744_v39, %v4794_v59  ;;  %v9865_v8 = vmax.f32 %v4747_v40, %v4797_v60  ;;  %v5848_v39 = vld [vmem:[%s4655_s14 + $0x3f0] sm:$0xff]  ;;  %v5851_v59 = vld [vmem:[%s4655_s14 + $0x3f8] sm:$0xf] }
  0xaa   : > { %9859 = vst [vmem:[#allocation51_spill] sm:$0xff] %v5796_v18  ;;  %v9866_v63 = vmax.f32 %v4758_v45, %v4800_v61  ;;  %v1612_v24 = vsel %vm1525_vm0, %v1610_v5, %v1611_v49  ;;  %v2083_v48 = vmax.f32 %v1182_v31, %v1611_v49  ;;  %v9869_v40 = vmax.f32 %v4761_v46, %v4812_v2 }
  0xab   : > { %9862 = vst [vmem:[#allocation53_spill] sm:$0xff] %v5817_v20  ;;  %v758_v51 = vmax.f32 %v9864_v43, %v5799_v14  ;;  %v759_v26 = vmax.f32 %v9865_v8, %v5802_v58  ;;  %v2313_v21 = vsel %vm2226_vm1, %v2311_v19, %v2312_v41  ;;  %v2082_v60 = vmax.f32 %v1181_v34, %v1612_v24  ;;  %v5899_v24 = vld [vmem:[%s4655_s14 + $0x410] sm:$0xff] }
  0xac   : > { %2957 = vst.msk [vmem:[%s4913_s18 + $0x6f] sm:$0xfe] %vm2927_vm3, %v5796_v18  ;;  %v760_v55 = vmax.f32 %v9866_v63, %v5820_v15  ;;  %v761_v45 = vmax.f32 %v9869_v40, %v5828_v54  ;;  %v9870_v61 = vmax.f32 %v4764_v47, %v4815_v3  ;;  %v9871_v31 = vmax.f32 %v4776_v52, %v4818_v4  ;;  %v5872_v63 = vld [vmem:[%s4655_s14 + $0x400] sm:$0xff]  ;;  %v5875_v47 = vld [vmem:[%s4655_s14 + $0x408] sm:$0xf] }
  0xad   : > { %9863 = vst [vmem:[#allocation60_spill] sm:$0xff] %v5825_v38  ;;  %v9872_v49 = vmax.f32 %v9766_v22, %v4830_v9  ;;  %v5869_v46 = vmax.f32 %v2083_v48, %v2312_v41  ;;  %v985_v2 = vmax.f32 %v757_v6, %v759_v26  ;;  %v5877_v3 = vmax.f32 %v2082_v60, %v2313_v21  ;;  %v9878_v22 = vld [vmem:[#allocation16_spill] sm:$0xff]  ;;  %v9884_v40 = vld [vmem:[#allocation22_spill] sm:$0xff] }
  0xae   : > { %9867 = vst [vmem:[#allocation62_spill] sm:$0xff] %v5848_v39  ;;  %v762_v5 = vmax.f32 %v9870_v61, %v5845_v62  ;;  %v763_v19 = vmax.f32 %v9871_v31, %v5848_v39  ;;  %v986_v34 = vmax.f32 %v758_v51, %v760_v55  ;;  %v987_v8 = vmax.f32 %v759_v26, %v761_v45  ;;  %v9885_v60 = vld [vmem:[#allocation24_spill] sm:$0xff] }
  0xaf   : > { %9868 = vst [vmem:[#allocation45_spill] sm:$0xff] %v5851_v59  ;;  %v764_v43 = vmax.f32 %v9872_v49, %v5851_v59  ;;  %v9877_v4 = vmax.f32 %v9770_v28, %v9768_v30  ;;  %v9879_v48 = vmax.f32 %v9774_v0, %v9878_v22  ;;  %v5894_v41 = vmax.f32 %v985_v2, %v761_v45 }
  0xb0   : > { %9873 = vst [vmem:[#allocation49_spill] sm:$0xff] %v5869_v46  ;;  %v988_v52 = vmax.f32 %v760_v55, %v762_v5  ;;  %v5896_v51 = vmax.f32 %v986_v34, %v762_v5  ;;  %v1187_v26 = vmax.f32 %v987_v8, %v763_v19  ;;  %v989_v55 = vmax.f32 %v761_v45, %v763_v19 }
  0xb1   : > { %9874 = vst [vmem:[#allocation61_spill] sm:$0xff] %v5872_v63  ;;  %v5883_v9 = vmax.f32 %v9877_v4, %v5872_v63  ;;  %v5889_v6 = vmax.f32 %v9879_v48, %v5875_v47  ;;  %v990_v21 = vmax.f32 %v762_v5, %v764_v43  ;;  %v9886_v61 = vmax.f32 %v9884_v40, %v9885_v60  ;;  %v5916_v48 = vld [vmem:[%s4655_s14 + $0x418] sm:$0xf]  ;;  %v9888_v40 = vld [vmem:[#allocation23_spill] sm:$0xff] }
  0xb2   : > { %9875 = vst [vmem:[#allocation63_spill] sm:$0xff] %v5875_v47  ;;  %v1188_v0 = vmax.f32 %v988_v52, %v764_v43  ;;  %v1619_v49 = vrot.slane %v1187_v26, 1  ;;  %v2320_v2 = vrot.slane %v1187_v26, 2  ;;  %v9889_v60 = vld [vmem:[#allocation25_spill] sm:$0xff] }
  0xb3   : > { %9876 = vst [vmem:[#allocation55_spill] sm:$0xff] %v5877_v3  ;;  %v5910_v31 = vmax.f32 %v9886_v61, %v5899_v24  ;;  %v1189_v45 = vmax.f32 %v989_v55, %v5883_v9  ;;  %v991_v34 = vmax.f32 %v763_v19, %v5883_v9  ;;  %v1190_v22 = vmax.f32 %v990_v21, %v5889_v6 }
  0xb4   : > { %2960 = vst.msk [vmem:[%s4913_s18 + $0x7f] sm:$0x1] %vm2929_vm2, %v5869_v46  ;;  %v1620_v8 = vrot.slane %v1188_v0, 1  ;;  %v2321_v4 = vrot.slane %v1188_v0, 2  ;;  %v992_v5 = vmax.f32 %v764_v43, %v5889_v6  ;;  %v9890_v61 = vmax.f32 %v9888_v40, %v9889_v60 }
  0xb5   : > { %9880 = vst [vmem:[#allocation66_spill] sm:$0xff] %v5894_v41  ;;  %v1622_v52 = vrot.slane %v1189_v45, 1  ;;  %v2323_v28 = vrot.slane %v1189_v45, 2  ;;  %v1191_v41 = vmax.f32 %v991_v34, %v5910_v31  ;;  %v1623_v38 = vrot.slane %v1190_v22, 1 }
  0xb6   : > { %9881 = vst [vmem:[#allocation16_spill] sm:$0xff] %v5896_v51  ;;  %v768_v51 = vmax.f32 %v9890_v61, %v5916_v48  ;;  %v1621_v55 = vsel %vm1525_vm0, %v1619_v49, %v1620_v8  ;;  %v2322_v19 = vsel %vm2226_vm1, %v2320_v2, %v2321_v4  ;;  %v2089_v21 = vmax.f32 %v1188_v0, %v1620_v8  ;;  %v5933_v8 = vld [vmem:[%s4655_s14 + $0x420] sm:$0xff] }
  0xb7   : > { %9882 = vst [vmem:[#allocation83_spill] sm:$0xff] %v5899_v24  ;;  %v2088_v37 = vmax.f32 %v1187_v26, %v1621_v55  ;;  %v2324_v46 = vrot.slane %v1190_v22, 2  ;;  %v1624_v40 = vsel %vm1525_vm0, %v1622_v52, %v1623_v38  ;;  %v2091_v60 = vmax.f32 %v1190_v22, %v1623_v38  ;;  %v5943_v22 = vld [vmem:[%s4655_s14 + $0x428] sm:$0xf] }
  0xb8   : > { %2959 = vst.msk [vmem:[%s4913_s18 + $0x77] sm:$0xfe] %vm2927_vm3, %v5877_v3  ;;  %v1192_v43 = vmax.f32 %v992_v5, %v768_v51  ;;  %v1625_v3 = vrot.slane %v1191_v41, 1  ;;  %v5926_v20 = vmax.f32 %v2089_v21, %v2321_v4  ;;  %v2326_v34 = vrot.slane %v1191_v41, 2 }
  0xb9   : > { %9887 = vst [vmem:[#allocation22_spill] sm:$0xff] %v5916_v48  ;;  %v5929_v61 = vmax.f32 %v2088_v37, %v2322_v19  ;;  %v2090_v49 = vmax.f32 %v1189_v45, %v1624_v40  ;;  %v2325_v2 = vsel %vm2226_vm1, %v2323_v28, %v2324_v46  ;;  %v5940_v5 = vmax.f32 %v2091_v60, %v2324_v46  ;;  %v9895_v37 = vld [vmem:[#allocation31_spill] sm:$0xff]  ;;  %v9896_v45 = vld [vmem:[#allocation34_spill] sm:$0xff]  ;;  %v9899_v46 = vld [vmem:[#allocation32_spill] sm:$0xff] }
  0xba   : > { %9891 = vst [vmem:[#allocation24_spill] sm:$0xff] %v5926_v20  ;;  %v1626_v0 = vrot.slane %v1192_v43, 1  ;;  %v2327_v38 = vrot.slane %v1192_v43, 2  ;;  %v9897_v52 = vmax.f32 %v9895_v37, %v9896_v45  ;;  %v9900_v40 = vld [vmem:[#allocation35_spill] sm:$0xff]  ;;  %v9902_v37 = vld [vmem:[#allocation12_spill] sm:$0xff] }
  0xbb   : > { %9892 = vst [vmem:[#allocation23_spill] sm:$0xff] %v5929_v61  ;;  %v5952_v55 = vmax.f32 %v2090_v49, %v2325_v2  ;;  %v9901_v60 = vmax.f32 %v9899_v46, %v9900_v40  ;;  %v9911_v46 = vld [vmem:[#allocation42_spill] sm:$0xff]  ;;  %v9912_v45 = vld [vmem:[#allocation44_spill] sm:$0xff] }
  0xbc   : > { %2962 = vst.msk [vmem:[%s4913_s18 + $0x87] sm:$0x1] %vm2929_vm2, %v5926_v20  ;;  %v769_v28 = vmax.f32 %v9897_v52, %v5933_v8  ;;  %v1627_v19 = vsel %vm1525_vm0, %v1625_v3, %v1626_v0  ;;  %v2093_v21 = vmax.f32 %v1192_v43, %v1626_v0  ;;  %v9903_v52 = vld [vmem:[#allocation28_spill] sm:$0xff]  ;;  %v2328_v43 = vsel %vm2226_vm1, %v2326_v34, %v2327_v38 }
  0xbd   : > { %9894 = vst [vmem:[#allocation25_spill] sm:$0xff] %v5940_v5  ;;  %v770_v4 = vmax.f32 %v9901_v60, %v5943_v22  ;;  %v9904_v49 = vmax.f32 %v9903_v52, %v9902_v37  ;;  %v2092_v3 = vmax.f32 %v1191_v41, %v1627_v19  ;;  %v993_v60 = vmax.f32 %v5883_v9, %v5910_v31  ;;  %v9914_v9 = vld [vmem:[#allocation20_spill] sm:$0xff]  ;;  %v9921_v41 = vld [vmem:[#allocation46_spill] sm:$0xff] }
  0xbe   : > { %2961 = vst.msk [vmem:[%s4913_s18 + $0x7f] sm:$0xfe] %vm2927_vm3, %v5929_v61  ;;  %v5976_v40 = vmax.f32 %v2093_v21, %v2327_v38  ;;  %v994_v52 = vmax.f32 %v5889_v6, %v768_v51  ;;  %v995_v38 = vmax.f32 %v5910_v31, %v769_v28  ;;  %v9915_v21 = vld [vmem:[#allocation37_spill] sm:$0xff]  ;;  %v9924_v31 = vld [vmem:[#allocation54_spill] sm:$0xff]  ;;  %v6035_v20 = vld [vmem:[%s4655_s14 + $0x450] sm:$0xff] }
  0xbf   : > { %9898 = vst [vmem:[#allocation31_spill] sm:$0xff] %v5952_v55  ;;  %v5968_v2 = vmax.f32 %v9904_v49, %v5940_v5  ;;  %v5982_v49 = vld [vmem:[%s4655_s14 + $0x430] sm:$0xff]  ;;  %v5986_v19 = vmax.f32 %v2092_v3, %v2328_v43  ;;  %v9916_v3 = vmax.f32 %v9915_v21, %v9914_v9  ;;  %v1193_v34 = vmax.f32 %v993_v60, %v769_v28 }
  0xc0   : > { %2964 = vst.msk [vmem:[%s4913_s18 + $0x8f] sm:$0x1] %vm2929_vm2, %v5940_v5  ;;  %v1194_v17 = vmax.f32 %v994_v52, %v770_v4  ;;  %v996_v0 = vmax.f32 %v768_v51, %v770_v4 }
  0xc1   : > { %9905 = vst [vmem:[#allocation34_spill] sm:$0xff] %v5968_v2  ;;  %v9913_v2 = vmax.f32 %v9911_v46, %v9912_v45  ;;  %v6004_v43 = vmax.f32 %v9916_v3, %v5976_v40  ;;  %v6007_v45 = vld [vmem:[%s4655_s14 + $0x438] sm:$0xf]  ;;  %v9920_v46 = vld [vmem:[#allocation43_spill] sm:$0xff]  ;;  %v1628_v3 = vrot.slane %v1193_v34, 1  ;;  %v2329_v52 = vrot.slane %v1193_v34, 2 }
  0xc2   : > { %2963 = vst.msk [vmem:[%s4913_s18 + $0x87] sm:$0xfe] %vm2927_vm3, %v5952_v55  ;;  %v9922_v6 = vmax.f32 %v9920_v46, %v9921_v41  ;;  %v1629_v60 = vrot.slane %v1194_v17, 1  ;;  %v6020_v55 = vld [vmem:[%s4655_s14 + $0x440] sm:$0xff] }
  0xc3   : > { %9907 = vst [vmem:[#allocation32_spill] sm:$0xff] %v5976_v40  ;;  %v5992_v30 = vmax.f32 %v9913_v2, %v5982_v49  ;;  %v9923_v2 = vld [vmem:[#allocation52_spill] sm:$0xff] }
  0xc4   : > { %9908 = vst [vmem:[#allocation35_spill] sm:$0xff] %v5982_v49  ;;  %v772_v26 = vmax.f32 %v9922_v6, %v6007_v45  ;;  %v1630_v51 = vsel %vm1525_vm0, %v1628_v3, %v1629_v60  ;;  %v2095_v6 = vmax.f32 %v1194_v17, %v1629_v60 }
  0xc5   : > { %9910 = vst [vmem:[#allocation28_spill] sm:$0xff] %v5986_v19  ;;  %v1195_v21 = vmax.f32 %v995_v38, %v5992_v30  ;;  %v997_v46 = vmax.f32 %v769_v28, %v5992_v30 }
  0xc6   : > { %2966 = vst.msk [vmem:[%s4913_s18 + $0x97] sm:$0x1] %vm2929_vm2, %v5976_v40  ;;  %v1196_v9 = vmax.f32 %v996_v0, %v772_v26  ;;  %v6032_v0 = vld [vmem:[%s4655_s14 + $0x448] sm:$0xf]  ;;  %v998_v5 = vmax.f32 %v770_v4, %v772_v26 }
  0xc7   : > { %9917 = vst [vmem:[#allocation42_spill] sm:$0xff] %v6004_v43  ;;  %v2330_v43 = vrot.slane %v1194_v17, 2  ;;  %v1631_v40 = vrot.slane %v1195_v21, 1  ;;  %v2332_v49 = vrot.slane %v1195_v21, 2 }
  0xc8   : > { %9918 = vst [vmem:[#allocation44_spill] sm:$0xff] %v6007_v45  ;;  %v2094_v45 = vmax.f32 %v1193_v34, %v1630_v51  ;;  %v1632_v61 = vrot.slane %v1196_v9, 1  ;;  %v2333_v37 = vrot.slane %v1196_v9, 2  ;;  %v9928_v34 = vld [vmem:[#allocation64_spill] sm:$0xff] }
  0xc9   : > { %2965 = vst.msk [vmem:[%s4913_s18 + $0x8f] sm:$0xfe] %vm2927_vm3, %v5986_v19  ;;  %v9925_v19 = vmax.f32 %v9923_v2, %v9924_v31  ;;  %v2331_v38 = vsel %vm2226_vm1, %v2329_v52, %v2330_v43  ;;  %v9927_v31 = vmax.f32 %v9826_v23, %v9824_v56  ;;  %v9929_v2 = vmax.f32 %v9830_v13, %v9928_v34  ;;  %v6114_v56 = vld [vmem:[%s4655_s14 + $0x468] sm:$0xf] }
  0xca   : > { %v6052_v4 = vmax.f32 %v2094_v45, %v2331_v38  ;;  %v1633_v60 = vsel %vm1525_vm0, %v1631_v40, %v1632_v61  ;;  %v2097_v52 = vmax.f32 %v1196_v9, %v1632_v61  ;;  %v9931_v23 = vmax.f32 %v9834_v32, %v5686_v7  ;;  %v6069_v40 = vld [vmem:[%s4655_s14 + $0x458] sm:$0xf] }
  0xcb   : > { %v6026_v41 = vmax.f32 %v9925_v19, %v6020_v55  ;;  %v6037_v19 = vmax.f32 %v2095_v6, %v2330_v43  ;;  %v6043_v17 = vmax.f32 %v9927_v31, %v6032_v0  ;;  %v6050_v3 = vmax.f32 %v9929_v2, %v6035_v20  ;;  %v9934_v38 = vld [vmem:[#allocation65_spill] sm:$0xff] }
  0xcc   : > { %9930 = vst [vmem:[#allocation43_spill] sm:$0xff] %v6052_v4  ;;  %v2334_v43 = vsel %vm2226_vm1, %v2332_v49, %v2333_v37  ;;  %v2096_v45 = vmax.f32 %v1195_v21, %v1633_v60  ;;  %v6074_v61 = vmax.f32 %v2097_v52, %v2333_v37  ;;  %v9935_v32 = vmax.f32 %v9839_v50, %v9934_v38  ;;  %v9938_v50 = vld [vmem:[#allocation56_spill] sm:$0xff] }
  0xcd   : > { %9926 = vst [vmem:[#allocation37_spill] sm:$0xff] %v6037_v19  ;;  %v1197_v28 = vmax.f32 %v997_v46, %v6026_v41  ;;  %v6065_v13 = vmax.f32 %v9931_v23, %v6037_v19  ;;  %v1198_v51 = vmax.f32 %v998_v5, %v6043_v17  ;;  %v999_v31 = vmax.f32 %v5992_v30, %v6026_v41  ;;  %v6099_v30 = vld [vmem:[%s4655_s14 + $0x460] sm:$0xff] }
  0xce   : > { %2968 = vst.msk [vmem:[%s4913_s18 + $0x9f] sm:$0x1] %vm2929_vm2, %v6037_v19  ;;  %v776_v6 = vmax.f32 %v9935_v32, %v6069_v40  ;;  %v6080_v46 = vmax.f32 %v2096_v45, %v2334_v43  ;;  %v9939_v60 = vmax.f32 %v9938_v50, %v5721_v10  ;;  %v1000_v52 = vmax.f32 %v772_v26, %v6043_v17 }
  0xcf   : > { %9932 = vst [vmem:[#allocation46_spill] sm:$0xff] %v6065_v13  ;;  %v1634_v49 = vrot.slane %v1197_v28, 1  ;;  %v2335_v9 = vrot.slane %v1197_v28, 2  ;;  %v1635_v21 = vrot.slane %v1198_v51, 1  ;;  %v2336_v5 = vrot.slane %v1198_v51, 2 }
  0xd0   : > { %2967 = vst.msk [vmem:[%s4913_s18 + $0x97] sm:$0xfe] %vm2927_vm3, %v6052_v4  ;;  %v6095_v43 = vmax.f32 %v9939_v60, %v6074_v61  ;;  %v9941_v32 = vmax.f32 %v5413_v16, %v5431_v11  ;;  %v1199_v2 = vmax.f32 %v999_v31, %v6050_v3  ;;  %v1200_v37 = vmax.f32 %v1000_v52, %v776_v6  ;;  %v4598_v4 = vld [vmem:[%s4655_s14 + $0x3a8] sm:$0xf] }
  0xd1   : > { %9933 = vst [vmem:[#allocation52_spill] sm:$0xff] %v6074_v61  ;;  %v1636_v23 = vsel %vm1525_vm0, %v1634_v49, %v1635_v21  ;;  %v2337_v45 = vsel %vm2226_vm1, %v2335_v9, %v2336_v5  ;;  %v2099_v38 = vmax.f32 %v1198_v51, %v1635_v21  ;;  %v6117_v49 = vld [vmem:[%s4655_s14 + $0x470] sm:$0xff]  ;;  %v9944_v16 = vmax.f32 %v5418_v42, %v5434_v29  ;;  %v9947_v29 = vld [vmem:[#allocation70_spill] sm:$0xff] }
  0xd2   : > { %9936 = vst [vmem:[#allocation54_spill] sm:$0xff] %v6080_v46  ;;  %v777_v50 = vmax.f32 %v9941_v32, %v6099_v30  ;;  %v2098_v26 = vmax.f32 %v1197_v28, %v1636_v23  ;;  %v9945_v28 = vmax.f32 %v5421_v27, %v5437_v53  ;;  %v1001_v21 = vmax.f32 %v6026_v41, %v6050_v3 }
  0xd3   : > { %2970 = vst.msk [vmem:[%s4913_s18 + $0xa7] sm:$0x1] %vm2929_vm2, %v6074_v61  ;;  %v6119_v51 = vmax.f32 %v2099_v38, %v2336_v5  ;;  %v778_v11 = vmax.f32 %v9944_v16, %v6114_v56  ;;  %v1637_v52 = vrot.slane %v1199_v2, 1  ;;  %v1638_v23 = vrot.slane %v1200_v37, 1  ;;  %v6145_v38 = vld [vmem:[%s4655_s14 + $0x478] sm:$0xf] }
  0xd4   : > { %9940 = vst [vmem:[#allocation64_spill] sm:$0xff] %v6095_v43  ;;  %v779_v9 = vmax.f32 %v9945_v28, %v6117_v49  ;;  %v6131_v31 = vmax.f32 %v2098_v26, %v2337_v45  ;;  %v2338_v32 = vrot.slane %v1199_v2, 2  ;;  %v9948_v5 = vmax.f32 %v9947_v29, %v5752_v25 }
  0xd5   : > { %2969 = vst.msk [vmem:[%s4913_s18 + $0x9f] sm:$0xfe] %vm2927_vm3, %v6080_v46  ;;  %v2339_v53 = vrot.slane %v1200_v37, 2  ;;  %v1002_v41 = vmax.f32 %v6043_v17, %v776_v6  ;;  %v1639_v45 = vsel %vm1525_vm0, %v1637_v52, %v1638_v23  ;;  %v2101_v26 = vmax.f32 %v1200_v37, %v1638_v23 }
  0xd6   : > { %9942 = vst [vmem:[#allocation65_spill] sm:$0xff] %v6114_v56  ;;  %v6142_v27 = vmax.f32 %v9948_v5, %v6119_v51  ;;  %v9951_v16 = vmax.f32 %v5424_v33, %v5480_v36  ;;  %v1003_v29 = vmax.f32 %v6050_v3, %v777_v50  ;;  %v2100_v5 = vmax.f32 %v1199_v2, %v1639_v45  ;;  %v4577_v2 = vld [vmem:[%s4655_s14 + $0x300] sm:$0xff]  ;;  %v4579_v45 = vld [vmem:[%s4655_s14 + $0x310] sm:$0xff] }
  0xd7   : > { %9943 = vst [vmem:[#allocation56_spill] sm:$0xff] %v6117_v49  ;;  %v2340_v60 = vsel %vm2226_vm1, %v2338_v32, %v2339_v53  ;;  %v1004_v42 = vmax.f32 %v776_v6, %v778_v11  ;;  %v1201_v17 = vmax.f32 %v1001_v21, %v777_v50  ;;  %v6160_v52 = vmax.f32 %v2101_v26, %v2339_v53  ;;  %v4578_v53 = vld [vmem:[%s4655_s14 + $0x308] sm:$0xf]  ;;  %v4580_v26 = vld [vmem:[%s4655_s14 + $0x318] sm:$0xf]  ;;  %v4583_v50 = vld [vmem:[%s4655_s14 + $0x330] sm:$0xff] }
  0xd8   : > { %9946 = vst [vmem:[#allocation84_spill] sm:$0xff] %v6131_v31  ;;  %v780_v28 = vmax.f32 %v9951_v16, %v6145_v38  ;;  %v1202_v37 = vmax.f32 %v1002_v41, %v778_v11  ;;  %v6162_v23 = vmax.f32 %v1003_v29, %v779_v9  ;;  %v6164_v33 = vmax.f32 %v2100_v5, %v2340_v60 }
  0xd9   : > { %2972 = vst.msk [vmem:[%s4913_s18 + $0xaf] sm:$0x1] %vm2929_vm2, %v6119_v51  ;;  %v1640_v36 = vrot.slane %v1201_v17, 1  ;;  %v2341_v3 = vrot.slane %v1201_v17, 2  ;;  %v541_v6 = vmax.f32 %v4577_v2, %v5794_v35  ;;  %v9954_v11 = vmax.f32 %v5428_v12, %v5789_v1 }
  0xda   : > { %9949 = vst [vmem:[#allocation70_spill] sm:$0xff] %v6142_v27  ;;  %v1641_v60 = vrot.slane %v1202_v37, 1  ;;  %v2342_v21 = vrot.slane %v1202_v37, 2  ;;  %v6182_v32 = vmax.f32 %v1004_v42, %v780_v28  ;;  %v542_v41 = vmax.f32 %v4578_v53, %v5799_v14  ;;  %v4581_v28 = vld [vmem:[%s4655_s14 + $0x320] sm:$0xff]  ;;  %v6198_v27 = vld [vmem:[%s4655_s14 + $0x488] sm:$0xf] }
  0xdb   : > { %9950 = vst [vmem:[#allocation85_spill] sm:$0xff] %v6145_v38  ;;  %v6177_v9 = vmax.f32 %v9954_v11, %v6160_v52  ;;  %v543_v12 = vmax.f32 %v4579_v45, %v5802_v58  ;;  %v544_v16 = vmax.f32 %v4580_v26, %v5820_v15  ;;  %v545_v2 = vmax.f32 %v4581_v28, %v5828_v54  ;;  %v6195_v53 = vld [vmem:[%s4655_s14 + $0x480] sm:$0xff]  ;;  %v6201_v45 = vld [vmem:[%s4655_s14 + $0x490] sm:$0xff]  ;;  %v4582_v26 = vld [vmem:[%s4655_s14 + $0x328] sm:$0xf] }
  0xdc   : > { %2971 = vst.msk [vmem:[%s4913_s18 + $0xa7] sm:$0xfe] %vm2927_vm3, %v6131_v31  ;;  %v1642_v29 = vsel %vm1525_vm0, %v1640_v36, %v1641_v60  ;;  %v2343_v5 = vsel %vm2226_vm1, %v2341_v3, %v2342_v21  ;;  %v2103_v42 = vmax.f32 %v1202_v37, %v1641_v60  ;;  %v546_v36 = vmax.f32 %v4582_v26, %v5845_v62  ;;  %v4584_v37 = vld [vmem:[%s4655_s14 + $0x338] sm:$0xf] }
  0xdd   : > { %9952 = vst [vmem:[#allocation86_spill] sm:$0xff] %v6162_v23  ;;  %v2102_v11 = vmax.f32 %v1201_v17, %v1642_v29  ;;  %v547_v3 = vmax.f32 %v4583_v50, %v5848_v39  ;;  %v548_v60 = vmax.f32 %v4584_v37, %v5851_v59  ;;  %v6212_v17 = vld [vmem:[%s4655_s14 + $0x498] sm:$0xf]  ;;  %v6215_v29 = vld [vmem:[%s4655_s14 + $0x4a0] sm:$0xff]  ;;  %v781_v23 = vmax.f32 %v541_v6, %v6195_v53  ;;  %v6226_v37 = vld [vmem:[%s4655_s14 + $0x4b0] sm:$0xff] }
  0xde   : > { %9953 = vst [vmem:[#allocation87_spill] sm:$0xff] %v6164_v33  ;;  %v6209_v28 = vmax.f32 %v2103_v42, %v2342_v21  ;;  %v782_v26 = vmax.f32 %v542_v41, %v6198_v27  ;;  %v783_v50 = vmax.f32 %v543_v12, %v6201_v45  ;;  %v6229_v21 = vld [vmem:[%s4655_s14 + $0x4b8] sm:$0xf]  ;;  %v784_v42 = vmax.f32 %v544_v16, %v6212_v17 }
  0xdf   : > { %2974 = vst.msk [vmem:[%s4913_s18 + $0xb7] sm:$0x1] %vm2929_vm2, %v6160_v52  ;;  %v785_v43 = vmax.f32 %v545_v2, %v6215_v29  ;;  %v787_v6 = vmax.f32 %v547_v3, %v6226_v37  ;;  %v788_v41 = vmax.f32 %v548_v60, %v6229_v21  ;;  %v6252_v60 = vld [vmem:[%s4655_s14 + $0x4c8] sm:$0xf] }
  0xe0   : > { %9955 = vst [vmem:[#allocation88_spill] sm:$0xff] %v6177_v9  ;;  %v6223_v9 = vmax.f32 %v2102_v11, %v2343_v5  ;;  %v1005_v12 = vmax.f32 %v781_v23, %v783_v50  ;;  %v4585_v5 = vld [vmem:[%s4655_s14 + $0x340] sm:$0xff]  ;;  %v1006_v16 = vmax.f32 %v782_v26, %v784_v42 }
  0xe1   : > { %2973 = vst.msk [vmem:[%s4913_s18 + $0xaf] sm:$0xfe] %vm2927_vm3, %v6164_v33  ;;  %v549_v11 = vmax.f32 %v4585_v5, %v5872_v63  ;;  %v1007_v2 = vmax.f32 %v783_v50, %v785_v43  ;;  %v1009_v5 = vmax.f32 %v785_v43, %v787_v6 }
  0xe2   : > { %9956 = vst [vmem:[#allocation89_spill] sm:$0xff] %v6182_v32  ;;  %v6218_v32 = vld [vmem:[%s4655_s14 + $0x4a8] sm:$0xf]  ;;  %v6249_v3 = vmax.f32 %v1005_v12, %v785_v43  ;;  %v4587_v12 = vld [vmem:[%s4655_s14 + $0x350] sm:$0xff] }
  0xe3   : > { %9957 = vst [vmem:[#allocation90_spill] sm:$0xff] %v6209_v28  ;;  %v786_v13 = vmax.f32 %v546_v36, %v6218_v32  ;;  %v6245_v36 = vld [vmem:[%s4655_s14 + $0x4c0] sm:$0xff]  ;;  %v1207_v50 = vmax.f32 %v1007_v2, %v787_v6  ;;  %v6269_v2 = vld [vmem:[%s4655_s14 + $0x4d0] sm:$0xff] }
  0xe4   : > { %9958 = vst [vmem:[#allocation91_spill] sm:$0xff] %v6215_v29  ;;  %v6255_v23 = vmax.f32 %v549_v11, %v6245_v36 }
  0xe5   : > { %9959 = vst [vmem:[#allocation92_spill] sm:$0xff] %v6218_v32  ;;  %v1008_v44 = vmax.f32 %v784_v42, %v786_v13  ;;  %v6257_v26 = vmax.f32 %v1006_v16, %v786_v13  ;;  %v1649_v63 = vrot.slane %v1207_v50, 1 }
  0xe6   : > { %9960 = vst [vmem:[#allocation93_spill] sm:$0xff] %v6223_v9  ;;  %v1011_v43 = vmax.f32 %v787_v6, %v6255_v23 }
  0xe7   : > { %9961 = vst [vmem:[#allocation94_spill] sm:$0xff] %v6226_v37  ;;  %v1208_v42 = vmax.f32 %v1008_v44, %v788_v41 }
  0xe8   : > { %9962 = vst [vmem:[#allocation95_spill] sm:$0xff] %v6229_v21 }
  0xe9   : > { %2976 = vst.msk [vmem:[%s4913_s18 + $0xbf] sm:$0x1] %vm2929_vm2, %v6209_v28  ;;  %v550_v28 = vmax.f32 %v4586_v57, %v5875_v47  ;;  %v1209_v57 = vmax.f32 %v1009_v5, %v6255_v23  ;;  %v4588_v47 = vld [vmem:[%s4655_s14 + $0x358] sm:$0xf]  ;;  %v2351_v16 = vrot.slane %v1208_v42, 2 }
  0xea   : > { %2975 = vst.msk [vmem:[%s4913_s18 + $0xb7] sm:$0xfe] %vm2927_vm3, %v6223_v9  ;;  %v1010_v9 = vmax.f32 %v786_v13, %v788_v41  ;;  %v552_v11 = vmax.f32 %v4588_v47, %v5916_v48  ;;  %v2350_v13 = vrot.slane %v1207_v50, 2 }
  0xeb   : > { %9963 = vst [vmem:[#allocation96_spill] sm:$0xff] %v6245_v36  ;;  %v6260_v34 = vmax.f32 %v550_v28, %v6252_v60  ;;  %v1650_v36 = vrot.slane %v1208_v42, 1  ;;  %v1652_v28 = vrot.slane %v1209_v57, 1  ;;  %v2353_v5 = vrot.slane %v1209_v57, 2 }
  0xec   : > { %9964 = vst [vmem:[#allocation97_spill] sm:$0xff] %v6249_v3  ;;  %v551_v3 = vmax.f32 %v4587_v12, %v5899_v24  ;;  %v2352_v6 = vsel %vm2226_vm1, %v2350_v13, %v2351_v16  ;;  %v4590_v13 = vld [vmem:[%s4655_s14 + $0x368] sm:$0xf] }
  0xed   : > { %9965 = vst [vmem:[#allocation98_spill] sm:$0xff] %v6252_v60  ;;  %v1210_v44 = vmax.f32 %v1010_v9, %v6260_v34  ;;  %v1651_v47 = vsel %vm1525_vm0, %v1649_v63, %v1650_v36  ;;  %v2109_v48 = vmax.f32 %v1208_v42, %v1650_v36  ;;  %v1012_v21 = vmax.f32 %v788_v41, %v6260_v34 }
  0xee   : > { %9966 = vst [vmem:[#allocation99_spill] sm:$0xff] %v6257_v26  ;;  %v6273_v26 = vld [vmem:[%s4655_s14 + $0x4d8] sm:$0xf]  ;;  %v6276_v12 = vmax.f32 %v551_v3, %v6269_v2  ;;  %v2108_v60 = vmax.f32 %v1207_v50, %v1651_v47  ;;  %v554_v36 = vmax.f32 %v4590_v13, %v5943_v22  ;;  %v6302_v47 = vld [vmem:[%s4655_s14 + $0x4e0] sm:$0xff] }
  0xef   : > { %9967 = vst [vmem:[#allocation100_spill] sm:$0xff] %v6269_v2  ;;  %v6281_v24 = vmax.f32 %v552_v11, %v6273_v26  ;;  %v1653_v59 = vrot.slane %v1210_v44, 1  ;;  %v2354_v9 = vrot.slane %v1210_v44, 2  ;;  %v6284_v39 = vmax.f32 %v2109_v48, %v2351_v16  ;;  %v4589_v2 = vld [vmem:[%s4655_s14 + $0x360] sm:$0xff] }
  0xf0   : > { %9968 = vst [vmem:[#allocation101_spill] sm:$0xff] %v6273_v26  ;;  %v1211_v3 = vmax.f32 %v1011_v43, %v6276_v12  ;;  %v553_v63 = vmax.f32 %v4589_v2, %v5933_v8  ;;  %v6291_v42 = vmax.f32 %v2108_v60, %v2352_v6 }
  0xf1   : > { %9969 = vst [vmem:[#allocation102_spill] sm:$0xff] %v6284_v39  ;;  %v1654_v50 = vsel %vm1525_vm0, %v1652_v28, %v1653_v59  ;;  %v2355_v11 = vsel %vm2226_vm1, %v2353_v5, %v2354_v9  ;;  %v2111_v41 = vmax.f32 %v1210_v44, %v1653_v59  ;;  %v1212_v16 = vmax.f32 %v1012_v21, %v6281_v24  ;;  %v6312_v5 = vld [vmem:[%s4655_s14 + $0x4e8] sm:$0xf]  ;;  %v9977_v59 = vld [vmem:[#allocation12_spill] sm:$0xff] }
  0xf2   : > { %9970 = vst [vmem:[#allocation103_spill] sm:$0xff] %v6291_v42  ;;  %v2110_v43 = vmax.f32 %v1209_v57, %v1654_v50  ;;  %v1655_v2 = vrot.slane %v1211_v3, 1  ;;  %v2356_v28 = vrot.slane %v1211_v3, 2  ;;  %v6315_v6 = vmax.f32 %v553_v63, %v6302_v47 }
  0xf3   : > { %2978 = vst.msk [vmem:[%s4913_s18 + $0xc7] sm:$0x1] %vm2929_vm2, %v6284_v39  ;;  %v6309_v44 = vmax.f32 %v2111_v41, %v2354_v9  ;;  %v1656_v21 = vrot.slane %v1212_v16, 1  ;;  %v2357_v13 = vrot.slane %v1212_v16, 2  ;;  %v6320_v50 = vmax.f32 %v554_v36, %v6312_v5  ;;  %v9976_v9 = vld [vmem:[#allocation25_spill] sm:$0xff] }
  0xf4   : > { %9971 = vst [vmem:[#allocation104_spill] sm:$0xff] %v6302_v47  ;;  %v6317_v57 = vmax.f32 %v2110_v43, %v2355_v11  ;;  %v9978_v63 = vmax.f32 %v9977_v59, %v9976_v9  ;;  %v1013_v11 = vmax.f32 %v6255_v23, %v6276_v12  ;;  %v1014_v36 = vmax.f32 %v6260_v34, %v6281_v24  ;;  %v4591_v9 = vld [vmem:[%s4655_s14 + $0x370] sm:$0xff]  ;;  %v9981_v34 = vld [vmem:[#allocation35_spill] sm:$0xff]  ;;  %v4592_v43 = vld [vmem:[%s4655_s14 + $0x378] sm:$0xf] }
  0xf5   : > { %2977 = vst.msk [vmem:[%s4913_s18 + $0xbf] sm:$0xfe] %vm2927_vm3, %v6291_v42  ;;  %v1657_v41 = vsel %vm1525_vm0, %v1655_v2, %v1656_v21  ;;  %v2358_v18 = vsel %vm2226_vm1, %v2356_v28, %v2357_v13  ;;  %v2113_v59 = vmax.f32 %v1212_v16, %v1656_v21  ;;  %v9983_v42 = vld [vmem:[#allocation44_spill] sm:$0xff]  ;;  %v1015_v28 = vmax.f32 %v6276_v12, %v6315_v6 }
  0xf6   : > { %9973 = vst [vmem:[#allocation105_spill] sm:$0xff] %v6309_v44  ;;  %v6331_v48 = vmax.f32 %v9978_v63, %v6309_v44  ;;  %v2112_v63 = vmax.f32 %v1211_v3, %v1657_v41  ;;  %v1214_v23 = vmax.f32 %v1014_v36, %v6320_v50  ;;  %v556_v2 = vmax.f32 %v4592_v43, %v9983_v42  ;;  %v6359_v36 = vld [vmem:[%s4655_s14 + $0x4f0] sm:$0xff]  ;;  %v6389_v42 = vld [vmem:[%s4655_s14 + $0x500] sm:$0xff] }
  0xf7   : > { %9974 = vst [vmem:[#allocation106_spill] sm:$0xff] %v6312_v5  ;;  %v6348_v60 = vmax.f32 %v2113_v59, %v2357_v13  ;;  %v1016_v3 = vmax.f32 %v6281_v24, %v6320_v50  ;;  %v9986_v13 = vld [vmem:[#allocation32_spill] sm:$0xff]  ;;  %v6373_v24 = vld [vmem:[%s4655_s14 + $0x4f8] sm:$0xf] }
  0xf8   : > { %9975 = vst [vmem:[#allocation107_spill] sm:$0xff] %v6317_v57  ;;  %v6356_v16 = vmax.f32 %v2112_v63, %v2358_v18  ;;  %v1659_v41 = vrot.slane %v1214_v23, 1  ;;  %v9987_v43 = vld [vmem:[#allocation20_spill] sm:$0xff]  ;;  %v2360_v18 = vrot.slane %v1214_v23, 2 }
  0xf9   : > { %2980 = vst.msk [vmem:[%s4913_s18 + $0xcf] sm:$0x1] %vm2929_vm2, %v6309_v44  ;;  %v555_v44 = vmax.f32 %v4591_v9, %v9981_v34  ;;  %v9988_v12 = vmax.f32 %v9987_v43, %v9986_v13  ;;  %v796_v43 = vmax.f32 %v556_v2, %v6373_v24 }
  0xfa   : > { %9979 = vst [vmem:[#allocation12_spill] sm:$0xff] %v6331_v48  ;;  %v1213_v48 = vmax.f32 %v1013_v11, %v6315_v6  ;;  %v2115_v39 = vmax.f32 %v1214_v23, %v1659_v41 }
  0xfb   : > { %2979 = vst.msk [vmem:[%s4913_s18 + $0xc7] sm:$0xfe] %vm2927_vm3, %v6317_v57  ;;  %v6370_v59 = vmax.f32 %v9988_v12, %v6348_v60  ;;  %v795_v63 = vmax.f32 %v555_v44, %v6359_v36  ;;  %v1216_v34 = vmax.f32 %v1016_v3, %v796_v43  ;;  %v4594_v57 = vld [vmem:[%s4655_s14 + $0x388] sm:$0xf] }
  0xfc   : > { %9982 = vst [vmem:[#allocation108_spill] sm:$0xff] %v6348_v60  ;;  %v1658_v21 = vrot.slane %v1213_v48, 1  ;;  %v2359_v11 = vrot.slane %v1213_v48, 2  ;;  %v6386_v44 = vmax.f32 %v2115_v39, %v2360_v18  ;;  %v558_v23 = vmax.f32 %v4594_v57, %v6032_v0 }
  0xfd   : > { %9984 = vst [vmem:[#allocation109_spill] sm:$0xff] %v6356_v16  ;;  %v1215_v13 = vmax.f32 %v1015_v28, %v795_v63  ;;  %v1017_v2 = vmax.f32 %v6315_v6, %v795_v63  ;;  %v1662_v6 = vrot.slane %v1216_v34, 1  ;;  %v2363_v3 = vrot.slane %v1216_v34, 2 }
  0xfe   : > { %9985 = vst [vmem:[#allocation110_spill] sm:$0xff] %v6359_v36  ;;  %v1660_v9 = vsel %vm1525_vm0, %v1658_v21, %v1659_v41 }
  0xff   : > { %2982 = vst.msk [vmem:[%s4913_s18 + $0xd7] sm:$0x1] %vm2929_vm2, %v6348_v60  ;;  %v2114_v12 = vmax.f32 %v1213_v48, %v1660_v9  ;;  %v4593_v60 = vld [vmem:[%s4655_s14 + $0x380] sm:$0xff]  ;;  %v1661_v48 = vrot.slane %v1215_v13, 1  ;;  %v2362_v41 = vrot.slane %v1215_v13, 2  ;;  %v2117_v39 = vmax.f32 %v1216_v34, %v1662_v6 }
 0x100   : > { %9989 = vst [vmem:[#allocation20_spill] sm:$0xff] %v6370_v59  ;;  %v2361_v59 = vsel %vm2226_vm1, %v2359_v11, %v2360_v18  ;;  %v557_v33 = vmax.f32 %v4593_v60, %v6020_v55  ;;  %v9994_v60 = vmax.f32 %v5686_v7, %v6037_v19  ;;  %v6411_v11 = vld [vmem:[%s4655_s14 + $0x508] sm:$0xf]  ;;  %v1018_v18 = vmax.f32 %v6320_v50, %v796_v43 }
 0x101   : > { %9990 = vst [vmem:[#allocation111_spill] sm:$0xff] %v6373_v24  ;;  %v6394_v21 = vmax.f32 %v2114_v12, %v2361_v59  ;;  %v6419_v59 = vmax.f32 %v558_v23, %v6411_v11  ;;  %v1663_v12 = vsel %vm1525_vm0, %v1661_v48, %v1662_v6  ;;  %v6431_v50 = vmax.f32 %v2117_v39, %v2363_v3 }
 0x102   : > { %2981 = vst.msk [vmem:[%s4913_s18 + $0xcf] sm:$0xfe] %vm2927_vm3, %v6356_v16  ;;  %v6397_v28 = vmax.f32 %v557_v33, %v6389_v42  ;;  %v6408_v57 = vmax.f32 %v9994_v60, %v6386_v44  ;;  %v2364_v60 = vsel %vm2226_vm1, %v2362_v41, %v2363_v3  ;;  %v2116_v33 = vmax.f32 %v1215_v13, %v1663_v12 }
 0x103   : > { %9992 = vst [vmem:[#allocation112_spill] sm:$0xff] %v6386_v44  ;;  %v1218_v16 = vmax.f32 %v1018_v18, %v6419_v59  ;;  %v6442_v18 = vld [vmem:[%s4655_s14 + $0x518] sm:$0xf]  ;;  %v1020_v12 = vmax.f32 %v796_v43, %v6419_v59  ;;  %v10000_v3 = vmax.f32 %v5721_v10, %v6074_v61  ;;  %v4597_v61 = vld [vmem:[%s4655_s14 + $0x3a0] sm:$0xff] }
 0x104   : > { %9993 = vst [vmem:[#allocation113_spill] sm:$0xff] %v6394_v21  ;;  %v1217_v7 = vmax.f32 %v1017_v2, %v6397_v28  ;;  %v4596_v2 = vld [vmem:[%s4655_s14 + $0x398] sm:$0xf]  ;;  %v1019_v41 = vmax.f32 %v795_v63, %v6397_v28  ;;  %v561_v43 = vmax.f32 %v4597_v61, %v6099_v30 }
 0x105   : > { %2984 = vst.msk [vmem:[%s4913_s18 + $0xdf] sm:$0x1] %vm2929_vm2, %v6386_v44  ;;  %v6429_v44 = vld [vmem:[%s4655_s14 + $0x510] sm:$0xff]  ;;  %v560_v48 = vmax.f32 %v4596_v2, %v6069_v40  ;;  %v1665_v13 = vrot.slane %v1218_v16, 1  ;;  %v2366_v6 = vrot.slane %v1218_v16, 2  ;;  %v6454_v63 = vmax.f32 %v10000_v3, %v6431_v50 }
 0x106   : > { %9995 = vst [vmem:[#allocation114_spill] sm:$0xff] %v6408_v57  ;;  %v4595_v57 = vld [vmem:[%s4655_s14 + $0x390] sm:$0xff]  ;;  %v1664_v19 = vrot.slane %v1217_v7, 1  ;;  %v2365_v23 = vrot.slane %v1217_v7, 2 }
 0x107   : > { %9996 = vst [vmem:[#allocation115_spill] sm:$0xff] %v6411_v11  ;;  %v559_v9 = vmax.f32 %v4595_v57, %v6035_v20  ;;  %v6439_v57 = vmax.f32 %v2116_v33, %v2364_v60  ;;  %v800_v33 = vmax.f32 %v560_v48, %v6442_v18  ;;  %v2119_v10 = vmax.f32 %v1218_v16, %v1665_v13 }
 0x108   : > { %2983 = vst.msk [vmem:[%s4913_s18 + $0xd7] sm:$0xfe] %vm2927_vm3, %v6394_v21  ;;  %v1666_v60 = vsel %vm1525_vm0, %v1664_v19, %v1665_v13  ;;  %v2367_v2 = vsel %vm2226_vm1, %v2365_v23, %v2366_v6  ;;  %v562_v21 = vmax.f32 %v4598_v4, %v6114_v56  ;;  %v4599_v19 = vld [vmem:[%s4655_s14 + $0x3b0] sm:$0xff] }
 0x109   : > { %9998 = vst [vmem:[#allocation116_spill] sm:$0xff] %v6431_v50  ;;  %v6436_v34 = vmax.f32 %v559_v9, %v6429_v44  ;;  %v2118_v3 = vmax.f32 %v1217_v7, %v1666_v60  ;;  %v1220_v39 = vmax.f32 %v1020_v12, %v800_v33  ;;  %v563_v23 = vmax.f32 %v4599_v19, %v6117_v49  ;;  %v6476_v12 = vld [vmem:[%s4655_s14 + $0x520] sm:$0xff]  ;;  %v4600_v60 = vld [vmem:[%s4655_s14 + $0x3b8] sm:$0xf]  ;;  %v6504_v56 = vld [vmem:[%s4655_s14 + $0x530] sm:$0xff] }
 0x10a   : > { %9999 = vst [vmem:[#allocation117_spill] sm:$0xff] %v6439_v57  ;;  %v564_v61 = vmax.f32 %v4600_v60, %v6145_v38 }
 0x10b   : > { %2986 = vst.msk [vmem:[%s4913_s18 + $0xe7] sm:$0x1] %vm2929_vm2, %v6431_v50  ;;  %v1219_v9 = vmax.f32 %v1019_v41, %v6436_v34  ;;  %v6465_v41 = vmax.f32 %v2119_v10, %v2366_v6  ;;  %v6473_v16 = vmax.f32 %v2118_v3, %v2367_v2  ;;  %v1668_v7 = vrot.slane %v1220_v39, 1  ;;  %v6479_v6 = vld [vmem:[%s4655_s14 + $0x528] sm:$0xf] }
 0x10c   : > { %10001 = vst [vmem:[#allocation118_spill] sm:$0xff] %v6454_v63  ;;  %v2369_v13 = vrot.slane %v1220_v39, 2  ;;  %v10003_v2 = vmax.f32 %v5752_v25, %v6119_v51  ;;  %v801_v3 = vmax.f32 %v561_v43, %v6476_v12  ;;  %v802_v19 = vmax.f32 %v562_v21, %v6479_v6  ;;  %v6507_v25 = vld [vmem:[%s4655_s14 + $0x538] sm:$0xf] }
 0x10d   : > { %2985 = vst.msk [vmem:[%s4913_s18 + $0xdf] sm:$0xfe] %vm2927_vm3, %v6439_v57  ;;  %v1667_v48 = vrot.slane %v1219_v9, 1  ;;  %v2368_v63 = vrot.slane %v1219_v9, 2  ;;  %v2121_v38 = vmax.f32 %v1220_v39, %v1668_v7  ;;  %v803_v43 = vmax.f32 %v563_v23, %v6504_v56  ;;  %v6866_v57 = vld [vmem:[%s4655_s14 + $0x5f8] sm:$0xf] }
 0x10e   : > { %10002 = vst [vmem:[#allocation119_spill] sm:$0xff] %v6473_v16  ;;  %v6492_v10 = vmax.f32 %v10003_v2, %v6465_v41  ;;  %v804_v21 = vmax.f32 %v564_v61, %v6507_v25  ;;  %v1021_v49 = vmax.f32 %v6397_v28, %v6436_v34  ;;  %v1024_v39 = vmax.f32 %v800_v33, %v802_v19 }
 0x10f   : > { %2988 = vst.msk [vmem:[%s4913_s18 + $0xef] sm:$0x1] %vm2929_vm2, %v6465_v41  ;;  %v1669_v60 = vsel %vm1525_vm0, %v1667_v48, %v1668_v7  ;;  %v2370_v4 = vsel %vm2226_vm1, %v2368_v63, %v2369_v13  ;;  %v1022_v48 = vmax.f32 %v6419_v59, %v800_v33  ;;  %v1023_v63 = vmax.f32 %v6436_v34, %v801_v3  ;;  %v6561_v7 = vld [vmem:[%s4655_s14 + $0x548] sm:$0xf] }
 0x110   : > { %10004 = vst [vmem:[#allocation120_spill] sm:$0xff] %v6492_v10  ;;  %v2120_v2 = vmax.f32 %v1219_v9, %v1669_v60  ;;  %v6513_v10 = vmax.f32 %v2121_v38, %v2369_v13  ;;  %v1221_v9 = vmax.f32 %v1021_v49, %v801_v3  ;;  %v565_v23 = vmax.f32 %v5794_v35, %v6195_v53  ;;  %v6548_v60 = vld [vmem:[%s4655_s14 + $0x540] sm:$0xff]  ;;  %v6564_v38 = vld [vmem:[%s4655_s14 + $0x550] sm:$0xff] }
 0x111   : > { %2987 = vst.msk [vmem:[%s4913_s18 + $0xe7] sm:$0xfe] %vm2927_vm3, %v6473_v16  ;;  %v10007_v28 = vmax.f32 %v5789_v1, %v6160_v52  ;;  %v1222_v34 = vmax.f32 %v1022_v48, %v802_v19  ;;  %v6534_v33 = vmax.f32 %v1023_v63, %v803_v43  ;;  %v6539_v49 = vmax.f32 %v1024_v39, %v804_v21  ;;  %v10012_v48 = vld [vmem:[#allocation95_spill] sm:$0xff]  ;;  %v10013_v63 = vld [vmem:[#allocation45_spill] sm:$0xff] }
 0x112   : > { %10005 = vst [vmem:[#allocation121_spill] sm:$0xff] %v6507_v25  ;;  %v6519_v46 = vmax.f32 %v2120_v2, %v2370_v4  ;;  %v1670_v35 = vrot.slane %v1221_v9, 1  ;;  %v2371_v13 = vrot.slane %v1221_v9, 2  ;;  %v566_v61 = vmax.f32 %v5799_v14, %v6198_v27  ;;  %v10011_v14 = vld [vmem:[#allocation62_spill] sm:$0xff]  ;;  %v6919_v16 = vld [vmem:[%s4655_s14 + $0x608] sm:$0xf] }
 0x113   : > { %2990 = vst.msk [vmem:[%s4913_s18 + $0xf7] sm:$0x1] %vm2929_vm2, %v6513_v10  ;;  %v6532_v59 = vmax.f32 %v10007_v28, %v6513_v10  ;;  %v1671_v4 = vrot.slane %v1222_v34, 1  ;;  %v2372_v1 = vrot.slane %v1222_v34, 2  ;;  %v567_v3 = vmax.f32 %v5802_v58, %v6201_v45 }
 0x114   : > { %10006 = vst [vmem:[#allocation122_spill] sm:$0xff] %v6519_v46  ;;  %v568_v19 = vmax.f32 %v5820_v15, %v6212_v17  ;;  %v569_v2 = vmax.f32 %v5828_v54, %v6215_v29  ;;  %v570_v43 = vmax.f32 %v5845_v62, %v6218_v32  ;;  %v571_v21 = vmax.f32 %v10011_v14, %v6226_v37  ;;  %v6567_v54 = vld [vmem:[%s4655_s14 + $0x558] sm:$0xf]  ;;  %v6571_v14 = vld [vmem:[%s4655_s14 + $0x560] sm:$0xff]  ;;  %v10025_v29 = vld [vmem:[#allocation63_spill] sm:$0xff] }
 0x115   : > { %10008 = vst [vmem:[#allocation123_spill] sm:$0xff] %v6532_v59  ;;  %v572_v39 = vmax.f32 %v10013_v63, %v10012_v48  ;;  %v1672_v58 = vsel %vm1525_vm0, %v1670_v35, %v1671_v4  ;;  %v2373_v15 = vsel %vm2226_vm1, %v2371_v13, %v2372_v1  ;;  %v2123_v28 = vmax.f32 %v1222_v34, %v1671_v4  ;;  %v6577_v63 = vld [vmem:[%s4655_s14 + $0x570] sm:$0xff]  ;;  %v6585_v59 = vld [vmem:[%s4655_s14 + $0x578] sm:$0xf]  ;;  %v10024_v32 = vld [vmem:[#allocation98_spill] sm:$0xff] }
 0x116   : > { %10009 = vst [vmem:[#allocation124_spill] sm:$0xff] %v6534_v33  ;;  %v805_v62 = vmax.f32 %v565_v23, %v6548_v60  ;;  %v6574_v33 = vld [vmem:[%s4655_s14 + $0x568] sm:$0xf]  ;;  %v806_v35 = vmax.f32 %v566_v61, %v6561_v7  ;;  %v807_v34 = vmax.f32 %v567_v3, %v6564_v38  ;;  %v808_v13 = vmax.f32 %v568_v19, %v6567_v54  ;;  %v10023_v37 = vld [vmem:[#allocation61_spill] sm:$0xff] }
 0x117   : > { %2989 = vst.msk [vmem:[%s4913_s18 + $0xef] sm:$0xfe] %vm2927_vm3, %v6519_v46  ;;  %v6582_v4 = vmax.f32 %v2123_v28, %v2372_v1  ;;  %v810_v23 = vmax.f32 %v570_v43, %v6574_v33  ;;  %v812_v61 = vmax.f32 %v572_v39, %v6585_v59  ;;  %v10022_v28 = vld [vmem:[#allocation96_spill] sm:$0xff]  ;;  %v574_v43 = vmax.f32 %v10025_v29, %v10024_v32  ;;  %v6608_v39 = vld [vmem:[%s4655_s14 + $0x580] sm:$0xff] }
 0x118   : > { %10010 = vst [vmem:[#allocation125_spill] sm:$0xff] %v6539_v49  ;;  %v2122_v49 = vmax.f32 %v1221_v9, %v1672_v58  ;;  %v809_v9 = vmax.f32 %v569_v2, %v6571_v14  ;;  %v811_v58 = vmax.f32 %v571_v21, %v6577_v63  ;;  %v1025_v3 = vmax.f32 %v805_v62, %v807_v34 }
 0x119   : > { %10014 = vst [vmem:[#allocation62_spill] sm:$0xff] %v6564_v38  ;;  %v1026_v48 = vmax.f32 %v806_v35, %v808_v13  ;;  %v1028_v19 = vmax.f32 %v808_v13, %v810_v23  ;;  %v573_v2 = vmax.f32 %v10023_v37, %v10022_v28  ;;  %v1030_v35 = vmax.f32 %v810_v23, %v812_v61  ;;  %v6627_v28 = vld [vmem:[%s4655_s14 + $0x598] sm:$0xf] }
 0x11a   : > { %10015 = vst [vmem:[#allocation45_spill] sm:$0xff] %v6567_v54  ;;  %v6590_v31 = vmax.f32 %v2122_v49, %v2373_v15  ;;  %v1027_v1 = vmax.f32 %v807_v34, %v809_v9  ;;  %v6603_v49 = vmax.f32 %v1025_v3, %v809_v9  ;;  %v6611_v15 = vld [vmem:[%s4655_s14 + $0x588] sm:$0xf]  ;;  %v1029_v62 = vmax.f32 %v809_v9, %v811_v58 }
 0x11b   : > { %10016 = vst [vmem:[#allocation126_spill] sm:$0xff] %v6571_v14  ;;  %v6605_v21 = vmax.f32 %v1026_v48, %v810_v23  ;;  %v1228_v13 = vmax.f32 %v1028_v19, %v812_v61  ;;  %v813_v37 = vmax.f32 %v573_v2, %v6608_v39  ;;  %v814_v29 = vmax.f32 %v574_v43, %v6611_v15  ;;  %v10032_v3 = vld [vmem:[#allocation83_spill] sm:$0xff]  ;;  %v10033_v48 = vld [vmem:[#allocation22_spill] sm:$0xff] }
 0x11c   : > { %10017 = vst [vmem:[#allocation127_spill] sm:$0xff] %v6574_v33  ;;  %v1227_v34 = vmax.f32 %v1027_v1, %v811_v58  ;;  %v577_v32 = vmax.f32 %v5933_v8, %v6302_v47  ;;  %v578_v9 = vmax.f32 %v5943_v22, %v6312_v5 }
 0x11d   : > { %10018 = vst [vmem:[#allocation128_spill] sm:$0xff] %v6577_v63  ;;  %v1680_v1 = vrot.slane %v1228_v13, 1  ;;  %v2381_v2 = vrot.slane %v1228_v13, 2  ;;  %v1229_v43 = vmax.f32 %v1029_v62, %v813_v37  ;;  %v1031_v5 = vmax.f32 %v811_v58, %v813_v37 }
 0x11e   : > { %10019 = vst [vmem:[#allocation129_spill] sm:$0xff] %v6582_v4  ;;  %v1679_v23 = vrot.slane %v1227_v34, 1  ;;  %v2380_v19 = vrot.slane %v1227_v34, 2 }
 0x11f   : > { %10020 = vst [vmem:[#allocation130_spill] sm:$0xff] %v6585_v59  ;;  %v2129_v22 = vmax.f32 %v1228_v13, %v1680_v1  ;;  %v2383_v62 = vrot.slane %v1229_v43, 2 }
 0x120   : > { %10021 = vst [vmem:[#allocation131_spill] sm:$0xff] %v6590_v31  ;;  %v2382_v8 = vsel %vm2226_vm1, %v2380_v19, %v2381_v2 }
 0x121   : > { %2992 = vst.msk [vmem:[%s4913_s18 + $0xff] sm:$0x1] %vm2929_vm2, %v6582_v4  ;;  %v6616_v4 = vld [vmem:[%s4655_s14 + $0x590] sm:$0xff] }
 0x122   : > { %2991 = vst.msk [vmem:[%s4913_s18 + $0xf7] sm:$0xfe] %vm2927_vm3, %v6590_v31  ;;  %v10031_v31 = vld [vmem:[#allocation100_spill] sm:$0xff] }
 0x123   : > { %10026 = vst [vmem:[#allocation61_spill] sm:$0xff] %v6603_v49  ;;  %v575_v49 = vmax.f32 %v10032_v3, %v10031_v31 }
 0x124   : > { %10027 = vst [vmem:[#allocation63_spill] sm:$0xff] %v6605_v21  ;;  %v576_v21 = vmax.f32 %v10033_v48, %v6273_v26  ;;  %v1681_v48 = vsel %vm1525_vm0, %v1679_v23, %v1680_v1  ;;  %v1682_v26 = vrot.slane %v1229_v43, 1 }
 0x125   : > { %10028 = vst [vmem:[#allocation132_spill] sm:$0xff] %v6608_v39  ;;  %v6630_v39 = vmax.f32 %v575_v49, %v6616_v4  ;;  %v2128_v47 = vmax.f32 %v1227_v34, %v1681_v48  ;;  %v6646_v34 = vld [vmem:[%s4655_s14 + $0x5a0] sm:$0xff]  ;;  %v6664_v48 = vld [vmem:[%s4655_s14 + $0x5a8] sm:$0xf] }
 0x126   : > { %10029 = vst [vmem:[#allocation133_spill] sm:$0xff] %v6611_v15  ;;  %v1230_v15 = vmax.f32 %v1030_v35, %v814_v29  ;;  %v6633_v3 = vmax.f32 %v576_v21, %v6627_v28  ;;  %v6637_v35 = vmax.f32 %v2129_v22, %v2381_v2  ;;  %v6654_v19 = vmax.f32 %v577_v32, %v6646_v34  ;;  %v10042_v22 = vld [vmem:[#allocation105_spill] sm:$0xff] }
 0x127   : > { %10030 = vst [vmem:[#allocation134_spill] sm:$0xff] %v6616_v4  ;;  %v1032_v4 = vmax.f32 %v812_v61, %v814_v29  ;;  %v1231_v21 = vmax.f32 %v1031_v5, %v6630_v39  ;;  %v6642_v59 = vmax.f32 %v2128_v47, %v2382_v8  ;;  %v6669_v32 = vmax.f32 %v578_v9, %v6664_v48 }
 0x128   : > { %10034 = vst [vmem:[#allocation83_spill] sm:$0xff] %v6627_v28  ;;  %v1683_v31 = vrot.slane %v1230_v15, 1  ;;  %v2384_v49 = vrot.slane %v1230_v15, 2 }
 0x129   : > { %10035 = vst [vmem:[#allocation22_spill] sm:$0xff] %v6637_v35  ;;  %v1232_v5 = vmax.f32 %v1032_v4, %v6633_v3  ;;  %v2386_v2 = vrot.slane %v1231_v21, 2 }
 0x12a   : > { %10037 = vst [vmem:[#allocation135_spill] sm:$0xff] %v6642_v59  ;;  %v1684_v13 = vsel %vm1525_vm0, %v1682_v26, %v1683_v31  ;;  %v2131_v58 = vmax.f32 %v1230_v15, %v1683_v31  ;;  %v2385_v61 = vsel %vm2226_vm1, %v2383_v62, %v2384_v49  ;;  %v1685_v15 = vrot.slane %v1231_v21, 1  ;;  %v10049_v31 = vld [vmem:[#allocation44_spill] sm:$0xff] }
 0x12b   : > { %10038 = vst [vmem:[#allocation136_spill] sm:$0xff] %v6646_v34  ;;  %v2130_v1 = vmax.f32 %v1229_v43, %v1684_v13  ;;  %v1686_v8 = vrot.slane %v1232_v5, 1  ;;  %v2387_v4 = vrot.slane %v1232_v5, 2  ;;  %v580_v28 = vmax.f32 %v10049_v31, %v6373_v24  ;;  %v10052_v31 = vld [vmem:[#allocation32_spill] sm:$0xff] }
 0x12c   : > { %2994 = vst.msk [vmem:[%s4913_s18 + $0x107] sm:$0x1] %vm2929_vm2, %v6637_v35  ;;  %v6661_v47 = vmax.f32 %v2131_v58, %v2384_v49  ;;  %v10043_v49 = vld [vmem:[#allocation25_spill] sm:$0xff] }
 0x12d   : > { %2993 = vst.msk [vmem:[%s4913_s18 + $0xff] sm:$0xfe] %vm2927_vm3, %v6642_v59  ;;  %v6666_v43 = vmax.f32 %v2130_v1, %v2385_v61  ;;  %v10044_v13 = vmax.f32 %v10043_v49, %v10042_v22  ;;  %v1033_v1 = vmax.f32 %v813_v37, %v6630_v39  ;;  %v1034_v61 = vmax.f32 %v814_v29, %v6633_v3  ;;  %v10047_v29 = vld [vmem:[#allocation35_spill] sm:$0xff] }
 0x12e   : > { %10040 = vst [vmem:[#allocation137_spill] sm:$0xff] %v6664_v48  ;;  %v1687_v23 = vsel %vm1525_vm0, %v1685_v15, %v1686_v8  ;;  %v2388_v62 = vsel %vm2226_vm1, %v2386_v2, %v2387_v4  ;;  %v2133_v26 = vmax.f32 %v1232_v5, %v1686_v8  ;;  %v1035_v15 = vmax.f32 %v6630_v39, %v6654_v19 }
 0x12f   : > { %10041 = vst [vmem:[#allocation138_spill] sm:$0xff] %v6666_v43  ;;  %v6680_v58 = vmax.f32 %v10044_v13, %v6661_v47  ;;  %v2132_v49 = vmax.f32 %v1231_v21, %v1687_v23  ;;  %v1233_v13 = vmax.f32 %v1033_v1, %v6654_v19  ;;  %v1234_v37 = vmax.f32 %v1034_v61, %v6669_v32  ;;  %v6706_v1 = vld [vmem:[%s4655_s14 + $0x5b0] sm:$0xff] }
 0x130   : > { %2996 = vst.msk [vmem:[%s4913_s18 + $0x10f] sm:$0x1] %vm2929_vm2, %v6661_v47  ;;  %v6695_v9 = vmax.f32 %v2133_v26, %v2387_v4  ;;  %v1036_v21 = vmax.f32 %v6633_v3, %v6669_v32  ;;  %v10051_v26 = vld [vmem:[#allocation108_spill] sm:$0xff] }
 0x131   : > { %10045 = vst [vmem:[#allocation105_spill] sm:$0xff] %v6680_v58  ;;  %v579_v58 = vmax.f32 %v10047_v29, %v6359_v36  ;;  %v6703_v23 = vmax.f32 %v2132_v49, %v2388_v62  ;;  %v1688_v5 = vrot.slane %v1233_v13, 1  ;;  %v1689_v2 = vrot.slane %v1234_v37, 1  ;;  %v6720_v62 = vld [vmem:[%s4655_s14 + $0x5b8] sm:$0xf]  ;;  %v6736_v29 = vld [vmem:[%s4655_s14 + $0x5c0] sm:$0xff] }
 0x132   : > { %2995 = vst.msk [vmem:[%s4913_s18 + $0x107] sm:$0xfe] %vm2927_vm3, %v6666_v43  ;;  %v2389_v8 = vrot.slane %v1233_v13, 2  ;;  %v10053_v39 = vmax.f32 %v10052_v31, %v10051_v26  ;;  %v2390_v3 = vrot.slane %v1234_v37, 2  ;;  %v820_v31 = vmax.f32 %v580_v28, %v6720_v62 }
 0x133   : > { %10048 = vst [vmem:[#allocation25_spill] sm:$0xff] %v6695_v9  ;;  %v819_v49 = vmax.f32 %v579_v58, %v6706_v1  ;;  %v1690_v4 = vsel %vm1525_vm0, %v1688_v5, %v1689_v2  ;;  %v2135_v36 = vmax.f32 %v1234_v37, %v1689_v2  ;;  %v581_v58 = vmax.f32 %v6020_v55, %v6389_v42  ;;  %v10058_v55 = vld [vmem:[#allocation112_spill] sm:$0xff] }
 0x134   : > { %10050 = vst [vmem:[#allocation35_spill] sm:$0xff] %v6703_v23  ;;  %v6717_v61 = vmax.f32 %v10053_v39, %v6695_v9  ;;  %v2134_v26 = vmax.f32 %v1233_v13, %v1690_v4  ;;  %v2391_v39 = vsel %vm2226_vm1, %v2389_v8, %v2390_v3  ;;  %v1236_v24 = vmax.f32 %v1036_v21, %v820_v31  ;;  %v10059_v21 = vld [vmem:[#allocation37_spill] sm:$0xff]  ;;  %v6758_v4 = vld [vmem:[%s4655_s14 + $0x5c8] sm:$0xf] }
 0x135   : > { %2998 = vst.msk [vmem:[%s4913_s18 + $0x117] sm:$0x1] %vm2929_vm2, %v6695_v9  ;;  %v6733_v9 = vmax.f32 %v2135_v36, %v2390_v3  ;;  %v582_v5 = vmax.f32 %v6032_v0, %v6411_v11  ;;  %v1037_v37 = vmax.f32 %v6654_v19, %v819_v49  ;;  %v10060_v8 = vmax.f32 %v10059_v21, %v10058_v55  ;;  %v6776_v11 = vld [vmem:[%s4655_s14 + $0x5d0] sm:$0xff] }
 0x136   : > { %10054 = vst [vmem:[#allocation44_spill] sm:$0xff] %v6717_v61  ;;  %v1235_v61 = vmax.f32 %v1035_v15, %v819_v49  ;;  %v6741_v28 = vmax.f32 %v2134_v26, %v2391_v39  ;;  %v6744_v15 = vmax.f32 %v581_v58, %v6736_v29  ;;  %v1692_v19 = vrot.slane %v1236_v24, 1 }
 0x137   : > { %2997 = vst.msk [vmem:[%s4913_s18 + $0x10f] sm:$0xfe] %vm2927_vm3, %v6703_v23  ;;  %v6755_v0 = vmax.f32 %v10060_v8, %v6733_v9  ;;  %v2393_v26 = vrot.slane %v1236_v24, 2  ;;  %v6766_v58 = vmax.f32 %v582_v5, %v6758_v4  ;;  %v1038_v36 = vmax.f32 %v6669_v32, %v820_v31 }
 0x138   : > { %10056 = vst [vmem:[#allocation32_spill] sm:$0xff] %v6733_v9  ;;  %v1691_v13 = vrot.slane %v1235_v61, 1  ;;  %v2392_v2 = vrot.slane %v1235_v61, 2  ;;  %v1237_v21 = vmax.f32 %v1037_v37, %v6744_v15  ;;  %v2137_v55 = vmax.f32 %v1236_v24, %v1692_v19 }
 0x139   : > { %10057 = vst [vmem:[#allocation139_spill] sm:$0xff] %v6741_v28  ;;  %v583_v39 = vmax.f32 %v6035_v20, %v6429_v44  ;;  %v584_v37 = vmax.f32 %v6069_v40, %v6442_v18  ;;  %v1039_v24 = vmax.f32 %v819_v49, %v6744_v15  ;;  %v10065_v40 = vld [vmem:[#allocation52_spill] sm:$0xff] }
 0x13a   : > { %3000 = vst.msk [vmem:[%s4913_s18 + $0x11f] sm:$0x1] %vm2929_vm2, %v6733_v9  ;;  %v1693_v8 = vsel %vm1525_vm0, %v1691_v13, %v1692_v19  ;;  %v1238_v9 = vmax.f32 %v1038_v36, %v6766_v58  ;;  %v1694_v23 = vrot.slane %v1237_v21, 1  ;;  %v2395_v5 = vrot.slane %v1237_v21, 2  ;;  %v6789_v36 = vld [vmem:[%s4655_s14 + $0x5d8] sm:$0xf] }
 0x13b   : > { %10061 = vst [vmem:[#allocation37_spill] sm:$0xff] %v6755_v0  ;;  %v2394_v0 = vsel %vm2226_vm1, %v2392_v2, %v2393_v26  ;;  %v2136_v3 = vmax.f32 %v1235_v61, %v1693_v8  ;;  %v6778_v32 = vmax.f32 %v2137_v55, %v2393_v26  ;;  %v6783_v13 = vmax.f32 %v583_v39, %v6776_v11 }
 0x13c   : > { %2999 = vst.msk [vmem:[%s4913_s18 + $0x117] sm:$0xfe] %vm2927_vm3, %v6741_v28  ;;  %v1695_v20 = vrot.slane %v1238_v9, 1  ;;  %v2396_v61 = vrot.slane %v1238_v9, 2  ;;  %v1040_v19 = vmax.f32 %v820_v31, %v6766_v58  ;;  %v10066_v26 = vmax.f32 %v10065_v40, %v6431_v50 }
 0x13d   : > { %10063 = vst [vmem:[#allocation140_spill] sm:$0xff] %v6778_v32  ;;  %v6786_v2 = vmax.f32 %v2136_v3, %v2394_v0  ;;  %v6804_v49 = vmax.f32 %v584_v37, %v6789_v36  ;;  %v1239_v0 = vmax.f32 %v1039_v24, %v6783_v13  ;;  %v585_v31 = vmax.f32 %v6099_v30, %v6476_v12  ;;  %v10069_v3 = vld [vmem:[#allocation65_spill] sm:$0xff] }
 0x13e   : > { %3002 = vst.msk [vmem:[%s4913_s18 + $0x127] sm:$0x1] %vm2929_vm2, %v6778_v32  ;;  %v6801_v39 = vmax.f32 %v10066_v26, %v6778_v32  ;;  %v1696_v8 = vsel %vm1525_vm0, %v1694_v23, %v1695_v20  ;;  %v2397_v55 = vsel %vm2226_vm1, %v2395_v5, %v2396_v61  ;;  %v2139_v40 = vmax.f32 %v1238_v9, %v1695_v20  ;;  %v10070_v23 = vld [vmem:[#allocation56_spill] sm:$0xff]  ;;  %v6826_v20 = vld [vmem:[%s4655_s14 + $0x5e0] sm:$0xff] }
 0x13f   : > { %10064 = vst [vmem:[#allocation141_spill] sm:$0xff] %v6786_v2  ;;  %v2138_v26 = vmax.f32 %v1237_v21, %v1696_v8  ;;  %v1240_v37 = vmax.f32 %v1040_v19, %v6804_v49  ;;  %v2398_v50 = vrot.slane %v1239_v0, 2  ;;  %v586_v32 = vmax.f32 %v10069_v3, %v6479_v6  ;;  %v6829_v19 = vld [vmem:[%s4655_s14 + $0x5e8] sm:$0xf] }
 0x140   : > { %10067 = vst [vmem:[#allocation52_spill] sm:$0xff] %v6801_v39  ;;  %v1697_v39 = vrot.slane %v1239_v0, 1  ;;  %v6815_v24 = vmax.f32 %v2139_v40, %v2396_v61  ;;  %v587_v28 = vmax.f32 %v10070_v23, %v6504_v56  ;;  %v10072_v61 = vld [vmem:[#allocation85_spill] sm:$0xff]  ;;  %v825_v40 = vmax.f32 %v585_v31, %v6826_v20  ;;  %v10082_v31 = vld [vmem:[#allocation94_spill] sm:$0xff] }
 0x141   : > { %3001 = vst.msk [vmem:[%s4913_s18 + $0x11f] sm:$0xfe] %vm2927_vm3, %v6786_v2  ;;  %v6823_v5 = vmax.f32 %v2138_v26, %v2397_v55  ;;  %v1698_v9 = vrot.slane %v1240_v37, 1  ;;  %v2399_v21 = vrot.slane %v1240_v37, 2  ;;  %v588_v8 = vmax.f32 %v10072_v61, %v6507_v25 }
 0x142   : > { %3004 = vst.msk [vmem:[%s4913_s18 + $0x12f] sm:$0x1] %vm2929_vm2, %v6815_v24  ;;  %v10073_v55 = vmax.f32 %v6119_v51, %v6465_v41  ;;  %v6846_v26 = vmax.f32 %v586_v32, %v6829_v19  ;;  %v6856_v51 = vld [vmem:[%s4655_s14 + $0x5f0] sm:$0xff]  ;;  %v1041_v23 = vmax.f32 %v6744_v15, %v6783_v13  ;;  %v595_v15 = vmax.f32 %v10082_v31, %v6577_v63  ;;  %v6929_v31 = vld [vmem:[%s4655_s14 + $0x620] sm:$0xff]  ;;  %v6932_v63 = vld [vmem:[%s4655_s14 + $0x628] sm:$0xf] }
 0x143   : > { %10071 = vst [vmem:[#allocation65_spill] sm:$0xff] %v6823_v5  ;;  %v1699_v61 = vsel %vm1525_vm0, %v1697_v39, %v1698_v9  ;;  %v2400_v30 = vsel %vm2226_vm1, %v2398_v50, %v2399_v21  ;;  %v2141_v25 = vmax.f32 %v1240_v37, %v1698_v9  ;;  %v827_v32 = vmax.f32 %v587_v28, %v6856_v51  ;;  %v10083_v37 = vld [vmem:[#allocation130_spill] sm:$0xff] }
 0x144   : > { %v6842_v3 = vmax.f32 %v10073_v55, %v6815_v24  ;;  %3003 = vst.msk [vmem:[%s4913_s18 + $0x127] sm:$0xfe] %vm2927_vm3, %v6823_v5  ;;  %v2140_v55 = vmax.f32 %v1239_v0, %v1699_v61  ;;  %v1042_v50 = vmax.f32 %v6766_v58, %v6804_v49  ;;  %v1043_v39 = vmax.f32 %v6783_v13, %v825_v40 }
 0x145   : > { %v6876_v28 = vmax.f32 %v588_v8, %v6866_v57  ;;  %v1241_v0 = vmax.f32 %v1041_v23, %v825_v40  ;;  %v10077_v58 = vmax.f32 %v6160_v52, %v6513_v10  ;;  %v590_v8 = vmax.f32 %v6198_v27, %v6561_v7  ;;  %10087 = vst [vmem:[#allocation94_spill] sm:$0xff] %v6929_v31 }
 0x146   : > { %10074 = vst [vmem:[#allocation56_spill] sm:$0xff] %v6842_v3  ;;  %v6863_v3 = vmax.f32 %v2141_v25, %v2399_v21  ;;  %v6873_v9 = vmax.f32 %v2140_v55, %v2400_v30  ;;  %v589_v25 = vmax.f32 %v6195_v53, %v6548_v60  ;;  %v1242_v21 = vmax.f32 %v1042_v50, %v6846_v26  ;;  %v6906_v50 = vld [vmem:[%s4655_s14 + $0x600] sm:$0xff] }
 0x147   : > { %v6899_v30 = vmax.f32 %v1043_v39, %v827_v32  ;;  %v1700_v40 = vrot.slane %v1241_v0, 1  ;;  %v2401_v52 = vrot.slane %v1241_v0, 2  ;;  %v591_v55 = vmax.f32 %v6201_v45, %v6564_v38  ;;  %v10080_v32 = vld [vmem:[#allocation91_spill] sm:$0xff]  ;;  %v10096_v38 = vld [vmem:[#allocation98_spill] sm:$0xff] }
 0x148   : > { %10075 = vst [vmem:[#allocation85_spill] sm:$0xff] %v6863_v3  ;;  %v6889_v13 = vmax.f32 %v10077_v58, %v6863_v3  ;;  %v1701_v23 = vrot.slane %v1242_v21, 1  ;;  %v2402_v61 = vrot.slane %v1242_v21, 2  ;;  %v592_v27 = vmax.f32 %v6212_v17, %v6567_v54  ;;  %v10081_v58 = vld [vmem:[#allocation92_spill] sm:$0xff] }
 0x149   : > { %10076 = vst [vmem:[#allocation142_spill] sm:$0xff] %v6873_v9  ;;  %v593_v39 = vmax.f32 %v10080_v32, %v6571_v14  ;;  %v594_v53 = vmax.f32 %v10081_v58, %v6574_v33  ;;  %v6925_v32 = vld [vmem:[%s4655_s14 + $0x618] sm:$0xf]  ;;  %v829_v58 = vmax.f32 %v589_v25, %v6906_v50 }
 0x14a   : > { %3006 = vst.msk [vmem:[%s4913_s18 + $0x137] sm:$0x1] %vm2929_vm2, %v6863_v3  ;;  %v1702_v45 = vsel %vm1525_vm0, %v1700_v40, %v1701_v23  ;;  %v2403_v17 = vsel %vm2226_vm1, %v2401_v52, %v2402_v61  ;;  %v2143_v46 = vmax.f32 %v1242_v21, %v1701_v23  ;;  %v830_v40 = vmax.f32 %v590_v8, %v6919_v16 }
 0x14b   : > { %10078 = vst [vmem:[#allocation143_spill] sm:$0xff] %v6889_v13  ;;  %v2142_v33 = vmax.f32 %v1241_v0, %v1702_v45  ;;  %v832_v52 = vmax.f32 %v592_v27, %v6925_v32  ;;  %v833_v0 = vmax.f32 %v593_v39, %v6929_v31  ;;  %v834_v25 = vmax.f32 %v594_v53, %v6932_v63  ;;  %v10093_v27 = vld [vmem:[#allocation132_spill] sm:$0xff]  ;;  %v10095_v31 = vld [vmem:[#allocation133_spill] sm:$0xff] }
 0x14c   : > { %3005 = vst.msk [vmem:[%s4913_s18 + $0x12f] sm:$0xfe] %vm2927_vm3, %v6873_v9  ;;  %v6922_v9 = vld [vmem:[%s4655_s14 + $0x610] sm:$0xff]  ;;  %v6940_v23 = vmax.f32 %v2143_v46, %v2402_v61  ;;  %v598_v53 = vmax.f32 %v10096_v38, %v10095_v31 }
 0x14d   : > { %10079 = vst [vmem:[#allocation144_spill] sm:$0xff] %v6899_v30  ;;  %v10084_v30 = vld [vmem:[#allocation95_spill] sm:$0xff]  ;;  %v831_v21 = vmax.f32 %v591_v55, %v6922_v9  ;;  %v6948_v14 = vmax.f32 %v2142_v33, %v2403_v17  ;;  %v1046_v54 = vmax.f32 %v830_v40, %v832_v52  ;;  %v1048_v61 = vmax.f32 %v832_v52, %v834_v25 }
 0x14e   : > { %v596_v13 = vmax.f32 %v10084_v30, %v10083_v37  ;;  %10085 = vst [vmem:[#allocation91_spill] sm:$0xff] %v6922_v9  ;;  %v6935_v30 = vld [vmem:[%s4655_s14 + $0x630] sm:$0xff]  ;;  %v6943_v37 = vld [vmem:[%s4655_s14 + $0x638] sm:$0xf]  ;;  %v6969_v17 = vld [vmem:[%s4655_s14 + $0x648] sm:$0xf] }
 0x14f   : > { %10086 = vst [vmem:[#allocation92_spill] sm:$0xff] %v6925_v32  ;;  %v835_v45 = vmax.f32 %v595_v15, %v6935_v30  ;;  %v1045_v55 = vmax.f32 %v829_v58, %v831_v21  ;;  %v1047_v46 = vmax.f32 %v831_v21, %v833_v0  ;;  %v10094_v32 = vld [vmem:[#allocation96_spill] sm:$0xff]  ;;  %v6963_v15 = vmax.f32 %v1046_v54, %v834_v25  ;;  %v10104_v54 = vld [vmem:[#allocation83_spill] sm:$0xff] }
 0x150   : > { %10088 = vst [vmem:[#allocation95_spill] sm:$0xff] %v6932_v63  ;;  %v836_v8 = vmax.f32 %v596_v13, %v6943_v37  ;;  %v597_v39 = vmax.f32 %v10094_v32, %v10093_v27  ;;  %v6966_v13 = vld [vmem:[%s4655_s14 + $0x640] sm:$0xff]  ;;  %v838_v38 = vmax.f32 %v598_v53, %v6969_v17  ;;  %v10106_v27 = vld [vmem:[#allocation104_spill] sm:$0xff] }
 0x151   : > { %10089 = vst [vmem:[#allocation145_spill] sm:$0xff] %v6935_v30  ;;  %v6961_v33 = vmax.f32 %v1045_v55, %v833_v0  ;;  %v1049_v58 = vmax.f32 %v833_v0, %v835_v45  ;;  %v1247_v21 = vmax.f32 %v1047_v46, %v835_v45  ;;  %v10103_v55 = vld [vmem:[#allocation100_spill] sm:$0xff]  ;;  %v10107_v0 = vld [vmem:[#allocation106_spill] sm:$0xff] }
 0x152   : > { %10090 = vst [vmem:[#allocation146_spill] sm:$0xff] %v6940_v23  ;;  %v1050_v40 = vmax.f32 %v834_v25, %v836_v8  ;;  %v1248_v52 = vmax.f32 %v1048_v61, %v836_v8  ;;  %v837_v32 = vmax.f32 %v597_v39, %v6966_v13  ;;  %v602_v25 = vmax.f32 %v10107_v0, %v6664_v48 }
 0x153   : > { %10091 = vst [vmem:[#allocation147_spill] sm:$0xff] %v6943_v37  ;;  %v601_v37 = vmax.f32 %v10106_v27, %v6646_v34  ;;  %v1709_v46 = vrot.slane %v1247_v21, 1  ;;  %v2410_v30 = vrot.slane %v1247_v21, 2 }
 0x154   : > { %10092 = vst [vmem:[#allocation148_spill] sm:$0xff] %v6948_v14  ;;  %v1710_v61 = vrot.slane %v1248_v52, 1  ;;  %v2411_v39 = vrot.slane %v1248_v52, 2  ;;  %v1249_v53 = vmax.f32 %v1049_v58, %v837_v32  ;;  %v1051_v48 = vmax.f32 %v835_v45, %v837_v32 }
 0x155   : > { %3008 = vst.msk [vmem:[%s4913_s18 + $0x13f] sm:$0x1] %vm2929_vm2, %v6940_v23  ;;  %v6974_v23 = vld [vmem:[%s4655_s14 + $0x650] sm:$0xff] }
 0x156   : > { %3007 = vst.msk [vmem:[%s4913_s18 + $0x137] sm:$0xfe] %vm2927_vm3, %v6948_v14  ;;  %v10102_v14 = vld [vmem:[#allocation134_spill] sm:$0xff]  ;;  %v2412_v27 = vsel %vm2226_vm1, %v2410_v30, %v2411_v39  ;;  %v2149_v0 = vmax.f32 %v1248_v52, %v1710_v61  ;;  %v2413_v58 = vrot.slane %v1249_v53, 2 }
 0x157   : > { %10097 = vst [vmem:[#allocation96_spill] sm:$0xff] %v6961_v33  ;;  %v599_v33 = vmax.f32 %v10103_v55, %v10102_v14 }
 0x158   : > { %10098 = vst [vmem:[#allocation98_spill] sm:$0xff] %v6963_v15  ;;  %v10105_v15 = vld [vmem:[#allocation101_spill] sm:$0xff] }
 0x159   : > { %10099 = vst [vmem:[#allocation149_spill] sm:$0xff] %v6966_v13  ;;  %v600_v31 = vmax.f32 %v10105_v15, %v10104_v54  ;;  %v6985_v13 = vld [vmem:[%s4655_s14 + $0x658] sm:$0xf]  ;;  %v6988_v63 = vmax.f32 %v599_v33, %v6974_v23  ;;  %v1711_v15 = vsel %vm1525_vm0, %v1709_v46, %v1710_v61  ;;  %v1712_v54 = vrot.slane %v1249_v53, 1  ;;  %v7008_v61 = vld [vmem:[%s4655_s14 + $0x660] sm:$0xff] }
 0x15a   : > { %10100 = vst [vmem:[#allocation150_spill] sm:$0xff] %v6969_v17  ;;  %v1250_v17 = vmax.f32 %v1050_v40, %v838_v38  ;;  %v2148_v34 = vmax.f32 %v1247_v21, %v1711_v15  ;;  %v6995_v40 = vmax.f32 %v2149_v0, %v2411_v39  ;;  %v10109_v46 = vmax.f32 %v6804_v49, %v6846_v26 }
 0x15b   : > { %10101 = vst [vmem:[#allocation151_spill] sm:$0xff] %v6974_v23  ;;  %v6991_v55 = vmax.f32 %v600_v31, %v6985_v13  ;;  %v1052_v23 = vmax.f32 %v836_v8, %v838_v38  ;;  %v1251_v31 = vmax.f32 %v1051_v48, %v6988_v63  ;;  %v7016_v49 = vmax.f32 %v601_v37, %v7008_v61 }
 0x15c   : > { %v1713_v14 = vrot.slane %v1250_v17, 1  ;;  %10108 = vst [vmem:[#allocation100_spill] sm:$0xff] %v6995_v40  ;;  %v2414_v33 = vrot.slane %v1250_v17, 2  ;;  %v7002_v30 = vmax.f32 %v10109_v46, %v6876_v28  ;;  %v7004_v52 = vmax.f32 %v2148_v34, %v2412_v27 }
 0x15d   : > { %3010 = vst.msk [vmem:[%s4913_s18 + $0x147] sm:$0x1] %vm2929_vm2, %v6995_v40  ;;  %v1252_v39 = vmax.f32 %v1052_v23, %v6991_v55  ;;  %v1715_v26 = vrot.slane %v1251_v31, 1  ;;  %v2416_v28 = vrot.slane %v1251_v31, 2  ;;  %v1053_v0 = vmax.f32 %v837_v32, %v6988_v63  ;;  %v7138_v40 = vld [vmem:[%s4655_s14 + $0x690] sm:$0xff] }
 0x15e   : > { %10110 = vst [vmem:[#allocation101_spill] sm:$0xff] %v7002_v30  ;;  %v1714_v45 = vsel %vm1525_vm0, %v1712_v54, %v1713_v14  ;;  %v2151_v21 = vmax.f32 %v1250_v17, %v1713_v14  ;;  %v2415_v48 = vsel %vm2226_vm1, %v2413_v58, %v2414_v33  ;;  %v7026_v17 = vld [vmem:[%s4655_s14 + $0x668] sm:$0xf]  ;;  %v1054_v58 = vmax.f32 %v838_v38, %v6991_v55 }
 0x15f   : > { %10111 = vst [vmem:[#allocation104_spill] sm:$0xff] %v7004_v52  ;;  %v2150_v8 = vmax.f32 %v1249_v53, %v1714_v45  ;;  %v1716_v53 = vrot.slane %v1252_v39, 1  ;;  %v2417_v23 = vrot.slane %v1252_v39, 2  ;;  %v7031_v37 = vmax.f32 %v602_v25, %v7026_v17 }
 0x160   : > { %3009 = vst.msk [vmem:[%s4913_s18 + $0x13f] sm:$0xfe] %vm2927_vm3, %v7004_v52  ;;  %v7023_v34 = vmax.f32 %v2151_v21, %v2414_v33  ;;  %v10113_v25 = vmax.f32 %v10042_v22, %v6661_v47  ;;  %v1253_v32 = vmax.f32 %v1053_v0, %v7016_v49 }
 0x161   : > { %v7028_v54 = vmax.f32 %v2150_v8, %v2415_v48  ;;  %v1717_v46 = vsel %vm1525_vm0, %v1715_v26, %v1716_v53  ;;  %v2418_v45 = vsel %vm2226_vm1, %v2416_v28, %v2417_v23  ;;  %v2153_v21 = vmax.f32 %v1252_v39, %v1716_v53  ;;  %v10115_v48 = vld [vmem:[#allocation110_spill] sm:$0xff] }
 0x162   : > { %3012 = vst.msk [vmem:[%s4913_s18 + $0x14f] sm:$0x1] %vm2929_vm2, %v7023_v34  ;;  %v7049_v33 = vmax.f32 %v10113_v25, %v7023_v34  ;;  %v2152_v8 = vmax.f32 %v1251_v31, %v1717_v46  ;;  %v1254_v38 = vmax.f32 %v1054_v58, %v7031_v37  ;;  %v603_v14 = vmax.f32 %v10115_v48, %v6706_v1  ;;  %v10116_v25 = vld [vmem:[#allocation111_spill] sm:$0xff]  ;;  %v7068_v58 = vld [vmem:[%s4655_s14 + $0x670] sm:$0xff]  ;;  %v10118_v46 = vld [vmem:[#allocation25_spill] sm:$0xff] }
 0x163   : > { %10112 = vst [vmem:[#allocation106_spill] sm:$0xff] %v7028_v54  ;;  %v7057_v22 = vmax.f32 %v2153_v21, %v2417_v23  ;;  %v604_v15 = vmax.f32 %v10116_v25, %v6720_v62  ;;  %v1055_v26 = vmax.f32 %v6988_v63, %v7016_v49  ;;  %v1056_v31 = vmax.f32 %v6991_v55, %v7031_v37  ;;  %v7078_v48 = vld [vmem:[%s4655_s14 + $0x678] sm:$0xf] }
 0x164   : > { %3011 = vst.msk [vmem:[%s4913_s18 + $0x147] sm:$0xfe] %vm2927_vm3, %v7028_v54  ;;  %v7065_v39 = vmax.f32 %v2152_v8, %v2418_v45  ;;  %v1718_v28 = vrot.slane %v1253_v32, 1  ;;  %v1719_v53 = vrot.slane %v1254_v38, 1  ;;  %v2419_v0 = vrot.slane %v1253_v32, 2  ;;  %v10119_v45 = vld [vmem:[#allocation108_spill] sm:$0xff] }
 0x165   : > { %10114 = vst [vmem:[#allocation152_spill] sm:$0xff] %v7049_v33  ;;  %v2420_v21 = vrot.slane %v1254_v38, 2  ;;  %v843_v55 = vmax.f32 %v603_v14, %v7068_v58  ;;  %v10120_v8 = vmax.f32 %v10119_v45, %v10118_v46  ;;  %v844_v63 = vmax.f32 %v604_v15, %v7078_v48 }
 0x166   : > { %10117 = vst [vmem:[#allocation110_spill] sm:$0xff] %v7065_v39  ;;  %v1720_v23 = vsel %vm1525_vm0, %v1718_v28, %v1719_v53  ;;  %v2155_v27 = vmax.f32 %v1254_v38, %v1719_v53  ;;  %v605_v14 = vmax.f32 %v6389_v42, %v6736_v29  ;;  %v10123_v28 = vld [vmem:[#allocation115_spill] sm:$0xff]  ;;  %v607_v54 = vmax.f32 %v6429_v44, %v6776_v11 }
 0x167   : > { %3014 = vst.msk [vmem:[%s4913_s18 + $0x157] sm:$0x1] %vm2929_vm2, %v7057_v22  ;;  %v7088_v25 = vmax.f32 %v10120_v8, %v7057_v22  ;;  %v2154_v33 = vmax.f32 %v1253_v32, %v1720_v23  ;;  %v2421_v30 = vsel %vm2226_vm1, %v2419_v0, %v2420_v21  ;;  %v1255_v43 = vmax.f32 %v1055_v26, %v843_v55  ;;  %v7098_v8 = vld [vmem:[%s4655_s14 + $0x680] sm:$0xff] }
 0x168   : > { %3013 = vst.msk [vmem:[%s4913_s18 + $0x14f] sm:$0xfe] %vm2927_vm3, %v7065_v39  ;;  %v7095_v35 = vmax.f32 %v2155_v27, %v2420_v21  ;;  %v1256_v45 = vmax.f32 %v1056_v31, %v844_v63  ;;  %v606_v38 = vmax.f32 %v10123_v28, %v6758_v4  ;;  %v1057_v53 = vmax.f32 %v7016_v49, %v843_v55  ;;  %v10126_v27 = vld [vmem:[#allocation32_spill] sm:$0xff]  ;;  %v7116_v49 = vld [vmem:[%s4655_s14 + $0x688] sm:$0xf] }
 0x169   : > { %10121 = vst [vmem:[#allocation111_spill] sm:$0xff] %v7088_v25  ;;  %v7103_v15 = vmax.f32 %v2154_v33, %v2421_v30  ;;  %v1721_v32 = vrot.slane %v1255_v43, 1  ;;  %v2422_v0 = vrot.slane %v1255_v43, 2  ;;  %v7106_v26 = vmax.f32 %v605_v14, %v7098_v8  ;;  %v10127_v30 = vld [vmem:[#allocation112_spill] sm:$0xff] }
 0x16a   : > { %10122 = vst [vmem:[#allocation25_spill] sm:$0xff] %v7095_v35  ;;  %v1722_v21 = vrot.slane %v1256_v45, 1  ;;  %v2423_v28 = vrot.slane %v1256_v45, 2  ;;  %v10128_v33 = vmax.f32 %v10127_v30, %v10126_v27  ;;  %v7128_v23 = vmax.f32 %v606_v38, %v7116_v49 }
 0x16b   : > { %10124 = vst [vmem:[#allocation108_spill] sm:$0xff] %v7103_v15  ;;  %v1058_v25 = vmax.f32 %v7031_v37, %v844_v63  ;;  %v1257_v31 = vmax.f32 %v1057_v53, %v7106_v26  ;;  %v608_v53 = vmax.f32 %v6442_v18, %v6789_v36  ;;  %v10133_v18 = vld [vmem:[#allocation140_spill] sm:$0xff] }
 0x16c   : > { %3016 = vst.msk [vmem:[%s4913_s18 + $0x15f] sm:$0x1] %vm2929_vm2, %v7095_v35  ;;  %v7125_v14 = vmax.f32 %v10128_v33, %v7095_v35  ;;  %v1723_v42 = vsel %vm1525_vm0, %v1721_v32, %v1722_v21  ;;  %v2424_v59 = vsel %vm2226_vm1, %v2422_v0, %v2423_v28  ;;  %v2157_v39 = vmax.f32 %v1256_v45, %v1722_v21 }
 0x16d   : > { %3015 = vst.msk [vmem:[%s4913_s18 + $0x157] sm:$0xfe] %vm2927_vm3, %v7103_v15  ;;  %v2156_v30 = vmax.f32 %v1255_v43, %v1723_v42  ;;  %v1258_v33 = vmax.f32 %v1058_v25, %v7128_v23  ;;  %v2425_v38 = vrot.slane %v1257_v31, 2  ;;  %v847_v32 = vmax.f32 %v607_v54, %v7138_v40  ;;  %v7149_v42 = vld [vmem:[%s4655_s14 + $0x698] sm:$0xf] }
 0x16e   : > { %10129 = vst [vmem:[#allocation115_spill] sm:$0xff] %v7125_v14  ;;  %v1724_v14 = vrot.slane %v1257_v31, 1  ;;  %v7140_v37 = vmax.f32 %v2157_v39, %v2423_v28  ;;  %v1059_v45 = vmax.f32 %v843_v55, %v7106_v26  ;;  %v1060_v25 = vmax.f32 %v844_v63, %v7128_v23 }
 0x16f   : > { %v7146_v0 = vmax.f32 %v2156_v30, %v2424_v59  ;;  %v1725_v44 = vrot.slane %v1258_v33, 1  ;;  %v2426_v43 = vrot.slane %v1258_v33, 2  ;;  %v848_v54 = vmax.f32 %v608_v53, %v7149_v42  ;;  %v10134_v59 = vld [vmem:[#allocation116_spill] sm:$0xff] }
 0x170   : > { %10130 = vst [vmem:[#allocation32_spill] sm:$0xff] %v7140_v37  ;;  %v1259_v55 = vmax.f32 %v1059_v45, %v847_v32  ;;  %v10135_v28 = vmax.f32 %v10134_v59, %v10133_v18  ;;  %v609_v59 = vmax.f32 %v6476_v12, %v6826_v20 }
 0x171   : > { %10131 = vst [vmem:[#allocation112_spill] sm:$0xff] %v7146_v0  ;;  %v1726_v30 = vsel %vm1525_vm0, %v1724_v14, %v1725_v44  ;;  %v2427_v52 = vsel %vm2226_vm1, %v2425_v38, %v2426_v43  ;;  %v2159_v21 = vmax.f32 %v1258_v33, %v1725_v44  ;;  %v1260_v53 = vmax.f32 %v1060_v25, %v848_v54  ;;  %v7182_v38 = vld [vmem:[%s4655_s14 + $0x6a0] sm:$0xff]  ;;  %v7185_v44 = vld [vmem:[%s4655_s14 + $0x6a8] sm:$0xf] }
 0x172   : > { %3018 = vst.msk [vmem:[%s4913_s18 + $0x167] sm:$0x1] %vm2929_vm2, %v7140_v37  ;;  %v7167_v63 = vmax.f32 %v10135_v28, %v7140_v37  ;;  %v2158_v39 = vmax.f32 %v1257_v31, %v1726_v30  ;;  %v1727_v45 = vrot.slane %v1259_v55, 1  ;;  %v2428_v15 = vrot.slane %v1259_v55, 2 }
 0x173   : > { %3017 = vst.msk [vmem:[%s4913_s18 + $0x15f] sm:$0xfe] %vm2927_vm3, %v7146_v0  ;;  %v7171_v35 = vmax.f32 %v2159_v21, %v2426_v43  ;;  %v610_v28 = vmax.f32 %v6479_v6, %v6829_v19  ;;  %v611_v14 = vmax.f32 %v6504_v56, %v6856_v51  ;;  %v1728_v33 = vrot.slane %v1260_v53, 1  ;;  %v10139_v43 = vld [vmem:[#allocation121_spill] sm:$0xff]  ;;  %v7210_v56 = vld [vmem:[%s4655_s14 + $0x6b0] sm:$0xff] }
 0x174   : > { %10136 = vst [vmem:[#allocation140_spill] sm:$0xff] %v7167_v63  ;;  %v7179_v63 = vmax.f32 %v2158_v39, %v2427_v52  ;;  %v2429_v31 = vrot.slane %v1260_v53, 2  ;;  %v612_v25 = vmax.f32 %v10139_v43, %v6866_v57  ;;  %v849_v6 = vmax.f32 %v609_v59, %v7182_v38  ;;  %v7213_v59 = vld [vmem:[%s4655_s14 + $0x6b8] sm:$0xf] }
 0x175   : > { %10137 = vst [vmem:[#allocation116_spill] sm:$0xff] %v7171_v35  ;;  %v850_v52 = vmax.f32 %v610_v28, %v7185_v44  ;;  %v10140_v21 = vmax.f32 %v6465_v41, %v6815_v24  ;;  %v1729_v30 = vsel %vm1525_vm0, %v1727_v45, %v1728_v33  ;;  %v2161_v12 = vmax.f32 %v1260_v53, %v1728_v33  ;;  %v10155_v53 = vld [vmem:[#allocation145_spill] sm:$0xff] }
 0x176   : > { %10138 = vst [vmem:[#allocation153_spill] sm:$0xff] %v7179_v63  ;;  %v2430_v43 = vsel %vm2226_vm1, %v2428_v15, %v2429_v31  ;;  %v2160_v28 = vmax.f32 %v1259_v55, %v1729_v30  ;;  %v851_v2 = vmax.f32 %v611_v14, %v7210_v56  ;;  %v852_v0 = vmax.f32 %v612_v25, %v7213_v59  ;;  %v10150_v30 = vld [vmem:[#allocation45_spill] sm:$0xff] }
 0x177   : > { %3020 = vst.msk [vmem:[%s4913_s18 + $0x16f] sm:$0x1] %vm2929_vm2, %v7171_v35  ;;  %v7205_v39 = vmax.f32 %v10140_v21, %v7171_v35  ;;  %v1061_v41 = vmax.f32 %v7106_v26, %v847_v32  ;;  %v7218_v21 = vmax.f32 %v2161_v12, %v2429_v31  ;;  %v1062_v45 = vmax.f32 %v7128_v23, %v848_v54  ;;  %v10156_v26 = vld [vmem:[#allocation128_spill] sm:$0xff] }
 0x178   : > { %3019 = vst.msk [vmem:[%s4913_s18 + $0x167] sm:$0xfe] %vm2927_vm3, %v7179_v63  ;;  %v1064_v15 = vmax.f32 %v848_v54, %v850_v52  ;;  %v7223_v33 = vmax.f32 %v2160_v28, %v2430_v43  ;;  %v613_v55 = vmax.f32 %v6548_v60, %v6906_v50  ;;  %v10145_v54 = vmax.f32 %v6513_v10, %v6863_v3  ;;  %v7252_v10 = vld [vmem:[%s4655_s14 + $0x6c0] sm:$0xff]  ;;  %v7268_v3 = vld [vmem:[%s4655_s14 + $0x6d0] sm:$0xff] }
 0x179   : > { %10141 = vst [vmem:[#allocation121_spill] sm:$0xff] %v7205_v39  ;;  %v1063_v39 = vmax.f32 %v847_v32, %v849_v6  ;;  %v1261_v35 = vmax.f32 %v1061_v41, %v849_v6  ;;  %v1262_v14 = vmax.f32 %v1062_v45, %v850_v52  ;;  %v614_v32 = vmax.f32 %v6561_v7, %v6919_v16  ;;  %v10148_v7 = vld [vmem:[#allocation62_spill] sm:$0xff]  ;;  %v10153_v45 = vld [vmem:[#allocation95_spill] sm:$0xff] }
 0x17a   : > { %10142 = vst [vmem:[#allocation154_spill] sm:$0xff] %v7218_v21  ;;  %v7243_v60 = vmax.f32 %v10145_v54, %v7218_v21  ;;  %v7245_v31 = vmax.f32 %v1064_v15, %v852_v0  ;;  %v615_v52 = vmax.f32 %v10148_v7, %v6922_v9  ;;  %v10151_v28 = vld [vmem:[#allocation94_spill] sm:$0xff]  ;;  %v10154_v15 = vld [vmem:[#allocation127_spill] sm:$0xff]  ;;  %v10168_v9 = vld [vmem:[#allocation133_spill] sm:$0xff] }
 0x17b   : > { %10143 = vst [vmem:[#allocation155_spill] sm:$0xff] %v7223_v33  ;;  %v7232_v23 = vmax.f32 %v1063_v39, %v851_v2  ;;  %v1730_v25 = vrot.slane %v1261_v35, 1  ;;  %v2431_v2 = vrot.slane %v1261_v35, 2  ;;  %v1731_v12 = vrot.slane %v1262_v14, 1  ;;  %v10149_v39 = vld [vmem:[#allocation92_spill] sm:$0xff]  ;;  %v10152_v0 = vld [vmem:[#allocation126_spill] sm:$0xff] }
 0x17c   : > { %3022 = vst.msk [vmem:[%s4913_s18 + $0x177] sm:$0x1] %vm2929_vm2, %v7218_v21  ;;  %v2432_v6 = vrot.slane %v1262_v14, 2  ;;  %v616_v43 = vmax.f32 %v10150_v30, %v10149_v39  ;;  %v617_v41 = vmax.f32 %v10152_v0, %v10151_v28  ;;  %v618_v54 = vmax.f32 %v10154_v15, %v10153_v45  ;;  %v7265_v21 = vld [vmem:[%s4655_s14 + $0x6c8] sm:$0xf] }
 0x17d   : > { %10144 = vst [vmem:[#allocation156_spill] sm:$0xff] %v7232_v23  ;;  %v10157_v23 = vld [vmem:[#allocation147_spill] sm:$0xff]  ;;  %v1732_v7 = vsel %vm1525_vm0, %v1730_v25, %v1731_v12  ;;  %v2163_v63 = vmax.f32 %v1262_v14, %v1731_v12  ;;  %v7271_v0 = vld [vmem:[%s4655_s14 + $0x6d8] sm:$0xf]  ;;  %v853_v15 = vmax.f32 %v613_v55, %v7252_v10  ;;  %v854_v25 = vmax.f32 %v614_v32, %v7265_v21 }
 0x17e   : > { %3021 = vst.msk [vmem:[%s4913_s18 + $0x16f] sm:$0xfe] %vm2927_vm3, %v7223_v33  ;;  %v2433_v30 = vsel %vm2226_vm1, %v2431_v2, %v2432_v6  ;;  %v2162_v45 = vmax.f32 %v1261_v35, %v1732_v7  ;;  %v855_v14 = vmax.f32 %v615_v52, %v7268_v3  ;;  %v856_v2 = vmax.f32 %v616_v43, %v7271_v0  ;;  %v10165_v43 = vld [vmem:[#allocation149_spill] sm:$0xff] }
 0x17f   : > { %10146 = vst [vmem:[#allocation157_spill] sm:$0xff] %v7243_v60  ;;  %v10158_v60 = vld [vmem:[#allocation130_spill] sm:$0xff]  ;;  %v7286_v12 = vmax.f32 %v2163_v63, %v2432_v6 }
 0x180   : > { %10147 = vst [vmem:[#allocation158_spill] sm:$0xff] %v7245_v31  ;;  %v619_v31 = vmax.f32 %v10156_v26, %v10155_v53  ;;  %v620_v5 = vmax.f32 %v10158_v60, %v10157_v23  ;;  %v7275_v26 = vld [vmem:[%s4655_s14 + $0x6e0] sm:$0xff]  ;;  %v7278_v53 = vld [vmem:[%s4655_s14 + $0x6e8] sm:$0xf]  ;;  %v7281_v60 = vld [vmem:[%s4655_s14 + $0x6f0] sm:$0xff]  ;;  %v7294_v28 = vmax.f32 %v2162_v45, %v2433_v30  ;;  %v1065_v52 = vmax.f32 %v853_v15, %v855_v14 }
 0x181   : > { %10159 = vst [vmem:[#allocation62_spill] sm:$0xff] %v7271_v0  ;;  %v7289_v23 = vld [vmem:[%s4655_s14 + $0x6f8] sm:$0xf]  ;;  %v857_v35 = vmax.f32 %v617_v41, %v7275_v26  ;;  %v858_v55 = vmax.f32 %v618_v54, %v7278_v53  ;;  %v1066_v39 = vmax.f32 %v854_v25, %v856_v2  ;;  %v10166_v0 = vld [vmem:[#allocation132_spill] sm:$0xff]  ;;  %v7312_v45 = vld [vmem:[%s4655_s14 + $0x700] sm:$0xff] }
 0x182   : > { %10160 = vst [vmem:[#allocation45_spill] sm:$0xff] %v7275_v26  ;;  %v859_v7 = vmax.f32 %v619_v31, %v7281_v60  ;;  %v860_v32 = vmax.f32 %v620_v5, %v7289_v23  ;;  %v621_v41 = vmax.f32 %v10166_v0, %v10165_v43  ;;  %v10167_v26 = vld [vmem:[#allocation150_spill] sm:$0xff]  ;;  %v7315_v30 = vld [vmem:[%s4655_s14 + $0x708] sm:$0xf] }
 0x183   : > { %10161 = vst [vmem:[#allocation126_spill] sm:$0xff] %v7281_v60  ;;  %v1067_v63 = vmax.f32 %v855_v14, %v857_v35  ;;  %v1068_v6 = vmax.f32 %v856_v2, %v858_v55  ;;  %v622_v54 = vmax.f32 %v10168_v9, %v10167_v26  ;;  %v7307_v31 = vmax.f32 %v1065_v52, %v857_v35  ;;  %v7320_v26 = vld [vmem:[%s4655_s14 + $0x710] sm:$0xff]  ;;  %v10174_v43 = vld [vmem:[#allocation151_spill] sm:$0xff]  ;;  %v10175_v52 = vld [vmem:[#allocation134_spill] sm:$0xff] }
 0x184   : > { %10162 = vst [vmem:[#allocation127_spill] sm:$0xff] %v7286_v12  ;;  %v7309_v5 = vmax.f32 %v1066_v39, %v858_v55  ;;  %v1069_v15 = vmax.f32 %v857_v35, %v859_v7  ;;  %v1070_v25 = vmax.f32 %v858_v55, %v860_v32  ;;  %v861_v0 = vmax.f32 %v621_v41, %v7312_v45  ;;  %v10176_v39 = vld [vmem:[#allocation83_spill] sm:$0xff]  ;;  %v10178_v35 = vld [vmem:[#allocation137_spill] sm:$0xff] }
 0x185   : > { %10163 = vst [vmem:[#allocation128_spill] sm:$0xff] %v7289_v23  ;;  %v1267_v14 = vmax.f32 %v1067_v63, %v859_v7  ;;  %v1268_v2 = vmax.f32 %v1068_v6, %v860_v32  ;;  %v862_v9 = vmax.f32 %v622_v54, %v7315_v30  ;;  %v626_v55 = vmax.f32 %v10178_v35, %v7026_v17 }
 0x186   : > { %10164 = vst [vmem:[#allocation130_spill] sm:$0xff] %v7294_v28  ;;  %v1269_v54 = vmax.f32 %v1069_v15, %v861_v0 }
 0x187   : > { %3024 = vst.msk [vmem:[%s4913_s18 + $0x17f] sm:$0x1] %vm2929_vm2, %v7286_v12  ;;  %v623_v12 = vmax.f32 %v10175_v52, %v10174_v43  ;;  %v1739_v63 = vrot.slane %v1267_v14, 1  ;;  %v1740_v6 = vrot.slane %v1268_v2, 1  ;;  %v2440_v23 = vrot.slane %v1267_v14, 2 }
 0x188   : > { %3023 = vst.msk [vmem:[%s4913_s18 + $0x177] sm:$0xfe] %vm2927_vm3, %v7294_v28  ;;  %v624_v28 = vmax.f32 %v10176_v39, %v6985_v13  ;;  %v2441_v41 = vrot.slane %v1268_v2, 2  ;;  %v1071_v52 = vmax.f32 %v859_v7, %v861_v0  ;;  %v1742_v35 = vrot.slane %v1269_v54, 1 }
 0x189   : > { %10169 = vst [vmem:[#allocation149_spill] sm:$0xff] %v7307_v31  ;;  %v7334_v43 = vmax.f32 %v623_v12, %v7320_v26  ;;  %v2169_v17 = vmax.f32 %v1268_v2, %v1740_v6  ;;  %v2443_v15 = vrot.slane %v1269_v54, 2 }
 0x18a   : > { %10170 = vst [vmem:[#allocation132_spill] sm:$0xff] %v7309_v5  ;;  %v10177_v5 = vld [vmem:[#allocation136_spill] sm:$0xff]  ;;  %v10217_v33 = vld [vmem:[#allocation126_spill] sm:$0xff] }
 0x18b   : > { %10171 = vst [vmem:[#allocation150_spill] sm:$0xff] %v7312_v45  ;;  %v625_v31 = vmax.f32 %v10177_v5, %v7008_v61  ;;  %v7331_v45 = vld [vmem:[%s4655_s14 + $0x718] sm:$0xf]  ;;  %v1741_v61 = vsel %vm1525_vm0, %v1739_v63, %v1740_v6  ;;  %v2442_v5 = vsel %vm2226_vm1, %v2440_v23, %v2441_v41 }
 0x18c   : > { %10172 = vst [vmem:[#allocation133_spill] sm:$0xff] %v7315_v30  ;;  %v1270_v30 = vmax.f32 %v1070_v25, %v862_v9  ;;  %v7337_v13 = vmax.f32 %v624_v28, %v7331_v45  ;;  %v2168_v39 = vmax.f32 %v1267_v14, %v1741_v61  ;;  %v7341_v25 = vmax.f32 %v2169_v17, %v2441_v41  ;;  %v7359_v61 = vld [vmem:[%s4655_s14 + $0x728] sm:$0xf] }
 0x18d   : > { %10173 = vst [vmem:[#allocation159_spill] sm:$0xff] %v7320_v26  ;;  %v1072_v26 = vmax.f32 %v860_v32, %v862_v9  ;;  %v1271_v28 = vmax.f32 %v1071_v52, %v7334_v43 }
 0x18e   : > { %10179 = vst [vmem:[#allocation151_spill] sm:$0xff] %v7331_v45  ;;  %v1743_v60 = vrot.slane %v1270_v30, 1  ;;  %v2444_v12 = vrot.slane %v1270_v30, 2  ;;  %v7345_v45 = vld [vmem:[%s4655_s14 + $0x720] sm:$0xff]  ;;  %v7347_v63 = vmax.f32 %v2168_v39, %v2442_v5  ;;  %v1074_v52 = vmax.f32 %v862_v9, %v7337_v13  ;;  %v404_v39 = vld [vmem:[%s4655_s14 + $0x7b8] sm:$0xf] }
 0x18f   : > { %10180 = vst [vmem:[#allocation134_spill] sm:$0xff] %v7341_v25  ;;  %v7351_v7 = vmax.f32 %v625_v31, %v7345_v45  ;;  %v1272_v32 = vmax.f32 %v1072_v26, %v7337_v13  ;;  %v1745_v41 = vrot.slane %v1271_v28, 1  ;;  %v2446_v31 = vrot.slane %v1271_v28, 2 }
 0x190   : > { %10181 = vst [vmem:[#allocation83_spill] sm:$0xff] %v7347_v63  ;;  %v1744_v23 = vsel %vm1525_vm0, %v1742_v35, %v1743_v60  ;;  %v2171_v2 = vmax.f32 %v1270_v30, %v1743_v60  ;;  %v2445_v6 = vsel %vm2226_vm1, %v2443_v15, %v2444_v12  ;;  %v7367_v30 = vmax.f32 %v626_v55, %v7359_v61 }
 0x191   : > { %3026 = vst.msk [vmem:[%s4913_s18 + $0x187] sm:$0x1] %vm2929_vm2, %v7341_v25  ;;  %v2170_v14 = vmax.f32 %v1269_v54, %v1744_v23  ;;  %v1073_v54 = vmax.f32 %v861_v0, %v7334_v43  ;;  %v1746_v17 = vrot.slane %v1272_v32, 1  ;;  %v2447_v26 = vrot.slane %v1272_v32, 2 }
 0x192   : > { %3025 = vst.msk [vmem:[%s4913_s18 + $0x17f] sm:$0xfe] %vm2927_vm3, %v7347_v63  ;;  %v7364_v60 = vmax.f32 %v2171_v2, %v2444_v12  ;;  %v627_v55 = vmax.f32 %v6706_v1, %v7068_v58  ;;  %v628_v0 = vmax.f32 %v6720_v62, %v7078_v48  ;;  %v1274_v2 = vmax.f32 %v1074_v52, %v7367_v30  ;;  %v7393_v1 = vld [vmem:[%s4655_s14 + $0x738] sm:$0xf] }
 0x193   : > { %v7370_v5 = vmax.f32 %v2170_v14, %v2445_v6  ;;  %v1273_v15 = vmax.f32 %v1073_v54, %v7351_v7  ;;  %v1747_v12 = vsel %vm1525_vm0, %v1745_v41, %v1746_v17  ;;  %v2448_v9 = vsel %vm2226_vm1, %v2446_v31, %v2447_v26  ;;  %v7390_v14 = vld [vmem:[%s4655_s14 + $0x730] sm:$0xff] }
 0x194   : > { %3028 = vst.msk [vmem:[%s4913_s18 + $0x18f] sm:$0x1] %vm2929_vm2, %v7364_v60  ;;  %v2173_v23 = vmax.f32 %v1272_v32, %v1746_v17  ;;  %v2172_v6 = vmax.f32 %v1271_v28, %v1747_v12  ;;  %v7396_v62 = vmax.f32 %v627_v55, %v7390_v14  ;;  %v1749_v48 = vrot.slane %v1274_v2, 1 }
 0x195   : > { %10182 = vst [vmem:[#allocation136_spill] sm:$0xff] %v7370_v5  ;;  %v1748_v54 = vrot.slane %v1273_v15, 1  ;;  %v2449_v35 = vrot.slane %v1273_v15, 2  ;;  %v2450_v41 = vrot.slane %v1274_v2, 2  ;;  %v868_v32 = vmax.f32 %v628_v0, %v7393_v1 }
 0x196   : > { %3027 = vst.msk [vmem:[%s4913_s18 + $0x187] sm:$0xfe] %vm2927_vm3, %v7370_v5  ;;  %v7398_v58 = vmax.f32 %v2173_v23, %v2447_v26  ;;  %v7401_v31 = vmax.f32 %v2172_v6, %v2448_v9  ;;  %v1075_v28 = vmax.f32 %v7334_v43, %v7351_v7  ;;  %v1076_v17 = vmax.f32 %v7337_v13, %v7367_v30 }
 0x197   : > { %v629_v52 = vmax.f32 %v6736_v29, %v7098_v8  ;;  %v10185_v26 = vmax.f32 %v6661_v47, %v7023_v34  ;;  %v1750_v0 = vsel %vm1525_vm0, %v1748_v54, %v1749_v48  ;;  %v2451_v12 = vsel %vm2226_vm1, %v2449_v35, %v2450_v41  ;;  %v7425_v47 = vld [vmem:[%s4655_s14 + $0x740] sm:$0xff] }
 0x198   : > { %10184 = vst [vmem:[#allocation137_spill] sm:$0xff] %v7401_v31  ;;  %v2175_v43 = vmax.f32 %v1274_v2, %v1749_v48  ;;  %v2174_v29 = vmax.f32 %v1273_v15, %v1750_v0  ;;  %v1275_v8 = vmax.f32 %v1075_v28, %v7396_v62  ;;  %v1276_v13 = vmax.f32 %v1076_v17, %v868_v32  ;;  %v7440_v17 = vld [vmem:[%s4655_s14 + $0x748] sm:$0xf] }
 0x199   : > { %v7413_v55 = vmax.f32 %v10185_v26, %v7364_v60  ;;  %3030 = vst.msk [vmem:[%s4913_s18 + $0x197] sm:$0x1] %vm2929_vm2, %v7398_v58  ;;  %v630_v9 = vmax.f32 %v6758_v4, %v7116_v49  ;;  %v7432_v35 = vmax.f32 %v629_v52, %v7425_v47  ;;  %v1077_v2 = vmax.f32 %v7351_v7, %v7396_v62 }
 0x19a   : > { %3029 = vst.msk [vmem:[%s4913_s18 + $0x18f] sm:$0xfe] %vm2927_vm3, %v7401_v31  ;;  %v7429_v23 = vmax.f32 %v2175_v43, %v2450_v41  ;;  %v1078_v6 = vmax.f32 %v7367_v30, %v868_v32  ;;  %v7437_v15 = vmax.f32 %v2174_v29, %v2451_v12  ;;  %v1751_v54 = vrot.slane %v1275_v8, 1 }
 0x19b   : > { %10186 = vst [vmem:[#allocation160_spill] sm:$0xff] %v7413_v55  ;;  %v1752_v48 = vrot.slane %v1276_v13, 1  ;;  %v2452_v28 = vrot.slane %v1275_v8, 2  ;;  %v10188_v4 = vmax.f32 %v10118_v46, %v7057_v22  ;;  %v2453_v7 = vrot.slane %v1276_v13, 2  ;;  %v402_v55 = vld [vmem:[%s4655_s14 + $0x7a8] sm:$0xf] }
 0x19c   : > { %10187 = vst [vmem:[#allocation161_spill] sm:$0xff] %v7437_v15  ;;  %v7452_v30 = vmax.f32 %v630_v9, %v7440_v17  ;;  %v1277_v41 = vmax.f32 %v1077_v2, %v7432_v35  ;;  %v631_v46 = vmax.f32 %v6776_v11, %v7138_v40  ;;  %v632_v0 = vmax.f32 %v6789_v36, %v7149_v42  ;;  %v7466_v2 = vld [vmem:[%s4655_s14 + $0x750] sm:$0xff] }
 0x19d   : > { %v7446_v49 = vmax.f32 %v10188_v4, %v7398_v58  ;;  %3032 = vst.msk [vmem:[%s4913_s18 + $0x19f] sm:$0x1] %vm2929_vm2, %v7429_v23  ;;  %v1753_v52 = vsel %vm1525_vm0, %v1751_v54, %v1752_v48  ;;  %v2177_v26 = vmax.f32 %v1276_v13, %v1752_v48  ;;  %v2454_v43 = vsel %vm2226_vm1, %v2452_v28, %v2453_v7  ;;  %v10191_v54 = vld [vmem:[#allocation25_spill] sm:$0xff] }
 0x19e   : > { %3031 = vst.msk [vmem:[%s4913_s18 + $0x197] sm:$0xfe] %vm2927_vm3, %v7437_v15  ;;  %v2176_v12 = vmax.f32 %v1275_v8, %v1753_v52  ;;  %v1278_v29 = vmax.f32 %v1078_v6, %v7452_v30  ;;  %v1754_v9 = vrot.slane %v1277_v41, 1  ;;  %v10192_v13 = vmax.f32 %v10126_v27, %v10191_v54  ;;  %v7480_v28 = vld [vmem:[%s4655_s14 + $0x758] sm:$0xf] }
 0x19f   : > { %10189 = vst [vmem:[#allocation162_spill] sm:$0xff] %v7446_v49  ;;  %v7474_v11 = vmax.f32 %v2177_v26, %v2453_v7  ;;  %v2455_v40 = vrot.slane %v1277_v41, 2  ;;  %v871_v36 = vmax.f32 %v631_v46, %v7466_v2  ;;  %v1079_v4 = vmax.f32 %v7396_v62, %v7432_v35 }
 0x1a0   : > { %10190 = vst [vmem:[#allocation163_spill] sm:$0xff] %v7466_v2  ;;  %v7472_v48 = vmax.f32 %v10192_v13, %v7429_v23  ;;  %v7477_v42 = vmax.f32 %v2176_v12, %v2454_v43  ;;  %v1755_v8 = vrot.slane %v1278_v29, 1  ;;  %v2456_v6 = vrot.slane %v1278_v29, 2  ;;  %v7499_v13 = vld [vmem:[%s4655_s14 + $0x760] sm:$0xff] }
 0x1a1   : > { %10194 = vst [vmem:[#allocation164_spill] sm:$0xff] %v7474_v11  ;;  %v872_v27 = vmax.f32 %v632_v0, %v7480_v28  ;;  %v1080_v7 = vmax.f32 %v868_v32, %v7452_v30  ;;  %v633_v52 = vmax.f32 %v6826_v20, %v7182_v38  ;;  %v634_v26 = vmax.f32 %v6829_v19, %v7185_v44 }
 0x1a2   : > { %10193 = vst [vmem:[#allocation25_spill] sm:$0xff] %v7472_v48  ;;  %v1756_v46 = vsel %vm1525_vm0, %v1754_v9, %v1755_v8  ;;  %v2457_v62 = vsel %vm2226_vm1, %v2455_v40, %v2456_v6  ;;  %v2179_v12 = vmax.f32 %v1278_v29, %v1755_v8  ;;  %v1279_v0 = vmax.f32 %v1079_v4, %v871_v36  ;;  %v7508_v40 = vld [vmem:[%s4655_s14 + $0x768] sm:$0xf] }
 0x1a3   : > { %10195 = vst [vmem:[#allocation165_spill] sm:$0xff] %v7477_v42  ;;  %v2178_v43 = vmax.f32 %v1277_v41, %v1756_v46  ;;  %v1280_v32 = vmax.f32 %v1080_v7, %v872_v27  ;;  %v635_v20 = vmax.f32 %v6856_v51, %v7210_v56  ;;  %v636_v19 = vmax.f32 %v6866_v57, %v7213_v59  ;;  %v7514_v7 = vld [vmem:[%s4655_s14 + $0x770] sm:$0xff]  ;;  %v7517_v46 = vld [vmem:[%s4655_s14 + $0x778] sm:$0xf] }
 0x1a4   : > { %10196 = vst [vmem:[#allocation166_spill] sm:$0xff] %v7480_v28  ;;  %v7505_v38 = vmax.f32 %v2179_v12, %v2456_v6  ;;  %v1757_v44 = vrot.slane %v1279_v0, 1  ;;  %v2458_v9 = vrot.slane %v1279_v0, 2  ;;  %v873_v29 = vmax.f32 %v633_v52, %v7499_v13  ;;  %v427_v28 = vld [vmem:[%s4655_s14 + $0x870] sm:$0xff] }
 0x1a5   : > { %3034 = vst.msk [vmem:[%s4913_s18 + $0x1a7] sm:$0x1] %vm2929_vm2, %v7474_v11  ;;  %v7511_v41 = vmax.f32 %v2178_v43, %v2457_v62  ;;  %v1758_v8 = vrot.slane %v1280_v32, 1  ;;  %v2459_v4 = vrot.slane %v1280_v32, 2  ;;  %v874_v51 = vmax.f32 %v634_v26, %v7508_v40 }
 0x1a6   : > { %3033 = vst.msk [vmem:[%s4913_s18 + $0x19f] sm:$0xfe] %vm2927_vm3, %v7477_v42  ;;  %v10203_v57 = vmax.f32 %v10133_v18, %v7140_v37  ;;  %v875_v59 = vmax.f32 %v635_v20, %v7514_v7  ;;  %v876_v6 = vmax.f32 %v636_v19, %v7517_v46  ;;  %v1081_v52 = vmax.f32 %v7432_v35, %v871_v36  ;;  %v10205_v35 = vld [vmem:[#allocation116_spill] sm:$0xff] }
 0x1a7   : > { %10197 = vst [vmem:[#allocation167_spill] sm:$0xff] %v7499_v13  ;;  %v1759_v26 = vsel %vm1525_vm0, %v1757_v44, %v1758_v8  ;;  %v2460_v62 = vsel %vm2226_vm1, %v2458_v9, %v2459_v4  ;;  %v2181_v18 = vmax.f32 %v1280_v32, %v1758_v8  ;;  %v1082_v12 = vmax.f32 %v7452_v30, %v872_v27  ;;  %v398_v32 = vld [vmem:[%s4655_s14 + $0x788] sm:$0xf] }
 0x1a8   : > { %10198 = vst [vmem:[#allocation168_spill] sm:$0xff] %v7505_v38  ;;  %v7524_v56 = vmax.f32 %v10203_v57, %v7474_v11  ;;  %v2180_v43 = vmax.f32 %v1279_v0, %v1759_v26  ;;  %v1083_v57 = vmax.f32 %v871_v36, %v873_v29  ;;  %v1281_v20 = vmax.f32 %v1081_v52, %v873_v29  ;;  %v400_v52 = vld [vmem:[%s4655_s14 + $0x798] sm:$0xf]  ;;  %v401_v26 = vld [vmem:[%s4655_s14 + $0x7a0] sm:$0xff] }
 0x1a9   : > { %10199 = vst [vmem:[#allocation169_spill] sm:$0xff] %v7508_v40  ;;  %v10206_v19 = vmax.f32 %v6815_v24, %v10205_v35  ;;  %v7544_v44 = vmax.f32 %v2181_v18, %v2459_v4  ;;  %v1282_v9 = vmax.f32 %v1082_v12, %v874_v51  ;;  %v637_v30 = vmax.f32 %v6906_v50, %v7252_v10  ;;  %v10212_v18 = vld [vmem:[#allocation62_spill] sm:$0xff]  ;;  %v10213_v12 = vld [vmem:[#allocation92_spill] sm:$0xff] }
 0x1aa   : > { %10200 = vst [vmem:[#allocation170_spill] sm:$0xff] %v7511_v41  ;;  %v7548_v36 = vmax.f32 %v2180_v43, %v2460_v62  ;;  %v1760_v0 = vrot.slane %v1281_v20, 1  ;;  %v638_v24 = vmax.f32 %v6919_v16, %v7265_v21  ;;  %v2461_v4 = vrot.slane %v1281_v20, 2  ;;  %v10211_v16 = vld [vmem:[#allocation91_spill] sm:$0xff]  ;;  %v10215_v43 = vld [vmem:[#allocation94_spill] sm:$0xff] }
 0x1ab   : > { %10201 = vst [vmem:[#allocation171_spill] sm:$0xff] %v7514_v7  ;;  %v7542_v48 = vmax.f32 %v10206_v19, %v7505_v38  ;;  %v1761_v8 = vrot.slane %v1282_v9, 1  ;;  %v2462_v50 = vrot.slane %v1282_v9, 2  ;;  %v639_v62 = vmax.f32 %v10211_v16, %v7268_v3  ;;  %v10216_v19 = vld [vmem:[#allocation95_spill] sm:$0xff]  ;;  %v403_v16 = vld [vmem:[%s4655_s14 + $0x7b0] sm:$0xff] }
 0x1ac   : > { %10202 = vst [vmem:[#allocation172_spill] sm:$0xff] %v7517_v46  ;;  %v10219_v7 = vld [vmem:[#allocation128_spill] sm:$0xff] }
 0x1ad   : > { %10204 = vst [vmem:[#allocation173_spill] sm:$0xff] %v7524_v56  ;;  %v1084_v56 = vmax.f32 %v872_v27, %v874_v51  ;;  %v7550_v27 = vmax.f32 %v1083_v57, %v875_v59  ;;  %v397_v51 = vld [vmem:[%s4655_s14 + $0x780] sm:$0xff]  ;;  %v399_v59 = vld [vmem:[%s4655_s14 + $0x790] sm:$0xff]  ;;  %v2183_v49 = vmax.f32 %v1282_v9, %v1761_v8 }
 0x1ae   : > { %3036 = vst.msk [vmem:[%s4913_s18 + $0x1af] sm:$0x1] %vm2929_vm2, %v7505_v38  ;;  %v663_v13 = vmax.f32 %v7268_v3, %v399_v59  ;;  %v425_v3 = vld [vmem:[%s4655_s14 + $0x860] sm:$0xff]  ;;  %v877_v2 = vmax.f32 %v637_v30, %v397_v51  ;;  %v879_v35 = vmax.f32 %v639_v62, %v399_v59 }
 0x1af   : > { %3035 = vst.msk [vmem:[%s4913_s18 + $0x1a7] sm:$0xfe] %vm2927_vm3, %v7511_v41  ;;  %v7558_v29 = vmax.f32 %v1084_v56, %v876_v6  ;;  %v640_v56 = vmax.f32 %v10213_v12, %v10212_v18  ;;  %v10214_v6 = vld [vmem:[#allocation45_spill] sm:$0xff]  ;;  %v7586_v9 = vmax.f32 %v2183_v49, %v2462_v50  ;;  %v426_v41 = vld [vmem:[%s4655_s14 + $0x868] sm:$0xf]  ;;  %v667_v49 = vmax.f32 %v10217_v33, %v403_v16 }
 0x1b0   : > { %10207 = vst [vmem:[#allocation174_spill] sm:$0xff] %v7542_v48  ;;  %v641_v57 = vmax.f32 %v10215_v43, %v10214_v6  ;;  %v2463_v48 = vsel %vm2226_vm1, %v2461_v4, %v2462_v50  ;;  %v10218_v12 = vld [vmem:[#allocation145_spill] sm:$0xff]  ;;  %v10220_v43 = vld [vmem:[#allocation147_spill] sm:$0xff]  ;;  %v668_v50 = vmax.f32 %v10219_v7, %v404_v39  ;;  %v1085_v59 = vmax.f32 %v877_v2, %v879_v35 }
 0x1b1   : > { %10208 = vst [vmem:[#allocation175_spill] sm:$0xff] %v7548_v36  ;;  %v644_v40 = vmax.f32 %v10220_v43, %v10219_v7  ;;  %v422_v4 = vld [vmem:[%s4655_s14 + $0x848] sm:$0xf]  ;;  %v423_v43 = vld [vmem:[%s4655_s14 + $0x850] sm:$0xff] }
 0x1b2   : > { %10209 = vst [vmem:[#allocation176_spill] sm:$0xff] %v7550_v27  ;;  %v1762_v27 = vsel %vm1525_vm0, %v1760_v0, %v1761_v8  ;;  %v662_v0 = vmax.f32 %v7265_v21, %v398_v32  ;;  %v421_v8 = vld [vmem:[%s4655_s14 + $0x840] sm:$0xff]  ;;  %v666_v21 = vmax.f32 %v7278_v53, %v402_v55  ;;  %v903_v37 = vmax.f32 %v663_v13, %v423_v43 }
 0x1b3   : > { %3038 = vst.msk [vmem:[%s4913_s18 + $0x1b7] sm:$0x1] %vm2929_vm2, %v7544_v44  ;;  %v2182_v46 = vmax.f32 %v1281_v20, %v1762_v27  ;;  %v665_v20 = vmax.f32 %v10214_v6, %v401_v26  ;;  %v878_v6 = vmax.f32 %v638_v24, %v398_v32  ;;  %v7616_v7 = vmax.f32 %v644_v40, %v404_v39 }
 0x1b4   : > { %10210 = vst [vmem:[#allocation177_spill] sm:$0xff] %v7558_v29  ;;  %v642_v29 = vmax.f32 %v10216_v19, %v7278_v53  ;;  %v661_v19 = vmax.f32 %v7252_v10, %v397_v51  ;;  %v424_v10 = vld [vmem:[%s4655_s14 + $0x858] sm:$0xf]  ;;  %v7622_v32 = vmax.f32 %v666_v21, %v426_v41  ;;  %v7624_v24 = vmax.f32 %v667_v49, %v427_v28 }
 0x1b5   : > { %3037 = vst.msk [vmem:[%s4913_s18 + $0x1af] sm:$0xfe] %vm2927_vm3, %v7548_v36  ;;  %v643_v36 = vmax.f32 %v10218_v12, %v10217_v33  ;;  %v664_v12 = vmax.f32 %v10212_v18, %v400_v52  ;;  %v7593_v27 = vmax.f32 %v2182_v46, %v2463_v48  ;;  %v428_v18 = vld [vmem:[%s4655_s14 + $0x878] sm:$0xf]  ;;  %v880_v48 = vmax.f32 %v640_v56, %v400_v52  ;;  %v10225_v56 = vld [vmem:[#allocation98_spill] sm:$0xff] }
 0x1b6   : > { %10221 = vst [vmem:[#allocation91_spill] sm:$0xff] %v7586_v9  ;;  %v7610_v46 = vmax.f32 %v641_v57, %v401_v26  ;;  %v7612_v53 = vmax.f32 %v642_v29, %v402_v55  ;;  %v901_v38 = vmax.f32 %v661_v19, %v421_v8  ;;  %v7620_v30 = vmax.f32 %v665_v20, %v425_v3 }
 0x1b7   : > { %10222 = vst [vmem:[#allocation62_spill] sm:$0xff] %v7593_v27  ;;  %v7614_v33 = vmax.f32 %v643_v36, %v403_v16  ;;  %v904_v11 = vmax.f32 %v664_v12, %v424_v10  ;;  %v7626_v51 = vmax.f32 %v668_v50, %v428_v18  ;;  %v1086_v55 = vmax.f32 %v878_v6, %v880_v48  ;;  %v10226_v16 = vld [vmem:[#allocation149_spill] sm:$0xff] }
 0x1b8   : > { %3040 = vst.msk [vmem:[%s4913_s18 + $0x1bf] sm:$0x1] %vm2929_vm2, %v7586_v9  ;;  %v7618_v9 = vmax.f32 %v662_v0, %v422_v4  ;;  %v1087_v36 = vmax.f32 %v879_v35, %v7610_v46  ;;  %v1088_v39 = vmax.f32 %v880_v48, %v7612_v53  ;;  %v1105_v40 = vmax.f32 %v901_v38, %v903_v37  ;;  %v10227_v0 = vld [vmem:[#allocation132_spill] sm:$0xff] }
 0x1b9   : > { %3039 = vst.msk [vmem:[%s4913_s18 + $0x1b7] sm:$0xfe] %vm2927_vm3, %v7593_v27  ;;  %v1107_v13 = vmax.f32 %v903_v37, %v7620_v30  ;;  %v1108_v52 = vmax.f32 %v904_v11, %v7622_v32  ;;  %v1285_v41 = vmax.f32 %v1085_v59, %v7610_v46  ;;  %v7635_v28 = vmax.f32 %v1086_v55, %v7612_v53  ;;  %v10224_v37 = vld [vmem:[#allocation96_spill] sm:$0xff] }
 0x1ba   : > { %v1106_v29 = vmax.f32 %v7618_v9, %v904_v11  ;;  %v1287_v26 = vmax.f32 %v1087_v36, %v7614_v33  ;;  %v7639_v2 = vmax.f32 %v1088_v39, %v7616_v7  ;;  %v7642_v35 = vmax.f32 %v1105_v40, %v7620_v30 }
 0x1bb   : > { %v1307_v38 = vmax.f32 %v1107_v13, %v7624_v24  ;;  %v7646_v62 = vmax.f32 %v1108_v52, %v7626_v51  ;;  %v1706_v11 = vrot.slane %v10224_v37, 1  ;;  %v1707_v57 = vrot.slane %v10225_v56, 1 }
 0x1bc   : > { %10223 = vst [vmem:[#allocation92_spill] sm:$0xff] %v7642_v35  ;;  %v1736_v19 = vrot.slane %v10226_v16, 1  ;;  %v1737_v9 = vrot.slane %v10227_v0, 1  ;;  %v1766_v8 = vrot.slane %v1285_v41, 1  ;;  %v1767_v4 = vrot.slane %v7635_v28, 1 }
 0x1bd   : > { %v1769_v12 = vrot.slane %v1287_v26, 1  ;;  %v1770_v20 = vrot.slane %v7639_v2, 1  ;;  %v1799_v43 = vrot.slane %v1307_v38, 1  ;;  %v1708_v10 = vsel %vm1525_vm0, %v1706_v11, %v1707_v57 }
 0x1be   : > { %v1738_v21 = vsel %vm1525_vm0, %v1736_v19, %v1737_v9  ;;  %v1800_v49 = vrot.slane %v7646_v62, 1  ;;  %v2407_v50 = vrot.slane %v10224_v37, 2  ;;  %v1768_v3 = vsel %vm1525_vm0, %v1766_v8, %v1767_v4 }
 0x1bf   : > { %v1771_v18 = vsel %vm1525_vm0, %v1769_v12, %v1770_v20  ;;  %v2146_v6 = vmax.f32 %v10224_v37, %v1708_v10  ;;  %v2166_v48 = vmax.f32 %v10226_v16, %v1738_v21  ;;  %v2186_v55 = vmax.f32 %v1285_v41, %v1768_v3 }
 0x1c0   : > { %v1801_v59 = vsel %vm1525_vm0, %v1799_v43, %v1800_v49  ;;  %v2188_v36 = vmax.f32 %v1287_v26, %v1771_v18  ;;  %v2408_v39 = vrot.slane %v10225_v56, 2  ;;  %v2437_v13 = vrot.slane %v10226_v16, 2 }
 0x1c1   : > { %v2208_v40 = vmax.f32 %v1307_v38, %v1801_v59  ;;  %v2438_v52 = vrot.slane %v10227_v0, 2  ;;  %v2467_v11 = vrot.slane %v1285_v41, 2  ;;  %v2468_v8 = vrot.slane %v7635_v28, 2 }
 0x1c2   : > { %v2409_v19 = vsel %vm2226_vm1, %v2407_v50, %v2408_v39  ;;  %v2470_v12 = vrot.slane %v1287_v26, 2  ;;  %v2471_v37 = vrot.slane %v7639_v2, 2  ;;  %v2500_v43 = vrot.slane %v1307_v38, 2  ;;  %v10230_v50 = vld [vmem:[#allocation104_spill] sm:$0xff] }
 0x1c3   : > { %v2439_v10 = vsel %vm2226_vm1, %v2437_v13, %v2438_v52  ;;  %v2501_v21 = vrot.slane %v7646_v62, 2  ;;  %v7671_v3 = vmax.f32 %v2146_v6, %v2409_v19  ;;  %v2469_v16 = vsel %vm2226_vm1, %v2467_v11, %v2468_v8 }
 0x1c4   : > { %v2472_v18 = vsel %vm2226_vm1, %v2470_v12, %v2471_v37  ;;  %v7675_v41 = vmax.f32 %v2166_v48, %v2439_v10  ;;  %v3179_v59 = vmax.f32 %v10230_v50, %v7347_v63  ;;  %v7680_v35 = vmax.f32 %v2186_v55, %v2469_v16  ;;  %v10238_v16 = vld [vmem:[#allocation100_spill] sm:$0xff] }
 0x1c5   : > { %10228 = vst [vmem:[#allocation45_spill] sm:$0xff] %v7671_v3  ;;  %v2502_v26 = vsel %vm2226_vm1, %v2500_v43, %v2501_v21  ;;  %v2889_v13 = vmax.f32 %v2188_v36, %v2472_v18  ;;  %v7683_v38 = vmax.f32 %v1106_v29, %v7622_v32  ;;  %v2147_v11 = vmax.f32 %v10225_v56, %v1707_v57  ;;  %v406_v43 = vld [vmem:[%s4655_s14 + $0x7c8] sm:$0xf]  ;;  %v4601_v18 = vld [vmem:[%s4655_s14 + $0x640] sm:$0xff] }
 0x1c6   : > { %10229 = vst [vmem:[#allocation94_spill] sm:$0xff] %v7675_v41  ;;  %v2909_v27 = vmax.f32 %v2208_v40, %v2502_v26  ;;  %v3177_v6 = vmax.f32 %v7671_v3, %v7675_v41  ;;  %v2167_v48 = vmax.f32 %v10227_v0, %v1737_v9  ;;  %v2187_v29 = vmax.f32 %v7635_v28, %v1767_v4  ;;  %v405_v4 = vld [vmem:[%s4655_s14 + $0x7c0] sm:$0xff] }
 0x1c7   : > { %10231 = vst [vmem:[#allocation95_spill] sm:$0xff] %v7680_v35  ;;  %v3199_v19 = vmax.f32 %v7347_v63, %v2889_v13  ;;  %v7692_v12 = vmax.f32 %v3179_v59, %v2889_v13  ;;  %v9598_v55 = vrot.slane %v7683_v38, 1  ;;  %v2189_v40 = vmax.f32 %v7639_v2, %v1770_v20  ;;  %v10239_v59 = vld [vmem:[#allocation150_spill] sm:$0xff] }
 0x1c8   : > { %10232 = vst [vmem:[#allocation126_spill] sm:$0xff] %v7683_v38  ;;  %v7697_v36 = vmax.f32 %v3177_v6, %v7680_v35  ;;  %v2209_v56 = vmax.f32 %v7646_v62, %v1800_v49  ;;  %v9597_v57 = vrot.slane %v7683_v38, 2  ;;  %v7707_v10 = vmax.f32 %v2147_v11, %v2408_v39  ;;  %v10240_v6 = vld [vmem:[#allocation133_spill] sm:$0xff] }
 0x1c9   : > { %3041 = vst.msk [vmem:[%s4913_s18 + $0x1bf] sm:$0xfe] %vm2927_vm3, %v2889_v13  ;;  %v7702_v0 = vmax.f32 %v3199_v19, %v2909_v27  ;;  %v2207_v9 = vmax.f32 %v7683_v38, %v9598_v55  ;;  %v7709_v28 = vmax.f32 %v2167_v48, %v2438_v52  ;;  %v2888_v62 = vmax.f32 %v2187_v29, %v2468_v8  ;;  %v4602_v13 = vld [vmem:[%s4655_s14 + $0x648] sm:$0xf]  ;;  %v10241_v19 = vld [vmem:[#allocation85_spill] sm:$0xff]  ;;  %v10242_v29 = vld [vmem:[#allocation154_spill] sm:$0xff] }
 0x1ca   : > { %10233 = vst [vmem:[#allocation145_spill] sm:$0xff] %v7692_v12  ;;  %v2890_v20 = vmax.f32 %v2189_v40, %v2471_v37  ;;  %v2910_v49 = vmax.f32 %v2209_v56, %v2501_v21  ;;  %v3180_v52 = vmax.f32 %v10238_v16, %v7341_v25  ;;  %v645_v26 = vmax.f32 %v4601_v18, %v10239_v59  ;;  %v429_v21 = vld [vmem:[%s4655_s14 + $0x880] sm:$0xff] }
 0x1cb   : > { %10234 = vst [vmem:[#allocation128_spill] sm:$0xff] %v7697_v36  ;;  %v2908_v27 = vmax.f32 %v2207_v9, %v9597_v57  ;;  %v3178_v39 = vmax.f32 %v7707_v10, %v7709_v28  ;;  %v3198_v8 = vmax.f32 %v7709_v28, %v2888_v62  ;;  %v646_v11 = vmax.f32 %v4602_v13, %v10240_v6  ;;  %v430_v57 = vld [vmem:[%s4655_s14 + $0x888] sm:$0xf] }
 0x1cc   : > { %10235 = vst [vmem:[#allocation147_spill] sm:$0xff] %v7702_v0  ;;  %v3200_v37 = vmax.f32 %v7341_v25, %v2890_v20  ;;  %v669_v48 = vmax.f32 %v10239_v59, %v405_v4  ;;  %v10243_v40 = vmax.f32 %v10241_v19, %v10242_v29  ;;  %v7739_v18 = vmax.f32 %v3180_v52, %v2890_v20 }
 0x1cd   : > { %10236 = vst [vmem:[#allocation96_spill] sm:$0xff] %v7707_v10  ;;  %v7737_v9 = vmax.f32 %v3178_v39, %v2888_v62  ;;  %v670_v55 = vmax.f32 %v10240_v6, %v406_v43  ;;  %v7743_v2 = vmax.f32 %v3198_v8, %v2908_v27  ;;  %v7747_v13 = vmax.f32 %v645_v26, %v405_v4  ;;  %v407_v39 = vld [vmem:[%s4655_s14 + $0x7d0] sm:$0xff] }
 0x1ce   : > { %10237 = vst [vmem:[#allocation98_spill] sm:$0xff] %v7709_v28  ;;  %v7735_v56 = vmax.f32 %v10243_v40, %v7544_v44  ;;  %v7745_v0 = vmax.f32 %v3200_v37, %v2910_v49  ;;  %v7749_v59 = vmax.f32 %v646_v11, %v406_v43  ;;  %v7753_v62 = vmax.f32 %v669_v48, %v429_v21  ;;  %v10249_v37 = vld [vmem:[#allocation159_spill] sm:$0xff] }
 0x1cf   : > { %3042 = vst.msk [vmem:[%s4913_s18 + $0x1c7] sm:$0x1] %vm2929_vm2, %v2890_v20  ;;  %v1089_v20 = vmax.f32 %v7610_v46, %v7614_v33  ;;  %v1090_v27 = vmax.f32 %v7612_v53, %v7616_v7  ;;  %v7762_v49 = vmax.f32 %v670_v55, %v430_v57  ;;  %v1109_v43 = vmax.f32 %v7620_v30, %v7624_v24  ;;  %v4603_v53 = vld [vmem:[%s4655_s14 + $0x650] sm:$0xff]  ;;  %v408_v57 = vld [vmem:[%s4655_s14 + $0x7d8] sm:$0xf]  ;;  %v10250_v11 = vld [vmem:[#allocation151_spill] sm:$0xff] }
 0x1d0   : > { %10244 = vst [vmem:[#allocation149_spill] sm:$0xff] %v7735_v56  ;;  %v1110_v52 = vmax.f32 %v7622_v32, %v7626_v51  ;;  %v3182_v46 = vmax.f32 %v7023_v34, %v7364_v60  ;;  %v647_v21 = vmax.f32 %v4603_v53, %v10249_v37  ;;  %v4604_v30 = vld [vmem:[%s4655_s14 + $0x658] sm:$0xf]  ;;  %v671_v32 = vmax.f32 %v10249_v37, %v407_v39  ;;  %v10251_v56 = vld [vmem:[#allocation106_spill] sm:$0xff] }
 0x1d1   : > { %10245 = vst [vmem:[#allocation132_spill] sm:$0xff] %v7737_v9  ;;  %v1289_v26 = vmax.f32 %v1089_v20, %v7747_v13  ;;  %v1290_v8 = vmax.f32 %v1090_v27, %v7749_v59  ;;  %v1309_v6 = vmax.f32 %v1109_v43, %v7753_v62  ;;  %v648_v48 = vmax.f32 %v4604_v30, %v10250_v11 }
 0x1d2   : > { %10246 = vst [vmem:[#allocation104_spill] sm:$0xff] %v7739_v18  ;;  %v1310_v55 = vmax.f32 %v1110_v52, %v7762_v49  ;;  %v672_v30 = vmax.f32 %v10250_v11, %v408_v57  ;;  %v3181_v28 = vmax.f32 %v10251_v56, %v7370_v5  ;;  %v7789_v25 = vmax.f32 %v647_v21, %v407_v39 }
 0x1d3   : > { %10247 = vst [vmem:[#allocation100_spill] sm:$0xff] %v7743_v2  ;;  %v1772_v40 = vrot.slane %v1289_v26, 1  ;;  %v1773_v20 = vrot.slane %v1290_v8, 1  ;;  %v2473_v27 = vrot.slane %v1289_v26, 2  ;;  %v2474_v4 = vrot.slane %v1290_v8, 2  ;;  %v431_v2 = vld [vmem:[%s4655_s14 + $0x890] sm:$0xff] }
 0x1d4   : > { %10248 = vst [vmem:[#allocation150_spill] sm:$0xff] %v7745_v0  ;;  %v1802_v19 = vrot.slane %v1309_v6, 1  ;;  %v1803_v34 = vrot.slane %v1310_v55, 1  ;;  %v2503_v38 = vrot.slane %v1309_v6, 2  ;;  %v2504_v53 = vrot.slane %v1310_v55, 2 }
 0x1d5   : > { %v1774_v43 = vsel %vm1525_vm0, %v1772_v40, %v1773_v20  ;;  %v2475_v52 = vsel %vm2226_vm1, %v2473_v27, %v2474_v4  ;;  %v2191_v0 = vmax.f32 %v1290_v8, %v1773_v20  ;;  %v432_v40 = vld [vmem:[%s4655_s14 + $0x898] sm:$0xf]  ;;  %v7791_v27 = vmax.f32 %v648_v48, %v408_v57 }
 0x1d6   : > { %v1804_v37 = vsel %vm1525_vm0, %v1802_v19, %v1803_v34  ;;  %v2190_v35 = vmax.f32 %v1289_v26, %v1774_v43  ;;  %v2505_v9 = vsel %vm2226_vm1, %v2503_v38, %v2504_v53  ;;  %v2211_v12 = vmax.f32 %v1310_v55, %v1803_v34  ;;  %v409_v55 = vld [vmem:[%s4655_s14 + $0x7e0] sm:$0xff]  ;;  %v410_v43 = vld [vmem:[%s4655_s14 + $0x7e8] sm:$0xf] }
 0x1d7   : > { %v2210_v36 = vmax.f32 %v1309_v6, %v1804_v37  ;;  %v2892_v41 = vmax.f32 %v2191_v0, %v2474_v4  ;;  %v7793_v11 = vmax.f32 %v671_v32, %v431_v2  ;;  %v1091_v6 = vmax.f32 %v7614_v33, %v7747_v13  ;;  %v4606_v37 = vld [vmem:[%s4655_s14 + $0x668] sm:$0xf] }
 0x1d8   : > { %v2891_v8 = vmax.f32 %v2190_v35, %v2475_v52  ;;  %v2912_v20 = vmax.f32 %v2211_v12, %v2504_v53  ;;  %v7805_v35 = vmax.f32 %v672_v30, %v432_v40  ;;  %v1092_v12 = vmax.f32 %v7616_v7, %v7749_v59  ;;  %v4605_v52 = vld [vmem:[%s4655_s14 + $0x660] sm:$0xff] }
 0x1d9   : > { %v2911_v19 = vmax.f32 %v2210_v36, %v2505_v9  ;;  %3044 = vst.msk [vmem:[%s4913_s18 + $0x1cf] sm:$0x1] %vm2929_vm2, %v2892_v41  ;;  %v3202_v38 = vmax.f32 %v7364_v60, %v2892_v41  ;;  %v7798_v26 = vmax.f32 %v3182_v46, %v2892_v41  ;;  %v1111_v36 = vmax.f32 %v7624_v24, %v7753_v62 }
 0x1da   : > { %3043 = vst.msk [vmem:[%s4913_s18 + $0x1c7] sm:$0xfe] %vm2927_vm3, %v2891_v8  ;;  %v3201_v0 = vmax.f32 %v7370_v5, %v2891_v8  ;;  %v1112_v33 = vmax.f32 %v7626_v51, %v7762_v49  ;;  %v1291_v41 = vmax.f32 %v1091_v6, %v7789_v25  ;;  %v7818_v9 = vmax.f32 %v3181_v28, %v2891_v8  ;;  %v10365_v5 = vld [vmem:[#allocation71_spill] sm:$0xff] }
 0x1db   : > { %10252 = vst [vmem:[#allocation133_spill] sm:$0xff] %v7798_v26  ;;  %v7811_v2 = vmax.f32 %v3202_v38, %v2912_v20  ;;  %v1292_v7 = vmax.f32 %v1092_v12, %v7791_v27  ;;  %v1311_v24 = vmax.f32 %v1111_v36, %v7793_v11  ;;  %v3184_v51 = vmax.f32 %v7057_v22, %v7398_v58  ;;  %v433_v36 = vld [vmem:[%s4655_s14 + $0x8a0] sm:$0xff]  ;;  %v442_v26 = vld [vmem:[%s4655_s14 + $0x8e8] sm:$0xf] }
 0x1dc   : > { %10254 = vst [vmem:[#allocation154_spill] sm:$0xff] %v7818_v9  ;;  %v7820_v39 = vmax.f32 %v3201_v0, %v2911_v19  ;;  %v1312_v4 = vmax.f32 %v1112_v33, %v7805_v35  ;;  %v1775_v46 = vrot.slane %v1291_v41, 1  ;;  %v2476_v21 = vrot.slane %v1291_v41, 2 }
 0x1dd   : > { %10253 = vst [vmem:[#allocation85_spill] sm:$0xff] %v7811_v2  ;;  %v1776_v57 = vrot.slane %v1292_v7, 1  ;;  %v1805_v48 = vrot.slane %v1311_v24, 1  ;;  %v2477_v28 = vrot.slane %v1292_v7, 2  ;;  %v2506_v32 = vrot.slane %v1311_v24, 2 }
 0x1de   : > { %10255 = vst [vmem:[#allocation159_spill] sm:$0xff] %v7820_v39  ;;  %v1806_v34 = vrot.slane %v1312_v4, 1  ;;  %v2507_v53 = vrot.slane %v1312_v4, 2  ;;  %v649_v30 = vmax.f32 %v4605_v52, %v7345_v45  ;;  %v650_v40 = vmax.f32 %v4606_v37, %v7359_v61  ;;  %v10256_v52 = vld [vmem:[#allocation110_spill] sm:$0xff]  ;;  %v438_v2 = vld [vmem:[%s4655_s14 + $0x8c8] sm:$0xf] }
 0x1df   : > { %v1777_v8 = vsel %vm1525_vm0, %v1775_v46, %v1776_v57  ;;  %v2478_v22 = vsel %vm2226_vm1, %v2476_v21, %v2477_v28  ;;  %v2193_v20 = vmax.f32 %v1292_v7, %v1776_v57  ;;  %v673_v19 = vmax.f32 %v7345_v45, %v409_v55  ;;  %v434_v46 = vld [vmem:[%s4655_s14 + $0x8a8] sm:$0xf] }
 0x1e0   : > { %v1807_v38 = vsel %vm1525_vm0, %v1805_v48, %v1806_v34  ;;  %v2192_v6 = vmax.f32 %v1291_v41, %v1777_v8  ;;  %v2508_v0 = vsel %vm2226_vm1, %v2506_v32, %v2507_v53  ;;  %v2213_v12 = vmax.f32 %v1312_v4, %v1806_v34 }
 0x1e1   : > { %v2212_v33 = vmax.f32 %v1311_v24, %v1807_v38  ;;  %v3183_v37 = vmax.f32 %v10256_v52, %v7401_v31  ;;  %v2894_v60 = vmax.f32 %v2193_v20, %v2477_v28  ;;  %v674_v21 = vmax.f32 %v7359_v61, %v410_v43 }
 0x1e2   : > { %v2893_v7 = vmax.f32 %v2192_v6, %v2478_v22  ;;  %v2914_v57 = vmax.f32 %v2213_v12, %v2507_v53  ;;  %v7843_v45 = vmax.f32 %v649_v30, %v409_v55  ;;  %v7845_v39 = vmax.f32 %v650_v40, %v410_v43 }
 0x1e3   : > { %v2913_v41 = vmax.f32 %v2212_v33, %v2508_v0  ;;  %3046 = vst.msk [vmem:[%s4913_s18 + $0x1d7] sm:$0x1] %vm2929_vm2, %v2894_v60  ;;  %v3204_v4 = vmax.f32 %v7398_v58, %v2894_v60  ;;  %v7850_v48 = vmax.f32 %v3184_v51, %v2894_v60  ;;  %v7852_v24 = vmax.f32 %v673_v19, %v433_v36 }
 0x1e4   : > { %3045 = vst.msk [vmem:[%s4913_s18 + $0x1cf] sm:$0xfe] %vm2927_vm3, %v2893_v7  ;;  %v3203_v61 = vmax.f32 %v7401_v31, %v2893_v7  ;;  %v7857_v28 = vmax.f32 %v674_v21, %v434_v46  ;;  %v1093_v55 = vmax.f32 %v7747_v13, %v7789_v25  ;;  %v1094_v32 = vmax.f32 %v7749_v59, %v7791_v27  ;;  %v10260_v59 = vld [vmem:[#allocation108_spill] sm:$0xff]  ;;  %v4617_v31 = vld [vmem:[%s4655_s14 + $0x238] sm:$0xf] }
 0x1e5   : > { %10257 = vst [vmem:[#allocation151_spill] sm:$0xff] %v7850_v48  ;;  %v7863_v34 = vmax.f32 %v3204_v4, %v2914_v57  ;;  %v1113_v60 = vmax.f32 %v7753_v62, %v7793_v11  ;;  %v1114_v51 = vmax.f32 %v7762_v49, %v7805_v35  ;;  %v3185_v30 = vmax.f32 %v10260_v59, %v7437_v15  ;;  %v4607_v49 = vld [vmem:[%s4655_s14 + $0x670] sm:$0xff]  ;;  %v4608_v4 = vld [vmem:[%s4655_s14 + $0x678] sm:$0xf]  ;;  %v10289_v48 = vld [vmem:[#allocation175_spill] sm:$0xff] }
 0x1e6   : > { %v7871_v53 = vmax.f32 %v3203_v61, %v2913_v41  ;;  %v1293_v43 = vmax.f32 %v1093_v55, %v7843_v45  ;;  %v1294_v13 = vmax.f32 %v1094_v32, %v7845_v39  ;;  %v3186_v62 = vmax.f32 %v10191_v54, %v7429_v23  ;;  %v411_v46 = vld [vmem:[%s4655_s14 + $0x7f0] sm:$0xff]  ;;  %v412_v54 = vld [vmem:[%s4655_s14 + $0x7f8] sm:$0xf] }
 0x1e7   : > { %10258 = vst [vmem:[#allocation106_spill] sm:$0xff] %v7863_v34  ;;  %v1313_v40 = vmax.f32 %v1113_v60, %v7852_v24  ;;  %v1314_v8 = vmax.f32 %v1114_v51, %v7857_v28  ;;  %v651_v22 = vmax.f32 %v4607_v49, %v7390_v14  ;;  %v652_v61 = vmax.f32 %v4608_v4, %v7393_v1  ;;  %v435_v34 = vld [vmem:[%s4655_s14 + $0x8b0] sm:$0xff] }
 0x1e8   : > { %10259 = vst [vmem:[#allocation178_spill] sm:$0xff] %v7871_v53  ;;  %v1778_v20 = vrot.slane %v1293_v43, 1  ;;  %v1779_v19 = vrot.slane %v1294_v13, 1  ;;  %v2479_v38 = vrot.slane %v1293_v43, 2  ;;  %v2480_v6 = vrot.slane %v1294_v13, 2 }
 0x1e9   : > { %v1808_v0 = vrot.slane %v1313_v40, 1  ;;  %v1809_v12 = vrot.slane %v1314_v8, 1  ;;  %v2509_v36 = vrot.slane %v1313_v40, 2  ;;  %v2510_v33 = vrot.slane %v1314_v8, 2 }
 0x1ea   : > { %v1780_v21 = vsel %vm1525_vm0, %v1778_v20, %v1779_v19  ;;  %v2481_v57 = vsel %vm2226_vm1, %v2479_v38, %v2480_v6  ;;  %v2195_v41 = vmax.f32 %v1294_v13, %v1779_v19  ;;  %v7891_v49 = vmax.f32 %v3183_v37, %v2893_v7  ;;  %v436_v37 = vld [vmem:[%s4655_s14 + $0x8b8] sm:$0xf] }
 0x1eb   : > { %v1810_v55 = vsel %vm1525_vm0, %v1808_v0, %v1809_v12  ;;  %v2194_v32 = vmax.f32 %v1293_v43, %v1780_v21  ;;  %v2511_v60 = vsel %vm2226_vm1, %v2509_v36, %v2510_v33  ;;  %v2215_v51 = vmax.f32 %v1314_v8, %v1809_v12  ;;  %v413_v21 = vld [vmem:[%s4655_s14 + $0x800] sm:$0xff] }
 0x1ec   : > { %10261 = vst [vmem:[#allocation179_spill] sm:$0xff] %v7891_v49  ;;  %v2214_v58 = vmax.f32 %v1313_v40, %v1810_v55  ;;  %v2896_v20 = vmax.f32 %v2195_v41, %v2480_v6  ;;  %v675_v13 = vmax.f32 %v7390_v14, %v411_v46  ;;  %v676_v53 = vmax.f32 %v7393_v1, %v412_v54  ;;  %v8061_v49 = vld [vmem:[%s4655_s14 + $0x838] sm:$0xf] }
 0x1ed   : > { %v2895_v19 = vmax.f32 %v2194_v32, %v2481_v57  ;;  %v2916_v38 = vmax.f32 %v2215_v51, %v2510_v33  ;;  %v7896_v4 = vmax.f32 %v651_v22, %v411_v46  ;;  %v7904_v7 = vmax.f32 %v652_v61, %v412_v54  ;;  %v10266_v46 = vld [vmem:[#allocation112_spill] sm:$0xff]  ;;  %v4609_v57 = vld [vmem:[%s4655_s14 + $0x680] sm:$0xff]  ;;  %v414_v61 = vld [vmem:[%s4655_s14 + $0x808] sm:$0xf] }
 0x1ee   : > { %v2915_v0 = vmax.f32 %v2214_v58, %v2511_v60  ;;  %3048 = vst.msk [vmem:[%s4913_s18 + $0x1df] sm:$0x1] %vm2929_vm2, %v2896_v20  ;;  %v3206_v43 = vmax.f32 %v7429_v23, %v2896_v20  ;;  %v7901_v8 = vmax.f32 %v3186_v62, %v2896_v20  ;;  %v7911_v1 = vmax.f32 %v675_v13, %v435_v34 }
 0x1ef   : > { %3047 = vst.msk [vmem:[%s4913_s18 + $0x1d7] sm:$0xfe] %vm2927_vm3, %v2895_v19  ;;  %v3205_v14 = vmax.f32 %v7437_v15, %v2895_v19  ;;  %v7909_v40 = vmax.f32 %v3185_v30, %v2895_v19  ;;  %v1095_v58 = vmax.f32 %v7789_v25, %v7843_v45  ;;  %v1096_v62 = vmax.f32 %v7791_v27, %v7845_v39 }
 0x1f0   : > { %10262 = vst [vmem:[#allocation180_spill] sm:$0xff] %v7901_v8  ;;  %v7915_v22 = vmax.f32 %v3206_v43, %v2916_v38  ;;  %v1115_v6 = vmax.f32 %v7793_v11, %v7852_v24  ;;  %v7925_v34 = vmax.f32 %v676_v53, %v436_v37  ;;  %v1116_v25 = vmax.f32 %v7805_v35, %v7857_v28  ;;  %v4610_v35 = vld [vmem:[%s4655_s14 + $0x688] sm:$0xf]  ;;  %v10267_v38 = vld [vmem:[#allocation164_spill] sm:$0xff] }
 0x1f1   : > { %10263 = vst [vmem:[#allocation181_spill] sm:$0xff] %v7909_v40  ;;  %v7923_v30 = vmax.f32 %v3205_v14, %v2915_v0  ;;  %v1295_v12 = vmax.f32 %v1095_v58, %v7896_v4  ;;  %v1296_v36 = vmax.f32 %v1096_v62, %v7904_v7  ;;  %v3187_v27 = vmax.f32 %v10266_v46, %v7477_v42  ;;  %v10268_v0 = vld [vmem:[#allocation32_spill] sm:$0xff] }
 0x1f2   : > { %10264 = vst [vmem:[#allocation182_spill] sm:$0xff] %v7915_v22  ;;  %v1315_v33 = vmax.f32 %v1115_v6, %v7911_v1  ;;  %v653_v11 = vmax.f32 %v4609_v57, %v7425_v47  ;;  %v1316_v41 = vmax.f32 %v1116_v25, %v7925_v34  ;;  %v654_v55 = vmax.f32 %v4610_v35, %v7440_v17  ;;  %v437_v6 = vld [vmem:[%s4655_s14 + $0x8c0] sm:$0xff] }
 0x1f3   : > { %10265 = vst [vmem:[#allocation183_spill] sm:$0xff] %v7923_v30  ;;  %v1781_v53 = vrot.slane %v1295_v12, 1  ;;  %v2482_v54 = vrot.slane %v1295_v12, 2  ;;  %v1782_v32 = vrot.slane %v1296_v36, 1  ;;  %v2483_v51 = vrot.slane %v1296_v36, 2 }
 0x1f4   : > { %v1811_v60 = vrot.slane %v1315_v33, 1  ;;  %v2512_v20 = vrot.slane %v1315_v33, 2  ;;  %v1812_v13 = vrot.slane %v1316_v41, 1  ;;  %v2513_v19 = vrot.slane %v1316_v41, 2 }
 0x1f5   : > { %v3188_v43 = vmax.f32 %v10268_v0, %v10267_v38  ;;  %v677_v37 = vmax.f32 %v7425_v47, %v413_v21  ;;  %v1783_v14 = vsel %vm1525_vm0, %v1781_v53, %v1782_v32  ;;  %v2484_v58 = vsel %vm2226_vm1, %v2482_v54, %v2483_v51 }
 0x1f6   : > { %v2197_v62 = vmax.f32 %v1296_v36, %v1782_v32  ;;  %v678_v25 = vmax.f32 %v7440_v17, %v414_v61  ;;  %v1813_v57 = vsel %vm1525_vm0, %v1811_v60, %v1812_v13  ;;  %v2196_v35 = vmax.f32 %v1295_v12, %v1783_v14 }
 0x1f7   : > { %v2514_v23 = vsel %vm2226_vm1, %v2512_v20, %v2513_v19  ;;  %v2217_v22 = vmax.f32 %v1316_v41, %v1812_v13  ;;  %v2216_v30 = vmax.f32 %v1315_v33, %v1813_v57  ;;  %v7951_v47 = vmax.f32 %v653_v11, %v413_v21 }
 0x1f8   : > { %v2898_v0 = vmax.f32 %v2197_v62, %v2483_v51  ;;  %v7953_v53 = vmax.f32 %v654_v55, %v414_v61  ;;  %v2897_v54 = vmax.f32 %v2196_v35, %v2484_v58  ;;  %v7955_v32 = vmax.f32 %v677_v37, %v437_v6  ;;  %v10273_v6 = vld [vmem:[#allocation168_spill] sm:$0xff] }
 0x1f9   : > { %v2918_v36 = vmax.f32 %v2217_v22, %v2513_v19  ;;  %v1097_v17 = vmax.f32 %v7843_v45, %v7896_v4  ;;  %v2917_v60 = vmax.f32 %v2216_v30, %v2514_v23  ;;  %v1098_v33 = vmax.f32 %v7845_v39, %v7904_v7  ;;  %v415_v35 = vld [vmem:[%s4655_s14 + $0x810] sm:$0xff] }
 0x1fa   : > { %3050 = vst.msk [vmem:[%s4913_s18 + $0x1e7] sm:$0x1] %vm2929_vm2, %v2898_v0  ;;  %v3208_v12 = vmax.f32 %v10267_v38, %v2898_v0  ;;  %v7962_v41 = vmax.f32 %v3188_v43, %v2898_v0  ;;  %v3207_v21 = vmax.f32 %v7477_v42, %v2897_v54  ;;  %v7969_v22 = vmax.f32 %v678_v25, %v438_v2  ;;  %v10274_v25 = vld [vmem:[#allocation116_spill] sm:$0xff]  ;;  %v416_v0 = vld [vmem:[%s4655_s14 + $0x818] sm:$0xf] }
 0x1fb   : > { %3049 = vst.msk [vmem:[%s4913_s18 + $0x1df] sm:$0xfe] %vm2927_vm3, %v2897_v54  ;;  %v1117_v11 = vmax.f32 %v7852_v24, %v7911_v1  ;;  %v1118_v45 = vmax.f32 %v7857_v28, %v7925_v34  ;;  %v1297_v61 = vmax.f32 %v1097_v17, %v7951_v47  ;;  %v1298_v39 = vmax.f32 %v1098_v33, %v7953_v53 }
 0x1fc   : > { %10269 = vst [vmem:[#allocation164_spill] sm:$0xff] %v7962_v41  ;;  %v7975_v23 = vmax.f32 %v3208_v12, %v2918_v36  ;;  %v7981_v55 = vmax.f32 %v3187_v27, %v2897_v54  ;;  %v7983_v2 = vmax.f32 %v3207_v21, %v2917_v60  ;;  %v3190_v57 = vmax.f32 %v10274_v25, %v10273_v6  ;;  %v439_v21 = vld [vmem:[%s4655_s14 + $0x8d0] sm:$0xff] }
 0x1fd   : > { %v1317_v24 = vmax.f32 %v1117_v11, %v7955_v32  ;;  %v1318_v51 = vmax.f32 %v1118_v45, %v7969_v22  ;;  %v1784_v28 = vrot.slane %v1297_v61, 1  ;;  %v1785_v20 = vrot.slane %v1298_v39, 1  ;;  %v4611_v11 = vld [vmem:[%s4655_s14 + $0x690] sm:$0xff]  ;;  %v10275_v45 = vld [vmem:[#allocation163_spill] sm:$0xff] }
 0x1fe   : > { %10270 = vst [vmem:[#allocation32_spill] sm:$0xff] %v7975_v23  ;;  %v2485_v13 = vrot.slane %v1297_v61, 2  ;;  %v2486_v19 = vrot.slane %v1298_v39, 2  ;;  %v440_v23 = vld [vmem:[%s4655_s14 + $0x8d8] sm:$0xf] }
 0x1ff   : > { %10271 = vst [vmem:[#allocation184_spill] sm:$0xff] %v7981_v55  ;;  %v1814_v38 = vrot.slane %v1317_v24, 1  ;;  %v1815_v43 = vrot.slane %v1318_v51, 1  ;;  %v2515_v37 = vrot.slane %v1317_v24, 2  ;;  %v2516_v14 = vrot.slane %v1318_v51, 2 }
 0x200   : > { %10272 = vst [vmem:[#allocation185_spill] sm:$0xff] %v7983_v2  ;;  %v1786_v27 = vsel %vm1525_vm0, %v1784_v28, %v1785_v20  ;;  %v2487_v58 = vsel %vm2226_vm1, %v2485_v13, %v2486_v19  ;;  %v2199_v62 = vmax.f32 %v1298_v39, %v1785_v20  ;;  %v655_v39 = vmax.f32 %v4611_v11, %v10275_v45  ;;  %v4612_v28 = vld [vmem:[%s4655_s14 + $0x698] sm:$0xf]  ;;  %v10276_v20 = vld [vmem:[#allocation166_spill] sm:$0xff] }
 0x201   : > { %v1816_v54 = vsel %vm1525_vm0, %v1814_v38, %v1815_v43  ;;  %v2198_v36 = vmax.f32 %v1297_v61, %v1786_v27  ;;  %v2517_v17 = vsel %vm2226_vm1, %v2515_v37, %v2516_v14  ;;  %v2219_v60 = vmax.f32 %v1318_v51, %v1815_v43  ;;  %v10277_v27 = vld [vmem:[#allocation170_spill] sm:$0xff]  ;;  %v10278_v51 = vld [vmem:[#allocation153_spill] sm:$0xff] }
 0x202   : > { %v2218_v12 = vmax.f32 %v1317_v24, %v1816_v54  ;;  %v2900_v33 = vmax.f32 %v2199_v62, %v2486_v19  ;;  %v656_v13 = vmax.f32 %v4612_v28, %v10276_v20  ;;  %v679_v38 = vmax.f32 %v10275_v45, %v415_v35  ;;  %v4614_v28 = vld [vmem:[%s4655_s14 + $0x6a8] sm:$0xf] }
 0x203   : > { %v2899_v25 = vmax.f32 %v2198_v36, %v2487_v58  ;;  %v2920_v30 = vmax.f32 %v2219_v60, %v2516_v14  ;;  %v680_v61 = vmax.f32 %v10276_v20, %v416_v0  ;;  %v3189_v24 = vmax.f32 %v10278_v51, %v10277_v27  ;;  %v10285_v20 = vld [vmem:[#allocation169_spill] sm:$0xff] }
 0x204   : > { %v2919_v37 = vmax.f32 %v2218_v12, %v2517_v17  ;;  %3052 = vst.msk [vmem:[%s4913_s18 + $0x1ef] sm:$0x1] %vm2929_vm2, %v2900_v33  ;;  %v3210_v19 = vmax.f32 %v10273_v6, %v2900_v33  ;;  %v8008_v43 = vmax.f32 %v3190_v57, %v2900_v33  ;;  %v8013_v58 = vmax.f32 %v655_v39, %v415_v35  ;;  %v4613_v33 = vld [vmem:[%s4655_s14 + $0x6a0] sm:$0xff] }
 0x205   : > { %3051 = vst.msk [vmem:[%s4913_s18 + $0x1e7] sm:$0xfe] %vm2927_vm3, %v2899_v25  ;;  %v3209_v14 = vmax.f32 %v10277_v27, %v2899_v25  ;;  %v8015_v62 = vmax.f32 %v656_v13, %v416_v0  ;;  %v8017_v54 = vmax.f32 %v679_v38, %v439_v21  ;;  %v8023_v6 = vmax.f32 %v680_v61, %v440_v23  ;;  %v10284_v21 = vld [vmem:[#allocation167_spill] sm:$0xff]  ;;  %v417_v39 = vld [vmem:[%s4655_s14 + $0x820] sm:$0xff]  ;;  %v4615_v61 = vld [vmem:[%s4655_s14 + $0x6b0] sm:$0xff] }
 0x206   : > { %10279 = vst [vmem:[#allocation168_spill] sm:$0xff] %v8008_v43  ;;  %v8019_v36 = vmax.f32 %v3210_v19, %v2920_v30  ;;  %v1099_v57 = vmax.f32 %v7896_v4, %v7951_v47  ;;  %v1100_v35 = vmax.f32 %v7904_v7, %v7953_v53  ;;  %v1119_v30 = vmax.f32 %v7911_v1, %v7955_v32  ;;  %v10287_v19 = vld [vmem:[#allocation172_spill] sm:$0xff] }
 0x207   : > { %10281 = vst [vmem:[#allocation163_spill] sm:$0xff] %v8023_v6  ;;  %v8027_v60 = vmax.f32 %v3209_v14, %v2919_v37  ;;  %v1120_v0 = vmax.f32 %v7925_v34, %v7969_v22  ;;  %v8035_v12 = vmax.f32 %v3189_v24, %v2899_v25  ;;  %v3192_v4 = vmax.f32 %v10242_v29, %v7544_v44  ;;  %v418_v34 = vld [vmem:[%s4655_s14 + $0x828] sm:$0xf]  ;;  %v4616_v24 = vld [vmem:[%s4655_s14 + $0x6b8] sm:$0xf] }
 0x208   : > { %10280 = vst [vmem:[#allocation116_spill] sm:$0xff] %v8019_v36  ;;  %v1299_v23 = vmax.f32 %v1099_v57, %v8013_v58  ;;  %v657_v11 = vmax.f32 %v4613_v33, %v10284_v21  ;;  %v1300_v7 = vmax.f32 %v1100_v35, %v8015_v62  ;;  %v1319_v45 = vmax.f32 %v1119_v30, %v8017_v54  ;;  %v10286_v37 = vld [vmem:[#allocation171_spill] sm:$0xff]  ;;  %v419_v36 = vld [vmem:[%s4655_s14 + $0x830] sm:$0xff] }
 0x209   : > { %10282 = vst [vmem:[#allocation166_spill] sm:$0xff] %v8027_v60  ;;  %v1320_v1 = vmax.f32 %v1120_v0, %v8023_v6  ;;  %v658_v13 = vmax.f32 %v4614_v28, %v10285_v20  ;;  %v659_v29 = vmax.f32 %v4615_v61, %v10286_v37  ;;  %v660_v14 = vmax.f32 %v4616_v24, %v10287_v19 }
 0x20a   : > { %10283 = vst [vmem:[#allocation186_spill] sm:$0xff] %v8035_v12  ;;  %v1787_v25 = vrot.slane %v1299_v23, 1  ;;  %v2488_v38 = vrot.slane %v1299_v23, 2  ;;  %v1788_v57 = vrot.slane %v1300_v7, 1  ;;  %v1817_v35 = vrot.slane %v1319_v45, 1 }
 0x20b   : > { %v1818_v30 = vrot.slane %v1320_v1, 1  ;;  %v2489_v33 = vrot.slane %v1300_v7, 2  ;;  %v2518_v0 = vrot.slane %v1319_v45, 2  ;;  %v2519_v17 = vrot.slane %v1320_v1, 2  ;;  %10288 = vst [vmem:[#allocation167_spill] sm:$0xff] %v8061_v49 }
 0x20c   : > { %v681_v28 = vmax.f32 %v10284_v21, %v417_v39  ;;  %v682_v60 = vmax.f32 %v10285_v20, %v418_v34  ;;  %v1789_v2 = vsel %vm1525_vm0, %v1787_v25, %v1788_v57  ;;  %v2201_v12 = vmax.f32 %v1300_v7, %v1788_v57  ;;  %v10290_v21 = vld [vmem:[#allocation155_spill] sm:$0xff]  ;;  %v441_v25 = vld [vmem:[%s4655_s14 + $0x8e0] sm:$0xff] }
 0x20d   : > { %v1819_v61 = vsel %vm1525_vm0, %v1817_v35, %v1818_v30  ;;  %v2490_v24 = vsel %vm2226_vm1, %v2488_v38, %v2489_v33  ;;  %v2200_v55 = vmax.f32 %v1299_v23, %v1789_v2  ;;  %v2520_v8 = vsel %vm2226_vm1, %v2518_v0, %v2519_v17  ;;  %v443_v23 = vld [vmem:[%s4655_s14 + $0x8f0] sm:$0xff] }
 0x20e   : > { %v2220_v41 = vmax.f32 %v1319_v45, %v1819_v61  ;;  %v2221_v40 = vmax.f32 %v1320_v1, %v1818_v30  ;;  %v3191_v18 = vmax.f32 %v10290_v21, %v10289_v48  ;;  %v2902_v20 = vmax.f32 %v2201_v12, %v2489_v33  ;;  %v10318_v30 = vld [vmem:[#allocation10_spill] sm:$0xff] }
 0x20f   : > { %v683_v35 = vmax.f32 %v10286_v37, %v419_v36  ;;  %v897_v38 = vmax.f32 %v657_v11, %v417_v39  ;;  %v2901_v9 = vmax.f32 %v2200_v55, %v2490_v24  ;;  %v898_v45 = vmax.f32 %v658_v13, %v418_v34 }
 0x210   : > { %v2921_v7 = vmax.f32 %v2220_v41, %v2520_v8  ;;  %v2922_v2 = vmax.f32 %v2221_v40, %v2519_v17  ;;  %3054 = vst.msk [vmem:[%s4913_s18 + $0x1f7] sm:$0x1] %vm2929_vm2, %v2902_v20  ;;  %v3212_v1 = vmax.f32 %v7544_v44, %v2902_v20  ;;  %v8072_v57 = vmax.f32 %v3192_v4, %v2902_v20 }
 0x211   : > { %v899_v12 = vmax.f32 %v659_v29, %v419_v36  ;;  %3053 = vst.msk [vmem:[%s4913_s18 + $0x1ef] sm:$0xfe] %vm2927_vm3, %v2901_v9  ;;  %v3211_v37 = vmax.f32 %v10289_v48, %v2901_v9  ;;  %v900_v55 = vmax.f32 %v660_v14, %v8061_v49  ;;  %v921_v8 = vmax.f32 %v681_v28, %v441_v25  ;;  %v10329_v49 = vld [vmem:[#allocation27_spill] sm:$0xff] }
 0x212   : > { %10291 = vst [vmem:[#allocation169_spill] sm:$0xff] %v8072_v57  ;;  %v8080_v40 = vmax.f32 %v682_v60, %v442_v26  ;;  %v8082_v41 = vmax.f32 %v3212_v1, %v2922_v2  ;;  %v923_v17 = vmax.f32 %v683_v35, %v443_v23  ;;  %v1101_v44 = vmax.f32 %v7951_v47, %v8013_v58  ;;  %v10301_v23 = vld [vmem:[#allocation91_spill] sm:$0xff] }
 0x213   : > { %v1102_v4 = vmax.f32 %v7953_v53, %v8015_v62  ;;  %v8088_v11 = vmax.f32 %v3211_v37, %v2921_v7  ;;  %v1103_v36 = vmax.f32 %v8013_v58, %v897_v38  ;;  %v1104_v39 = vmax.f32 %v8015_v62, %v898_v45 }
 0x214   : > { %10292 = vst [vmem:[#allocation171_spill] sm:$0xff] %v8080_v40  ;;  %v1121_v34 = vmax.f32 %v7955_v32, %v8017_v54  ;;  %v1122_v26 = vmax.f32 %v7969_v22, %v8023_v6  ;;  %v1123_v60 = vmax.f32 %v8017_v54, %v921_v8  ;;  %v1301_v13 = vmax.f32 %v1101_v44, %v897_v38 }
 0x215   : > { %10293 = vst [vmem:[#allocation187_spill] sm:$0xff] %v8082_v41  ;;  %v8099_v29 = vmax.f32 %v3191_v18, %v2901_v9  ;;  %v1302_v53 = vmax.f32 %v1102_v4, %v898_v45  ;;  %v8101_v14 = vmax.f32 %v1103_v36, %v899_v12  ;;  %v8103_v33 = vmax.f32 %v1104_v39, %v900_v55  ;;  %v10299_v18 = vld [vmem:[#allocation62_spill] sm:$0xff]  ;;  %v10302_v45 = vld [vmem:[#allocation127_spill] sm:$0xff] }
 0x216   : > { %10294 = vst [vmem:[#allocation188_spill] sm:$0xff] %v8088_v11  ;;  %v1321_v58 = vmax.f32 %v1121_v34, %v921_v8  ;;  %v1322_v62 = vmax.f32 %v1122_v26, %v8080_v40  ;;  %v1790_v32 = vrot.slane %v1301_v13, 1  ;;  %v2491_v0 = vrot.slane %v1301_v13, 2  ;;  %v10300_v9 = vld [vmem:[#allocation130_spill] sm:$0xff]  ;;  %v10304_v39 = vld [vmem:[#allocation3_spill] sm:$0xff]  ;;  %v10305_v34 = vld [vmem:[#allocation4_spill] sm:$0xff] }
 0x217   : > { %10295 = vst [vmem:[#allocation189_spill] sm:$0xff] %v8099_v29  ;;  %v8106_v28 = vmax.f32 %v1123_v60, %v923_v17  ;;  %v1791_v22 = vrot.slane %v1302_v53, 1  ;;  %v2492_v61 = vrot.slane %v1302_v53, 2  ;;  %v3193_v35 = vmax.f32 %v10300_v9, %v10299_v18  ;;  %v10303_v36 = vld [vmem:[#allocation6_spill] sm:$0xff]  ;;  %v10343_v11 = vld [vmem:[#allocation59_spill] sm:$0xff] }
 0x218   : > { %10296 = vst [vmem:[#allocation190_spill] sm:$0xff] %v8101_v14  ;;  %v1820_v54 = vrot.slane %v1321_v58, 1  ;;  %v1821_v24 = vrot.slane %v1322_v62, 1  ;;  %v2521_v20 = vrot.slane %v1321_v58, 2  ;;  %v2522_v25 = vrot.slane %v1322_v62, 2  ;;  %v10342_v41 = vld [vmem:[#allocation58_spill] sm:$0xff] }
 0x219   : > { %10297 = vst [vmem:[#allocation191_spill] sm:$0xff] %v8103_v33  ;;  %v1792_v38 = vsel %vm1525_vm0, %v1790_v32, %v1791_v22  ;;  %v2493_v7 = vsel %vm2226_vm1, %v2491_v0, %v2492_v61  ;;  %v2203_v2 = vmax.f32 %v1302_v53, %v1791_v22  ;;  %v3194_v1 = vmax.f32 %v10302_v45, %v10301_v23  ;;  %v10307_v0 = vld [vmem:[#allocation7_spill] sm:$0xff] }
 0x21a   : > { %10298 = vst [vmem:[#allocation192_spill] sm:$0xff] %v8106_v28  ;;  %v1822_v12 = vsel %vm1525_vm0, %v1820_v54, %v1821_v24  ;;  %v2202_v37 = vmax.f32 %v1301_v13, %v1792_v38  ;;  %v2523_v55 = vsel %vm2226_vm1, %v2521_v20, %v2522_v25  ;;  %v2223_v8 = vmax.f32 %v1322_v62, %v1821_v24  ;;  %v10308_v54 = vld [vmem:[#allocation9_spill] sm:$0xff]  ;;  %v10323_v28 = vld [vmem:[#allocation15_spill] sm:$0xff] }
 0x21b   : > { %v2222_v17 = vmax.f32 %v1321_v58, %v1822_v12  ;;  %v2904_v44 = vmax.f32 %v2203_v2, %v2492_v61  ;;  %v3486_v4 = vmax.f32 %v8008_v43, %v8072_v57  ;;  %v10306_v26 = vmax.f32 %v10304_v39, %v10305_v34  ;;  %v10313_v12 = vld [vmem:[#allocation2_spill] sm:$0xff] }
 0x21c   : > { %v2903_v53 = vmax.f32 %v2202_v37, %v2493_v7  ;;  %v2924_v32 = vmax.f32 %v2223_v8, %v2522_v25  ;;  %v1526_v22 = vrot.slane %v10307_v0, 1  ;;  %v1557_v13 = vrot.slane %v10308_v54, 1  ;;  %v10311_v7 = vld [vmem:[#allocation8_spill] sm:$0xff] }
 0x21d   : > { %v1126_v60 = vmax.f32 %v10306_v26, %v10303_v36  ;;  %v2923_v38 = vmax.f32 %v2222_v17, %v2523_v55  ;;  %3056 = vst.msk [vmem:[%s4913_s18 + $0x1ff] sm:$0x1] %vm2929_vm2, %v2904_v44  ;;  %v3214_v58 = vmax.f32 %v10301_v23, %v2904_v44  ;;  %v8127_v62 = vmax.f32 %v3194_v1, %v2904_v44  ;;  %v10317_v36 = vld [vmem:[#allocation5_spill] sm:$0xff] }
 0x21e   : > { %3055 = vst.msk [vmem:[%s4913_s18 + $0x1f7] sm:$0xfe] %vm2927_vm3, %v2903_v53  ;;  %v3213_v24 = vmax.f32 %v10299_v18, %v2903_v53  ;;  %v8132_v20 = vmax.f32 %v3193_v35, %v2903_v53  ;;  %v10312_v25 = vrot.slane %v10311_v7, 1  ;;  %v1586_v37 = vrot.slane %v10313_v12, 1  ;;  %v10320_v35 = vld [vmem:[#allocation19_spill] sm:$0xff] }
 0x21f   : > { %10309 = vst [vmem:[#allocation6_spill] sm:$0xff] %v8127_v62  ;;  %v1527_v61 = vrot.slane %v1126_v60, 1  ;;  %v8138_v55 = vmax.f32 %v3214_v58, %v2924_v32  ;;  %v8143_v1 = vmax.f32 %v3486_v4, %v8127_v62  ;;  %v1587_v39 = vrot.slane %v10317_v36, 1 }
 0x220   : > { %10310 = vst [vmem:[#allocation3_spill] sm:$0xff] %v8132_v20  ;;  %v1558_v2 = vsel %vm1525_vm0, %v10312_v25, %v1557_v13  ;;  %v8146_v44 = vmax.f32 %v3213_v24, %v2923_v38  ;;  %v2047_v4 = vmax.f32 %v10308_v54, %v1557_v13  ;;  %v2227_v38 = vrot.slane %v10307_v0, 2  ;;  %v10319_v13 = vld [vmem:[#allocation17_spill] sm:$0xff] }
 0x221   : > { %10314 = vst [vmem:[#allocation4_spill] sm:$0xff] %v8138_v55  ;;  %v1528_v17 = vsel %vm1525_vm0, %v1526_v22, %v1527_v61  ;;  %v2027_v53 = vmax.f32 %v1126_v60, %v1527_v61  ;;  %v2046_v32 = vmax.f32 %v10311_v7, %v1558_v2  ;;  %v1588_v58 = vsel %vm1525_vm0, %v1586_v37, %v1587_v39  ;;  %v10338_v55 = vld [vmem:[#allocation48_spill] sm:$0xff] }
 0x222   : > { %10315 = vst [vmem:[#allocation7_spill] sm:$0xff] %v8143_v1  ;;  %v2026_v34 = vmax.f32 %v10307_v0, %v1528_v17  ;;  %v2067_v22 = vmax.f32 %v10317_v36, %v1587_v39  ;;  %v2228_v24 = vrot.slane %v1126_v60, 2  ;;  %v2066_v25 = vmax.f32 %v10313_v12, %v1588_v58  ;;  %v10322_v39 = vld [vmem:[#allocation14_spill] sm:$0xff]  ;;  %v10345_v1 = vld [vmem:[#allocation33_spill] sm:$0xff] }
 0x223   : > { %10316 = vst [vmem:[#allocation9_spill] sm:$0xff] %v8146_v44  ;;  %v2258_v47 = vrot.slane %v10308_v54, 2  ;;  %v2287_v17 = vrot.slane %v10313_v12, 2  ;;  %v2288_v26 = vrot.slane %v10317_v36, 2  ;;  %v10321_v37 = vmax.f32 %v10319_v13, %v10320_v35  ;;  %v10324_v0 = vld [vmem:[#allocation18_spill] sm:$0xff]  ;;  %v10327_v13 = vld [vmem:[#allocation11_spill] sm:$0xff] }
 0x224   : > { %v2229_v61 = vsel %vm2226_vm1, %v2227_v38, %v2228_v24  ;;  %v2728_v2 = vmax.f32 %v2027_v53, %v2228_v24  ;;  %v10325_v60 = vmax.f32 %v10323_v28, %v10324_v0  ;;  %v10326_v58 = vrot.slane %v10311_v7, 2 }
 0x225   : > { %v3219_v8 = vmax.f32 %v10321_v37, %v10318_v30  ;;  %v2289_v12 = vsel %vm2226_vm1, %v2287_v17, %v2288_v26  ;;  %v2727_v36 = vmax.f32 %v2026_v34, %v2229_v61  ;;  %v8176_v6 = vmax.f32 %v2047_v4, %v2258_v47  ;;  %v10328_v37 = vld [vmem:[#allocation26_spill] sm:$0xff]  ;;  %v10333_v34 = vld [vmem:[#allocation39_spill] sm:$0xff]  ;;  %v10335_v61 = vld [vmem:[#allocation13_spill] sm:$0xff] }
 0x226   : > { %v3220_v40 = vmax.f32 %v10325_v60, %v10322_v39  ;;  %v2259_v54 = vsel %vm2226_vm1, %v10326_v58, %v2258_v47  ;;  %v8181_v24 = vmax.f32 %v2066_v25, %v2289_v12  ;;  %v10330_v28 = vmax.f32 %v10328_v37, %v10329_v49  ;;  %v10331_v58 = vld [vmem:[#allocation21_spill] sm:$0xff]  ;;  %v10332_v17 = vld [vmem:[#allocation38_spill] sm:$0xff]  ;;  %v10337_v12 = vld [vmem:[#allocation47_spill] sm:$0xff] }
 0x227   : > { %v8179_v38 = vmax.f32 %v2046_v32, %v2259_v54  ;;  %v8187_v19 = vmax.f32 %v2067_v22, %v2288_v26  ;;  %v3058_v7 = vmax.f32 %v2728_v2, %v8176_v6  ;;  %v10334_v47 = vmax.f32 %v10332_v17, %v10333_v34  ;;  %v10336_v54 = vld [vmem:[#allocation30_spill] sm:$0xff]  ;;  %v10340_v26 = vld [vmem:[#allocation29_spill] sm:$0xff] }
 0x228   : > { %v3221_v60 = vmax.f32 %v10330_v28, %v10327_v13  ;;  %v3380_v53 = vmax.f32 %v3220_v40, %v10335_v61  ;;  %v10339_v37 = vmax.f32 %v10337_v12, %v10338_v55  ;;  %v3382_v22 = vmax.f32 %v10335_v61, %v10340_v26 }
 0x229   : > { %v3223_v4 = vmax.f32 %v10334_v47, %v10331_v58  ;;  %v3057_v32 = vmax.f32 %v2727_v36, %v8179_v38  ;;  %v3218_v2 = vmax.f32 %v3058_v7, %v8187_v19  ;;  %v10341_v47 = vld [vmem:[#allocation40_spill] sm:$0xff]  ;;  %v10344_v62 = vmax.f32 %v10342_v41, %v10343_v11 }
 0x22a   : > { %v3379_v25 = vmax.f32 %v3219_v8, %v3221_v60  ;;  %v3225_v28 = vmax.f32 %v10339_v37, %v10336_v54  ;;  %v3508_v44 = vmax.f32 %v3380_v53, %v10340_v26  ;;  %v3510_v20 = vmax.f32 %v3382_v22, %v10345_v1  ;;  %v10348_v22 = vld [vmem:[#allocation68_spill] sm:$0xff] }
 0x22b   : > { %v3381_v17 = vmax.f32 %v3221_v60, %v3223_v4  ;;  %v3227_v36 = vmax.f32 %v10344_v62, %v10341_v47  ;;  %v3217_v14 = vmax.f32 %v3057_v32, %v8181_v24  ;;  %v3378_v37 = vmax.f32 %v3218_v2, %v3220_v40 }
 0x22c   : > { %v3507_v33 = vmax.f32 %v3379_v25, %v3223_v4  ;;  %v3383_v12 = vmax.f32 %v3223_v4, %v3225_v28  ;;  %v3765_v29 = vrot.slane %v3508_v44, 1  ;;  %v4085_v57 = vrot.slane %v3508_v44, 2 }
 0x22d   : > { %v3509_v43 = vmax.f32 %v3381_v17, %v3225_v28  ;;  %v3377_v23 = vmax.f32 %v3217_v14, %v3219_v8  ;;  %v3768_v18 = vrot.slane %v3510_v20, 1  ;;  %v3506_v48 = vmax.f32 %v3378_v37, %v10335_v61 }
 0x22e   : > { %v3764_v7 = vrot.slane %v3507_v33, 1  ;;  %v4084_v53 = vrot.slane %v3507_v33, 2  ;;  %v4088_v62 = vrot.slane %v3510_v20, 2  ;;  %v3384_v40 = vmax.f32 %v10340_v26, %v10345_v1  ;;  %v10346_v26 = vld [vmem:[#allocation36_spill] sm:$0xff] }
 0x22f   : > { %v3767_v27 = vrot.slane %v3509_v43, 1  ;;  %v4087_v41 = vrot.slane %v3509_v43, 2  ;;  %v3505_v42 = vmax.f32 %v3377_v23, %v3221_v60  ;;  %v3762_v44 = vrot.slane %v3506_v48, 1 }
 0x230   : > { %v3766_v32 = vsel %vm1525_vm0, %v3764_v7, %v3765_v29  ;;  %v4086_v25 = vsel %vm2226_vm1, %v4084_v53, %v4085_v57  ;;  %v4082_v4 = vrot.slane %v3506_v48, 2  ;;  %v3511_v61 = vmax.f32 %v3383_v12, %v3227_v36 }
 0x231   : > { %v4018_v14 = vmax.f32 %v3507_v33, %v3766_v32  ;;  %v3769_v8 = vsel %vm1525_vm0, %v3767_v27, %v3768_v18  ;;  %v3761_v23 = vrot.slane %v3505_v42, 1  ;;  %v4081_v20 = vrot.slane %v3505_v42, 2  ;;  %v10347_v33 = vld [vmem:[#allocation41_spill] sm:$0xff] }
 0x232   : > { %v4019_v29 = vmax.f32 %v3509_v43, %v3769_v8  ;;  %v4089_v57 = vsel %vm2226_vm1, %v4087_v41, %v4088_v62  ;;  %v3512_v48 = vmax.f32 %v3384_v40, %v10346_v26  ;;  %v10349_v27 = vld [vmem:[#allocation69_spill] sm:$0xff]  ;;  %v3385_v53 = vmax.f32 %v3225_v28, %v3227_v36  ;;  %v10353_v8 = vld [vmem:[#allocation74_spill] sm:$0xff] }
 0x233   : > { %v4338_v60 = vmax.f32 %v4018_v14, %v4086_v25  ;;  %v10350_v18 = vmax.f32 %v10348_v22, %v10349_v27  ;;  %v3763_v17 = vsel %vm1525_vm0, %v3761_v23, %v3762_v44  ;;  %v4083_v37 = vsel %vm2226_vm1, %v4081_v20, %v4082_v4  ;;  %v10351_v14 = vld [vmem:[#allocation51_spill] sm:$0xff]  ;;  %v10352_v44 = vld [vmem:[#allocation73_spill] sm:$0xff] }
 0x234   : > { %v4339_v7 = vmax.f32 %v4019_v29, %v4089_v57  ;;  %v4017_v32 = vmax.f32 %v3505_v42, %v3763_v17  ;;  %v3770_v43 = vrot.slane %v3511_v61, 1  ;;  %v3771_v41 = vrot.slane %v3512_v48, 1  ;;  %v10355_v29 = vld [vmem:[#allocation50_spill] sm:$0xff] }
 0x235   : > { %v3229_v2 = vmax.f32 %v10350_v18, %v10347_v33  ;;  %4403 = vst.msk [vmem:[%s8221_s21 + $0x8] sm:$0xff] %vm4401_vm4, %v4338_v60  ;;  %v4090_v12 = vrot.slane %v3511_v61, 2  ;;  %v4091_v62 = vrot.slane %v3512_v48, 2  ;;  %v3386_v25 = vmax.f32 %v10345_v1, %v10346_v26 }
 0x236   : > { %4404 = vst.msk [vmem:[%s8221_s21 + $0x10] sm:$0xff] %vm4401_vm4, %v4339_v7  ;;  %v10354_v4 = vmax.f32 %v10352_v44, %v10353_v8  ;;  %v4337_v42 = vmax.f32 %v4017_v32, %v4083_v37  ;;  %v3772_v28 = vsel %vm1525_vm0, %v3770_v43, %v3771_v41  ;;  %v3388_v57 = vmax.f32 %v10346_v26, %v10355_v29  ;;  %v10356_v7 = vld [vmem:[#allocation53_spill] sm:$0xff]  ;;  %v10358_v32 = vld [vmem:[#allocation80_spill] sm:$0xff] }
 0x237   : > { %v3513_v40 = vmax.f32 %v3385_v53, %v3229_v2  ;;  %v3387_v20 = vmax.f32 %v3227_v36, %v3229_v2  ;;  %v4020_v60 = vmax.f32 %v3511_v61, %v3772_v28  ;;  %v4092_v48 = vsel %vm2226_vm1, %v4090_v12, %v4091_v62  ;;  %v10357_v53 = vld [vmem:[#allocation55_spill] sm:$0xff]  ;;  %v10359_v36 = vld [vmem:[#allocation82_spill] sm:$0xff]  ;;  %v10361_v62 = vld [vmem:[#allocation49_spill] sm:$0xff] }
 0x238   : > { %v8241_v23 = vmax.f32 %v10354_v4, %v10351_v14  ;;  %v3514_v1 = vmax.f32 %v3386_v25, %v10355_v29  ;;  %4402 = vst.msk [vmem:[%s8221_s21] sm:$0xff] %vm4401_vm4, %v4337_v42  ;;  %v3516_v37 = vmax.f32 %v3388_v57, %v10356_v7  ;;  %v10360_v43 = vmax.f32 %v10358_v32, %v10359_v36  ;;  %v10362_v25 = vld [vmem:[#allocation79_spill] sm:$0xff]  ;;  %v10363_v44 = vld [vmem:[#allocation81_spill] sm:$0xff] }
 0x239   : > { %v3773_v22 = vrot.slane %v3513_v40, 1  ;;  %v4093_v18 = vrot.slane %v3513_v40, 2  ;;  %v4340_v61 = vmax.f32 %v4020_v60, %v4092_v48  ;;  %v10364_v4 = vmax.f32 %v10362_v25, %v10363_v44 }
 0x23a   : > { %v3515_v17 = vmax.f32 %v3387_v20, %v8241_v23  ;;  %v8256_v41 = vmax.f32 %v10360_v43, %v10357_v53  ;;  %v3774_v26 = vrot.slane %v3514_v1, 1  ;;  %v4094_v12 = vrot.slane %v3514_v1, 2 }
 0x23b   : > { %v8262_v42 = vmax.f32 %v10364_v4, %v10361_v62  ;;  %v3777_v20 = vrot.slane %v3516_v37, 1  ;;  %v4097_v57 = vrot.slane %v3516_v37, 2  ;;  %4405 = vst.msk [vmem:[%s8221_s21 + $0x18] sm:$0xff] %vm4401_vm4, %v4340_v61  ;;  %v3389_v60 = vmax.f32 %v3229_v2, %v8241_v23  ;;  %v10366_v37 = vld [vmem:[#allocation72_spill] sm:$0xff] }
 0x23c   : > { %v3776_v28 = vrot.slane %v3515_v17, 1  ;;  %v4096_v15 = vrot.slane %v3515_v17, 2  ;;  %v3775_v32 = vsel %vm1525_vm0, %v3773_v22, %v3774_v26  ;;  %v4095_v43 = vsel %vm2226_vm1, %v4093_v18, %v4094_v12  ;;  %v10368_v18 = vld [vmem:[#allocation76_spill] sm:$0xff]  ;;  %v10370_v12 = vld [vmem:[#allocation75_spill] sm:$0xff] }
 0x23d   : > { %v3390_v48 = vmax.f32 %v10355_v29, %v10356_v7  ;;  %v4021_v1 = vmax.f32 %v3513_v40, %v3775_v32  ;;  %v10367_v63 = vmax.f32 %v10365_v5, %v10366_v37  ;;  %v3517_v22 = vmax.f32 %v3389_v60, %v8256_v41  ;;  %v10369_v40 = vld [vmem:[#allocation67_spill] sm:$0xff]  ;;  %v10372_v32 = vld [vmem:[#allocation78_spill] sm:$0xff] }
 0x23e   : > { %v3778_v25 = vsel %vm1525_vm0, %v3776_v28, %v3777_v20  ;;  %v4098_v4 = vsel %vm2226_vm1, %v4096_v15, %v4097_v57  ;;  %v1553_v26 = vrot.slane %v10368_v18, 1  ;;  %v10371_v28 = vmax.f32 %v10369_v40, %v10370_v12  ;;  %v10373_v57 = vld [vmem:[#allocation57_spill] sm:$0xff] }
 0x23f   : > { %v708_v61 = vmax.f32 %v10367_v63, %v4617_v31  ;;  %v4022_v45 = vmax.f32 %v3515_v17, %v3778_v25  ;;  %v3518_v2 = vmax.f32 %v3390_v48, %v8262_v42  ;;  %v4341_v29 = vmax.f32 %v4021_v1, %v4095_v43  ;;  %v10374_v48 = vld [vmem:[#allocation77_spill] sm:$0xff]  ;;  %v10376_v1 = vld [vmem:[#allocation60_spill] sm:$0xff] }
 0x240   : > { %v1584_v15 = vrot.slane %v10372_v32, 1  ;;  %v1613_v9 = vrot.slane %v10373_v57, 1  ;;  %v3779_v5 = vrot.slane %v3517_v22, 1  ;;  %v4099_v31 = vrot.slane %v3517_v22, 2 }
 0x241   : > { %v1144_v20 = vmax.f32 %v10371_v28, %v708_v61  ;;  %v4342_v21 = vmax.f32 %v4022_v45, %v4098_v4  ;;  %v3780_v63 = vrot.slane %v3518_v2, 1  ;;  %4406 = vst.msk [vmem:[%s8221_s21 + $0x20] sm:$0xff] %vm4401_vm4, %v4341_v29  ;;  %v4100_v17 = vrot.slane %v3518_v2, 2 }
 0x242   : > { %v10375_v25 = vrot.slane %v10374_v48, 1  ;;  %v1614_v37 = vrot.slane %v10376_v1, 1  ;;  %v2065_v45 = vmax.f32 %v10372_v32, %v1584_v15  ;;  %v2254_v4 = vrot.slane %v10368_v18, 2 }
 0x243   : > { %v1554_v60 = vrot.slane %v1144_v20, 1  ;;  %4407 = vst.msk [vmem:[%s8221_s21 + $0x28] sm:$0xff] %vm4401_vm4, %v4342_v21  ;;  %v3781_v61 = vsel %vm1525_vm0, %v3779_v5, %v3780_v63  ;;  %v4101_v2 = vsel %vm2226_vm1, %v4099_v31, %v4100_v17 }
 0x244   : > { %v1585_v43 = vsel %vm1525_vm0, %v10375_v25, %v1584_v15  ;;  %v4023_v12 = vmax.f32 %v3517_v22, %v3781_v61  ;;  %v1615_v28 = vsel %vm1525_vm0, %v1613_v9, %v1614_v37  ;;  %v2085_v5 = vmax.f32 %v10376_v1, %v1614_v37 }
 0x245   : > { %v2064_v40 = vmax.f32 %v10374_v48, %v1585_v43  ;;  %v1555_v29 = vsel %vm1525_vm0, %v1553_v26, %v1554_v60  ;;  %v2045_v51 = vmax.f32 %v1144_v20, %v1554_v60  ;;  %v2084_v21 = vmax.f32 %v10373_v57, %v1615_v28 }
 0x246   : > { %v2044_v25 = vmax.f32 %v10368_v18, %v1555_v29  ;;  %v4343_v63 = vmax.f32 %v4023_v12, %v4101_v2  ;;  %v2255_v43 = vrot.slane %v1144_v20, 2  ;;  %v2285_v15 = vrot.slane %v10372_v32, 2  ;;  %v10377_v18 = vld [vmem:[#allocation66_spill] sm:$0xff]  ;;  %v10379_v12 = vld [vmem:[#allocation16_spill] sm:$0xff] }
 0x247   : > { %v2314_v22 = vrot.slane %v10373_v57, 2  ;;  %v2315_v61 = vrot.slane %v10376_v1, 2  ;;  %v3391_v26 = vmax.f32 %v8241_v23, %v8256_v41  ;;  %v3392_v9 = vmax.f32 %v10356_v7, %v8262_v42 }
 0x248   : > { %v1616_v31 = vrot.slane %v10377_v18, 1  ;;  %4408 = vst.msk [vmem:[%s8221_s21 + $0x30] sm:$0xff] %vm4401_vm4, %v4343_v63  ;;  %v2256_v17 = vsel %vm2226_vm1, %v2254_v4, %v2255_v43  ;;  %v10378_v20 = vrot.slane %v10374_v48, 2  ;;  %v2746_v60 = vmax.f32 %v2045_v51, %v2255_v43 }
 0x249   : > { %v8317_v57 = vmax.f32 %v2065_v45, %v2285_v15  ;;  %v2316_v1 = vsel %vm2226_vm1, %v2314_v22, %v2315_v61  ;;  %v2745_v37 = vmax.f32 %v2044_v25, %v2256_v17  ;;  %v8322_v41 = vmax.f32 %v2085_v5, %v2315_v61  ;;  %v10382_v22 = vld [vmem:[#allocation24_spill] sm:$0xff] }
 0x24a   : > { %v2286_v32 = vsel %vm2226_vm1, %v10378_v20, %v2285_v15  ;;  %v8324_v7 = vmax.f32 %v2084_v21, %v2316_v1  ;;  %v1617_v4 = vrot.slane %v10379_v12, 1  ;;  %v2317_v48 = vrot.slane %v10377_v18, 2  ;;  %v10380_v21 = vld [vmem:[#allocation23_spill] sm:$0xff] }
 0x24b   : > { %v8320_v23 = vmax.f32 %v2064_v40, %v2286_v32  ;;  %v3076_v42 = vmax.f32 %v2746_v60, %v8317_v57  ;;  %v2318_v51 = vrot.slane %v10379_v12, 2  ;;  %v3077_v45 = vmax.f32 %v8179_v38, %v8181_v24  ;;  %v10384_v20 = vld [vmem:[#allocation31_spill] sm:$0xff]  ;;  %v10386_v60 = vld [vmem:[#allocation28_spill] sm:$0xff] }
 0x24c   : > { %v3078_v40 = vmax.f32 %v8176_v6, %v8187_v19  ;;  %v1618_v28 = vsel %vm1525_vm0, %v1616_v31, %v1617_v4  ;;  %v2087_v25 = vmax.f32 %v10379_v12, %v1617_v4  ;;  %v10381_v5 = vmax.f32 %v10320_v35, %v10318_v30  ;;  %v10388_v12 = vld [vmem:[#allocation34_spill] sm:$0xff] }
 0x24d   : > { %v3075_v2 = vmax.f32 %v2745_v37, %v8320_v23  ;;  %v3236_v29 = vmax.f32 %v3076_v42, %v8322_v41  ;;  %v2086_v15 = vmax.f32 %v10377_v18, %v1618_v28  ;;  %v2319_v38 = vsel %vm2226_vm1, %v2317_v48, %v2318_v51 }
 0x24e   : > { %v3239_v63 = vmax.f32 %v10381_v5, %v10380_v21  ;;  %v10383_v6 = vmax.f32 %v10324_v0, %v10322_v39  ;;  %v8349_v31 = vmax.f32 %v2087_v25, %v2318_v51  ;;  %v10385_v32 = vmax.f32 %v10329_v49, %v10327_v13  ;;  %v10389_v0 = vld [vmem:[#allocation43_spill] sm:$0xff]  ;;  %v10391_v5 = vld [vmem:[#allocation42_spill] sm:$0xff] }
 0x24f   : > { %v3235_v43 = vmax.f32 %v3075_v2, %v8324_v7  ;;  %v3520_v17 = vmax.f32 %v3392_v9, %v3236_v29  ;;  %v10387_v1 = vmax.f32 %v10333_v34, %v10331_v58  ;;  %v8359_v42 = vmax.f32 %v2086_v15, %v2319_v38 }
 0x250   : > { %v3240_v61 = vmax.f32 %v10383_v6, %v10382_v22  ;;  %v3241_v35 = vmax.f32 %v10385_v32, %v10384_v20  ;;  %v10390_v9 = vmax.f32 %v10338_v55, %v10336_v54  ;;  %v3238_v49 = vmax.f32 %v3078_v40, %v8349_v31 }
 0x251   : > { %v3243_v18 = vmax.f32 %v10387_v1, %v10386_v60  ;;  %v3519_v37 = vmax.f32 %v3391_v26, %v3235_v43  ;;  %v3783_v2 = vrot.slane %v3520_v17, 1  ;;  %v4103_v51 = vrot.slane %v3520_v17, 2 }
 0x252   : > { %v3396_v4 = vmax.f32 %v3240_v61, %v10388_v12  ;;  %v3245_v48 = vmax.f32 %v10390_v9, %v10389_v0  ;;  %v3395_v29 = vmax.f32 %v3239_v63, %v3241_v35  ;;  %v3237_v34 = vmax.f32 %v3077_v45, %v8359_v42 }
 0x253   : > { %v3782_v28 = vrot.slane %v3519_v37, 1  ;;  %v4102_v25 = vrot.slane %v3519_v37, 2  ;;  %v3394_v43 = vmax.f32 %v3238_v49, %v3240_v61  ;;  %v3397_v38 = vmax.f32 %v3241_v35, %v3243_v18  ;;  %v10392_v49 = vld [vmem:[#allocation46_spill] sm:$0xff] }
 0x254   : > { %v3524_v26 = vmax.f32 %v3396_v4, %v10391_v5  ;;  %v3523_v15 = vmax.f32 %v3395_v29, %v3243_v18  ;;  %v3398_v6 = vmax.f32 %v10388_v12, %v10391_v5  ;;  %v3393_v17 = vmax.f32 %v3237_v34, %v3239_v63 }
 0x255   : > { %v3784_v55 = vsel %vm1525_vm0, %v3782_v28, %v3783_v2  ;;  %v4104_v32 = vsel %vm2226_vm1, %v4102_v25, %v4103_v51  ;;  %v3522_v9 = vmax.f32 %v3394_v43, %v10388_v12  ;;  %v3525_v61 = vmax.f32 %v3397_v38, %v3245_v48 }
 0x256   : > { %v3789_v1 = vrot.slane %v3524_v26, 1  ;;  %v4024_v40 = vmax.f32 %v3519_v37, %v3784_v55  ;;  %v3788_v46 = vrot.slane %v3523_v15, 1  ;;  %v4108_v45 = vrot.slane %v3523_v15, 2 }
 0x257   : > { %v3521_v59 = vmax.f32 %v3393_v17, %v3241_v35  ;;  %v4109_v4 = vrot.slane %v3524_v26, 2  ;;  %v3526_v29 = vmax.f32 %v3398_v6, %v10392_v49  ;;  %v3786_v10 = vrot.slane %v3522_v9, 1  ;;  %v10393_v6 = vld [vmem:[#allocation54_spill] sm:$0xff] }
 0x258   : > { %v4344_v52 = vmax.f32 %v4024_v40, %v4104_v32  ;;  %v4106_v3 = vrot.slane %v3522_v9, 2  ;;  %v3790_v2 = vsel %vm1525_vm0, %v3788_v46, %v3789_v1  ;;  %v3791_v12 = vrot.slane %v3525_v61, 1 }
 0x259   : > { %v3785_v28 = vrot.slane %v3521_v59, 1  ;;  %v4105_v51 = vrot.slane %v3521_v59, 2  ;;  %v4026_v63 = vmax.f32 %v3523_v15, %v3790_v2  ;;  %v4110_v37 = vsel %vm2226_vm1, %v4108_v45, %v4109_v4  ;;  %v10397_v4 = vld [vmem:[#allocation64_spill] sm:$0xff]  ;;  %v10398_v2 = vld [vmem:[#allocation87_spill] sm:$0xff] }
 0x25a   : > { %4409 = vst.msk [vmem:[%s8221_s21 + $0x38] sm:$0xff] %vm4401_vm4, %v4344_v52  ;;  %v3792_v25 = vrot.slane %v3526_v29, 1  ;;  %v4111_v35 = vrot.slane %v3525_v61, 2  ;;  %v4112_v34 = vrot.slane %v3526_v29, 2  ;;  %v10394_v46 = vmax.f32 %v10343_v11, %v10341_v47 }
 0x25b   : > { %v3787_v26 = vsel %vm1525_vm0, %v3785_v28, %v3786_v10  ;;  %v4107_v43 = vsel %vm2226_vm1, %v4105_v51, %v4106_v3  ;;  %v4346_v38 = vmax.f32 %v4026_v63, %v4110_v37  ;;  %v3399_v17 = vmax.f32 %v3243_v18, %v3245_v48  ;;  %v10395_v3 = vld [vmem:[#allocation84_spill] sm:$0xff]  ;;  %v10400_v37 = vld [vmem:[#allocation70_spill] sm:$0xff] }
 0x25c   : > { %v3247_v55 = vmax.f32 %v10394_v46, %v10393_v6  ;;  %v4025_v32 = vmax.f32 %v3521_v59, %v3787_v26  ;;  %v3793_v15 = vsel %vm1525_vm0, %v3791_v12, %v3792_v25  ;;  %v4113_v52 = vsel %vm2226_vm1, %v4111_v35, %v4112_v34  ;;  %v10401_v46 = vld [vmem:[#allocation88_spill] sm:$0xff] }
 0x25d   : > { %4411 = vst.msk [vmem:[%s8221_s21 + $0x48] sm:$0xff] %vm4401_vm4, %v4346_v38  ;;  %v4027_v1 = vmax.f32 %v3525_v61, %v3793_v15  ;;  %v3400_v10 = vmax.f32 %v10391_v5, %v10392_v49  ;;  %v10396_v40 = vmax.f32 %v10349_v27, %v10347_v33  ;;  %v3402_v29 = vmax.f32 %v10392_v49, %v10397_v4 }
 0x25e   : > { %v3401_v9 = vmax.f32 %v3245_v48, %v3247_v55  ;;  %v4345_v59 = vmax.f32 %v4025_v32, %v4107_v43  ;;  %v3527_v45 = vmax.f32 %v3399_v17, %v3247_v55  ;;  %v10399_v18 = vmax.f32 %v10353_v8, %v10351_v14 }
 0x25f   : > { %v3249_v11 = vmax.f32 %v10396_v40, %v10395_v3  ;;  %v4347_v28 = vmax.f32 %v4027_v1, %v4113_v52  ;;  %v3528_v5 = vmax.f32 %v3400_v10, %v10397_v4  ;;  %v3530_v12 = vmax.f32 %v3402_v29, %v10400_v37 }
 0x260   : > { %v8401_v61 = vmax.f32 %v10399_v18, %v10398_v2  ;;  %4410 = vst.msk [vmem:[%s8221_s21 + $0x40] sm:$0xff] %vm4401_vm4, %v4345_v59  ;;  %v3794_v27 = vrot.slane %v3527_v45, 1  ;;  %v4114_v48 = vrot.slane %v3527_v45, 2  ;;  %v3404_v49 = vmax.f32 %v10397_v4, %v10400_v37 }
 0x261   : > { %v3529_v51 = vmax.f32 %v3401_v9, %v3249_v11  ;;  %v3403_v63 = vmax.f32 %v3247_v55, %v3249_v11  ;;  %4412 = vst.msk [vmem:[%s8221_s21 + $0x50] sm:$0xff] %vm4401_vm4, %v4347_v28  ;;  %v3795_v25 = vrot.slane %v3528_v5, 1  ;;  %v4115_v8 = vrot.slane %v3528_v5, 2  ;;  %v10402_v5 = vld [vmem:[#allocation93_spill] sm:$0xff] }
 0x262   : > { %v3798_v26 = vrot.slane %v3530_v12, 1  ;;  %v4118_v43 = vrot.slane %v3530_v12, 2  ;;  %v3532_v55 = vmax.f32 %v3404_v49, %v10401_v46  ;;  %v3093_v52 = vmax.f32 %v10359_v36, %v10357_v53 }
 0x263   : > { %v3797_v35 = vrot.slane %v3529_v51, 1  ;;  %v4117_v34 = vrot.slane %v3529_v51, 2  ;;  %v3531_v38 = vmax.f32 %v3403_v63, %v8401_v61  ;;  %v3796_v32 = vsel %vm1525_vm0, %v3794_v27, %v3795_v25  ;;  %v10403_v27 = vld [vmem:[#allocation90_spill] sm:$0xff] }
 0x264   : > { %v4116_v15 = vsel %vm2226_vm1, %v4114_v48, %v4115_v8  ;;  %v3094_v17 = vmax.f32 %v10363_v44, %v10361_v62  ;;  %v4028_v1 = vmax.f32 %v3527_v45, %v3796_v32  ;;  %v3801_v4 = vrot.slane %v3532_v55, 1  ;;  %v10404_v8 = vld [vmem:[#allocation86_spill] sm:$0xff] }
 0x265   : > { %v3799_v10 = vsel %vm1525_vm0, %v3797_v35, %v3798_v26  ;;  %v4119_v40 = vsel %vm2226_vm1, %v4117_v34, %v4118_v43  ;;  %v3800_v9 = vrot.slane %v3531_v38, 1  ;;  %v4120_v29 = vrot.slane %v3531_v38, 2  ;;  %v10405_v34 = vld [vmem:[#allocation89_spill] sm:$0xff] }
 0x266   : > { %v4029_v59 = vmax.f32 %v3529_v51, %v3799_v10  ;;  %v4121_v18 = vrot.slane %v3532_v55, 2  ;;  %v4348_v28 = vmax.f32 %v4028_v1, %v4116_v15  ;;  %v3253_v63 = vmax.f32 %v3093_v52, %v10402_v5 }
 0x267   : > { %v3254_v36 = vmax.f32 %v3094_v17, %v10403_v27  ;;  %v3405_v48 = vmax.f32 %v3249_v11, %v8401_v61  ;;  %v3802_v45 = vsel %vm1525_vm0, %v3800_v9, %v3801_v4  ;;  %v3406_v49 = vmax.f32 %v10400_v37, %v10401_v46 }
 0x268   : > { %v4349_v44 = vmax.f32 %v4029_v59, %v4119_v40  ;;  %v4122_v12 = vsel %vm2226_vm1, %v4120_v29, %v4121_v18  ;;  %4413 = vst.msk [vmem:[%s8221_s21 + $0x58] sm:$0xff] %vm4401_vm4, %v4348_v28  ;;  %v4030_v51 = vmax.f32 %v3531_v38, %v3802_v45  ;;  %v1643_v35 = vrot.slane %v10404_v8, 1  ;;  %v10406_v45 = vld [vmem:[#allocation97_spill] sm:$0xff] }
 0x269   : > { %v3533_v25 = vmax.f32 %v3405_v48, %v3253_v63  ;;  %v1644_v26 = vrot.slane %v10405_v34, 1  ;;  %v3534_v11 = vmax.f32 %v3406_v49, %v3254_v36  ;;  %v2344_v43 = vrot.slane %v10404_v8, 2  ;;  %v10407_v49 = vld [vmem:[#allocation99_spill] sm:$0xff] }
 0x26a   : > { %4414 = vst.msk [vmem:[%s8221_s21 + $0x60] sm:$0xff] %vm4401_vm4, %v4349_v44  ;;  %v2345_v55 = vrot.slane %v10405_v34, 2  ;;  %v3095_v32 = vmax.f32 %v8320_v23, %v8324_v7  ;;  %v4350_v37 = vmax.f32 %v4030_v51, %v4122_v12  ;;  %v3096_v59 = vmax.f32 %v8317_v57, %v8322_v41 }
 0x26b   : > { %v3803_v15 = vrot.slane %v3533_v25, 1  ;;  %v4123_v52 = vrot.slane %v3533_v25, 2  ;;  %v1645_v38 = vsel %vm1525_vm0, %v1643_v35, %v1644_v26  ;;  %v3804_v17 = vrot.slane %v3534_v11, 1 }
 0x26c   : > { %v4124_v1 = vrot.slane %v3534_v11, 2  ;;  %v2104_v10 = vmax.f32 %v10404_v8, %v1645_v38  ;;  %v2105_v40 = vmax.f32 %v10405_v34, %v1644_v26  ;;  %4415 = vst.msk [vmem:[%s8221_s21 + $0x68] sm:$0xff] %vm4401_vm4, %v4350_v37  ;;  %v2346_v9 = vsel %vm2226_vm1, %v2344_v43, %v2345_v55  ;;  %v10408_v37 = vld [vmem:[#allocation103_spill] sm:$0xff] }
 0x26d   : > { %v3407_v23 = vmax.f32 %v8401_v61, %v3253_v63  ;;  %v3408_v4 = vmax.f32 %v10401_v46, %v3254_v36  ;;  %v3805_v29 = vsel %vm1525_vm0, %v3803_v15, %v3804_v17  ;;  %v1646_v12 = vrot.slane %v10406_v45, 1  ;;  %v10412_v17 = vld [vmem:[#allocation107_spill] sm:$0xff] }
 0x26e   : > { %v4125_v18 = vsel %vm2226_vm1, %v4123_v52, %v4124_v1  ;;  %v8450_v28 = vmax.f32 %v2104_v10, %v2346_v9  ;;  %v8452_v48 = vmax.f32 %v2105_v40, %v2345_v55  ;;  %v4031_v44 = vmax.f32 %v3533_v25, %v3805_v29  ;;  %v10410_v52 = vld [vmem:[#allocation102_spill] sm:$0xff] }
 0x26f   : > { %v1647_v51 = vrot.slane %v10407_v49, 1  ;;  %v2347_v57 = vrot.slane %v10406_v45, 2  ;;  %v2348_v63 = vrot.slane %v10407_v49, 2  ;;  %v3097_v36 = vmax.f32 %v8181_v24, %v8359_v42 }
 0x270   : > { %v3255_v61 = vmax.f32 %v3095_v32, %v8450_v28  ;;  %v3256_v46 = vmax.f32 %v3096_v59, %v8452_v48  ;;  %v4351_v8 = vmax.f32 %v4031_v44, %v4125_v18  ;;  %v3098_v34 = vmax.f32 %v8187_v19, %v8349_v31 }
 0x271   : > { %v1648_v35 = vsel %vm1525_vm0, %v1646_v12, %v1647_v51  ;;  %v2107_v25 = vmax.f32 %v10407_v49, %v1647_v51  ;;  %v2349_v55 = vsel %vm2226_vm1, %v2347_v57, %v2348_v63  ;;  %v10409_v24 = vmax.f32 %v10318_v30, %v10380_v21  ;;  %v10414_v30 = vld [vmem:[#allocation109_spill] sm:$0xff] }
 0x272   : > { %v3535_v26 = vmax.f32 %v3407_v23, %v3255_v61  ;;  %v3536_v11 = vmax.f32 %v3408_v4, %v3256_v46  ;;  %v2106_v43 = vmax.f32 %v10406_v45, %v1648_v35  ;;  %4416 = vst.msk [vmem:[%s8221_s21 + $0x70] sm:$0xff] %vm4401_vm4, %v4351_v8  ;;  %v10411_v38 = vmax.f32 %v10322_v39, %v10382_v22  ;;  %v10417_v51 = vld [vmem:[#allocation113_spill] sm:$0xff] }
 0x273   : > { %v8470_v32 = vmax.f32 %v2107_v25, %v2348_v63  ;;  %v3259_v15 = vmax.f32 %v10409_v24, %v10408_v37  ;;  %v10413_v1 = vmax.f32 %v10327_v13, %v10384_v20  ;;  %v10415_v18 = vmax.f32 %v10331_v58, %v10386_v60  ;;  %v10416_v13 = vld [vmem:[#allocation12_spill] sm:$0xff] }
 0x274   : > { %v3260_v19 = vmax.f32 %v10411_v38, %v10410_v52  ;;  %v3806_v40 = vrot.slane %v3535_v26, 1  ;;  %v3807_v9 = vrot.slane %v3536_v11, 1  ;;  %v4126_v59 = vrot.slane %v3535_v26, 2  ;;  %v10419_v58 = vld [vmem:[#allocation20_spill] sm:$0xff] }
 0x275   : > { %v3261_v10 = vmax.f32 %v10413_v1, %v10412_v17  ;;  %v4127_v23 = vrot.slane %v3536_v11, 2  ;;  %v8484_v4 = vmax.f32 %v2106_v43, %v2349_v55  ;;  %v3258_v29 = vmax.f32 %v3098_v34, %v8470_v32  ;;  %v10420_v43 = vld [vmem:[#allocation117_spill] sm:$0xff] }
 0x276   : > { %v3263_v44 = vmax.f32 %v10415_v18, %v10414_v30  ;;  %v3808_v45 = vsel %vm1525_vm0, %v3806_v40, %v3807_v9  ;;  %v3412_v49 = vmax.f32 %v3260_v19, %v10416_v13  ;;  %v10418_v57 = vmax.f32 %v10336_v54, %v10389_v0  ;;  %v10422_v18 = vld [vmem:[#allocation114_spill] sm:$0xff] }
 0x277   : > { %v3411_v39 = vmax.f32 %v3259_v15, %v3261_v10  ;;  %v4128_v12 = vsel %vm2226_vm1, %v4126_v59, %v4127_v23  ;;  %v4032_v46 = vmax.f32 %v3535_v26, %v3808_v45  ;;  %v3257_v63 = vmax.f32 %v3097_v36, %v8484_v4 }
 0x278   : > { %v3265_v61 = vmax.f32 %v10418_v57, %v10417_v51  ;;  %v3410_v8 = vmax.f32 %v3258_v29, %v3260_v19  ;;  %v3540_v25 = vmax.f32 %v3412_v49, %v10419_v58  ;;  %v3413_v34 = vmax.f32 %v3261_v10, %v3263_v44 }
 0x279   : > { %v3539_v35 = vmax.f32 %v3411_v39, %v3263_v44  ;;  %v3414_v11 = vmax.f32 %v10416_v13, %v10419_v58  ;;  %v10421_v55 = vmax.f32 %v10341_v47, %v10393_v6  ;;  %v4352_v38 = vmax.f32 %v4032_v46, %v4128_v12 }
 0x27a   : > { %v3409_v54 = vmax.f32 %v3257_v63, %v3259_v15  ;;  %v3538_v26 = vmax.f32 %v3410_v8, %v10416_v13  ;;  %v3813_v40 = vrot.slane %v3540_v25, 1  ;;  %v4133_v19 = vrot.slane %v3540_v25, 2  ;;  %v10423_v25 = vld [vmem:[#allocation119_spill] sm:$0xff] }
 0x27b   : > { %v3267_v24 = vmax.f32 %v10421_v55, %v10420_v43  ;;  %v3812_v1 = vrot.slane %v3539_v35, 1  ;;  %v4132_v36 = vrot.slane %v3539_v35, 2  ;;  %v3541_v9 = vmax.f32 %v3413_v34, %v3265_v61  ;;  %4417 = vst.msk [vmem:[%s8221_s21 + $0x78] sm:$0xff] %vm4401_vm4, %v4352_v38 }
 0x27c   : > { %v3537_v59 = vmax.f32 %v3409_v54, %v3261_v10  ;;  %v3810_v23 = vrot.slane %v3538_v26, 1  ;;  %v4130_v29 = vrot.slane %v3538_v26, 2  ;;  %v3542_v39 = vmax.f32 %v3414_v11, %v10422_v18 }
 0x27d   : > { %v3814_v45 = vsel %vm1525_vm0, %v3812_v1, %v3813_v40  ;;  %v4134_v47 = vsel %vm2226_vm1, %v4132_v36, %v4133_v19  ;;  %v3815_v12 = vrot.slane %v3541_v9, 1  ;;  %v4135_v15 = vrot.slane %v3541_v9, 2 }
 0x27e   : > { %v3809_v49 = vrot.slane %v3537_v59, 1  ;;  %v4129_v13 = vrot.slane %v3537_v59, 2  ;;  %v4034_v57 = vmax.f32 %v3539_v35, %v3814_v45  ;;  %v3816_v46 = vrot.slane %v3542_v39, 1 }
 0x27f   : > { %v4136_v63 = vrot.slane %v3542_v39, 2  ;;  %v3415_v8 = vmax.f32 %v3263_v44, %v3265_v61  ;;  %v3416_v10 = vmax.f32 %v10419_v58, %v10422_v18  ;;  %v10424_v34 = vmax.f32 %v10347_v33, %v10395_v3  ;;  %v10425_v58 = vld [vmem:[#allocation118_spill] sm:$0xff] }
 0x280   : > { %v3811_v55 = vsel %vm1525_vm0, %v3809_v49, %v3810_v23  ;;  %v4131_v38 = vsel %vm2226_vm1, %v4129_v13, %v4130_v29  ;;  %v4354_v54 = vmax.f32 %v4034_v57, %v4134_v47  ;;  %v3817_v26 = vsel %vm1525_vm0, %v3815_v12, %v3816_v46  ;;  %v10426_v23 = vld [vmem:[#allocation122_spill] sm:$0xff]  ;;  %v10428_v13 = vld [vmem:[#allocation120_spill] sm:$0xff] }
 0x281   : > { %v3269_v11 = vmax.f32 %v10424_v34, %v10423_v25  ;;  %v4033_v1 = vmax.f32 %v3537_v59, %v3811_v55  ;;  %v4035_v35 = vmax.f32 %v3541_v9, %v3817_v26  ;;  %v4137_v44 = vsel %vm2226_vm1, %v4135_v15, %v4136_v63 }
 0x282   : > { %v3543_v40 = vmax.f32 %v3415_v8, %v3267_v24  ;;  %4419 = vst.msk [vmem:[%s8221_s21 + $0x88] sm:$0xff] %vm4401_vm4, %v4354_v54  ;;  %v3544_v36 = vmax.f32 %v3416_v10, %v10425_v58  ;;  %v3417_v19 = vmax.f32 %v3265_v61, %v3267_v24  ;;  %v3418_v33 = vmax.f32 %v10422_v18, %v10425_v58 }
 0x283   : > { %v10427_v29 = vmax.f32 %v10351_v14, %v10398_v2  ;;  %v4353_v9 = vmax.f32 %v4033_v1, %v4131_v38  ;;  %v4355_v59 = vmax.f32 %v4035_v35, %v4137_v44  ;;  %v3419_v61 = vmax.f32 %v3267_v24, %v3269_v11  ;;  %v10430_v35 = vld [vmem:[#allocation131_spill] sm:$0xff]  ;;  %v10431_v44 = vld [vmem:[#allocation129_spill] sm:$0xff] }
 0x284   : > { %v3818_v45 = vrot.slane %v3543_v40, 1  ;;  %v4138_v47 = vrot.slane %v3543_v40, 2  ;;  %v3819_v12 = vrot.slane %v3544_v36, 1  ;;  %v4139_v15 = vrot.slane %v3544_v36, 2 }
 0x285   : > { %v8531_v39 = vmax.f32 %v10427_v29, %v10426_v23  ;;  %v3545_v49 = vmax.f32 %v3417_v19, %v3269_v11  ;;  %v3546_v57 = vmax.f32 %v3418_v33, %v10428_v13  ;;  %4418 = vst.msk [vmem:[%s8221_s21 + $0x80] sm:$0xff] %vm4401_vm4, %v4353_v9  ;;  %v3420_v18 = vmax.f32 %v10425_v58, %v10428_v13 }
 0x286   : > { %v3113_v14 = vmax.f32 %v10357_v53, %v10402_v5  ;;  %v3114_v46 = vmax.f32 %v10361_v62, %v10403_v27  ;;  %4420 = vst.msk [vmem:[%s8221_s21 + $0x90] sm:$0xff] %vm4401_vm4, %v4355_v59  ;;  %v3820_v63 = vsel %vm1525_vm0, %v3818_v45, %v3819_v12  ;;  %v4140_v8 = vsel %vm2226_vm1, %v4138_v47, %v4139_v15  ;;  %v10429_v53 = vld [vmem:[#allocation123_spill] sm:$0xff]  ;;  %v10432_v15 = vld [vmem:[#allocation124_spill] sm:$0xff] }
 0x287   : > { %v3821_v10 = vrot.slane %v3545_v49, 1  ;;  %v3822_v34 = vrot.slane %v3546_v57, 1  ;;  %v4036_v55 = vmax.f32 %v3543_v40, %v3820_v63  ;;  %v4141_v24 = vrot.slane %v3545_v49, 2 }
 0x288   : > { %v4142_v38 = vrot.slane %v3546_v57, 2  ;;  %v3547_v54 = vmax.f32 %v3419_v61, %v8531_v39  ;;  %v3548_v1 = vmax.f32 %v3420_v18, %v10429_v53  ;;  %v3273_v62 = vmax.f32 %v3113_v14, %v10430_v35  ;;  %v10433_v61 = vld [vmem:[#allocation125_spill] sm:$0xff] }
 0x289   : > { %v3823_v26 = vsel %vm1525_vm0, %v3821_v10, %v3822_v34  ;;  %v3274_v58 = vmax.f32 %v3114_v46, %v10431_v44  ;;  %v4356_v36 = vmax.f32 %v4036_v55, %v4140_v8  ;;  %v3421_v45 = vmax.f32 %v3269_v11, %v8531_v39 }
 0x28a   : > { %v4037_v19 = vmax.f32 %v3545_v49, %v3823_v26  ;;  %v4143_v33 = vsel %vm2226_vm1, %v4141_v24, %v4142_v38  ;;  %v3824_v29 = vrot.slane %v3547_v54, 1  ;;  %v3825_v40 = vrot.slane %v3548_v1, 1 }
 0x28b   : > { %v4144_v9 = vrot.slane %v3547_v54, 2  ;;  %v4145_v59 = vrot.slane %v3548_v1, 2  ;;  %4421 = vst.msk [vmem:[%s8221_s21 + $0x98] sm:$0xff] %vm4401_vm4, %v4356_v36  ;;  %v3422_v12 = vmax.f32 %v10428_v13, %v10429_v53  ;;  %v1673_v57 = vrot.slane %v10432_v15, 1 }
 0x28c   : > { %v4357_v47 = vmax.f32 %v4037_v19, %v4143_v33  ;;  %v1674_v18 = vrot.slane %v10433_v61, 1  ;;  %v3826_v49 = vsel %vm1525_vm0, %v3824_v29, %v3825_v40  ;;  %v3549_v46 = vmax.f32 %v3421_v45, %v3273_v62 }
 0x28d   : > { %v4146_v14 = vsel %vm2226_vm1, %v4144_v9, %v4145_v59  ;;  %v2374_v63 = vrot.slane %v10432_v15, 2  ;;  %v4038_v11 = vmax.f32 %v3547_v54, %v3826_v49  ;;  %v3550_v8 = vmax.f32 %v3422_v12, %v3274_v58 }
 0x28e   : > { %4422 = vst.msk [vmem:[%s8221_s21 + $0xa0] sm:$0xff] %vm4401_vm4, %v4357_v47  ;;  %v1675_v10 = vsel %vm1525_vm0, %v1673_v57, %v1674_v18  ;;  %v2125_v13 = vmax.f32 %v10433_v61, %v1674_v18  ;;  %v3827_v34 = vrot.slane %v3549_v46, 1  ;;  %v4147_v55 = vrot.slane %v3549_v46, 2 }
 0x28f   : > { %v2124_v24 = vmax.f32 %v10432_v15, %v1675_v10  ;;  %v2375_v38 = vrot.slane %v10433_v61, 2  ;;  %v4358_v26 = vmax.f32 %v4038_v11, %v4146_v14  ;;  %v3828_v1 = vrot.slane %v3550_v8, 1  ;;  %v10434_v15 = vld [vmem:[#allocation61_spill] sm:$0xff]  ;;  %v10435_v61 = vld [vmem:[#allocation63_spill] sm:$0xff] }
 0x290   : > { %v4148_v36 = vrot.slane %v3550_v8, 2  ;;  %v3115_v19 = vmax.f32 %v8324_v7, %v8450_v28  ;;  %v3116_v29 = vmax.f32 %v8322_v41, %v8452_v48  ;;  %v3423_v40 = vmax.f32 %v8531_v39, %v3273_v62 }
 0x291   : > { %v2376_v54 = vsel %vm2226_vm1, %v2374_v63, %v2375_v38  ;;  %v8571_v33 = vmax.f32 %v2125_v13, %v2375_v38  ;;  %4423 = vst.msk [vmem:[%s8221_s21 + $0xa8] sm:$0xff] %vm4401_vm4, %v4358_v26  ;;  %v3829_v9 = vsel %vm1525_vm0, %v3827_v34, %v3828_v1  ;;  %v3424_v47 = vmax.f32 %v10429_v53, %v3274_v58 }
 0x292   : > { %v4149_v59 = vsel %vm2226_vm1, %v4147_v55, %v4148_v36  ;;  %v8580_v45 = vmax.f32 %v2124_v24, %v2376_v54  ;;  %v4039_v7 = vmax.f32 %v3549_v46, %v3829_v9  ;;  %v1676_v57 = vrot.slane %v10434_v15, 1 }
 0x293   : > { %v3276_v12 = vmax.f32 %v3116_v29, %v8571_v33  ;;  %v1677_v41 = vrot.slane %v10435_v61, 1  ;;  %v2377_v62 = vrot.slane %v10434_v15, 2  ;;  %v2378_v18 = vrot.slane %v10435_v61, 2 }
 0x294   : > { %v3275_v39 = vmax.f32 %v3115_v19, %v8580_v45  ;;  %v3117_v49 = vmax.f32 %v8359_v42, %v8484_v4  ;;  %v4359_v14 = vmax.f32 %v4039_v7, %v4149_v59  ;;  %v3118_v10 = vmax.f32 %v8349_v31, %v8470_v32  ;;  %v10436_v42 = vld [vmem:[#allocation135_spill] sm:$0xff]  ;;  %v10438_v19 = vld [vmem:[#allocation22_spill] sm:$0xff] }
 0x295   : > { %v3552_v63 = vmax.f32 %v3424_v47, %v3276_v12  ;;  %v1678_v53 = vsel %vm1525_vm0, %v1676_v57, %v1677_v41  ;;  %v2127_v58 = vmax.f32 %v10435_v61, %v1677_v41  ;;  %v2379_v8 = vsel %vm2226_vm1, %v2377_v62, %v2378_v18  ;;  %v10442_v47 = vld [vmem:[#allocation35_spill] sm:$0xff] }
 0x296   : > { %v3551_v46 = vmax.f32 %v3423_v40, %v3275_v39  ;;  %v2126_v11 = vmax.f32 %v10434_v15, %v1678_v53  ;;  %4424 = vst.msk [vmem:[%s8221_s21 + $0xb0] sm:$0xff] %vm4401_vm4, %v4359_v14  ;;  %v10437_v24 = vmax.f32 %v10380_v21, %v10408_v37  ;;  %v10439_v54 = vmax.f32 %v10382_v22, %v10410_v52  ;;  %v10440_v40 = vld [vmem:[#allocation138_spill] sm:$0xff]  ;;  %v10444_v12 = vld [vmem:[#allocation139_spill] sm:$0xff]  ;;  %v10446_v39 = vld [vmem:[#allocation105_spill] sm:$0xff] }
 0x297   : > { %v3831_v13 = vrot.slane %v3552_v63, 1  ;;  %v4151_v34 = vrot.slane %v3552_v63, 2  ;;  %v8599_v55 = vmax.f32 %v2127_v58, %v2378_v18  ;;  %v10441_v9 = vmax.f32 %v10384_v20, %v10412_v17  ;;  %v10447_v53 = vld [vmem:[#allocation44_spill] sm:$0xff] }
 0x298   : > { %v3279_v38 = vmax.f32 %v10437_v24, %v10436_v42  ;;  %v3830_v26 = vrot.slane %v3551_v46, 1  ;;  %v4150_v1 = vrot.slane %v3551_v46, 2  ;;  %v8605_v36 = vmax.f32 %v2126_v11, %v2379_v8  ;;  %v10448_v11 = vld [vmem:[#allocation141_spill] sm:$0xff] }
 0x299   : > { %v3280_v31 = vmax.f32 %v10439_v54, %v10438_v19  ;;  %v3278_v29 = vmax.f32 %v3118_v10, %v8599_v55  ;;  %v3281_v59 = vmax.f32 %v10441_v9, %v10440_v40  ;;  %v10443_v21 = vmax.f32 %v10386_v60, %v10414_v30  ;;  %v10450_v54 = vld [vmem:[#allocation37_spill] sm:$0xff] }
 0x29a   : > { %v10445_v15 = vmax.f32 %v10389_v0, %v10417_v51  ;;  %v3832_v22 = vsel %vm1525_vm0, %v3830_v26, %v3831_v13  ;;  %v4152_v61 = vsel %vm2226_vm1, %v4150_v1, %v4151_v34  ;;  %v3277_v41 = vmax.f32 %v3117_v49, %v8605_v36 }
 0x29b   : > { %v3283_v7 = vmax.f32 %v10443_v21, %v10442_v47  ;;  %v3428_v62 = vmax.f32 %v3280_v31, %v10446_v39  ;;  %v4040_v20 = vmax.f32 %v3551_v46, %v3832_v22  ;;  %v3426_v18 = vmax.f32 %v3278_v29, %v3280_v31 }
 0x29c   : > { %v3285_v57 = vmax.f32 %v10445_v15, %v10444_v12  ;;  %v3427_v14 = vmax.f32 %v3279_v38, %v3281_v59  ;;  %v3425_v60 = vmax.f32 %v3277_v41, %v3279_v38  ;;  %v3430_v0 = vmax.f32 %v10446_v39, %v10447_v53 }
 0x29d   : > { %v3429_v63 = vmax.f32 %v3281_v59, %v3283_v7  ;;  %v3556_v58 = vmax.f32 %v3428_v62, %v10447_v53  ;;  %v10449_v8 = vmax.f32 %v10393_v6, %v10420_v43  ;;  %v4360_v13 = vmax.f32 %v4040_v20, %v4152_v61 }
 0x29e   : > { %v3554_v49 = vmax.f32 %v3426_v18, %v10446_v39  ;;  %v3555_v34 = vmax.f32 %v3427_v14, %v3283_v7  ;;  %v3553_v24 = vmax.f32 %v3425_v60, %v3281_v59  ;;  %v3558_v38 = vmax.f32 %v3430_v0, %v10450_v54 }
 0x29f   : > { %v3287_v10 = vmax.f32 %v10449_v8, %v10448_v11  ;;  %v3557_v46 = vmax.f32 %v3429_v63, %v3285_v57  ;;  %v3837_v26 = vrot.slane %v3556_v58, 1  ;;  %v4157_v1 = vrot.slane %v3556_v58, 2  ;;  %4425 = vst.msk [vmem:[%s8221_s21 + $0xb8] sm:$0xff] %vm4401_vm4, %v4360_v13 }
 0x2a0   : > { %v3834_v31 = vrot.slane %v3554_v49, 1  ;;  %v4154_v29 = vrot.slane %v3554_v49, 2  ;;  %v3836_v9 = vrot.slane %v3555_v34, 1  ;;  %v4156_v21 = vrot.slane %v3555_v34, 2 }
 0x2a1   : > { %v3833_v15 = vrot.slane %v3553_v24, 1  ;;  %v4153_v22 = vrot.slane %v3553_v24, 2  ;;  %v3839_v6 = vrot.slane %v3557_v46, 1  ;;  %v3840_v41 = vrot.slane %v3558_v38, 1 }
 0x2a2   : > { %v3838_v61 = vsel %vm1525_vm0, %v3836_v9, %v3837_v26  ;;  %v4158_v39 = vsel %vm2226_vm1, %v4156_v21, %v4157_v1  ;;  %v4159_v62 = vrot.slane %v3557_v46, 2  ;;  %v4160_v59 = vrot.slane %v3558_v38, 2  ;;  %v10451_v26 = vld [vmem:[#allocation65_spill] sm:$0xff] }
 0x2a3   : > { %v3835_v20 = vsel %vm1525_vm0, %v3833_v15, %v3834_v31  ;;  %v4155_v18 = vsel %vm2226_vm1, %v4153_v22, %v4154_v29  ;;  %v4042_v14 = vmax.f32 %v3555_v34, %v3838_v61  ;;  %v3841_v63 = vsel %vm1525_vm0, %v3839_v6, %v3840_v41  ;;  %v10454_v15 = vld [vmem:[#allocation142_spill] sm:$0xff]  ;;  %v10456_v41 = vld [vmem:[#allocation56_spill] sm:$0xff] }
 0x2a4   : > { %v4041_v60 = vmax.f32 %v3553_v24, %v3835_v20  ;;  %v4043_v58 = vmax.f32 %v3557_v46, %v3841_v63  ;;  %v4161_v0 = vsel %vm2226_vm1, %v4159_v62, %v4160_v59  ;;  %v3431_v8 = vmax.f32 %v3283_v7, %v3285_v57  ;;  %v10453_v24 = vld [vmem:[#allocation52_spill] sm:$0xff] }
 0x2a5   : > { %v4362_v13 = vmax.f32 %v4042_v14, %v4158_v39  ;;  %v3432_v49 = vmax.f32 %v10447_v53, %v10450_v54  ;;  %v10452_v1 = vmax.f32 %v10395_v3, %v10423_v25  ;;  %v3433_v31 = vmax.f32 %v3285_v57, %v3287_v10 }
 0x2a6   : > { %v4361_v34 = vmax.f32 %v4041_v60, %v4155_v18  ;;  %v4363_v29 = vmax.f32 %v4043_v58, %v4161_v0  ;;  %v3559_v9 = vmax.f32 %v3431_v8, %v3287_v10  ;;  %v3434_v46 = vmax.f32 %v10450_v54, %v10453_v24 }
 0x2a7   : > { %v3289_v38 = vmax.f32 %v10452_v1, %v10451_v26  ;;  %4427 = vst.msk [vmem:[%s8221_s21 + $0xc8] sm:$0xff] %vm4401_vm4, %v4362_v13  ;;  %v3560_v7 = vmax.f32 %v3432_v49, %v10453_v24  ;;  %v10455_v53 = vmax.f32 %v10398_v2, %v10426_v23  ;;  %v3436_v54 = vmax.f32 %v10453_v24, %v10456_v41 }
 0x2a8   : > { %4426 = vst.msk [vmem:[%s8221_s21 + $0xc0] sm:$0xff] %vm4401_vm4, %v4361_v34  ;;  %v3842_v57 = vrot.slane %v3559_v9, 1  ;;  %v4162_v6 = vrot.slane %v3559_v9, 2  ;;  %v3562_v61 = vmax.f32 %v3434_v46, %v10456_v41  ;;  %v3133_v0 = vmax.f32 %v10402_v5, %v10430_v35 }
 0x2a9   : > { %v3561_v21 = vmax.f32 %v3433_v31, %v3289_v38  ;;  %v8660_v22 = vmax.f32 %v10455_v53, %v10454_v15  ;;  %v3435_v3 = vmax.f32 %v3287_v10, %v3289_v38  ;;  %4428 = vst.msk [vmem:[%s8221_s21 + $0xd0] sm:$0xff] %vm4401_vm4, %v4363_v29  ;;  %v3843_v39 = vrot.slane %v3560_v7, 1  ;;  %v10457_v10 = vld [vmem:[#allocation143_spill] sm:$0xff]  ;;  %v10458_v53 = vld [vmem:[#allocation148_spill] sm:$0xff] }
 0x2aa   : > { %v4163_v62 = vrot.slane %v3560_v7, 2  ;;  %v3846_v18 = vrot.slane %v3562_v61, 1  ;;  %v4166_v2 = vrot.slane %v3562_v61, 2  ;;  %v3564_v63 = vmax.f32 %v3436_v54, %v10457_v10 }
 0x2ab   : > { %v3845_v59 = vrot.slane %v3561_v21, 1  ;;  %v4165_v20 = vrot.slane %v3561_v21, 2  ;;  %v3563_v14 = vmax.f32 %v3435_v3, %v8660_v22  ;;  %v3844_v60 = vsel %vm1525_vm0, %v3842_v57, %v3843_v39  ;;  %v10459_v57 = vld [vmem:[#allocation146_spill] sm:$0xff] }
 0x2ac   : > { %v4164_v58 = vsel %vm2226_vm1, %v4162_v6, %v4163_v62  ;;  %v3134_v8 = vmax.f32 %v10403_v27, %v10431_v44  ;;  %v4044_v13 = vmax.f32 %v3559_v9, %v3844_v60  ;;  %v3849_v29 = vrot.slane %v3564_v63, 1  ;;  %v10460_v62 = vld [vmem:[#allocation144_spill] sm:$0xff] }
 0x2ad   : > { %v3847_v49 = vsel %vm1525_vm0, %v3845_v59, %v3846_v18  ;;  %v4167_v1 = vsel %vm2226_vm1, %v4165_v20, %v4166_v2  ;;  %v3848_v31 = vrot.slane %v3563_v14, 1  ;;  %v4168_v24 = vrot.slane %v3563_v14, 2  ;;  %v10461_v20 = vld [vmem:[#allocation101_spill] sm:$0xff] }
 0x2ae   : > { %v4045_v34 = vmax.f32 %v3561_v21, %v3847_v49  ;;  %v4169_v46 = vrot.slane %v3564_v63, 2  ;;  %v4364_v7 = vmax.f32 %v4044_v13, %v4164_v58  ;;  %v3293_v3 = vmax.f32 %v3133_v0, %v10458_v53 }
 0x2af   : > { %v3294_v5 = vmax.f32 %v3134_v8, %v10459_v57  ;;  %v3437_v6 = vmax.f32 %v3289_v38, %v8660_v22  ;;  %v3850_v9 = vsel %vm1525_vm0, %v3848_v31, %v3849_v29  ;;  %v3438_v54 = vmax.f32 %v10456_v41, %v10457_v10 }
 0x2b0   : > { %v4365_v27 = vmax.f32 %v4045_v34, %v4167_v1  ;;  %v4170_v61 = vsel %vm2226_vm1, %v4168_v24, %v4169_v46  ;;  %4429 = vst.msk [vmem:[%s8221_s21 + $0xd8] sm:$0xff] %vm4401_vm4, %v4364_v7  ;;  %v4046_v21 = vmax.f32 %v3563_v14, %v3850_v9  ;;  %v1703_v59 = vrot.slane %v10460_v62, 1 }
 0x2b1   : > { %v3565_v39 = vmax.f32 %v3437_v6, %v3293_v3  ;;  %v1704_v18 = vrot.slane %v10461_v20, 1  ;;  %v3566_v38 = vmax.f32 %v3438_v54, %v3294_v5  ;;  %v2404_v2 = vrot.slane %v10460_v62, 2 }
 0x2b2   : > { %4430 = vst.msk [vmem:[%s8221_s21 + $0xe0] sm:$0xff] %vm4401_vm4, %v4365_v27  ;;  %v2405_v63 = vrot.slane %v10461_v20, 2  ;;  %v3135_v60 = vmax.f32 %v8450_v28, %v8580_v45  ;;  %v4366_v41 = vmax.f32 %v4046_v21, %v4170_v61  ;;  %v3136_v34 = vmax.f32 %v8452_v48, %v8571_v33 }
 0x2b3   : > { %v3851_v58 = vrot.slane %v3565_v39, 1  ;;  %v4171_v0 = vrot.slane %v3565_v39, 2  ;;  %v1705_v14 = vsel %vm1525_vm0, %v1703_v59, %v1704_v18  ;;  %v3852_v8 = vrot.slane %v3566_v38, 1  ;;  %v10466_v59 = vld [vmem:[#allocation96_spill] sm:$0xff] }
 0x2b4   : > { %v4172_v13 = vrot.slane %v3566_v38, 2  ;;  %v2144_v49 = vmax.f32 %v10460_v62, %v1705_v14  ;;  %v2145_v1 = vmax.f32 %v10461_v20, %v1704_v18  ;;  %4431 = vst.msk [vmem:[%s8221_s21 + $0xe8] sm:$0xff] %vm4401_vm4, %v4366_v41  ;;  %v2406_v31 = vsel %vm2226_vm1, %v2404_v2, %v2405_v63  ;;  %v10467_v20 = vld [vmem:[#allocation110_spill] sm:$0xff] }
 0x2b5   : > { %v3439_v28 = vmax.f32 %v8660_v22, %v3293_v3  ;;  %v3440_v29 = vmax.f32 %v10457_v10, %v3294_v5  ;;  %v3853_v24 = vsel %vm1525_vm0, %v3851_v58, %v3852_v8  ;;  %v3137_v9 = vmax.f32 %v8484_v4, %v8605_v36 }
 0x2b6   : > { %v4173_v46 = vsel %vm2226_vm1, %v4171_v0, %v4172_v13  ;;  %v8708_v7 = vmax.f32 %v2144_v49, %v2406_v31  ;;  %v8710_v6 = vmax.f32 %v2145_v1, %v2405_v63  ;;  %v4047_v27 = vmax.f32 %v3565_v39, %v3853_v24  ;;  %v10465_v39 = vld [vmem:[#allocation45_spill] sm:$0xff]  ;;  %v10470_v0 = vld [vmem:[#allocation108_spill] sm:$0xff]  ;;  %v10472_v24 = vld [vmem:[#allocation111_spill] sm:$0xff] }
 0x2b7   : > { %v3138_v48 = vmax.f32 %v8470_v32, %v8599_v55  ;;  %v10462_v22 = vmax.f32 %v10408_v37, %v10436_v42  ;;  %v10463_v61 = vmax.f32 %v10410_v52, %v10438_v19  ;;  %v10464_v4 = vmax.f32 %v10412_v17, %v10440_v40  ;;  %v10469_v52 = vld [vmem:[#allocation152_spill] sm:$0xff] }
 0x2b8   : > { %v3295_v3 = vmax.f32 %v3135_v60, %v8708_v7  ;;  %v3296_v5 = vmax.f32 %v3136_v34, %v8710_v6  ;;  %v4367_v32 = vmax.f32 %v4047_v27, %v4173_v46  ;;  %v3297_v62 = vmax.f32 %v3137_v9, %v10465_v39 }
 0x2b9   : > { %v3299_v10 = vmax.f32 %v10462_v22, %v10230_v50  ;;  %v3300_v54 = vmax.f32 %v10463_v61, %v10238_v16  ;;  %v3301_v21 = vmax.f32 %v10464_v4, %v10251_v56  ;;  %v3298_v37 = vmax.f32 %v3138_v48, %v10466_v59 }
 0x2ba   : > { %v10468_v18 = vmax.f32 %v10414_v30, %v10442_v47  ;;  %v3567_v2 = vmax.f32 %v3439_v28, %v3295_v3  ;;  %v3568_v63 = vmax.f32 %v3440_v29, %v3296_v5  ;;  %4432 = vst.msk [vmem:[%s8221_s21 + $0xf0] sm:$0xff] %vm4401_vm4, %v4367_v32  ;;  %v10471_v14 = vmax.f32 %v10417_v51, %v10444_v12 }
 0x2bb   : > { %v3443_v60 = vmax.f32 %v3299_v10, %v3301_v21  ;;  %v3444_v41 = vmax.f32 %v3300_v54, %v10469_v52  ;;  %v3441_v58 = vmax.f32 %v3297_v62, %v3299_v10  ;;  %v3442_v17 = vmax.f32 %v3298_v37, %v3300_v54 }
 0x2bc   : > { %v3303_v38 = vmax.f32 %v10468_v18, %v10467_v20  ;;  %v3305_v8 = vmax.f32 %v10471_v14, %v10470_v0  ;;  %v3854_v49 = vrot.slane %v3567_v2, 1  ;;  %v3855_v1 = vrot.slane %v3568_v63, 1  ;;  %v10473_v18 = vld [vmem:[#allocation115_spill] sm:$0xff] }
 0x2bd   : > { %v4174_v31 = vrot.slane %v3567_v2, 2  ;;  %v4175_v30 = vrot.slane %v3568_v63, 2  ;;  %v3569_v34 = vmax.f32 %v3441_v58, %v3301_v21  ;;  %v3570_v28 = vmax.f32 %v3442_v17, %v10469_v52 }
 0x2be   : > { %v3445_v13 = vmax.f32 %v3301_v21, %v3303_v38  ;;  %v3571_v29 = vmax.f32 %v3443_v60, %v3303_v38  ;;  %v3572_v46 = vmax.f32 %v3444_v41, %v10472_v24  ;;  %v3856_v27 = vsel %vm1525_vm0, %v3854_v49, %v3855_v1 }
 0x2bf   : > { %v4176_v9 = vsel %vm2226_vm1, %v4174_v31, %v4175_v30  ;;  %v3446_v48 = vmax.f32 %v10469_v52, %v10472_v24  ;;  %v4048_v22 = vmax.f32 %v3567_v2, %v3856_v27  ;;  %v3857_v10 = vrot.slane %v3569_v34, 1  ;;  %v10474_v31 = vld [vmem:[#allocation112_spill] sm:$0xff] }
 0x2c0   : > { %v3573_v51 = vmax.f32 %v3445_v13, %v3305_v8  ;;  %v3858_v3 = vrot.slane %v3570_v28, 1  ;;  %v4177_v5 = vrot.slane %v3569_v34, 2  ;;  %v4178_v61 = vrot.slane %v3570_v28, 2 }
 0x2c1   : > { %v3860_v54 = vrot.slane %v3571_v29, 1  ;;  %v3861_v4 = vrot.slane %v3572_v46, 1  ;;  %v4180_v21 = vrot.slane %v3571_v29, 2  ;;  %v4368_v32 = vmax.f32 %v4048_v22, %v4176_v9 }
 0x2c2   : > { %v3859_v62 = vsel %vm1525_vm0, %v3857_v10, %v3858_v3  ;;  %v4181_v37 = vrot.slane %v3572_v46, 2  ;;  %v3574_v63 = vmax.f32 %v3446_v48, %v10473_v18  ;;  %v4179_v41 = vsel %vm2226_vm1, %v4177_v5, %v4178_v61 }
 0x2c3   : > { %v4049_v60 = vmax.f32 %v3569_v34, %v3859_v62  ;;  %v3862_v2 = vsel %vm1525_vm0, %v3860_v54, %v3861_v4  ;;  %v3863_v52 = vrot.slane %v3573_v51, 1  ;;  %4433 = vst.msk [vmem:[%s8221_s21 + $0xf8] sm:$0xff] %vm4401_vm4, %v4368_v32  ;;  %v4183_v13 = vrot.slane %v3573_v51, 2  ;;  %v10479_v54 = vld [vmem:[#allocation155_spill] sm:$0xff] }
 0x2c4   : > { %v4050_v58 = vmax.f32 %v3571_v29, %v3862_v2  ;;  %v4182_v17 = vsel %vm2226_vm1, %v4180_v21, %v4181_v37  ;;  %v3864_v14 = vrot.slane %v3574_v63, 1  ;;  %v4184_v1 = vrot.slane %v3574_v63, 2  ;;  %v10476_v29 = vld [vmem:[#allocation153_spill] sm:$0xff] }
 0x2c5   : > { %v4369_v49 = vmax.f32 %v4049_v60, %v4179_v41  ;;  %v10475_v30 = vmax.f32 %v10420_v43, %v10448_v11  ;;  %v3447_v28 = vmax.f32 %v3303_v38, %v3305_v8  ;;  %v3448_v9 = vmax.f32 %v10472_v24, %v10473_v18  ;;  %v10478_v38 = vld [vmem:[#allocation140_spill] sm:$0xff]  ;;  %v10481_v60 = vld [vmem:[#allocation121_spill] sm:$0xff] }
 0x2c6   : > { %v4370_v46 = vmax.f32 %v4050_v58, %v4182_v17  ;;  %v3865_v27 = vsel %vm1525_vm0, %v3863_v52, %v3864_v14  ;;  %v10477_v48 = vmax.f32 %v10423_v25, %v10451_v26  ;;  %v4185_v3 = vsel %vm2226_vm1, %v4183_v13, %v4184_v1 }
 0x2c7   : > { %v3307_v34 = vmax.f32 %v10475_v30, %v10474_v31  ;;  %4434 = vst.msk [vmem:[%s8221_s21 + $0x100] sm:$0xff] %vm4401_vm4, %v4369_v49  ;;  %v4051_v10 = vmax.f32 %v3573_v51, %v3865_v27  ;;  %v3576_v61 = vmax.f32 %v3448_v9, %v10478_v38  ;;  %v3450_v24 = vmax.f32 %v10473_v18, %v10478_v38  ;;  %v10482_v30 = vld [vmem:[#allocation157_spill] sm:$0xff] }
 0x2c8   : > { %v3309_v22 = vmax.f32 %v10477_v48, %v10476_v29  ;;  %4435 = vst.msk [vmem:[%s8221_s21 + $0x108] sm:$0xff] %vm4401_vm4, %v4370_v46  ;;  %v10480_v25 = vmax.f32 %v10426_v23, %v10454_v15  ;;  %v3452_v2 = vmax.f32 %v10478_v38, %v10481_v60  ;;  %v3153_v58 = vmax.f32 %v10430_v35, %v10458_v53  ;;  %v10483_v35 = vld [vmem:[#allocation130_spill] sm:$0xff] }
 0x2c9   : > { %v3575_v43 = vmax.f32 %v3447_v28, %v3307_v34  ;;  %v3449_v5 = vmax.f32 %v3305_v8, %v3307_v34  ;;  %v4371_v51 = vmax.f32 %v4051_v10, %v4185_v3  ;;  %v3867_v63 = vrot.slane %v3576_v61, 1 }
 0x2ca   : > { %v8779_v4 = vmax.f32 %v10480_v25, %v10479_v54  ;;  %v3451_v21 = vmax.f32 %v3307_v34, %v3309_v22  ;;  %v4187_v8 = vrot.slane %v3576_v61, 2  ;;  %v3578_v41 = vmax.f32 %v3450_v24, %v10481_v60 }
 0x2cb   : > { %v3866_v32 = vrot.slane %v3575_v43, 1  ;;  %v4186_v62 = vrot.slane %v3575_v43, 2  ;;  %v3577_v37 = vmax.f32 %v3449_v5, %v3309_v22  ;;  %4436 = vst.msk [vmem:[%s8221_s21 + $0x110] sm:$0xff] %vm4401_vm4, %v4371_v51  ;;  %v3580_v34 = vmax.f32 %v3452_v2, %v10482_v30  ;;  %v10485_v51 = vld [vmem:[#allocation156_spill] sm:$0xff] }
 0x2cc   : > { %v3579_v23 = vmax.f32 %v3451_v21, %v8779_v4  ;;  %v3870_v13 = vrot.slane %v3578_v41, 1  ;;  %v4190_v49 = vrot.slane %v3578_v41, 2  ;;  %v3154_v48 = vmax.f32 %v10431_v44, %v10459_v57 }
 0x2cd   : > { %v3869_v18 = vrot.slane %v3577_v37, 1  ;;  %v4189_v52 = vrot.slane %v3577_v37, 2  ;;  %v3868_v17 = vsel %vm1525_vm0, %v3866_v32, %v3867_v63  ;;  %v4188_v14 = vsel %vm2226_vm1, %v4186_v62, %v4187_v8 }
 0x2ce   : > { %v4052_v1 = vmax.f32 %v3575_v43, %v3868_v17  ;;  %v3872_v28 = vrot.slane %v3579_v23, 1  ;;  %v4192_v46 = vrot.slane %v3579_v23, 2  ;;  %v3313_v10 = vmax.f32 %v3153_v58, %v10483_v35  ;;  %v10484_v43 = vld [vmem:[#allocation127_spill] sm:$0xff] }
 0x2cf   : > { %v3871_v27 = vsel %vm1525_vm0, %v3869_v18, %v3870_v13  ;;  %v4191_v9 = vsel %vm2226_vm1, %v4189_v52, %v4190_v49  ;;  %v3873_v38 = vrot.slane %v3580_v34, 1  ;;  %v4193_v61 = vrot.slane %v3580_v34, 2 }
 0x2d0   : > { %v4372_v3 = vmax.f32 %v4052_v1, %v4188_v14  ;;  %v4053_v5 = vmax.f32 %v3577_v37, %v3871_v27  ;;  %v3314_v24 = vmax.f32 %v3154_v48, %v10484_v43  ;;  %v3453_v25 = vmax.f32 %v3309_v22, %v8779_v4  ;;  %v10486_v37 = vld [vmem:[#allocation158_spill] sm:$0xff] }
 0x2d1   : > { %v3454_v21 = vmax.f32 %v10481_v60, %v10482_v30  ;;  %v1733_v32 = vrot.slane %v10485_v51, 1  ;;  %v3874_v44 = vsel %vm1525_vm0, %v3872_v28, %v3873_v38  ;;  %v4194_v63 = vsel %vm2226_vm1, %v4192_v46, %v4193_v61 }
 0x2d2   : > { %4437 = vst.msk [vmem:[%s8221_s21 + $0x118] sm:$0xff] %vm4401_vm4, %v4372_v3  ;;  %v4373_v62 = vmax.f32 %v4053_v5, %v4191_v9  ;;  %v1734_v8 = vrot.slane %v10486_v37, 1  ;;  %v4054_v41 = vmax.f32 %v3579_v23, %v3874_v44  ;;  %v3581_v2 = vmax.f32 %v3453_v25, %v3313_v10  ;;  %v10491_v44 = vld [vmem:[#allocation94_spill] sm:$0xff] }
 0x2d3   : > { %v3582_v18 = vmax.f32 %v3454_v21, %v3314_v24  ;;  %v2434_v22 = vrot.slane %v10485_v51, 2  ;;  %v2435_v58 = vrot.slane %v10486_v37, 2  ;;  %v3155_v17 = vmax.f32 %v8580_v45, %v8708_v7 }
 0x2d4   : > { %4438 = vst.msk [vmem:[%s8221_s21 + $0x120] sm:$0xff] %vm4401_vm4, %v4373_v62  ;;  %v1735_v60 = vsel %vm1525_vm0, %v1733_v32, %v1734_v8  ;;  %v2165_v52 = vmax.f32 %v10486_v37, %v1734_v8  ;;  %v4374_v14 = vmax.f32 %v4054_v41, %v4194_v63  ;;  %v3875_v13 = vrot.slane %v3581_v2, 1  ;;  %v10494_v37 = vld [vmem:[#allocation98_spill] sm:$0xff] }
 0x2d5   : > { %v3876_v49 = vrot.slane %v3582_v18, 1  ;;  %v4195_v23 = vrot.slane %v3581_v2, 2  ;;  %v4196_v1 = vrot.slane %v3582_v18, 2  ;;  %v2164_v34 = vmax.f32 %v10485_v51, %v1735_v60  ;;  %v10487_v51 = vld [vmem:[#allocation83_spill] sm:$0xff]  ;;  %v10498_v60 = vld [vmem:[#allocation161_spill] sm:$0xff] }
 0x2d6   : > { %v2436_v28 = vsel %vm2226_vm1, %v2434_v22, %v2435_v58  ;;  %v8817_v46 = vmax.f32 %v2165_v52, %v2435_v58  ;;  %4439 = vst.msk [vmem:[%s8221_s21 + $0x128] sm:$0xff] %vm4401_vm4, %v4374_v14  ;;  %v3156_v9 = vmax.f32 %v8571_v33, %v8710_v6  ;;  %v3455_v45 = vmax.f32 %v8779_v4, %v3313_v10  ;;  %v10500_v14 = vld [vmem:[#allocation162_spill] sm:$0xff] }
 0x2d7   : > { %v3877_v27 = vsel %vm1525_vm0, %v3875_v13, %v3876_v49  ;;  %v3456_v48 = vmax.f32 %v10482_v30, %v3314_v24  ;;  %v4197_v5 = vsel %vm2226_vm1, %v4195_v23, %v4196_v1  ;;  %v8827_v38 = vmax.f32 %v2164_v34, %v2436_v28  ;;  %v10489_v30 = vld [vmem:[#allocation134_spill] sm:$0xff] }
 0x2d8   : > { %v4055_v3 = vmax.f32 %v3581_v2, %v3877_v27  ;;  %v3157_v61 = vmax.f32 %v8605_v36, %v10465_v39  ;;  %v3316_v25 = vmax.f32 %v3156_v9, %v8817_v46  ;;  %v3158_v21 = vmax.f32 %v8599_v55, %v10466_v59  ;;  %v10492_v39 = vld [vmem:[#allocation136_spill] sm:$0xff] }
 0x2d9   : > { %v10488_v33 = vmax.f32 %v10436_v42, %v10230_v50  ;;  %v10490_v10 = vmax.f32 %v10438_v19, %v10238_v16  ;;  %v3315_v62 = vmax.f32 %v3155_v17, %v8827_v38  ;;  %v10493_v63 = vmax.f32 %v10440_v40, %v10251_v56  ;;  %v10495_v50 = vld [vmem:[#allocation137_spill] sm:$0xff]  ;;  %v10497_v16 = vld [vmem:[#allocation160_spill] sm:$0xff] }
 0x2da   : > { %v4375_v32 = vmax.f32 %v4055_v3, %v4197_v5  ;;  %v3317_v36 = vmax.f32 %v3157_v61, %v10491_v44  ;;  %v3584_v59 = vmax.f32 %v3456_v48, %v3316_v25  ;;  %v3318_v8 = vmax.f32 %v3158_v21, %v10494_v37 }
 0x2db   : > { %v3319_v4 = vmax.f32 %v10488_v33, %v10487_v51  ;;  %v3320_v24 = vmax.f32 %v10490_v10, %v10489_v30  ;;  %v3321_v55 = vmax.f32 %v10493_v63, %v10492_v39  ;;  %v10496_v42 = vmax.f32 %v10442_v47, %v10467_v20  ;;  %v10501_v33 = vld [vmem:[#allocation165_spill] sm:$0xff] }
 0x2dc   : > { %4440 = vst.msk [vmem:[%s8221_s21 + $0x130] sm:$0xff] %vm4401_vm4, %v4375_v32  ;;  %v3583_v2 = vmax.f32 %v3455_v45, %v3315_v62  ;;  %v10499_v56 = vmax.f32 %v10444_v12, %v10470_v0  ;;  %v3879_v52 = vrot.slane %v3584_v59, 1  ;;  %v4199_v58 = vrot.slane %v3584_v59, 2 }
 0x2dd   : > { %v3323_v41 = vmax.f32 %v10496_v42, %v10495_v50  ;;  %v3460_v19 = vmax.f32 %v3320_v24, %v10497_v16  ;;  %v3457_v18 = vmax.f32 %v3317_v36, %v3319_v4  ;;  %v3459_v22 = vmax.f32 %v3319_v4, %v3321_v55 }
 0x2de   : > { %v3325_v40 = vmax.f32 %v10499_v56, %v10498_v60  ;;  %v3458_v17 = vmax.f32 %v3318_v8, %v3320_v24  ;;  %v3878_v49 = vrot.slane %v3583_v2, 1  ;;  %v4198_v47 = vrot.slane %v3583_v2, 2  ;;  %v10505_v60 = vld [vmem:[#allocation170_spill] sm:$0xff] }
 0x2df   : > { %v3588_v13 = vmax.f32 %v3460_v19, %v10500_v14  ;;  %v3585_v20 = vmax.f32 %v3457_v18, %v3321_v55  ;;  %v3587_v23 = vmax.f32 %v3459_v22, %v3323_v41  ;;  %v3461_v27 = vmax.f32 %v3321_v55, %v3323_v41  ;;  %v10503_v55 = vld [vmem:[#allocation25_spill] sm:$0xff] }
 0x2e0   : > { %v3586_v1 = vmax.f32 %v3458_v17, %v10497_v16  ;;  %v3880_v9 = vsel %vm1525_vm0, %v3878_v49, %v3879_v52  ;;  %v4200_v45 = vsel %vm2226_vm1, %v4198_v47, %v4199_v58  ;;  %v3462_v21 = vmax.f32 %v10497_v16, %v10500_v14  ;;  %v10504_v18 = vld [vmem:[#allocation173_spill] sm:$0xff] }
 0x2e1   : > { %v3885_v34 = vrot.slane %v3588_v13, 1  ;;  %v4205_v28 = vrot.slane %v3588_v13, 2  ;;  %v3881_v12 = vrot.slane %v3585_v20, 1  ;;  %v4201_v0 = vrot.slane %v3585_v20, 2  ;;  %v10507_v13 = vld [vmem:[#allocation175_spill] sm:$0xff] }
 0x2e2   : > { %v4056_v48 = vmax.f32 %v3583_v2, %v3880_v9  ;;  %v3882_v3 = vrot.slane %v3586_v1, 1  ;;  %v4202_v5 = vrot.slane %v3586_v1, 2  ;;  %v3884_v61 = vrot.slane %v3587_v23, 1 }
 0x2e3   : > { %v4204_v25 = vrot.slane %v3587_v23, 2  ;;  %v3589_v51 = vmax.f32 %v3461_v27, %v3325_v40  ;;  %v10502_v4 = vmax.f32 %v10448_v11, %v10474_v31  ;;  %v3590_v59 = vmax.f32 %v3462_v21, %v10503_v55  ;;  %v10510_v21 = vld [vmem:[#allocation149_spill] sm:$0xff] }
 0x2e4   : > { %v4376_v10 = vmax.f32 %v4056_v48, %v4200_v45  ;;  %v3883_v24 = vsel %vm1525_vm0, %v3881_v12, %v3882_v3  ;;  %v4203_v32 = vsel %vm2226_vm1, %v4201_v0, %v4202_v5  ;;  %v3886_v62 = vsel %vm1525_vm0, %v3884_v61, %v3885_v34  ;;  %v10509_v34 = vld [vmem:[#allocation174_spill] sm:$0xff] }
 0x2e5   : > { %v3327_v30 = vmax.f32 %v10502_v4, %v10501_v33  ;;  %v4057_v36 = vmax.f32 %v3585_v20, %v3883_v24  ;;  %v4058_v39 = vmax.f32 %v3587_v23, %v3886_v62  ;;  %v4206_v63 = vsel %vm2226_vm1, %v4204_v25, %v4205_v28 }
 0x2e6   : > { %4441 = vst.msk [vmem:[%s8221_s21 + $0x138] sm:$0xff] %vm4401_vm4, %v4376_v10  ;;  %v3887_v37 = vrot.slane %v3589_v51, 1  ;;  %v4207_v8 = vrot.slane %v3589_v51, 2  ;;  %v3463_v11 = vmax.f32 %v3323_v41, %v3325_v40  ;;  %v3464_v31 = vmax.f32 %v10500_v14, %v10503_v55 }
 0x2e7   : > { %v4377_v50 = vmax.f32 %v4057_v36, %v4203_v32  ;;  %v4378_v42 = vmax.f32 %v4058_v39, %v4206_v63  ;;  %v3888_v16 = vrot.slane %v3590_v59, 1  ;;  %v4208_v19 = vrot.slane %v3590_v59, 2  ;;  %v10512_v63 = vld [vmem:[#allocation91_spill] sm:$0xff] }
 0x2e8   : > { %v3591_v2 = vmax.f32 %v3463_v11, %v3327_v30  ;;  %v3592_v22 = vmax.f32 %v3464_v31, %v10504_v18  ;;  %v10506_v56 = vmax.f32 %v10451_v26, %v10476_v29  ;;  %v3465_v58 = vmax.f32 %v3325_v40, %v3327_v30 }
 0x2e9   : > { %4442 = vst.msk [vmem:[%s8221_s21 + $0x140] sm:$0xff] %vm4401_vm4, %v4377_v50  ;;  %v3889_v41 = vsel %vm1525_vm0, %v3887_v37, %v3888_v16  ;;  %v4209_v17 = vsel %vm2226_vm1, %v4207_v8, %v4208_v19  ;;  %v3466_v14 = vmax.f32 %v10503_v55, %v10504_v18  ;;  %v10508_v49 = vmax.f32 %v10454_v15, %v10479_v54  ;;  %v10514_v16 = vld [vmem:[#allocation177_spill] sm:$0xff] }
 0x2ea   : > { %v3329_v52 = vmax.f32 %v10506_v56, %v10505_v60  ;;  %4443 = vst.msk [vmem:[%s8221_s21 + $0x148] sm:$0xff] %vm4401_vm4, %v4378_v42  ;;  %v4059_v26 = vmax.f32 %v3589_v51, %v3889_v41  ;;  %v3890_v29 = vrot.slane %v3591_v2, 1  ;;  %v3891_v40 = vrot.slane %v3592_v22, 1 }
 0x2eb   : > { %v8894_v47 = vmax.f32 %v10508_v49, %v10507_v13  ;;  %v4210_v20 = vrot.slane %v3591_v2, 2  ;;  %v4211_v23 = vrot.slane %v3592_v22, 2  ;;  %v3594_v28 = vmax.f32 %v3466_v14, %v10509_v34 }
 0x2ec   : > { %v3593_v1 = vmax.f32 %v3465_v58, %v3329_v52  ;;  %v3467_v27 = vmax.f32 %v3327_v30, %v3329_v52  ;;  %v4379_v9 = vmax.f32 %v4059_v26, %v4209_v17  ;;  %v3892_v45 = vsel %vm1525_vm0, %v3890_v29, %v3891_v40 }
 0x2ed   : > { %v3468_v15 = vmax.f32 %v10504_v18, %v10509_v34  ;;  %v3173_v54 = vmax.f32 %v10458_v53, %v10483_v35  ;;  %v4060_v12 = vmax.f32 %v3591_v2, %v3892_v45  ;;  %v4212_v0 = vsel %vm2226_vm1, %v4210_v20, %v4211_v23  ;;  %v10511_v35 = vld [vmem:[#allocation62_spill] sm:$0xff]  ;;  %v10517_v45 = vld [vmem:[#allocation145_spill] sm:$0xff] }
 0x2ee   : > { %v3893_v48 = vrot.slane %v3593_v1, 1  ;;  %v3894_v3 = vrot.slane %v3594_v28, 1  ;;  %4444 = vst.msk [vmem:[%s8221_s21 + $0x150] sm:$0xff] %vm4401_vm4, %v4379_v9  ;;  %v4213_v5 = vrot.slane %v3593_v1, 2  ;;  %v4214_v61 = vrot.slane %v3594_v28, 2  ;;  %v10516_v9 = vld [vmem:[#allocation128_spill] sm:$0xff] }
 0x2ef   : > { %v3595_v25 = vmax.f32 %v3467_v27, %v8894_v47  ;;  %v3596_v51 = vmax.f32 %v3468_v15, %v10510_v21  ;;  %v4380_v33 = vmax.f32 %v4060_v12, %v4212_v0  ;;  %v3174_v53 = vmax.f32 %v10459_v57, %v10484_v43  ;;  %v10513_v43 = vld [vmem:[#allocation176_spill] sm:$0xff]  ;;  %v10515_v27 = vld [vmem:[#allocation154_spill] sm:$0xff] }
 0x2f0   : > { %v3895_v4 = vsel %vm1525_vm0, %v3893_v48, %v3894_v3  ;;  %v3333_v30 = vmax.f32 %v3173_v54, %v10511_v35  ;;  %v4215_v24 = vsel %vm2226_vm1, %v4213_v5, %v4214_v61  ;;  %v3469_v59 = vmax.f32 %v3329_v52, %v8894_v47  ;;  %v10520_v12 = vld [vmem:[#allocation132_spill] sm:$0xff] }
 0x2f1   : > { %v4061_v10 = vmax.f32 %v3593_v1, %v3895_v4  ;;  %v3896_v32 = vrot.slane %v3595_v25, 1  ;;  %v3897_v62 = vrot.slane %v3596_v51, 1  ;;  %4445 = vst.msk [vmem:[%s8221_s21 + $0x158] sm:$0xff] %vm4401_vm4, %v4380_v33  ;;  %v4216_v36 = vrot.slane %v3595_v25, 2  ;;  %v10525_v33 = vld [vmem:[#allocation179_spill] sm:$0xff] }
 0x2f2   : > { %v4217_v39 = vrot.slane %v3596_v51, 2  ;;  %v3334_v55 = vmax.f32 %v3174_v53, %v10512_v63  ;;  %v3470_v57 = vmax.f32 %v10509_v34, %v10510_v21  ;;  %v1763_v11 = vrot.slane %v10513_v43, 1 }
 0x2f3   : > { %v4381_v37 = vmax.f32 %v4061_v10, %v4215_v24  ;;  %v3898_v8 = vsel %vm1525_vm0, %v3896_v32, %v3897_v62  ;;  %v3597_v42 = vmax.f32 %v3469_v59, %v3333_v30  ;;  %v1764_v19 = vrot.slane %v10514_v16, 1  ;;  %v10526_v59 = vld [vmem:[#allocation181_spill] sm:$0xff] }
 0x2f4   : > { %v4062_v31 = vmax.f32 %v3595_v25, %v3898_v8  ;;  %v4218_v50 = vsel %vm2226_vm1, %v4216_v36, %v4217_v39  ;;  %v3598_v2 = vmax.f32 %v3470_v57, %v3334_v55  ;;  %v2464_v18 = vrot.slane %v10513_v43, 2  ;;  %v10523_v25 = vld [vmem:[#allocation151_spill] sm:$0xff] }
 0x2f5   : > { %4446 = vst.msk [vmem:[%s8221_s21 + $0x160] sm:$0xff] %vm4401_vm4, %v4381_v37  ;;  %v2465_v22 = vrot.slane %v10514_v16, 2  ;;  %v3175_v60 = vmax.f32 %v8708_v7, %v8827_v38  ;;  %v3899_v52 = vrot.slane %v3597_v42, 1  ;;  %v4219_v58 = vrot.slane %v3597_v42, 2 }
 0x2f6   : > { %v4382_v56 = vmax.f32 %v4062_v31, %v4218_v50  ;;  %v1765_v41 = vsel %vm1525_vm0, %v1763_v11, %v1764_v19  ;;  %v3900_v17 = vrot.slane %v3598_v2, 1  ;;  %v4220_v14 = vrot.slane %v3598_v2, 2 }
 0x2f7   : > { %v2184_v13 = vmax.f32 %v10513_v43, %v1765_v41  ;;  %v2185_v49 = vmax.f32 %v10514_v16, %v1764_v19  ;;  %v2466_v26 = vsel %vm2226_vm1, %v2464_v18, %v2465_v22  ;;  %v3176_v29 = vmax.f32 %v8710_v6, %v8817_v46  ;;  %v10519_v6 = vld [vmem:[#allocation133_spill] sm:$0xff]  ;;  %v10527_v18 = vld [vmem:[#allocation180_spill] sm:$0xff] }
 0x2f8   : > { %4447 = vst.msk [vmem:[%s8221_s21 + $0x168] sm:$0xff] %vm4401_vm4, %v4382_v56  ;;  %v3471_v7 = vmax.f32 %v8894_v47, %v3333_v30  ;;  %v3472_v40 = vmax.f32 %v10510_v21, %v3334_v55  ;;  %v3901_v20 = vsel %vm1525_vm0, %v3899_v52, %v3900_v17  ;;  %v4221_v23 = vsel %vm2226_vm1, %v4219_v58, %v4220_v14  ;;  %v10521_v47 = vld [vmem:[#allocation104_spill] sm:$0xff] }
 0x2f9   : > { %v8942_v1 = vmax.f32 %v2184_v13, %v2466_v26  ;;  %v8944_v34 = vmax.f32 %v2185_v49, %v2465_v22  ;;  %v4063_v28 = vmax.f32 %v3597_v42, %v3901_v20  ;;  %v10518_v15 = vmax.f32 %v10516_v9, %v10517_v45 }
 0x2fa   : > { %v10522_v0 = vmax.f32 %v10520_v12, %v10521_v47  ;;  %v3475_v3 = vmax.f32 %v10517_v45, %v10515_v27  ;;  %v10524_v21 = vmax.f32 %v10521_v47, %v10519_v6  ;;  %v3477_v4 = vmax.f32 %v10515_v27, %v10525_v33 }
 0x2fb   : > { %v3601_v54 = vmax.f32 %v10518_v15, %v10515_v27  ;;  %v3335_v5 = vmax.f32 %v3175_v60, %v8942_v1  ;;  %v3336_v61 = vmax.f32 %v3176_v29, %v8944_v34  ;;  %v4383_v53 = vmax.f32 %v4063_v28, %v4221_v23  ;;  %v10531_v28 = vld [vmem:[#allocation184_spill] sm:$0xff] }
 0x2fc   : > { %v3602_v48 = vmax.f32 %v10522_v0, %v10519_v6  ;;  %v3604_v51 = vmax.f32 %v10524_v21, %v10523_v25  ;;  %v3603_v36 = vmax.f32 %v3475_v3, %v10525_v33  ;;  %v3605_v37 = vmax.f32 %v3477_v4, %v10526_v59 }
 0x2fd   : > { %v3905_v35 = vrot.slane %v3601_v54, 1  ;;  %v4225_v10 = vrot.slane %v3601_v54, 2  ;;  %v3599_v24 = vmax.f32 %v3471_v7, %v3335_v5  ;;  %v3600_v32 = vmax.f32 %v3472_v40, %v3336_v61  ;;  %4448 = vst.msk [vmem:[%s8221_s21 + $0x170] sm:$0xff] %vm4401_vm4, %v4383_v53  ;;  %v10529_v40 = vld [vmem:[#allocation164_spill] sm:$0xff]  ;;  %v10534_v5 = vld [vmem:[#allocation186_spill] sm:$0xff] }
 0x2fe   : > { %v3906_v30 = vrot.slane %v3602_v48, 1  ;;  %v4226_v62 = vrot.slane %v3602_v48, 2  ;;  %v3909_v63 = vrot.slane %v3604_v51, 1  ;;  %v4229_v55 = vrot.slane %v3604_v51, 2 }
 0x2ff   : > { %v3902_v8 = vrot.slane %v3599_v24, 1  ;;  %v3903_v57 = vrot.slane %v3600_v32, 1  ;;  %v4222_v43 = vrot.slane %v3599_v24, 2  ;;  %v4223_v11 = vrot.slane %v3600_v32, 2 }
 0x300   : > { %v3907_v39 = vsel %vm1525_vm0, %v3905_v35, %v3906_v30  ;;  %v4227_v50 = vsel %vm2226_vm1, %v4225_v10, %v4226_v62  ;;  %v3908_v42 = vrot.slane %v3603_v36, 1  ;;  %v4228_v16 = vrot.slane %v3603_v36, 2  ;;  %v10535_v35 = vld [vmem:[#allocation169_spill] sm:$0xff] }
 0x301   : > { %v4065_v31 = vmax.f32 %v3601_v54, %v3907_v39  ;;  %v3904_v19 = vsel %vm1525_vm0, %v3902_v8, %v3903_v57  ;;  %v4224_v2 = vsel %vm2226_vm1, %v4222_v43, %v4223_v11  ;;  %v10528_v22 = vmax.f32 %v10519_v6, %v10523_v25  ;;  %v10532_v54 = vld [vmem:[#allocation168_spill] sm:$0xff]  ;;  %v10537_v62 = vld [vmem:[#allocation189_spill] sm:$0xff] }
 0x302   : > { %v3911_v56 = vrot.slane %v3605_v37, 1  ;;  %v4064_v52 = vmax.f32 %v3599_v24, %v3904_v19  ;;  %v3910_v41 = vsel %vm1525_vm0, %v3908_v42, %v3909_v63  ;;  %v4230_v17 = vsel %vm2226_vm1, %v4228_v16, %v4229_v55  ;;  %v10538_v42 = vld [vmem:[#allocation3_spill] sm:$0xff] }
 0x303   : > { %v3606_v60 = vmax.f32 %v10528_v22, %v10527_v18  ;;  %v4385_v58 = vmax.f32 %v4065_v31, %v4227_v50  ;;  %v4066_v14 = vmax.f32 %v3603_v36, %v3910_v41  ;;  %v4231_v49 = vrot.slane %v3605_v37, 2  ;;  %v10539_v19 = vld [vmem:[#allocation7_spill] sm:$0xff] }
 0x304   : > { %v4384_v29 = vmax.f32 %v4064_v52, %v4224_v2  ;;  %v3479_v7 = vmax.f32 %v10525_v33, %v10526_v59  ;;  %v10530_v20 = vmax.f32 %v10523_v25, %v10527_v18  ;;  %v3481_v27 = vmax.f32 %v10526_v59, %v10531_v28 }
 0x305   : > { %v3912_v13 = vrot.slane %v3606_v60, 1  ;;  %v4232_v26 = vrot.slane %v3606_v60, 2  ;;  %4450 = vst.msk [vmem:[%s8221_s21 + $0x180] sm:$0xff] %vm4401_vm4, %v4385_v58  ;;  %v4386_v9 = vmax.f32 %v4066_v14, %v4230_v17  ;;  %v10533_v6 = vmax.f32 %v10527_v18, %v10529_v40 }
 0x306   : > { %v3608_v23 = vmax.f32 %v10530_v20, %v10529_v40  ;;  %4449 = vst.msk [vmem:[%s8221_s21 + $0x178] sm:$0xff] %vm4401_vm4, %v4384_v29  ;;  %v3607_v0 = vmax.f32 %v3479_v7, %v10531_v28  ;;  %v3609_v61 = vmax.f32 %v3481_v27, %v10534_v5  ;;  %v3483_v51 = vmax.f32 %v10531_v28, %v10534_v5 }
 0x307   : > { %v3913_v45 = vsel %vm1525_vm0, %v3911_v56, %v3912_v13  ;;  %v4233_v15 = vsel %vm2226_vm1, %v4231_v49, %v4232_v26  ;;  %v3610_v12 = vmax.f32 %v10533_v6, %v10532_v54  ;;  %4451 = vst.msk [vmem:[%s8221_s21 + $0x188] sm:$0xff] %vm4401_vm4, %v4386_v9  ;;  %v10536_v30 = vmax.f32 %v10529_v40, %v10532_v54  ;;  %v10540_v56 = vld [vmem:[#allocation191_spill] sm:$0xff]  ;;  %v10541_v49 = vld [vmem:[#allocation190_spill] sm:$0xff] }
 0x308   : > { %v4067_v47 = vmax.f32 %v3605_v37, %v3913_v45  ;;  %v3915_v48 = vrot.slane %v3608_v23, 1  ;;  %v4235_v3 = vrot.slane %v3608_v23, 2  ;;  %v3914_v4 = vrot.slane %v3607_v0, 1 }
 0x309   : > { %v3918_v25 = vrot.slane %v3610_v12, 1  ;;  %v4238_v21 = vrot.slane %v3610_v12, 2  ;;  %v4234_v53 = vrot.slane %v3607_v0, 2  ;;  %v3612_v10 = vmax.f32 %v10536_v30, %v10535_v35 }
 0x30a   : > { %v4387_v33 = vmax.f32 %v4067_v47, %v4233_v15  ;;  %v3917_v24 = vrot.slane %v3609_v61, 1  ;;  %v4237_v32 = vrot.slane %v3609_v61, 2  ;;  %v3611_v36 = vmax.f32 %v3483_v51, %v10537_v62  ;;  %v10543_v47 = vld [vmem:[#allocation92_spill] sm:$0xff]  ;;  %v10547_v51 = vld [vmem:[#allocation150_spill] sm:$0xff] }
 0x30b   : > { %v3485_v39 = vmax.f32 %v10534_v5, %v10537_v62  ;;  %v3916_v63 = vsel %vm1525_vm0, %v3914_v4, %v3915_v48  ;;  %v4236_v55 = vsel %vm2226_vm1, %v4234_v53, %v4235_v3  ;;  %v3921_v59 = vrot.slane %v3612_v10, 1  ;;  %v10549_v53 = vld [vmem:[#allocation126_spill] sm:$0xff] }
 0x30c   : > { %4452 = vst.msk [vmem:[%s8221_s21 + $0x190] sm:$0xff] %vm4401_vm4, %v4387_v33  ;;  %v4241_v37 = vrot.slane %v3612_v10, 2  ;;  %v4068_v8 = vmax.f32 %v3607_v0, %v3916_v63  ;;  %v3919_v57 = vsel %vm1525_vm0, %v3917_v24, %v3918_v25  ;;  %v4239_v43 = vsel %vm2226_vm1, %v4237_v32, %v4238_v21  ;;  %v10546_v21 = vld [vmem:[#allocation100_spill] sm:$0xff] }
 0x30d   : > { %v3920_v11 = vrot.slane %v3611_v36, 1  ;;  %v4069_v31 = vmax.f32 %v3609_v61, %v3919_v57  ;;  %v4240_v50 = vrot.slane %v3611_v36, 2  ;;  %v3613_v16 = vmax.f32 %v3485_v39, %v10538_v42  ;;  %v10544_v61 = vld [vmem:[#allocation95_spill] sm:$0xff] }
 0x30e   : > { %v3924_v2 = vrot.slane %v10539_v19, 1  ;;  %v4388_v18 = vmax.f32 %v4068_v8, %v4236_v55  ;;  %v4244_v60 = vrot.slane %v10539_v19, 2  ;;  %v1794_v52 = vrot.slane %v10540_v56, 1  ;;  %v10553_v39 = vld [vmem:[#allocation147_spill] sm:$0xff]  ;;  %v10554_v8 = vld [vmem:[#allocation6_spill] sm:$0xff] }
 0x30f   : > { %v3922_v22 = vsel %vm1525_vm0, %v3920_v11, %v3921_v59  ;;  %v4389_v58 = vmax.f32 %v4069_v31, %v4239_v43  ;;  %v4242_v17 = vsel %vm2226_vm1, %v4240_v50, %v4241_v37  ;;  %v3923_v14 = vrot.slane %v3613_v16, 1  ;;  %v10556_v31 = vld [vmem:[#allocation178_spill] sm:$0xff] }
 0x310   : > { %v4070_v41 = vmax.f32 %v3611_v36, %v3922_v22  ;;  %4453 = vst.msk [vmem:[%s8221_s21 + $0x198] sm:$0xff] %vm4401_vm4, %v4388_v18  ;;  %v4243_v13 = vrot.slane %v3613_v16, 2  ;;  %v10542_v26 = vrot.slane %v10541_v49, 1  ;;  %v2205_v7 = vmax.f32 %v10540_v56, %v1794_v52  ;;  %v10552_v36 = vld [vmem:[#allocation159_spill] sm:$0xff]  ;;  %v10558_v22 = vld [vmem:[#allocation106_spill] sm:$0xff] }
 0x311   : > { %v2494_v40 = vrot.slane %v10541_v49, 2  ;;  %4454 = vst.msk [vmem:[%s8221_s21 + $0x1a0] sm:$0xff] %vm4401_vm4, %v4389_v58  ;;  %v3925_v23 = vsel %vm1525_vm0, %v3923_v14, %v3924_v2  ;;  %v2495_v27 = vrot.slane %v10540_v56, 2  ;;  %v3195_v15 = vmax.f32 %v8827_v38, %v8942_v1  ;;  %v10545_v38 = vld [vmem:[#allocation85_spill] sm:$0xff]  ;;  %v10559_v56 = vld [vmem:[#allocation183_spill] sm:$0xff] }
 0x312   : > { %v1795_v29 = vsel %vm1525_vm0, %v10542_v26, %v1794_v52  ;;  %v4390_v20 = vmax.f32 %v4070_v41, %v4242_v17  ;;  %v4071_v9 = vmax.f32 %v3613_v16, %v3925_v23  ;;  %v4245_v45 = vsel %vm2226_vm1, %v4243_v13, %v4244_v60 }
 0x313   : > { %v2204_v28 = vmax.f32 %v10541_v49, %v1795_v29  ;;  %v3196_v54 = vmax.f32 %v8817_v46, %v8944_v34  ;;  %v2496_v6 = vsel %vm2226_vm1, %v2494_v40, %v2495_v27  ;;  %v9041_v12 = vmax.f32 %v2205_v7, %v2495_v27 }
 0x314   : > { %4455 = vst.msk [vmem:[%s8221_s21 + $0x1a8] sm:$0xff] %vm4401_vm4, %v4390_v20  ;;  %v1796_v0 = vrot.slane %v10543_v47, 1  ;;  %v2497_v48 = vrot.slane %v10543_v47, 2  ;;  %v4391_v3 = vmax.f32 %v4071_v9, %v4245_v45  ;;  %v3197_v25 = vmax.f32 %v10491_v44, %v10544_v61 }
 0x315   : > { %v9045_v5 = vmax.f32 %v2204_v28, %v2496_v6  ;;  %v10548_v46 = vmax.f32 %v10546_v21, %v10547_v51  ;;  %v3356_v4 = vmax.f32 %v3196_v54, %v9041_v12  ;;  %v10550_v30 = vrot.slane %v10549_v53, 1  ;;  %v10562_v21 = vld [vmem:[#allocation32_spill] sm:$0xff] }
 0x316   : > { %v10551_v24 = vrot.slane %v10549_v53, 2  ;;  %v3491_v63 = vmax.f32 %v10553_v39, %v10552_v36  ;;  %4456 = vst.msk [vmem:[%s8221_s21 + $0x1b0] sm:$0xff] %vm4401_vm4, %v4391_v3  ;;  %v10555_v57 = vmax.f32 %v10535_v35, %v10554_v8  ;;  %v3492_v11 = vmax.f32 %v10547_v51, %v10545_v38 }
 0x317   : > { %v3618_v33 = vmax.f32 %v10548_v46, %v10545_v38  ;;  %v1798_v10 = vsel %vm1525_vm0, %v1796_v0, %v10550_v30  ;;  %v3355_v44 = vmax.f32 %v3195_v15, %v9045_v5  ;;  %v3493_v16 = vmax.f32 %v10552_v36, %v10556_v31 }
 0x318   : > { %v2499_v32 = vsel %vm2226_vm1, %v2497_v48, %v10551_v24  ;;  %v2206_v55 = vmax.f32 %v10543_v47, %v1798_v10  ;;  %v3616_v43 = vmax.f32 %v10555_v57, %v3356_v4  ;;  %v3619_v50 = vmax.f32 %v3491_v63, %v10556_v31 }
 0x319   : > { %v3930_v59 = vrot.slane %v3618_v33, 1  ;;  %v4250_v37 = vrot.slane %v3618_v33, 2  ;;  %v10557_v19 = vmax.f32 %v10537_v62, %v10538_v42  ;;  %v3494_v60 = vmax.f32 %v10545_v38, %v10558_v22  ;;  %v10560_v42 = vld [vmem:[#allocation182_spill] sm:$0xff] }
 0x31a   : > { %v2907_v18 = vmax.f32 %v2206_v55, %v2499_v32  ;;  %v3495_v35 = vmax.f32 %v10556_v31, %v10559_v56  ;;  %v3927_v52 = vrot.slane %v3616_v43, 1  ;;  %v4247_v58 = vrot.slane %v3616_v43, 2 }
 0x31b   : > { %v3615_v2 = vmax.f32 %v10557_v19, %v3355_v44  ;;  %v3620_v41 = vmax.f32 %v3492_v11, %v10558_v22  ;;  %v3932_v17 = vrot.slane %v3619_v50, 1  ;;  %v4252_v26 = vrot.slane %v3619_v50, 2 }
 0x31c   : > { %v3357_v49 = vmax.f32 %v3197_v25, %v2907_v18  ;;  %v3621_v62 = vmax.f32 %v3493_v16, %v10559_v56  ;;  %v3622_v40 = vmax.f32 %v3494_v60, %v10560_v42  ;;  %v3496_v27 = vmax.f32 %v10558_v22, %v10560_v42  ;;  %v10561_v25 = vld [vmem:[#allocation185_spill] sm:$0xff]  ;;  %v10565_v22 = vld [vmem:[#allocation188_spill] sm:$0xff] }
 0x31d   : > { %v3926_v14 = vrot.slane %v3615_v2, 1  ;;  %v4246_v13 = vrot.slane %v3615_v2, 2  ;;  %v3933_v29 = vrot.slane %v3620_v41, 1  ;;  %v4253_v7 = vrot.slane %v3620_v41, 2 }
 0x31e   : > { %v3489_v28 = vmax.f32 %v3357_v49, %v10553_v39  ;;  %v3935_v54 = vrot.slane %v3621_v62, 1  ;;  %v3936_v0 = vrot.slane %v3622_v40, 1  ;;  %v4255_v48 = vrot.slane %v3621_v62, 2  ;;  %v10567_v49 = vld [vmem:[#allocation9_spill] sm:$0xff] }
 0x31f   : > { %v3928_v20 = vsel %vm1525_vm0, %v3926_v14, %v3927_v52  ;;  %v4248_v23 = vsel %vm2226_vm1, %v4246_v13, %v4247_v58  ;;  %v3934_v45 = vsel %vm1525_vm0, %v3932_v17, %v3933_v29  ;;  %v4254_v15 = vsel %vm2226_vm1, %v4252_v26, %v4253_v7  ;;  %v10566_v58 = vld [vmem:[#allocation187_spill] sm:$0xff]  ;;  %v444_v29 = vld [vmem:[%s4655_s14 + $0x8f8] sm:$0xf] }
 0x320   : > { %v4072_v9 = vmax.f32 %v3615_v2, %v3928_v20  ;;  %v3617_v6 = vmax.f32 %v3489_v28, %v10552_v36  ;;  %v4074_v47 = vmax.f32 %v3619_v50, %v3934_v45  ;;  %v4256_v61 = vrot.slane %v3622_v40, 2  ;;  %v10563_v50 = vld [vmem:[#allocation166_spill] sm:$0xff]  ;;  %v10564_v2 = vld [vmem:[#allocation116_spill] sm:$0xff] }
 0x321   : > { %v3623_v38 = vmax.f32 %v3495_v35, %v10561_v25  ;;  %v3624_v51 = vmax.f32 %v3496_v27, %v10562_v21  ;;  %v3937_v53 = vsel %vm1525_vm0, %v3935_v54, %v3936_v0  ;;  %v3497_v43 = vmax.f32 %v10559_v56, %v10561_v25  ;;  %v10568_v28 = vld [vmem:[#allocation4_spill] sm:$0xff] }
 0x322   : > { %v4392_v3 = vmax.f32 %v4072_v9, %v4248_v23  ;;  %v3929_v46 = vrot.slane %v3617_v6, 1  ;;  %v4249_v33 = vrot.slane %v3617_v6, 2  ;;  %v4394_v4 = vmax.f32 %v4074_v47, %v4254_v15  ;;  %v10570_v47 = vld [vmem:[#allocation167_spill] sm:$0xff] }
 0x323   : > { %v4075_v30 = vmax.f32 %v3621_v62, %v3937_v53  ;;  %v4257_v10 = vsel %vm2226_vm1, %v4255_v48, %v4256_v61  ;;  %v3938_v24 = vrot.slane %v3623_v38, 1  ;;  %v3939_v32 = vrot.slane %v3624_v51, 1 }
 0x324   : > { %4457 = vst.msk [vmem:[%s8221_s21 + $0x1b8] sm:$0xff] %vm4401_vm4, %v4392_v3  ;;  %v3931_v36 = vsel %vm1525_vm0, %v3929_v46, %v3930_v59  ;;  %v4251_v39 = vsel %vm2226_vm1, %v4249_v33, %v4250_v37  ;;  %v4258_v63 = vrot.slane %v3623_v38, 2  ;;  %v4259_v44 = vrot.slane %v3624_v51, 2  ;;  %v10572_v46 = vld [vmem:[#allocation163_spill] sm:$0xff] }
 0x325   : > { %4459 = vst.msk [vmem:[%s8221_s21 + $0x1c8] sm:$0xff] %vm4401_vm4, %v4394_v4  ;;  %v4073_v55 = vmax.f32 %v3617_v6, %v3931_v36  ;;  %v4395_v8 = vmax.f32 %v4075_v30, %v4257_v10  ;;  %v3940_v57 = vsel %vm1525_vm0, %v3938_v24, %v3939_v32  ;;  %v3498_v59 = vmax.f32 %v10560_v42, %v10562_v21  ;;  %v10569_v6 = vld [vmem:[#allocation172_spill] sm:$0xff]  ;;  %v10573_v33 = vld [vmem:[#allocation171_spill] sm:$0xff] }
 0x326   : > { %v4076_v11 = vmax.f32 %v3623_v38, %v3940_v57  ;;  %v4260_v31 = vsel %vm2226_vm1, %v4258_v63, %v4259_v44  ;;  %v3499_v37 = vmax.f32 %v10561_v25, %v10563_v50  ;;  %v3625_v19 = vmax.f32 %v3497_v43, %v10563_v50  ;;  %v10575_v30 = vld [vmem:[#allocation192_spill] sm:$0xff] }
 0x327   : > { %v4393_v16 = vmax.f32 %v4073_v55, %v4251_v39  ;;  %4460 = vst.msk [vmem:[%s8221_s21 + $0x1d0] sm:$0xff] %vm4401_vm4, %v4395_v8  ;;  %v3500_v18 = vmax.f32 %v10562_v21, %v10564_v2  ;;  %v3501_v60 = vmax.f32 %v10563_v50, %v10565_v22  ;;  %v3626_v35 = vmax.f32 %v3498_v59, %v10564_v2 }
 0x328   : > { %v4396_v56 = vmax.f32 %v4076_v11, %v4260_v31  ;;  %v3627_v52 = vmax.f32 %v3499_v37, %v10565_v22  ;;  %v3502_v41 = vmax.f32 %v10564_v2, %v10566_v58  ;;  %v3941_v17 = vrot.slane %v3625_v19, 1 }
 0x329   : > { %4458 = vst.msk [vmem:[%s8221_s21 + $0x1c0] sm:$0xff] %vm4401_vm4, %v4393_v16  ;;  %v4261_v14 = vrot.slane %v3625_v19, 2  ;;  %v3628_v13 = vmax.f32 %v3500_v18, %v10566_v58  ;;  %v3629_v26 = vmax.f32 %v3501_v60, %v10567_v49  ;;  %v3942_v7 = vrot.slane %v3626_v35, 1 }
 0x32a   : > { %4461 = vst.msk [vmem:[%s8221_s21 + $0x1d8] sm:$0xff] %vm4401_vm4, %v4396_v56  ;;  %v4262_v62 = vrot.slane %v3626_v35, 2  ;;  %v3944_v42 = vrot.slane %v3627_v52, 1  ;;  %v4264_v40 = vrot.slane %v3627_v52, 2  ;;  %v3630_v27 = vmax.f32 %v3502_v41, %v10568_v28 }
 0x32b   : > { %v3945_v20 = vrot.slane %v3628_v13, 1  ;;  %v4265_v23 = vrot.slane %v3628_v13, 2  ;;  %v3947_v9 = vrot.slane %v3629_v26, 1  ;;  %v3943_v45 = vsel %vm1525_vm0, %v3941_v17, %v3942_v7 }
 0x32c   : > { %v4263_v15 = vsel %vm2226_vm1, %v4261_v14, %v4262_v62  ;;  %v4267_v54 = vrot.slane %v3629_v26, 2  ;;  %v10571_v0 = vmax.f32 %v10569_v6, %v10570_v47  ;;  %v4077_v3 = vmax.f32 %v3625_v19, %v3943_v45 }
 0x32d   : > { %v3946_v61 = vsel %vm1525_vm0, %v3944_v42, %v3945_v20  ;;  %v4266_v25 = vsel %vm2226_vm1, %v4264_v40, %v4265_v23  ;;  %v3948_v38 = vrot.slane %v3630_v27, 1  ;;  %v4268_v51 = vrot.slane %v3630_v27, 2 }
 0x32e   : > { %v924_v48 = vmax.f32 %v10571_v0, %v444_v29  ;;  %v4078_v21 = vmax.f32 %v3627_v52, %v3946_v61  ;;  %v10574_v4 = vmax.f32 %v10572_v46, %v10573_v33  ;;  %v1823_v10 = vrot.slane %v10575_v30, 1 }
 0x32f   : > { %v4397_v24 = vmax.f32 %v4077_v3, %v4263_v15  ;;  %v3949_v32 = vsel %vm1525_vm0, %v3947_v9, %v3948_v38  ;;  %v2524_v36 = vrot.slane %v10575_v30, 2  ;;  %v3215_v39 = vmax.f32 %v8942_v1, %v9045_v5 }
 0x330   : > { %v1324_v53 = vmax.f32 %v10574_v4, %v924_v48  ;;  %v4398_v63 = vmax.f32 %v4078_v21, %v4266_v25  ;;  %v4079_v44 = vmax.f32 %v3629_v26, %v3949_v32  ;;  %v4269_v55 = vsel %vm2226_vm1, %v4267_v54, %v4268_v51 }
 0x331   : > { %4462 = vst.msk [vmem:[%s8221_s21 + $0x1e0] sm:$0xff] %vm4401_vm4, %v4397_v24  ;;  %v3216_v43 = vmax.f32 %v8944_v34, %v9041_v12  ;;  %v3503_v11 = vmax.f32 %v10565_v22, %v10567_v49  ;;  %v10576_v12 = vmax.f32 %v10566_v58, %v10568_v28 }
 0x332   : > { %v1824_v8 = vrot.slane %v1324_v53, 1  ;;  %v2525_v57 = vrot.slane %v1324_v53, 2  ;;  %4463 = vst.msk [vmem:[%s8221_s21 + $0x1e8] sm:$0xff] %vm4401_vm4, %v4398_v63  ;;  %v4399_v31 = vmax.f32 %v4079_v44, %v4269_v55 }
 0x334   : > { %v1825_v59 = vsel %vm1525_vm0, %v1823_v10, %v1824_v8  ;;  %v2225_v1 = vmax.f32 %v1324_v53, %v1824_v8  ;;  %v2526_v50 = vsel %vm2226_vm1, %v2524_v36, %v2525_v57  ;;  %4464 = vst.msk [vmem:[%s8221_s21 + $0x1f0] sm:$0xff] %vm4401_vm4, %v4399_v31 }
 0x335   : > { %v2224_v5 = vmax.f32 %v10575_v30, %v1825_v59 }
 0x336   : > { %v2926_v37 = vmax.f32 %v2225_v1, %v2525_v57 }
 0x337   : > { %v2925_v16 = vmax.f32 %v2224_v5, %v2526_v50 }
 0x338   : > { %v3376_v19 = vmax.f32 %v3216_v43, %v2926_v37 }
 0x339   : > { %v3375_v34 = vmax.f32 %v3215_v39, %v2925_v16 }
 0x33a   : > { %v3632_v2 = vmax.f32 %v10576_v12, %v3376_v19 }
 0x33b   : > { %v3631_v18 = vmax.f32 %v3503_v11, %v3375_v34 }
 0x33c   : > { %v3951_v22 = vrot.slane %v3632_v2, 1  ;;  %v4271_v60 = vrot.slane %v3632_v2, 2 }
 0x33d   : > { %v3950_v56 = vrot.slane %v3631_v18, 1  ;;  %v4270_v35 = vrot.slane %v3631_v18, 2 }
 0x33f   : > { %v3952_v52 = vsel %vm1525_vm0, %v3950_v56, %v3951_v22  ;;  %v4272_v41 = vsel %vm2226_vm1, %v4270_v35, %v4271_v60 }
 0x340   : > { %v4080_v17 = vmax.f32 %v3631_v18, %v3952_v52 }
 0x342   : > { %v4400_v14 = vmax.f32 %v4080_v17, %v4272_v41 }
 0x344   : > { %4465 = vst.msk [vmem:[%s8221_s21 + $0x1f8] sm:$0xff] %vm4401_vm4, %v4400_v14 }
 0x345 PF: > { %s13_s9 = sadd.s32 1, %s4624_s9  }
 0x346   : > { %p10_p4 = scmp.ge.s32.totalorder %s13_s9, 4  }
 0x348   :  { %12 = sbr.rel (!%p10_p4) target bundleno = 1 (0x1), region = 66 }

// kernel: encoder_forward.8
= control target key start
LH: loop header
LB: loop body
LE: loop exit
PB: predicated region body
PF: predicated region fallthrough
CT: control target
= control target key end

     0   :  { %s2328_s18 = smov 0   ;;  %s2330_s19 = smov 0   ;;  %s3265_s0 = inlined_call_operand.vmem [shape: bf16[1024,768], index: 0, kind: input, shape index: {}]   ;;  %s3266_s1 = inlined_call_operand.vmem [shape: bf16[768,16], index: 1, kind: input, shape index: {}]   ;;  %s3267_s2 = inlined_call_operand.vmem [shape: f32[1,16], index: 2, kind: input, shape index: {}]   ;;  %s3268_s3 = inlined_call_operand.vmem [shape: f32[1024,4], index: 3, kind: input, shape index: {}]   ;;  %s3269_s4 = inlined_call_operand.vmem [shape: f32[1024,4], index: 4, kind: input, shape index: {}]   ;;  %s3270_s5 = inlined_call_operand.vmem [shape: f32[1024,4], index: 5, kind: output, shape index: {}]  }
   0x1   :  { %s2332_s20 = smov 0   ;;  %s2334_s21 = smov 0  }
   0x2   :  { %s2336_s22 = smov 0   ;;  %s2338_s23 = smov 0  }
   0x3   :  { %s2340_s24 = smov 0  }
   0x4 LB: > { %s24_s25 = sadd.s32 1, %s2284_s22  ;;  %s27_s26 = sadd.s32 1, %s2288_s23  ;;  %s2292_s24 = sphi %s2340_s24, %s15_s24   ;;  %s2288_s23 = sphi %s2338_s23, %s3282_s23   ;;  %s2284_s22 = sphi %s2336_s22, %s3281_s22   ;;  %s2280_s21 = sphi %s2334_s21, %s3280_s21   ;;  %s2276_s20 = sphi %s2332_s20, %s3279_s20   ;;  %s2272_s19 = sphi %s2330_s19, %s3278_s19   ;;  %s2268_s18 = sphi %s2328_s18, %s3277_s18  }
   0x5   : > { %p25_p0 = scmp.ge.s32.totalorder %s24_s25, 3  ;;  %p43_p1 = scmp.ne.s32.totalorder %s2272_s19, %s2268_s18 }
   0x6   : > { %p44_p2 = scmp.eq.s32.totalorder %s2292_s24, 0  ;;  %s36_s30 = sadd.s32 1, %s2272_s19 }
   0x7   : > { %s3284_s25 = smov (%p25_p0, %s24_s25), 0  ;;  %s3286_s26 = smov (!%p25_p0, %s27_s26), %s2288_s23 }
   0x8   : > { %p45_p3 = por %p44_p2, %p43_p1  ;;  %p29_p4 = scmp.ge.s32.totalorder %s3286_s26, 4 }
   0x9   : > { %s32_s27 = ssub.s32 %s2284_s22, %s3284_s25  ;;  %p1900_p6 = scmp.ge.s32.totalorder %s2292_s24, 12 }
   0xa   : > { %s3288_s26 = smov (%p29_p4, %s3286_s26), 0 }
   0xb   : > { %s31_s28 = ssub.s32 %s2288_s23, %s3288_s26  ;;  %197 = sbr.rel (%p1900_p6) target bundleno = 56 (0x38), region = 20 }
   0xc   : > { %s33_s29 = sor.u32 %s32_s27, %s31_s28 }
   0xd   : > { %p34_p5 = scmp.eq.s32.totalorder %s33_s29, 0 }
   0xf   : > { %s2379_s6 = scalar_select %p34_p5, %s2272_s19, %s36_s30  }
  0x10   : > { %200 = sbr.rel (!%p45_p3) target bundleno = 56 (0x38), region = 24  ;;  %s202_s7 = sand.u32 (%p45_p3), 1, %s2272_s19  }
  0x11   : > { %s1903_s8 = sshll.u32 (%p45_p3), %s2284_s22, 1  ;;  %s1901_s9 = sshll.u32 (%p45_p3), %s202_s7, 8 }
  0x12   : > { %s2176_s10 = smul.u32 (%p45_p3), 192, %s2288_s23  ;;  %s2393_s16 = scalar_lea.vmem (%p45_p3), [#allocation3], %s1901_s9 }
  0x14   : > { %s208_s11 = sadd.s32 (%p45_p3), %s2176_s10, %s1903_s8 }
  0x15   : > { %s1905_s12 = sshll.u32 %s208_s11, 2 }
  0x16   : > { %s2388_s15 = scalar_lea.vmem %s3265_s0, %s1905_s12 }
  0x17   : > { %v301_v0 = vld [vmem:[%s2388_s15] sm:$0xff]  ;;  %v303_v1 = vld [vmem:[%s2388_s15 + $0x18] sm:$0xff]  ;;  %v305_v2 = vld [vmem:[%s2388_s15 + $0x30] sm:$0xff] }
  0x18   : > { %302 = vst [vmem:[%s2393_s16] sm:$0xff] %v301_v0  ;;  %v307_v3 = vld [vmem:[%s2388_s15 + $0x48] sm:$0xff]  ;;  %v309_v4 = vld [vmem:[%s2388_s15 + $0x60] sm:$0xff]  ;;  %v311_v5 = vld [vmem:[%s2388_s15 + $0x78] sm:$0xff] }
  0x19   : > { %304 = vst [vmem:[%s2393_s16 + $0x8] sm:$0xff] %v303_v1  ;;  %v313_v6 = vld [vmem:[%s2388_s15 + $0x90] sm:$0xff]  ;;  %v315_v7 = vld [vmem:[%s2388_s15 + $0xa8] sm:$0xff]  ;;  %v317_v8 = vld [vmem:[%s2388_s15 + $0xc0] sm:$0xff] }
  0x1a   : > { %306 = vst [vmem:[%s2393_s16 + $0x10] sm:$0xff] %v305_v2  ;;  %v319_v9 = vld [vmem:[%s2388_s15 + $0xd8] sm:$0xff]  ;;  %v321_v10 = vld [vmem:[%s2388_s15 + $0xf0] sm:$0xff]  ;;  %v323_v11 = vld [vmem:[%s2388_s15 + $0x108] sm:$0xff] }
  0x1b   : > { %308 = vst [vmem:[%s2393_s16 + $0x18] sm:$0xff] %v307_v3  ;;  %v325_v12 = vld [vmem:[%s2388_s15 + $0x120] sm:$0xff]  ;;  %v327_v13 = vld [vmem:[%s2388_s15 + $0x138] sm:$0xff]  ;;  %v329_v14 = vld [vmem:[%s2388_s15 + $0x150] sm:$0xff] }
  0x1c   : > { %310 = vst [vmem:[%s2393_s16 + $0x20] sm:$0xff] %v309_v4  ;;  %v331_v15 = vld [vmem:[%s2388_s15 + $0x168] sm:$0xff]  ;;  %v333_v16 = vld [vmem:[%s2388_s15 + $0x180] sm:$0xff]  ;;  %v335_v17 = vld [vmem:[%s2388_s15 + $0x198] sm:$0xff] }
  0x1d   : > { %312 = vst [vmem:[%s2393_s16 + $0x28] sm:$0xff] %v311_v5  ;;  %v337_v18 = vld [vmem:[%s2388_s15 + $0x1b0] sm:$0xff]  ;;  %v339_v19 = vld [vmem:[%s2388_s15 + $0x1c8] sm:$0xff]  ;;  %v341_v20 = vld [vmem:[%s2388_s15 + $0x1e0] sm:$0xff] }
  0x1e   : > { %314 = vst [vmem:[%s2393_s16 + $0x30] sm:$0xff] %v313_v6  ;;  %v343_v21 = vld [vmem:[%s2388_s15 + $0x1f8] sm:$0xff]  ;;  %v345_v22 = vld [vmem:[%s2388_s15 + $0x210] sm:$0xff]  ;;  %v347_v23 = vld [vmem:[%s2388_s15 + $0x228] sm:$0xff] }
  0x1f   : > { %316 = vst [vmem:[%s2393_s16 + $0x38] sm:$0xff] %v315_v7  ;;  %v349_v24 = vld [vmem:[%s2388_s15 + $0x240] sm:$0xff]  ;;  %v351_v25 = vld [vmem:[%s2388_s15 + $0x258] sm:$0xff]  ;;  %v353_v26 = vld [vmem:[%s2388_s15 + $0x270] sm:$0xff] }
  0x20   : > { %318 = vst [vmem:[%s2393_s16 + $0x40] sm:$0xff] %v317_v8  ;;  %v355_v27 = vld [vmem:[%s2388_s15 + $0x288] sm:$0xff]  ;;  %v357_v28 = vld [vmem:[%s2388_s15 + $0x2a0] sm:$0xff]  ;;  %v359_v29 = vld [vmem:[%s2388_s15 + $0x2b8] sm:$0xff] }
  0x21   : > { %320 = vst [vmem:[%s2393_s16 + $0x48] sm:$0xff] %v319_v9  ;;  %v361_v30 = vld [vmem:[%s2388_s15 + $0x2d0] sm:$0xff]  ;;  %v363_v31 = vld [vmem:[%s2388_s15 + $0x2e8] sm:$0xff] }
  0x22   : > { %322 = vst [vmem:[%s2393_s16 + $0x50] sm:$0xff] %v321_v10 }
  0x23   : > { %324 = vst [vmem:[%s2393_s16 + $0x58] sm:$0xff] %v323_v11 }
  0x24   : > { %326 = vst [vmem:[%s2393_s16 + $0x60] sm:$0xff] %v325_v12 }
  0x25   : > { %328 = vst [vmem:[%s2393_s16 + $0x68] sm:$0xff] %v327_v13 }
  0x26   : > { %330 = vst [vmem:[%s2393_s16 + $0x70] sm:$0xff] %v329_v14 }
  0x27   : > { %332 = vst [vmem:[%s2393_s16 + $0x78] sm:$0xff] %v331_v15 }
  0x28   : > { %334 = vst [vmem:[%s2393_s16 + $0x80] sm:$0xff] %v333_v16 }
  0x29   : > { %336 = vst [vmem:[%s2393_s16 + $0x88] sm:$0xff] %v335_v17 }
  0x2a   : > { %338 = vst [vmem:[%s2393_s16 + $0x90] sm:$0xff] %v337_v18 }
  0x2b   : > { %340 = vst [vmem:[%s2393_s16 + $0x98] sm:$0xff] %v339_v19 }
  0x2c   : > { %342 = vst [vmem:[%s2393_s16 + $0xa0] sm:$0xff] %v341_v20 }
  0x2d   : > { %344 = vst [vmem:[%s2393_s16 + $0xa8] sm:$0xff] %v343_v21 }
  0x2e   : > { %346 = vst [vmem:[%s2393_s16 + $0xb0] sm:$0xff] %v345_v22 }
  0x2f   : > { %348 = vst [vmem:[%s2393_s16 + $0xb8] sm:$0xff] %v347_v23 }
  0x30   : > { %350 = vst [vmem:[%s2393_s16 + $0xc0] sm:$0xff] %v349_v24 }
  0x31   : > { %352 = vst [vmem:[%s2393_s16 + $0xc8] sm:$0xff] %v351_v25 }
  0x32   : > { %354 = vst [vmem:[%s2393_s16 + $0xd0] sm:$0xff] %v353_v26 }
  0x33   : > { %356 = vst [vmem:[%s2393_s16 + $0xd8] sm:$0xff] %v355_v27 }
  0x34   : > { %358 = vst [vmem:[%s2393_s16 + $0xe0] sm:$0xff] %v357_v28 }
  0x35   : > { %360 = vst [vmem:[%s2393_s16 + $0xe8] sm:$0xff] %v359_v29 }
  0x36   : > { %362 = vst [vmem:[%s2393_s16 + $0xf0] sm:$0xff] %v361_v30 }
  0x37   : > { %364 = vst [vmem:[%s2393_s16 + $0xf8] sm:$0xff] %v363_v31 }
  0x38 PF: > { %p1906_p7 = scmp.ge.s32.totalorder %s2292_s24, 1  ;;  %p396_p8 = scmp.lt.s32.totalorder %s2292_s24, 13 }
  0x3a   : > { %p397_p9 = pnand %p1906_p7, %p396_p8 }
  0x3b   : > { %s403_s17 = sand.u32 (!%p397_p9), 1, %s2268_s18   ;;  %s1908_s27 = sshll.u32 (!%p397_p9), %s2276_s20, 5 }
  0x3c   : > { %400 = sbr.rel (%p397_p9) target bundleno = 774 (0x306), region = 74  ;;  %s1907_s28 = sshll.u32 (!%p397_p9), %s403_s17, 8 }
  0x3d   : > { %p448_p10 = scmp.lt.s32.totalorder (!%p397_p9), %s1908_s27, 95  ;;  %s1910_s29 = sshll.u32 (!%p397_p9), %s2280_s21, 5 }
  0x3e   : > { %p454_p11 = scmp.lt.s32.totalorder (!%p397_p9), %s1910_s29, 127  ;;  %p1916_p12 = scmp.ne.s32.totalorder (!%p397_p9), %s2276_s20, 0 }
  0x41   : > { %s3290_s27 = smov (!%p448_p10, %s1908_s27), 95  ;;  %s3292_s29 = smov (!%p454_p11, %s1910_s29), 127 }
  0x42   : > { %s1909_s30 = sshll.u32 %s3290_s27, 2  ;;  %s1911_s10 = sshll.u32 %s3292_s29, 3 }
  0x43   : > { %s2464_s9 = scalar_lea.vmem %s3266_s1, %s1909_s30  ;;  %s2469_s13 = scalar_lea.vmem %s3268_s3, %s1911_s10 }
  0x44   : > { %s2474_s15 = scalar_lea.vmem %s3269_s4, %s1911_s10  ;;  %s2479_s17 = scalar_lea.vmem %s3270_s5, %s1911_s10 }
  0x45   : > { %s2481_s27 = scalar_lea.vmem [#allocation3], %s1907_s28  ;;  %474 = sbr.rel (%p1916_p12) target bundleno = 107 (0x6b), region = 82 }
  0x4a   : > { %vm475_vm0 = vcmask 130048   ;;  %v2294_v32 = vmov 0.0  }
  0x4b   : > { %476 = vst.msk [vmem:[#allocation2] sm:$0xff] %vm475_vm0, %v2294_v32 }
  0x4c   : > { %477 = vst.msk [vmem:[#allocation2 + $0x8] sm:$0xff] %vm475_vm0, %v2294_v32 }
  0x4d   : > { %478 = vst.msk [vmem:[#allocation2 + $0x10] sm:$0xff] %vm475_vm0, %v2294_v32 }
  0x4e   : > { %479 = vst.msk [vmem:[#allocation2 + $0x18] sm:$0xff] %vm475_vm0, %v2294_v32 }
  0x4f   : > { %480 = vst.msk [vmem:[#allocation2 + $0x20] sm:$0xff] %vm475_vm0, %v2294_v32 }
  0x50   : > { %481 = vst.msk [vmem:[#allocation2 + $0x28] sm:$0xff] %vm475_vm0, %v2294_v32 }
  0x51   : > { %482 = vst.msk [vmem:[#allocation2 + $0x30] sm:$0xff] %vm475_vm0, %v2294_v32 }
  0x52   : > { %483 = vst.msk [vmem:[#allocation2 + $0x38] sm:$0xff] %vm475_vm0, %v2294_v32 }
  0x53   : > { %484 = vst.msk [vmem:[#allocation2 + $0x40] sm:$0xff] %vm475_vm0, %v2294_v32 }
  0x54   : > { %485 = vst.msk [vmem:[#allocation2 + $0x48] sm:$0xff] %vm475_vm0, %v2294_v32 }
  0x55   : > { %486 = vst.msk [vmem:[#allocation2 + $0x50] sm:$0xff] %vm475_vm0, %v2294_v32 }
  0x56   : > { %487 = vst.msk [vmem:[#allocation2 + $0x58] sm:$0xff] %vm475_vm0, %v2294_v32 }
  0x57   : > { %488 = vst.msk [vmem:[#allocation2 + $0x60] sm:$0xff] %vm475_vm0, %v2294_v32 }
  0x58   : > { %489 = vst.msk [vmem:[#allocation2 + $0x68] sm:$0xff] %vm475_vm0, %v2294_v32 }
  0x59   : > { %490 = vst.msk [vmem:[#allocation2 + $0x70] sm:$0xff] %vm475_vm0, %v2294_v32 }
  0x5a   : > { %491 = vst.msk [vmem:[#allocation2 + $0x78] sm:$0xff] %vm475_vm0, %v2294_v32 }
  0x5b   : > { %492 = vst.msk [vmem:[#allocation2 + $0x80] sm:$0xff] %vm475_vm0, %v2294_v32 }
  0x5c   : > { %493 = vst.msk [vmem:[#allocation2 + $0x88] sm:$0xff] %vm475_vm0, %v2294_v32 }
  0x5d   : > { %494 = vst.msk [vmem:[#allocation2 + $0x90] sm:$0xff] %vm475_vm0, %v2294_v32 }
  0x5e   : > { %495 = vst.msk [vmem:[#allocation2 + $0x98] sm:$0xff] %vm475_vm0, %v2294_v32 }
  0x5f   : > { %496 = vst.msk [vmem:[#allocation2 + $0xa0] sm:$0xff] %vm475_vm0, %v2294_v32 }
  0x60   : > { %497 = vst.msk [vmem:[#allocation2 + $0xa8] sm:$0xff] %vm475_vm0, %v2294_v32 }
  0x61   : > { %498 = vst.msk [vmem:[#allocation2 + $0xb0] sm:$0xff] %vm475_vm0, %v2294_v32 }
  0x62   : > { %499 = vst.msk [vmem:[#allocation2 + $0xb8] sm:$0xff] %vm475_vm0, %v2294_v32 }
  0x63   : > { %500 = vst.msk [vmem:[#allocation2 + $0xc0] sm:$0xff] %vm475_vm0, %v2294_v32 }
  0x64   : > { %501 = vst.msk [vmem:[#allocation2 + $0xc8] sm:$0xff] %vm475_vm0, %v2294_v32 }
  0x65   : > { %502 = vst.msk [vmem:[#allocation2 + $0xd0] sm:$0xff] %vm475_vm0, %v2294_v32 }
  0x66   : > { %503 = vst.msk [vmem:[#allocation2 + $0xd8] sm:$0xff] %vm475_vm0, %v2294_v32 }
  0x67   : > { %504 = vst.msk [vmem:[#allocation2 + $0xe0] sm:$0xff] %vm475_vm0, %v2294_v32 }
  0x68   : > { %505 = vst.msk [vmem:[#allocation2 + $0xe8] sm:$0xff] %vm475_vm0, %v2294_v32 }
  0x69   : > { %506 = vst.msk [vmem:[#allocation2 + $0xf0] sm:$0xff] %vm475_vm0, %v2294_v32 }
  0x6a   : > { %507 = vst.msk [vmem:[#allocation2 + $0xf8] sm:$0xff] %vm475_vm0, %v2294_v32 }
  0x6b PF: > { %v2151_v33 = vld [vmem:[%s2464_s9 + $0x38] sm:$0xff]  ;;  %v2150_v35 = vld [vmem:[%s2464_s9 + $0x30] sm:$0xff]  ;;  %v2149_v37 = vld [vmem:[%s2464_s9 + $0x28] sm:$0xff]  ;;  %vm1070_vm1 = vcmask 130048   ;;  %p2109_p13 = scmp.ne.s32.totalorder %s2276_s20, 2 }
  0x6c   : > { %v2159_v34 = vld [vmem:[%s2464_s9 + $0x78] sm:$0xff]  ;;  %860 = vmatpush.bf16.msra.mxu0 %v2151_v33  ;;  %2160 = vmatpush.bf16.msra.mxu2 %v2151_v33  ;;  %v2158_v36 = vld [vmem:[%s2464_s9 + $0x70] sm:$0xff]  ;;  %v2157_v38 = vld [vmem:[%s2464_s9 + $0x68] sm:$0xff] }
  0x6d   : > { %949 = vmatpush.bf16.msra.mxu1 %v2159_v34  ;;  %2168 = vmatpush.bf16.msra.mxu3 %v2159_v34  ;;  %v2148_v39 = vld [vmem:[%s2464_s9 + $0x20] sm:$0xff]  ;;  %v2147_v41 = vld [vmem:[%s2464_s9 + $0x18] sm:$0xff]  ;;  %v2146_v43 = vld [vmem:[%s2464_s9 + $0x10] sm:$0xff] }
  0x6e   : > { %v2156_v40 = vld [vmem:[%s2464_s9 + $0x60] sm:$0xff]  ;;  %v2155_v42 = vld [vmem:[%s2464_s9 + $0x58] sm:$0xff]  ;;  %v2154_v44 = vld [vmem:[%s2464_s9 + $0x50] sm:$0xff] }
  0x6f   : > { %v2145_v45 = vld [vmem:[%s2464_s9 + $0x8] sm:$0xff]  ;;  %v2144_v47 = vld [vmem:[%s2464_s9] sm:$0xff]  ;;  %v1927_v61 = vld [vmem:[%s2481_s27 + $0x10] sm:$0xf] }
  0x70   : > { %861 = vmatpush.bf16.msra.mxu0 %v2150_v35  ;;  %2161 = vmatpush.bf16.msra.mxu2 %v2150_v35  ;;  %v2153_v46 = vld [vmem:[%s2464_s9 + $0x48] sm:$0xff]  ;;  %v2152_v48 = vld [vmem:[%s2464_s9 + $0x40] sm:$0xff]  ;;  %v2115_v62 = vld [vmem:[%s2481_s27 + $0x14] sm:$0xf0] }
  0x71   : > { %950 = vmatpush.bf16.msra.mxu1 %v2158_v36  ;;  %2169 = vmatpush.bf16.msra.mxu3 %v2158_v36  ;;  %v1919_v49 = vld [vmem:[%s2481_s27] sm:$0xf]  ;;  %v2113_v50 = vld [vmem:[%s2481_s27 + $0x4] sm:$0xf0]  ;;  %v2112_v53 = vld [vmem:[%s2481_s27 + $0x4] sm:$0xf]  ;;  %v1928_v5 = vor.u32 %v2115_v62, %v1927_v61 }
  0x72   : > { %v1983_v51 = vld [vmem:[%s2481_s27 + $0x80] sm:$0xf]  ;;  %v2129_v52 = vld [vmem:[%s2481_s27 + $0x84] sm:$0xf0]  ;;  %v1921_v54 = vld [vmem:[%s2481_s27 + $0x8] sm:$0xf0]  ;;  %v1920_v57 = vor.u32 %v2113_v50, %v1919_v49 }
  0x73   : > { %v2128_v55 = vld [vmem:[%s2481_s27 + $0x84] sm:$0xf]  ;;  %v1985_v56 = vld [vmem:[%s2481_s27 + $0x88] sm:$0xf0]  ;;  %v1984_v58 = vor.u32 %v2129_v52, %v1983_v51  ;;  %v1924_v59 = vor.u32 %v2112_v53, %v1921_v54  ;;  %v1991_v63 = vld [vmem:[%s2481_s27 + $0x90] sm:$0xf] }
  0x74   : > { %862 = vmatpush.bf16.msra.mxu0 %v2149_v37  ;;  %2162 = vmatpush.bf16.msra.mxu2 %v2149_v37  ;;  %v1988_v60 = vor.u32 %v2128_v55, %v1985_v56  ;;  %v2131_v0 = vld [vmem:[%s2481_s27 + $0x94] sm:$0xf0]  ;;  %v2114_v1 = vld [vmem:[%s2481_s27 + $0x14] sm:$0xf]  ;;  %v1929_v2 = vld [vmem:[%s2481_s27 + $0x18] sm:$0xf0] }
  0x75   : > { %951 = vmatpush.bf16.msra.mxu1 %v2157_v38  ;;  %2170 = vmatpush.bf16.msra.mxu3 %v2157_v38  ;;  %v2130_v3 = vld [vmem:[%s2481_s27 + $0x94] sm:$0xf]  ;;  %v1993_v4 = vld [vmem:[%s2481_s27 + $0x98] sm:$0xf0]  ;;  %v1992_v6 = vor.u32 %v2131_v0, %v1991_v63  ;;  %v1932_v7 = vor.u32 %v2114_v1, %v1929_v2  ;;  %v1935_v9 = vld [vmem:[%s2481_s27 + $0x20] sm:$0xf] }
  0x76   : > { %v1996_v8 = vor.u32 %v2130_v3, %v1993_v4  ;;  %v2117_v10 = vld [vmem:[%s2481_s27 + $0x24] sm:$0xf0]  ;;  %v1999_v11 = vld [vmem:[%s2481_s27 + $0xa0] sm:$0xf]  ;;  %v2116_v13 = vld [vmem:[%s2481_s27 + $0x24] sm:$0xf] }
  0x77   : > { %v2133_v12 = vld [vmem:[%s2481_s27 + $0xa4] sm:$0xf0]  ;;  %v1937_v14 = vld [vmem:[%s2481_s27 + $0x28] sm:$0xf0]  ;;  %v2132_v15 = vld [vmem:[%s2481_s27 + $0xa4] sm:$0xf]  ;;  %v1936_v17 = vor.u32 %v2117_v10, %v1935_v9 }
  0x78   : > { %863 = vmatpush.bf16.msra.mxu0 %v2148_v39  ;;  %2163 = vmatpush.bf16.msra.mxu2 %v2148_v39  ;;  %v2001_v16 = vld [vmem:[%s2481_s27 + $0xa8] sm:$0xf0]  ;;  %v2000_v18 = vor.u32 %v2133_v12, %v1999_v11  ;;  %v1940_v19 = vor.u32 %v2116_v13, %v1937_v14  ;;  %v1943_v21 = vld [vmem:[%s2481_s27 + $0x30] sm:$0xf]  ;;  %v2119_v22 = vld [vmem:[%s2481_s27 + $0x34] sm:$0xf0] }
  0x79   : > { %952 = vmatpush.bf16.msra.mxu1 %v2156_v40  ;;  %2171 = vmatpush.bf16.msra.mxu3 %v2156_v40  ;;  %v2004_v20 = vor.u32 %v2132_v15, %v2001_v16  ;;  %v2007_v23 = vld [vmem:[%s2481_s27 + $0xb0] sm:$0xf]  ;;  %v2135_v24 = vld [vmem:[%s2481_s27 + $0xb4] sm:$0xf0]  ;;  %v2118_v25 = vld [vmem:[%s2481_s27 + $0x34] sm:$0xf]  ;;  %v1944_v29 = vor.u32 %v2119_v22, %v1943_v21 }
  0x7a   : > { %v1945_v26 = vld [vmem:[%s2481_s27 + $0x38] sm:$0xf0]  ;;  %v2134_v27 = vld [vmem:[%s2481_s27 + $0xb4] sm:$0xf]  ;;  %v2008_v30 = vor.u32 %v2135_v24, %v2007_v23  ;;  %v1951_v33 = vld [vmem:[%s2481_s27 + $0x40] sm:$0xf] }
  0x7b   : > { %v2009_v28 = vld [vmem:[%s2481_s27 + $0xb8] sm:$0xf0]  ;;  %v1948_v31 = vor.u32 %v2118_v25, %v1945_v26  ;;  %v2121_v34 = vld [vmem:[%s2481_s27 + $0x44] sm:$0xf0]  ;;  %v2015_v35 = vld [vmem:[%s2481_s27 + $0xc0] sm:$0xf] }
  0x7c   : > { %864 = vmatpush.bf16.msra.mxu0 %v2147_v41  ;;  %2164 = vmatpush.bf16.msra.mxu2 %v2147_v41  ;;  %v2012_v32 = vor.u32 %v2134_v27, %v2009_v28  ;;  %v2137_v36 = vld [vmem:[%s2481_s27 + $0xc4] sm:$0xf0]  ;;  %v2120_v37 = vld [vmem:[%s2481_s27 + $0x44] sm:$0xf]  ;;  %v1953_v38 = vld [vmem:[%s2481_s27 + $0x48] sm:$0xf0]  ;;  %v1952_v41 = vor.u32 %v2121_v34, %v1951_v33 }
  0x7d   : > { %953 = vmatpush.bf16.msra.mxu1 %v2155_v42  ;;  %2172 = vmatpush.bf16.msra.mxu3 %v2155_v42  ;;  %v2136_v39 = vld [vmem:[%s2481_s27 + $0xc4] sm:$0xf]  ;;  %v2017_v40 = vld [vmem:[%s2481_s27 + $0xc8] sm:$0xf0]  ;;  %v2016_v42 = vor.u32 %v2137_v36, %v2015_v35  ;;  %v2122_v49 = vld [vmem:[%s2481_s27 + $0x54] sm:$0xf] }
  0x7e   : > { %v1961_v50 = vld [vmem:[%s2481_s27 + $0x58] sm:$0xf0]  ;;  %v2138_v51 = vld [vmem:[%s2481_s27 + $0xd4] sm:$0xf]  ;;  %v2124_v61 = vld [vmem:[%s2481_s27 + $0x64] sm:$0xf] }
  0x7f   : > { %v2025_v52 = vld [vmem:[%s2481_s27 + $0xd8] sm:$0xf0]  ;;  %v1964_v55 = vor.u32 %v2122_v49, %v1961_v50  ;;  %v1969_v62 = vld [vmem:[%s2481_s27 + $0x68] sm:$0xf0]  ;;  %v2140_v63 = vld [vmem:[%s2481_s27 + $0xe4] sm:$0xf] }
  0x80   : > { %865 = vmatpush.bf16.msra.mxu0 %v2146_v43  ;;  %2165 = vmatpush.bf16.msra.mxu2 %v2146_v43  ;;  %v1956_v43 = vor.u32 %v2120_v37, %v1953_v38  ;;  %v2028_v56 = vor.u32 %v2138_v51, %v2025_v52  ;;  %v2033_v0 = vld [vmem:[%s2481_s27 + $0xe8] sm:$0xf0]  ;;  %v1972_v3 = vor.u32 %v2124_v61, %v1969_v62  ;;  %v2126_v9 = vld [vmem:[%s2481_s27 + $0x74] sm:$0xf]  ;;  %v1977_v10 = vld [vmem:[%s2481_s27 + $0x78] sm:$0xf0] }
  0x81   : > { %954 = vmatpush.bf16.msra.mxu1 %v2154_v44  ;;  %2173 = vmatpush.bf16.msra.mxu3 %v2154_v44  ;;  %v2020_v44 = vor.u32 %v2136_v39, %v2017_v40  ;;  %v2036_v4 = vor.u32 %v2140_v63, %v2033_v0  ;;  %v2142_v11 = vld [vmem:[%s2481_s27 + $0xf4] sm:$0xf]  ;;  %v2041_v12 = vld [vmem:[%s2481_s27 + $0xf8] sm:$0xf0]  ;;  %v1980_v15 = vor.u32 %v2126_v9, %v1977_v10  ;;  %v524_v23 = vld [vmem:[#allocation2 + $0x80] sm:$0xff] }
  0x82   : > { %v2044_v16 = vor.u32 %v2142_v11, %v2041_v12  ;;  %v509_v27 = vld [vmem:[#allocation2 + $0x8] sm:$0xff]  ;;  %v510_v37 = vld [vmem:[#allocation2 + $0x10] sm:$0xff]  ;;  %v528_v63 = vld [vmem:[#allocation2 + $0xa0] sm:$0xff] }
  0x83   : > { %v525_v33 = vld [vmem:[#allocation2 + $0x88] sm:$0xff] }
  0x84   : > { %866 = vmatpush.bf16.msra.mxu0 %v2145_v45  ;;  %2166 = vmatpush.bf16.msra.mxu2 %v2145_v45  ;;  %v1959_v45 = vld [vmem:[%s2481_s27 + $0x50] sm:$0xf]  ;;  %v529_v9 = vld [vmem:[#allocation2 + $0xa8] sm:$0xff] }
  0x85   : > { %955 = vmatpush.bf16.msra.mxu1 %v2153_v46  ;;  %2174 = vmatpush.bf16.msra.mxu3 %v2153_v46  ;;  %v2123_v46 = vld [vmem:[%s2481_s27 + $0x54] sm:$0xf0] }
  0x86   : > { %v1960_v53 = vor.u32 %v2123_v46, %v1959_v45 }
  0x88   : > { %867 = vmatpush.bf16.msra.mxu0 %v2144_v47  ;;  %2167 = vmatpush.bf16.msra.mxu2 %v2144_v47  ;;  %v2023_v47 = vld [vmem:[%s2481_s27 + $0xd0] sm:$0xf] }
  0x89   : > { %956 = vmatpush.bf16.msra.mxu1 %v2152_v48  ;;  %2175 = vmatpush.bf16.msra.mxu3 %v2152_v48  ;;  %v2139_v48 = vld [vmem:[%s2481_s27 + $0xd4] sm:$0xf0] }
  0x8a   : > { %v2024_v54 = vor.u32 %v2139_v48, %v2023_v47  ;;  %v511_v47 = vld [vmem:[#allocation2 + $0x18] sm:$0xff] }
  0x8b   : > { %868 = vmatmul.bf16.vlgmr.msra.gmra.mxu0 %v1920_v57  ;;  %908 = vmatmul.bf16.vlgmr.msra.gmra.mxu2 %v1984_v58  ;;  %v1967_v57 = vld [vmem:[%s2481_s27 + $0x60] sm:$0xf]  ;;  %v2125_v58 = vld [vmem:[%s2481_s27 + $0x64] sm:$0xf0] }
  0x8c   : > { %957 = vmatmul.bf16.vlgmr.msra.gmra.mxu1 %v1924_v59  ;;  %997 = vmatmul.bf16.vlgmr.msra.gmra.mxu3 %v1988_v60  ;;  %v2031_v59 = vld [vmem:[%s2481_s27 + $0xe0] sm:$0xf]  ;;  %v2141_v60 = vld [vmem:[%s2481_s27 + $0xe4] sm:$0xf0]  ;;  %v1968_v1 = vor.u32 %v2125_v58, %v1967_v57 }
  0x8d   : > { %v2032_v2 = vor.u32 %v2141_v60, %v2031_v59  ;;  %v512_v57 = vld [vmem:[#allocation2 + $0x20] sm:$0xff] }
  0x9b   : > { %873 = vmatmul.bf16.gmra.mxu0 %v1928_v5  ;;  %913 = vmatmul.bf16.gmra.mxu2 %v1992_v6  ;;  %v1975_v5 = vld [vmem:[%s2481_s27 + $0x70] sm:$0xf]  ;;  %v2127_v6 = vld [vmem:[%s2481_s27 + $0x74] sm:$0xf0] }
  0x9c   : > { %962 = vmatmul.bf16.gmra.mxu1 %v1932_v7  ;;  %1002 = vmatmul.bf16.gmra.mxu3 %v1996_v8  ;;  %v2039_v7 = vld [vmem:[%s2481_s27 + $0xf0] sm:$0xf]  ;;  %v2143_v8 = vld [vmem:[%s2481_s27 + $0xf4] sm:$0xf0]  ;;  %v1976_v13 = vor.u32 %v2127_v6, %v1975_v5 }
  0x9d   : > { %v2040_v14 = vor.u32 %v2143_v8, %v2039_v7 }
  0xab   : > { %878 = vmatmul.bf16.gmra.mxu0 %v1936_v17  ;;  %918 = vmatmul.bf16.gmra.mxu2 %v2000_v18  ;;  %v508_v18 = vld [vmem:[#allocation2] sm:$0xff] }
  0xac   : > { %967 = vmatmul.bf16.gmra.mxu1 %v1940_v19  ;;  %1007 = vmatmul.bf16.gmra.mxu3 %v2004_v20 }
  0xbb   : > { %883 = vmatmul.bf16.gmra.mxu0 %v1944_v29  ;;  %923 = vmatmul.bf16.gmra.mxu2 %v2008_v30 }
  0xbc   : > { %972 = vmatmul.bf16.gmra.mxu1 %v1948_v31  ;;  %1012 = vmatmul.bf16.gmra.mxu3 %v2012_v32 }
  0xcb   : > { %888 = vmatmul.bf16.gmra.mxu0 %v1952_v41  ;;  %928 = vmatmul.bf16.gmra.mxu2 %v2016_v42 }
  0xcc   : > { %977 = vmatmul.bf16.gmra.mxu1 %v1956_v43  ;;  %1017 = vmatmul.bf16.gmra.mxu3 %v2020_v44  ;;  %v526_v43 = vld [vmem:[#allocation2 + $0x90] sm:$0xff] }
  0xdb   : > { %893 = vmatmul.bf16.gmra.mxu0 %v1960_v53  ;;  %933 = vmatmul.bf16.gmra.mxu2 %v2024_v54  ;;  %v527_v53 = vld [vmem:[#allocation2 + $0x98] sm:$0xff] }
  0xdc   : > { %982 = vmatmul.bf16.gmra.mxu1 %v1964_v55  ;;  %1022 = vmatmul.bf16.gmra.mxu3 %v2028_v56 }
  0xeb   : > { %898 = vmatmul.bf16.gmra.mxu0 %v1968_v1  ;;  %938 = vmatmul.bf16.gmra.mxu2 %v2032_v2 }
  0xec   : > { %987 = vmatmul.bf16.gmra.mxu1 %v1972_v3  ;;  %1027 = vmatmul.bf16.gmra.mxu3 %v2036_v4  ;;  %v513_v3 = vld [vmem:[#allocation2 + $0x28] sm:$0xff] }
  0xfb   : > { %903 = vmatmul.bf16.gmra.mxu0 %v1976_v13  ;;  %943 = vmatmul.bf16.gmra.mxu2 %v2040_v14  ;;  %v514_v13 = vld [vmem:[#allocation2 + $0x30] sm:$0xff] }
  0xfc   : > { %992 = vmatmul.bf16.gmra.mxu1 %v1980_v15  ;;  %1032 = vmatmul.bf16.gmra.mxu3 %v2044_v16 }
 0x108   : > { %v869_v17 = vpop.f32.mrf.mxu0 }
 0x109   : > { %v958_v19 = vpop.f32.mrf.mxu1 }
 0x10a   : > { %v959_v20 = vadd.f32 %v958_v19, %v869_v17  ;;  %v530_v19 = vld [vmem:[#allocation2 + $0xb0] sm:$0xff] }
 0x10c   : > { %v1038_v21 = vadd.f32 %v959_v20, %v508_v18 }
 0x10e   : > { %1071 = vst.msk [vmem:[#allocation2] sm:$0xff] %vm1070_vm1, %v1038_v21  ;;  %v909_v22 = vpop.f32.mrf.mxu2 }
 0x10f   : > { %v998_v24 = vpop.f32.mrf.mxu3 }
 0x110   : > { %v999_v25 = vadd.f32 %v998_v24, %v909_v22  ;;  %v871_v26 = vpop.f32.mrf.mxu0 }
 0x111   : > { %v960_v28 = vpop.f32.mrf.mxu1 }
 0x112   : > { %v1054_v29 = vadd.f32 %v999_v25, %v524_v23  ;;  %v961_v30 = vadd.f32 %v960_v28, %v871_v26  ;;  %v515_v23 = vld [vmem:[#allocation2 + $0x38] sm:$0xff] }
 0x114   : > { %1087 = vst.msk [vmem:[#allocation2 + $0x80] sm:$0xff] %vm1070_vm1, %v1054_v29  ;;  %v1039_v31 = vadd.f32 %v961_v30, %v509_v27  ;;  %v531_v29 = vld [vmem:[#allocation2 + $0xb8] sm:$0xff] }
 0x116   : > { %1072 = vst.msk [vmem:[#allocation2 + $0x8] sm:$0xff] %vm1070_vm1, %v1039_v31  ;;  %v911_v32 = vpop.f32.mrf.mxu2 }
 0x117   : > { %v1000_v34 = vpop.f32.mrf.mxu3 }
 0x118   : > { %v1001_v35 = vadd.f32 %v1000_v34, %v911_v32  ;;  %v874_v36 = vpop.f32.mrf.mxu0 }
 0x119   : > { %v963_v38 = vpop.f32.mrf.mxu1 }
 0x11a   : > { %v1055_v39 = vadd.f32 %v1001_v35, %v525_v33  ;;  %v964_v40 = vadd.f32 %v963_v38, %v874_v36  ;;  %v516_v33 = vld [vmem:[#allocation2 + $0x40] sm:$0xff] }
 0x11c   : > { %1088 = vst.msk [vmem:[#allocation2 + $0x88] sm:$0xff] %vm1070_vm1, %v1055_v39  ;;  %v1040_v41 = vadd.f32 %v964_v40, %v510_v37  ;;  %v532_v39 = vld [vmem:[#allocation2 + $0xc0] sm:$0xff] }
 0x11e   : > { %1073 = vst.msk [vmem:[#allocation2 + $0x10] sm:$0xff] %vm1070_vm1, %v1040_v41  ;;  %v914_v42 = vpop.f32.mrf.mxu2 }
 0x11f   : > { %v1003_v44 = vpop.f32.mrf.mxu3 }
 0x120   : > { %v1004_v45 = vadd.f32 %v1003_v44, %v914_v42  ;;  %v876_v46 = vpop.f32.mrf.mxu0 }
 0x121   : > { %v965_v48 = vpop.f32.mrf.mxu1 }
 0x122   : > { %v1056_v49 = vadd.f32 %v1004_v45, %v526_v43  ;;  %v966_v50 = vadd.f32 %v965_v48, %v876_v46  ;;  %v517_v43 = vld [vmem:[#allocation2 + $0x48] sm:$0xff] }
 0x124   : > { %1089 = vst.msk [vmem:[#allocation2 + $0x90] sm:$0xff] %vm1070_vm1, %v1056_v49  ;;  %v1041_v51 = vadd.f32 %v966_v50, %v511_v47  ;;  %v533_v49 = vld [vmem:[#allocation2 + $0xc8] sm:$0xff] }
 0x126   : > { %1074 = vst.msk [vmem:[#allocation2 + $0x18] sm:$0xff] %vm1070_vm1, %v1041_v51  ;;  %v916_v52 = vpop.f32.mrf.mxu2 }
 0x127   : > { %v1005_v54 = vpop.f32.mrf.mxu3 }
 0x128   : > { %v1006_v55 = vadd.f32 %v1005_v54, %v916_v52  ;;  %v879_v56 = vpop.f32.mrf.mxu0 }
 0x129   : > { %v968_v58 = vpop.f32.mrf.mxu1 }
 0x12a   : > { %v1057_v59 = vadd.f32 %v1006_v55, %v527_v53  ;;  %v969_v60 = vadd.f32 %v968_v58, %v879_v56  ;;  %v518_v53 = vld [vmem:[#allocation2 + $0x50] sm:$0xff] }
 0x12c   : > { %1090 = vst.msk [vmem:[#allocation2 + $0x98] sm:$0xff] %vm1070_vm1, %v1057_v59  ;;  %v1042_v61 = vadd.f32 %v969_v60, %v512_v57  ;;  %v534_v59 = vld [vmem:[#allocation2 + $0xd0] sm:$0xff] }
 0x12e   : > { %1075 = vst.msk [vmem:[#allocation2 + $0x20] sm:$0xff] %vm1070_vm1, %v1042_v61  ;;  %v919_v62 = vpop.f32.mrf.mxu2 }
 0x12f   : > { %v1008_v0 = vpop.f32.mrf.mxu3 }
 0x130   : > { %v1009_v1 = vadd.f32 %v1008_v0, %v919_v62  ;;  %v881_v2 = vpop.f32.mrf.mxu0 }
 0x131   : > { %v970_v4 = vpop.f32.mrf.mxu1 }
 0x132   : > { %v1058_v5 = vadd.f32 %v1009_v1, %v528_v63  ;;  %v971_v6 = vadd.f32 %v970_v4, %v881_v2  ;;  %v519_v63 = vld [vmem:[#allocation2 + $0x58] sm:$0xff] }
 0x134   : > { %1091 = vst.msk [vmem:[#allocation2 + $0xa0] sm:$0xff] %vm1070_vm1, %v1058_v5  ;;  %v1043_v7 = vadd.f32 %v971_v6, %v513_v3  ;;  %v535_v5 = vld [vmem:[#allocation2 + $0xd8] sm:$0xff] }
 0x136   : > { %1076 = vst.msk [vmem:[#allocation2 + $0x28] sm:$0xff] %vm1070_vm1, %v1043_v7  ;;  %v921_v8 = vpop.f32.mrf.mxu2 }
 0x137   : > { %v1010_v10 = vpop.f32.mrf.mxu3 }
 0x138   : > { %v1011_v11 = vadd.f32 %v1010_v10, %v921_v8  ;;  %v884_v12 = vpop.f32.mrf.mxu0 }
 0x139   : > { %v973_v14 = vpop.f32.mrf.mxu1 }
 0x13a   : > { %v1059_v15 = vadd.f32 %v1011_v11, %v529_v9  ;;  %v974_v16 = vadd.f32 %v973_v14, %v884_v12  ;;  %v520_v9 = vld [vmem:[#allocation2 + $0x60] sm:$0xff] }
 0x13c   : > { %1092 = vst.msk [vmem:[#allocation2 + $0xa8] sm:$0xff] %vm1070_vm1, %v1059_v15  ;;  %v1044_v17 = vadd.f32 %v974_v16, %v514_v13  ;;  %v536_v15 = vld [vmem:[#allocation2 + $0xe0] sm:$0xff] }
 0x13e   : > { %1077 = vst.msk [vmem:[#allocation2 + $0x30] sm:$0xff] %vm1070_vm1, %v1044_v17  ;;  %v924_v18 = vpop.f32.mrf.mxu2 }
 0x13f   : > { %v1013_v20 = vpop.f32.mrf.mxu3 }
 0x140   : > { %v1014_v21 = vadd.f32 %v1013_v20, %v924_v18  ;;  %v886_v22 = vpop.f32.mrf.mxu0 }
 0x141   : > { %v975_v24 = vpop.f32.mrf.mxu1 }
 0x142   : > { %v1060_v25 = vadd.f32 %v1014_v21, %v530_v19  ;;  %v976_v26 = vadd.f32 %v975_v24, %v886_v22  ;;  %v521_v19 = vld [vmem:[#allocation2 + $0x68] sm:$0xff] }
 0x144   : > { %1093 = vst.msk [vmem:[#allocation2 + $0xb0] sm:$0xff] %vm1070_vm1, %v1060_v25  ;;  %v1045_v27 = vadd.f32 %v976_v26, %v515_v23  ;;  %v537_v25 = vld [vmem:[#allocation2 + $0xe8] sm:$0xff] }
 0x146   : > { %1078 = vst.msk [vmem:[#allocation2 + $0x38] sm:$0xff] %vm1070_vm1, %v1045_v27  ;;  %v926_v28 = vpop.f32.mrf.mxu2 }
 0x147   : > { %v1015_v30 = vpop.f32.mrf.mxu3 }
 0x148   : > { %v1016_v31 = vadd.f32 %v1015_v30, %v926_v28  ;;  %v889_v32 = vpop.f32.mrf.mxu0 }
 0x149   : > { %v978_v34 = vpop.f32.mrf.mxu1 }
 0x14a   : > { %v1061_v35 = vadd.f32 %v1016_v31, %v531_v29  ;;  %v979_v36 = vadd.f32 %v978_v34, %v889_v32  ;;  %v522_v29 = vld [vmem:[#allocation2 + $0x70] sm:$0xff] }
 0x14c   : > { %1094 = vst.msk [vmem:[#allocation2 + $0xb8] sm:$0xff] %vm1070_vm1, %v1061_v35  ;;  %v1046_v37 = vadd.f32 %v979_v36, %v516_v33  ;;  %v538_v35 = vld [vmem:[#allocation2 + $0xf0] sm:$0xff] }
 0x14e   : > { %1079 = vst.msk [vmem:[#allocation2 + $0x40] sm:$0xff] %vm1070_vm1, %v1046_v37  ;;  %v929_v38 = vpop.f32.mrf.mxu2 }
 0x14f   : > { %v1018_v40 = vpop.f32.mrf.mxu3 }
 0x150   : > { %v1019_v41 = vadd.f32 %v1018_v40, %v929_v38  ;;  %v891_v42 = vpop.f32.mrf.mxu0 }
 0x151   : > { %v980_v44 = vpop.f32.mrf.mxu1 }
 0x152   : > { %v1062_v45 = vadd.f32 %v1019_v41, %v532_v39  ;;  %v981_v46 = vadd.f32 %v980_v44, %v891_v42  ;;  %v523_v39 = vld [vmem:[#allocation2 + $0x78] sm:$0xff] }
 0x154   : > { %1095 = vst.msk [vmem:[#allocation2 + $0xc0] sm:$0xff] %vm1070_vm1, %v1062_v45  ;;  %v1047_v47 = vadd.f32 %v981_v46, %v517_v43  ;;  %v539_v45 = vld [vmem:[#allocation2 + $0xf8] sm:$0xff] }
 0x156   : > { %1080 = vst.msk [vmem:[#allocation2 + $0x48] sm:$0xff] %vm1070_vm1, %v1047_v47  ;;  %v931_v48 = vpop.f32.mrf.mxu2 }
 0x157   : > { %v1020_v50 = vpop.f32.mrf.mxu3 }
 0x158   : > { %v1021_v51 = vadd.f32 %v1020_v50, %v931_v48  ;;  %v894_v52 = vpop.f32.mrf.mxu0 }
 0x159   : > { %v983_v54 = vpop.f32.mrf.mxu1 }
 0x15a   : > { %v1063_v55 = vadd.f32 %v1021_v51, %v533_v49  ;;  %v984_v56 = vadd.f32 %v983_v54, %v894_v52 }
 0x15c   : > { %1096 = vst.msk [vmem:[#allocation2 + $0xc8] sm:$0xff] %vm1070_vm1, %v1063_v55  ;;  %v1048_v57 = vadd.f32 %v984_v56, %v518_v53 }
 0x15e   : > { %1081 = vst.msk [vmem:[#allocation2 + $0x50] sm:$0xff] %vm1070_vm1, %v1048_v57  ;;  %v934_v58 = vpop.f32.mrf.mxu2 }
 0x15f   : > { %v1023_v60 = vpop.f32.mrf.mxu3 }
 0x160   : > { %v1024_v61 = vadd.f32 %v1023_v60, %v934_v58  ;;  %v896_v62 = vpop.f32.mrf.mxu0 }
 0x161   : > { %v985_v0 = vpop.f32.mrf.mxu1 }
 0x162   : > { %v1064_v1 = vadd.f32 %v1024_v61, %v534_v59  ;;  %v986_v2 = vadd.f32 %v985_v0, %v896_v62 }
 0x164   : > { %1097 = vst.msk [vmem:[#allocation2 + $0xd0] sm:$0xff] %vm1070_vm1, %v1064_v1  ;;  %v1049_v3 = vadd.f32 %v986_v2, %v519_v63 }
 0x166   : > { %1082 = vst.msk [vmem:[#allocation2 + $0x58] sm:$0xff] %vm1070_vm1, %v1049_v3  ;;  %v936_v4 = vpop.f32.mrf.mxu2 }
 0x167   : > { %v1025_v6 = vpop.f32.mrf.mxu3 }
 0x168   : > { %v1026_v7 = vadd.f32 %v1025_v6, %v936_v4  ;;  %v899_v8 = vpop.f32.mrf.mxu0 }
 0x169   : > { %v988_v10 = vpop.f32.mrf.mxu1 }
 0x16a   : > { %v1065_v11 = vadd.f32 %v1026_v7, %v535_v5  ;;  %v989_v12 = vadd.f32 %v988_v10, %v899_v8 }
 0x16c   : > { %1098 = vst.msk [vmem:[#allocation2 + $0xd8] sm:$0xff] %vm1070_vm1, %v1065_v11  ;;  %v1050_v13 = vadd.f32 %v989_v12, %v520_v9 }
 0x16e   : > { %1083 = vst.msk [vmem:[#allocation2 + $0x60] sm:$0xff] %vm1070_vm1, %v1050_v13  ;;  %v939_v14 = vpop.f32.mrf.mxu2 }
 0x16f   : > { %v1028_v16 = vpop.f32.mrf.mxu3 }
 0x170   : > { %v1029_v17 = vadd.f32 %v1028_v16, %v939_v14  ;;  %v901_v18 = vpop.f32.mrf.mxu0 }
 0x171   : > { %v990_v20 = vpop.f32.mrf.mxu1 }
 0x172   : > { %v1066_v21 = vadd.f32 %v1029_v17, %v536_v15  ;;  %v991_v22 = vadd.f32 %v990_v20, %v901_v18 }
 0x174   : > { %1099 = vst.msk [vmem:[#allocation2 + $0xe0] sm:$0xff] %vm1070_vm1, %v1066_v21  ;;  %v1051_v23 = vadd.f32 %v991_v22, %v521_v19 }
 0x176   : > { %1084 = vst.msk [vmem:[#allocation2 + $0x68] sm:$0xff] %vm1070_vm1, %v1051_v23  ;;  %v941_v24 = vpop.f32.mrf.mxu2 }
 0x177   : > { %v1030_v26 = vpop.f32.mrf.mxu3 }
 0x178   : > { %v1031_v27 = vadd.f32 %v1030_v26, %v941_v24  ;;  %v904_v28 = vpop.f32.mrf.mxu0 }
 0x179   : > { %v993_v30 = vpop.f32.mrf.mxu1 }
 0x17a   : > { %v1067_v31 = vadd.f32 %v1031_v27, %v537_v25  ;;  %v994_v32 = vadd.f32 %v993_v30, %v904_v28 }
 0x17c   : > { %1100 = vst.msk [vmem:[#allocation2 + $0xe8] sm:$0xff] %vm1070_vm1, %v1067_v31  ;;  %v1052_v33 = vadd.f32 %v994_v32, %v522_v29 }
 0x17e   : > { %1085 = vst.msk [vmem:[#allocation2 + $0x70] sm:$0xff] %vm1070_vm1, %v1052_v33  ;;  %v944_v34 = vpop.f32.mrf.mxu2 }
 0x17f   : > { %v1033_v36 = vpop.f32.mrf.mxu3 }
 0x180   : > { %v1034_v37 = vadd.f32 %v1033_v36, %v944_v34  ;;  %v906_v38 = vpop.f32.mrf.mxu0 }
 0x181   : > { %v995_v40 = vpop.f32.mrf.mxu1 }
 0x182   : > { %v1068_v41 = vadd.f32 %v1034_v37, %v538_v35  ;;  %v996_v42 = vadd.f32 %v995_v40, %v906_v38 }
 0x184   : > { %1101 = vst.msk [vmem:[#allocation2 + $0xf0] sm:$0xff] %vm1070_vm1, %v1068_v41  ;;  %v1053_v43 = vadd.f32 %v996_v42, %v523_v39 }
 0x186   : > { %1086 = vst.msk [vmem:[#allocation2 + $0x78] sm:$0xff] %vm1070_vm1, %v1053_v43  ;;  %v946_v44 = vpop.f32.mrf.mxu2 }
 0x187   : > { %v1035_v46 = vpop.f32.mrf.mxu3 }
 0x188   : > { %v1036_v47 = vadd.f32 %v1035_v46, %v946_v44  ;;  %1106 = sbr.rel (%p2109_p13) target bundleno = 774 (0x306), region = 86 }
 0x18a   : > { %v1069_v48 = vadd.f32 %v1036_v47, %v539_v45 }
 0x18c   : > { %1102 = vst.msk [vmem:[#allocation2 + $0xf8] sm:$0xff] %vm1070_vm1, %v1069_v48 }
 0x18d   : > { %v1111_v49 = vld [vmem:[#allocation2 + $0x20] sm:$0xff]  ;;  %v1109_v51 = vld [vmem:[#allocation2 + $0x10] sm:$0xff]  ;;  %v1112_v56 = vld [vmem:[#allocation2 + $0x28] sm:$0xff]  ;;  %s2295_s20 = smov 124   ;;  %s2296_s30 = smov 120   ;;  %vm1751_vm2 = vcmask 31744  }
 0x18e   : > { %v2632_v50 = vld [vmem:[%s3267_s2] ss:$0 sm:$0xff]  ;;  %v1110_v57 = vld [vmem:[#allocation2 + $0x18] sm:$0xff]  ;;  %v1108_v61 = vld [vmem:[#allocation2 + $0x8] sm:$0xff]  ;;  %s2297_s7 = smov 116  }
 0x18f   : > { %v1107_v52 = vld [vmem:[#allocation2] sm:$0xff]  ;;  %v1147_v53 = vadd.f32 %v2632_v50, %v1111_v49  ;;  %v1145_v54 = vadd.f32 %v2632_v50, %v1109_v51  ;;  %v1148_v62 = vadd.f32 %v2632_v50, %v1112_v56  ;;  %v1146_v63 = vadd.f32 %v2632_v50, %v1110_v57  ;;  %v1114_v5 = vld [vmem:[#allocation2 + $0x38] sm:$0xff]  ;;  %v1113_v6 = vld [vmem:[#allocation2 + $0x30] sm:$0xff] }
 0x190   : > { %v1143_v55 = vadd.f32 %v2632_v50, %v1107_v52  ;;  %v1144_v0 = vadd.f32 %v2632_v50, %v1108_v61  ;;  %v1115_v4 = vld [vmem:[#allocation2 + $0x40] sm:$0xff]  ;;  %v1150_v8 = vadd.f32 %v2632_v50, %v1114_v5  ;;  %v1149_v9 = vadd.f32 %v2632_v50, %v1113_v6  ;;  %v1118_v13 = vld [vmem:[#allocation2 + $0x58] sm:$0xff]  ;;  %v1117_v14 = vld [vmem:[#allocation2 + $0x50] sm:$0xff] }
 0x191   : > { %v2637_v58 = vmax.f32 %v1147_v53, 0.0  ;;  %v2639_v59 = vmax.f32 %v1145_v54, 0.0  ;;  %v2652_v1 = vmax.f32 %v1148_v62, 0.0  ;;  %v2654_v2 = vmax.f32 %v1146_v63, 0.0  ;;  %v1116_v15 = vld [vmem:[#allocation2 + $0x48] sm:$0xff]  ;;  %v1121_v22 = vld [vmem:[#allocation2 + $0x70] sm:$0xff] }
 0x192   : > { %v2641_v60 = vmax.f32 %v1143_v55, 0.0  ;;  %v2656_v3 = vmax.f32 %v1144_v0, 0.0  ;;  %v1151_v7 = vadd.f32 %v2632_v50, %v1115_v4  ;;  %v2669_v11 = vmax.f32 %v1150_v8, 0.0  ;;  %v1120_v23 = vld [vmem:[#allocation2 + $0x68] sm:$0xff]  ;;  %v1119_v24 = vld [vmem:[#allocation2 + $0x60] sm:$0xff]  ;;  %v1122_v33 = vld [vmem:[#allocation2 + $0x78] sm:$0xff] }
 0x193   : > { %1247 = vrot.lane.b32.xlu2 %v2637_v58, %s2295_s20  ;;  %1243 = vrot.lane.b32.xlu1 %v2639_v59, %s2295_s20  ;;  %v2671_v12 = vmax.f32 %v1149_v9, 0.0  ;;  %v1154_v16 = vadd.f32 %v2632_v50, %v1118_v13  ;;  %v1153_v17 = vadd.f32 %v2632_v50, %v1117_v14  ;;  %v1152_v18 = vadd.f32 %v2632_v50, %v1116_v15  ;;  %v1124_v31 = vld [vmem:[#allocation2 + $0x88] sm:$0xff]  ;;  %v1123_v32 = vld [vmem:[#allocation2 + $0x80] sm:$0xff]  ;;  %v1126_v41 = vld [vmem:[#allocation2 + $0x98] sm:$0xff] }
 0x194   : > { %1239 = vrot.lane.b32.xlu0 %v2641_v60, %s2295_s20  ;;  %v2667_v10 = vmax.f32 %v1151_v7, 0.0  ;;  %v1157_v25 = vadd.f32 %v2632_v50, %v1121_v22  ;;  %v1156_v26 = vadd.f32 %v2632_v50, %v1120_v23  ;;  %v1155_v27 = vadd.f32 %v2632_v50, %v1119_v24  ;;  %v1127_v40 = vld [vmem:[#allocation2 + $0xa0] sm:$0xff]  ;;  %v1125_v42 = vld [vmem:[#allocation2 + $0x90] sm:$0xff]  ;;  %v1130_v49 = vld [vmem:[#allocation2 + $0xb8] sm:$0xff] }
 0x195   : > { %v2682_v19 = vmax.f32 %v1154_v16, 0.0  ;;  %v2684_v20 = vmax.f32 %v1153_v17, 0.0  ;;  %v2686_v21 = vmax.f32 %v1152_v18, 0.0  ;;  %v1160_v34 = vadd.f32 %v2632_v50, %v1124_v31  ;;  %v1129_v51 = vld [vmem:[#allocation2 + $0xb0] sm:$0xff]  ;;  %v1128_v52 = vld [vmem:[#allocation2 + $0xa8] sm:$0xff]  ;;  %v1131_v0 = vld [vmem:[#allocation2 + $0xc0] sm:$0xff] }
 0x196   : > { %v2697_v28 = vmax.f32 %v1157_v25, 0.0  ;;  %v2699_v29 = vmax.f32 %v1156_v26, 0.0  ;;  %v2701_v30 = vmax.f32 %v1155_v27, 0.0  ;;  %v1159_v35 = vadd.f32 %v2632_v50, %v1123_v32  ;;  %v1133_v62 = vld [vmem:[#allocation2 + $0xd0] sm:$0xff]  ;;  %v1132_v63 = vld [vmem:[#allocation2 + $0xc8] sm:$0xff]  ;;  %v1135_v14 = vld [vmem:[#allocation2 + $0xe0] sm:$0xff] }
 0x197   : > { %v1158_v36 = vadd.f32 %v2632_v50, %v1122_v33  ;;  %v2712_v37 = vmax.f32 %v1160_v34, 0.0  ;;  %v1163_v43 = vadd.f32 %v2632_v50, %v1127_v40  ;;  %v1162_v44 = vadd.f32 %v2632_v50, %v1126_v41  ;;  %v1136_v13 = vld [vmem:[#allocation2 + $0xe8] sm:$0xff]  ;;  %v1134_v15 = vld [vmem:[#allocation2 + $0xd8] sm:$0xff]  ;;  %v1137_v26 = vld [vmem:[#allocation2 + $0xf0] sm:$0xff] }
 0x198   : > { %v2714_v38 = vmax.f32 %v1159_v35, 0.0  ;;  %v1161_v45 = vadd.f32 %v2632_v50, %v1125_v42  ;;  %v1166_v53 = vadd.f32 %v2632_v50, %v1130_v49  ;;  %v1165_v54 = vadd.f32 %v2632_v50, %v1129_v51  ;;  %v1138_v25 = vld [vmem:[#allocation2 + $0xf8] sm:$0xff] }
 0x199   : > { %v2716_v39 = vmax.f32 %v1158_v36, 0.0  ;;  %v2727_v46 = vmax.f32 %v1163_v43, 0.0  ;;  %v2729_v47 = vmax.f32 %v1162_v44, 0.0  ;;  %v1164_v55 = vadd.f32 %v2632_v50, %v1128_v52 }
 0x19a   : > { %v2731_v48 = vmax.f32 %v1161_v45, 0.0  ;;  %v2742_v56 = vmax.f32 %v1166_v53, 0.0  ;;  %v2744_v57 = vmax.f32 %v1165_v54, 0.0  ;;  %v1169_v4 = vadd.f32 %v2632_v50, %v1133_v62 }
 0x19b   : > { %1249 = vrot.lane.b32.xlu2 %v2652_v1, %s2295_s20  ;;  %1245 = vrot.lane.b32.xlu1 %v2654_v2, %s2295_s20  ;;  %v2746_v61 = vmax.f32 %v1164_v55, 0.0  ;;  %v1168_v5 = vadd.f32 %v2632_v50, %v1132_v63  ;;  %v1167_v6 = vadd.f32 %v2632_v50, %v1131_v0  ;;  %v1172_v16 = vadd.f32 %v2632_v50, %v1136_v13 }
 0x19c   : > { %1241 = vrot.lane.b32.xlu0 %v2656_v3, %s2295_s20  ;;  %v2757_v7 = vmax.f32 %v1169_v4, 0.0  ;;  %v1171_v17 = vadd.f32 %v2632_v50, %v1135_v14  ;;  %v1170_v18 = vadd.f32 %v2632_v50, %v1134_v15  ;;  %v1174_v27 = vadd.f32 %v2632_v50, %v1138_v25 }
 0x19d   : > { %v2759_v8 = vmax.f32 %v1168_v5, 0.0  ;;  %v2761_v9 = vmax.f32 %v1167_v6, 0.0  ;;  %v2772_v22 = vmax.f32 %v1172_v16, 0.0  ;;  %v1173_v31 = vadd.f32 %v2632_v50, %v1137_v26 }
 0x19e   : > { %v2774_v23 = vmax.f32 %v1171_v17, 0.0  ;;  %v2776_v24 = vmax.f32 %v1170_v18, 0.0  ;;  %v2786_v32 = vmax.f32 %v1174_v27, 0.0 }
 0x19f   : > { %v2788_v33 = vmax.f32 %v1173_v31, 0.0 }
 0x1a3   : > { %1255 = vrot.lane.b32.xlu2 %v2667_v10, %s2295_s20  ;;  %1253 = vrot.lane.b32.xlu1 %v2669_v11, %s2295_s20 }
 0x1a4   : > { %1251 = vrot.lane.b32.xlu0 %v2671_v12, %s2295_s20 }
 0x1ab   : > { %1261 = vrot.lane.b32.xlu2 %v2682_v19, %s2295_s20  ;;  %1259 = vrot.lane.b32.xlu1 %v2684_v20, %s2295_s20 }
 0x1ac   : > { %1257 = vrot.lane.b32.xlu0 %v2686_v21, %s2295_s20 }
 0x1b3   : > { %1267 = vrot.lane.b32.xlu2 %v2697_v28, %s2295_s20  ;;  %1265 = vrot.lane.b32.xlu1 %v2699_v29, %s2295_s20 }
 0x1b4   : > { %1263 = vrot.lane.b32.xlu0 %v2701_v30, %s2295_s20 }
 0x1bb   : > { %1273 = vrot.lane.b32.xlu2 %v2712_v37, %s2295_s20  ;;  %1271 = vrot.lane.b32.xlu1 %v2714_v38, %s2295_s20 }
 0x1bc   : > { %1269 = vrot.lane.b32.xlu0 %v2716_v39, %s2295_s20 }
 0x1c3   : > { %1279 = vrot.lane.b32.xlu2 %v2727_v46, %s2295_s20  ;;  %1277 = vrot.lane.b32.xlu1 %v2729_v47, %s2295_s20 }
 0x1c4   : > { %1275 = vrot.lane.b32.xlu0 %v2731_v48, %s2295_s20 }
 0x1cb   : > { %1285 = vrot.lane.b32.xlu2 %v2742_v56, %s2295_s20  ;;  %1283 = vrot.lane.b32.xlu1 %v2744_v57, %s2295_s20 }
 0x1cc   : > { %1281 = vrot.lane.b32.xlu0 %v2746_v61, %s2295_s20 }
 0x1d3   : > { %1291 = vrot.lane.b32.xlu2 %v2757_v7, %s2295_s20  ;;  %1289 = vrot.lane.b32.xlu1 %v2759_v8, %s2295_s20 }
 0x1d4   : > { %1287 = vrot.lane.b32.xlu0 %v2761_v9, %s2295_s20 }
 0x1db   : > { %1297 = vrot.lane.b32.xlu2 %v2772_v22, %s2295_s20  ;;  %1295 = vrot.lane.b32.xlu1 %v2774_v23, %s2295_s20 }
 0x1dc   : > { %1293 = vrot.lane.b32.xlu0 %v2776_v24, %s2295_s20 }
 0x1e3   : > { %1301 = vrot.lane.b32.xlu1 %v2786_v32, %s2295_s20  ;;  %1367 = vrot.lane.b32.xlu2 %v2641_v60, %s2296_s30 }
 0x1e4   : > { %1299 = vrot.lane.b32.xlu0 %v2788_v33, %s2295_s20 }
 0x1eb   : > { %1371 = vrot.lane.b32.xlu1 %v2639_v59, %s2296_s30  ;;  %1373 = vrot.lane.b32.xlu2 %v2654_v2, %s2296_s30 }
 0x1ec   : > { %1369 = vrot.lane.b32.xlu0 %v2656_v3, %s2296_s30 }
 0x1ed   : > { %v2802_v50 = vpop.permute.xlu2 %1247 }
 0x1f3   : > { %1377 = vrot.lane.b32.xlu1 %v2652_v1, %s2296_s30  ;;  %1379 = vrot.lane.b32.xlu2 %v2671_v12, %s2296_s30 }
 0x1f4   : > { %1375 = vrot.lane.b32.xlu0 %v2637_v58, %s2296_s30 }
 0x1f5   : > { %v2810_v34 = vpop.permute.xlu2 %1249 }
 0x1fb   : > { %1383 = vrot.lane.b32.xlu1 %v2667_v10, %s2296_s30  ;;  %1385 = vrot.lane.b32.xlu2 %v2686_v21, %s2296_s30 }
 0x1fc   : > { %1381 = vrot.lane.b32.xlu0 %v2669_v11, %s2296_s30 }
 0x1fd   : > { %v2818_v35 = vpop.permute.xlu2 %1255 }
 0x203   : > { %1389 = vrot.lane.b32.xlu1 %v2682_v19, %s2296_s30  ;;  %1391 = vrot.lane.b32.xlu2 %v2701_v30, %s2296_s30 }
 0x204   : > { %1387 = vrot.lane.b32.xlu0 %v2684_v20, %s2296_s30 }
 0x205   : > { %v2826_v36 = vpop.permute.xlu2 %1261  ;;  %v2828_v40 = vpop.permute.xlu1 %1243 }
 0x206   : > { %v1240_v41 = vpop.permute.xlu0 %1239 }
 0x207   : > { %v1335_v15 = vadd.f32 %v1240_v41, %v2641_v60 }
 0x20b   : > { %1395 = vrot.lane.b32.xlu1 %v2697_v28, %s2296_s30  ;;  %1397 = vrot.lane.b32.xlu2 %v2716_v39, %s2296_s30 }
 0x20c   : > { %1393 = vrot.lane.b32.xlu0 %v2699_v29, %s2296_s30 }
 0x20d   : > { %v2836_v42 = vpop.permute.xlu2 %1267  ;;  %v1246_v43 = vpop.permute.xlu1 %1245 }
 0x20e   : > { %v2838_v44 = vpop.permute.xlu0 %1241  ;;  %v1338_v26 = vadd.f32 %v1246_v43, %v2654_v2 }
 0x213   : > { %1401 = vrot.lane.b32.xlu1 %v2712_v37, %s2296_s30  ;;  %1403 = vrot.lane.b32.xlu2 %v2731_v48, %s2296_s30 }
 0x214   : > { %1399 = vrot.lane.b32.xlu0 %v2714_v38, %s2296_s30 }
 0x215   : > { %v2846_v45 = vpop.permute.xlu2 %1273  ;;  %v2848_v49 = vpop.permute.xlu1 %1253 }
 0x216   : > { %v1252_v51 = vpop.permute.xlu0 %1251 }
 0x21b   : > { %1407 = vrot.lane.b32.xlu1 %v2727_v46, %s2296_s30  ;;  %1409 = vrot.lane.b32.xlu2 %v2746_v61, %s2296_s30 }
 0x21c   : > { %1405 = vrot.lane.b32.xlu0 %v2729_v47, %s2296_s30 }
 0x21d   : > { %v2856_v52 = vpop.permute.xlu2 %1279  ;;  %v2858_v53 = vpop.permute.xlu1 %1259 }
 0x21e   : > { %v1258_v54 = vpop.permute.xlu0 %1257 }
 0x223   : > { %1413 = vrot.lane.b32.xlu1 %v2742_v56, %s2296_s30  ;;  %1415 = vrot.lane.b32.xlu2 %v2761_v9, %s2296_s30 }
 0x224   : > { %1411 = vrot.lane.b32.xlu0 %v2744_v57, %s2296_s30 }
 0x225   : > { %v2866_v55 = vpop.permute.xlu2 %1285  ;;  %v2868_v62 = vpop.permute.xlu1 %1265 }
 0x226   : > { %v1264_v63 = vpop.permute.xlu0 %1263 }
 0x22b   : > { %1419 = vrot.lane.b32.xlu1 %v2757_v7, %s2296_s30  ;;  %1421 = vrot.lane.b32.xlu2 %v2776_v24, %s2296_s30 }
 0x22c   : > { %1417 = vrot.lane.b32.xlu0 %v2759_v8, %s2296_s30 }
 0x22d   : > { %v2876_v0 = vpop.permute.xlu2 %1291  ;;  %v2878_v4 = vpop.permute.xlu1 %1271 }
 0x22e   : > { %v1270_v5 = vpop.permute.xlu0 %1269 }
 0x233   : > { %1425 = vrot.lane.b32.xlu1 %v2772_v22, %s2296_s30  ;;  %1427 = vrot.lane.b32.xlu2 %v2788_v33, %s2296_s30 }
 0x234   : > { %1423 = vrot.lane.b32.xlu0 %v2774_v23, %s2296_s30 }
 0x235   : > { %v2886_v6 = vpop.permute.xlu2 %1297  ;;  %v2888_v13 = vpop.permute.xlu1 %1277 }
 0x236   : > { %v1276_v14 = vpop.permute.xlu0 %1275 }
 0x23b   : > { %1495 = vrot.lane.b32.xlu1 %v2641_v60, %s2297_s7  ;;  %1497 = vrot.lane.b32.xlu2 %v2656_v3, %s2297_s7 }
 0x23c   : > { %1429 = vrot.lane.b32.xlu0 %v2786_v32, %s2296_s30 }
 0x23d   : > { %v2897_v16 = vpop.permute.xlu1 %1283  ;;  %v1368_v17 = vpop.permute.xlu2 %1367 }
 0x23e   : > { %v2899_v18 = vadd.f32 %v1368_v17, %v1335_v15  ;;  %v1282_v25 = vpop.permute.xlu0 %1281  ;;  %v1341_v15 = vadd.f32 %v1252_v51, %v2671_v12 }
 0x243   : > { %1501 = vrot.lane.b32.xlu1 %v2654_v2, %s2297_s7  ;;  %1503 = vrot.lane.b32.xlu2 %v2637_v58, %s2297_s7 }
 0x244   : > { %1499 = vrot.lane.b32.xlu0 %v2639_v59, %s2297_s7 }
 0x245   : > { %v2908_v60 = vpop.permute.xlu1 %1289  ;;  %v1374_v27 = vpop.permute.xlu2 %1373 }
 0x246   : > { %3271 = vst [vmem:[#allocation4_spill] sm:$0xff] %v2908_v60  ;;  %v2910_v31 = vadd.f32 %v1374_v27, %v1338_v26  ;;  %v1288_v41 = vpop.permute.xlu0 %1287  ;;  %v1344_v26 = vadd.f32 %v1258_v54, %v2686_v21 }
 0x24b   : > { %1507 = vrot.lane.b32.xlu1 %v2671_v12, %s2297_s7  ;;  %1509 = vrot.lane.b32.xlu2 %v2669_v11, %s2297_s7 }
 0x24c   : > { %1505 = vrot.lane.b32.xlu0 %v2652_v1, %s2297_s7 }
 0x24d   : > { %v2919_v2 = vpop.permute.xlu1 %1295  ;;  %v1380_v43 = vpop.permute.xlu2 %1379 }
 0x24e   : > { %3272 = vst [vmem:[#allocation5_spill] sm:$0xff] %v2919_v2  ;;  %v2921_v17 = vadd.f32 %v1380_v43, %v1341_v15  ;;  %v1294_v60 = vpop.permute.xlu0 %1293  ;;  %v1337_v15 = vadd.f32 %v2828_v40, %v2639_v59  ;;  %v1340_v59 = vadd.f32 %v2810_v34, %v2652_v1  ;;  %v1343_v1 = vadd.f32 %v2818_v35, %v2667_v10 }
 0x253   : > { %1513 = vrot.lane.b32.xlu1 %v2686_v21, %s2297_s7  ;;  %1515 = vrot.lane.b32.xlu2 %v2684_v20, %s2297_s7  ;;  %v1347_v21 = vadd.f32 %v1264_v63, %v2701_v30 }
 0x254   : > { %1511 = vrot.lane.b32.xlu0 %v2667_v10, %s2297_s7  ;;  %v1346_v10 = vadd.f32 %v2826_v36, %v2682_v19 }
 0x255   : > { %v2930_v12 = vpop.permute.xlu1 %1301  ;;  %v1386_v51 = vpop.permute.xlu2 %1385 }
 0x256   : > { %3273 = vst [vmem:[#allocation6_spill] sm:$0xff] %v2930_v12  ;;  %v2932_v27 = vadd.f32 %v1386_v51, %v1344_v26  ;;  %v2934_v2 = vpop.permute.xlu0 %1299 }
 0x25b   : > { %1519 = vrot.lane.b32.xlu1 %v2701_v30, %s2297_s7  ;;  %1521 = vrot.lane.b32.xlu2 %v2699_v29, %s2297_s7  ;;  %v1350_v30 = vadd.f32 %v1270_v5, %v2716_v39 }
 0x25c   : > { %1517 = vrot.lane.b32.xlu0 %v2682_v19, %s2297_s7  ;;  %v1349_v19 = vadd.f32 %v2836_v42, %v2697_v28 }
 0x25d   : > { %v1372_v54 = vpop.permute.xlu1 %1371  ;;  %v1392_v43 = vpop.permute.xlu2 %1391 }
 0x25e   : > { %v2945_v26 = vadd.f32 %v1372_v54, %v1337_v15  ;;  %v2947_v51 = vadd.f32 %v1392_v43, %v1347_v21  ;;  %v2949_v12 = vpop.permute.xlu0 %1369 }
 0x263   : > { %1525 = vrot.lane.b32.xlu1 %v2716_v39, %s2297_s7  ;;  %1527 = vrot.lane.b32.xlu2 %v2714_v38, %s2297_s7  ;;  %v1353_v39 = vadd.f32 %v1276_v14, %v2731_v48 }
 0x264   : > { %1523 = vrot.lane.b32.xlu0 %v2697_v28, %s2297_s7  ;;  %v1352_v28 = vadd.f32 %v2846_v45, %v2712_v37 }
 0x265   : > { %v1378_v40 = vpop.permute.xlu1 %1377  ;;  %v1398_v63 = vpop.permute.xlu2 %1397 }
 0x266   : > { %v2960_v15 = vadd.f32 %v1378_v40, %v1340_v59  ;;  %v2962_v21 = vadd.f32 %v1398_v63, %v1350_v30  ;;  %v2964_v54 = vpop.permute.xlu0 %1375 }
 0x26b   : > { %1531 = vrot.lane.b32.xlu1 %v2731_v48, %s2297_s7  ;;  %1533 = vrot.lane.b32.xlu2 %v2729_v47, %s2297_s7  ;;  %v1356_v48 = vadd.f32 %v1282_v25, %v2746_v61 }
 0x26c   : > { %1529 = vrot.lane.b32.xlu0 %v2712_v37, %s2297_s7  ;;  %v1355_v37 = vadd.f32 %v2856_v52, %v2727_v46 }
 0x26d   : > { %v1384_v34 = vpop.permute.xlu1 %1383  ;;  %v1404_v5 = vpop.permute.xlu2 %1403 }
 0x26e   : > { %v2975_v43 = vadd.f32 %v1384_v34, %v1343_v1  ;;  %v2977_v59 = vadd.f32 %v1404_v5, %v1353_v39  ;;  %v2979_v30 = vpop.permute.xlu0 %1381 }
 0x273   : > { %1537 = vrot.lane.b32.xlu1 %v2746_v61, %s2297_s7  ;;  %1539 = vrot.lane.b32.xlu2 %v2744_v57, %s2297_s7  ;;  %v1359_v61 = vadd.f32 %v1288_v41, %v2761_v9 }
 0x274   : > { %1535 = vrot.lane.b32.xlu0 %v2727_v46, %s2297_s7  ;;  %v1358_v46 = vadd.f32 %v2866_v55, %v2742_v56 }
 0x275   : > { %v1390_v35 = vpop.permute.xlu1 %1389  ;;  %v1410_v14 = vpop.permute.xlu2 %1409 }
 0x276   : > { %v2990_v40 = vadd.f32 %v1390_v35, %v1346_v10  ;;  %v2992_v63 = vadd.f32 %v1410_v14, %v1356_v48  ;;  %v2994_v1 = vpop.permute.xlu0 %1387 }
 0x27b   : > { %1543 = vrot.lane.b32.xlu1 %v2761_v9, %s2297_s7  ;;  %1545 = vrot.lane.b32.xlu2 %v2759_v8, %s2297_s7  ;;  %v1362_v9 = vadd.f32 %v1294_v60, %v2776_v24 }
 0x27c   : > { %1541 = vrot.lane.b32.xlu0 %v2742_v56, %s2297_s7  ;;  %v1361_v56 = vadd.f32 %v2876_v0, %v2757_v7  ;;  %v1364_v0 = vadd.f32 %v2886_v6, %v2772_v22 }
 0x27d   : > { %v1396_v36 = vpop.permute.xlu1 %1395  ;;  %v1416_v25 = vpop.permute.xlu2 %1415 }
 0x27e   : > { %v3005_v39 = vadd.f32 %v1396_v36, %v1349_v19  ;;  %v3007_v34 = vadd.f32 %v1416_v25, %v1359_v61  ;;  %v3009_v5 = vpop.permute.xlu0 %1393  ;;  %v1336_v36 = vadd.f32 %v2838_v44, %v2656_v3  ;;  %v1339_v3 = vadd.f32 %v2802_v50, %v2637_v58  ;;  %v1691_v58 = vld [vmem:[%s2474_s15 + $0x20] sm:$0xff] }
 0x280   : > { %v1467_v55 = vadd.f32 %v2964_v54, %v1339_v3  ;;  %v1623_v3 = vld [vmem:[%s2469_s13] sm:$0xff] }
 0x283   : > { %1549 = vrot.lane.b32.xlu1 %v2776_v24, %s2297_s7  ;;  %1551 = vrot.lane.b32.xlu2 %v2774_v23, %s2297_s7  ;;  %v1365_v24 = vadd.f32 %v2934_v2, %v2788_v33  ;;  %v1624_v2 = vld [vmem:[%s2469_s13 + $0x8] sm:$0xff] }
 0x284   : > { %1547 = vrot.lane.b32.xlu0 %v2757_v7, %s2297_s7 }
 0x285   : > { %v1402_v42 = vpop.permute.xlu1 %1401  ;;  %v1422_v41 = vpop.permute.xlu2 %1421 }
 0x286   : > { %v3020_v10 = vadd.f32 %v1402_v42, %v1352_v28  ;;  %v3022_v48 = vadd.f32 %v1422_v41, %v1362_v9  ;;  %v3024_v35 = vpop.permute.xlu0 %1399  ;;  %v1688_v41 = vld [vmem:[%s2474_s15 + $0x8] sm:$0xff] }
 0x28b   : > { %1555 = vrot.lane.b32.xlu1 %v2788_v33, %s2297_s7  ;;  %1557 = vrot.lane.b32.xlu2 %v2786_v32, %s2297_s7  ;;  %v1464_v33 = vadd.f32 %v2949_v12, %v1336_v36 }
 0x28c   : > { %1553 = vrot.lane.b32.xlu0 %v2772_v22, %s2297_s7  ;;  %v1345_v22 = vadd.f32 %v2858_v53, %v2684_v20  ;;  %v1697_v20 = vld [vmem:[%s2474_s15 + $0x50] sm:$0xff] }
 0x28d   : > { %v1408_v45 = vpop.permute.xlu1 %1407  ;;  %v1428_v60 = vpop.permute.xlu2 %1427 }
 0x28e   : > { %v3036_v14 = vadd.f32 %v1408_v45, %v1355_v37  ;;  %v3038_v19 = vadd.f32 %v1428_v60, %v1365_v24  ;;  %v3040_v61 = vpop.permute.xlu0 %1405  ;;  %v1627_v24 = vld [vmem:[%s2469_s13 + $0x20] sm:$0xff] }
 0x295   : > { %v1414_v52 = vpop.permute.xlu1 %1413  ;;  %v1498_v25 = vpop.permute.xlu2 %1497 }
 0x296   : > { %v3048_v28 = vadd.f32 %v1414_v52, %v1358_v46  ;;  %v1592_v9 = vadd.f32 %v1498_v25, %v1464_v33  ;;  %v3050_v42 = vpop.permute.xlu0 %1411  ;;  %v1342_v33 = vadd.f32 %v2848_v49, %v2669_v11  ;;  %v1694_v49 = vld [vmem:[%s2474_s15 + $0x38] sm:$0xff] }
 0x298   : > { %v1656_v37 = vadd.f32 %v1624_v2, %v1592_v9  ;;  %v1470_v54 = vadd.f32 %v2979_v30, %v1342_v33  ;;  %v1630_v2 = vld [vmem:[%s2469_s13 + $0x38] sm:$0xff]  ;;  %v1473_v30 = vadd.f32 %v2994_v1, %v1345_v22 }
 0x29a   : > { %v1720_v44 = vadd.f32 %v1688_v41, %v1656_v37 }
 0x29c   : > { %1753 = vst.msk [vmem:[%s2479_s17 + $0x8] sm:$0xff] %vm1751_vm2, %v1720_v44 }
 0x29d   : > { %v1420_v12 = vpop.permute.xlu1 %1419  ;;  %v1504_v45 = vpop.permute.xlu2 %1503 }
 0x29e   : > { %v3061_v60 = vadd.f32 %v1420_v12, %v1361_v56  ;;  %v1595_v36 = vadd.f32 %v1504_v45, %v1467_v55  ;;  %v3063_v46 = vpop.permute.xlu0 %1417  ;;  %v1633_v56 = vld [vmem:[%s2469_s13 + $0x50] sm:$0xff] }
 0x2a0   : > { %v1659_v50 = vadd.f32 %v1627_v24, %v1595_v36  ;;  %v1687_v36 = vld [vmem:[%s2474_s15] sm:$0xff] }
 0x2a2   : > { %v1723_v7 = vadd.f32 %v1691_v58, %v1659_v50  ;;  %v1348_v58 = vadd.f32 %v2868_v62, %v2699_v29  ;;  %v1690_v62 = vld [vmem:[%s2474_s15 + $0x18] sm:$0xff] }
 0x2a4   : > { %1756 = vst.msk [vmem:[%s2479_s17 + $0x20] sm:$0xff] %vm1751_vm2, %v1723_v7  ;;  %v1476_v7 = vadd.f32 %v3009_v5, %v1348_v58  ;;  %v1700_v5 = vld [vmem:[%s2474_s15 + $0x68] sm:$0xff] }
 0x2a5   : > { %v1426_v52 = vpop.permute.xlu1 %1425  ;;  %v1510_v25 = vpop.permute.xlu2 %1509 }
 0x2a6   : > { %v3074_v9 = vadd.f32 %v1426_v52, %v1364_v0  ;;  %v1598_v41 = vadd.f32 %v1510_v25, %v1470_v54  ;;  %v3076_v11 = vpop.permute.xlu0 %1423  ;;  %v1636_v54 = vld [vmem:[%s2469_s13 + $0x68] sm:$0xff] }
 0x2a8   : > { %v1662_v37 = vadd.f32 %v1630_v2, %v1598_v41  ;;  %v1625_v41 = vld [vmem:[%s2469_s13 + $0x10] sm:$0xff] }
 0x2aa   : > { %v1726_v6 = vadd.f32 %v1694_v49, %v1662_v37 }
 0x2ac   : > { %1759 = vst.msk [vmem:[%s2479_s17 + $0x38] sm:$0xff] %vm1751_vm2, %v1726_v6  ;;  %v1689_v6 = vld [vmem:[%s2474_s15 + $0x10] sm:$0xff] }
 0x2ad   : > { %v1496_v44 = vpop.permute.xlu1 %1495  ;;  %v1516_v55 = vpop.permute.xlu2 %1515 }
 0x2ae   : > { %v1591_v12 = vadd.f32 %v1496_v44, %v2899_v18  ;;  %v1601_v24 = vadd.f32 %v1516_v55, %v1473_v30  ;;  %v3087_v45 = vpop.permute.xlu0 %1429  ;;  %v1626_v18 = vld [vmem:[%s2469_s13 + $0x18] sm:$0xff] }
 0x2b0   : > { %v1655_v53 = vadd.f32 %v1623_v3, %v1591_v12  ;;  %v1665_v1 = vadd.f32 %v1633_v56, %v1601_v24  ;;  %v1639_v24 = vld [vmem:[%s2469_s13 + $0x80] sm:$0xff] }
 0x2b2   : > { %v1719_v50 = vadd.f32 %v1687_v36, %v1655_v53  ;;  %v1729_v33 = vadd.f32 %v1697_v20, %v1665_v1  ;;  %v1628_v20 = vld [vmem:[%s2469_s13 + $0x28] sm:$0xff]  ;;  %v1703_v1 = vld [vmem:[%s2474_s15 + $0x80] sm:$0xff] }
 0x2b4   : > { %1752 = vst.msk [vmem:[%s2479_s17] sm:$0xff] %vm1751_vm2, %v1719_v50 }
 0x2b5   : > { %1762 = vst.msk [vmem:[%s2479_s17 + $0x50] sm:$0xff] %vm1751_vm2, %v1729_v33  ;;  %v1502_v0 = vpop.permute.xlu1 %1501  ;;  %v1522_v52 = vpop.permute.xlu2 %1521 }
 0x2b6   : > { %v1594_v2 = vadd.f32 %v1502_v0, %v2910_v31  ;;  %v1604_v25 = vadd.f32 %v1522_v52, %v1476_v7  ;;  %v1500_v29 = vpop.permute.xlu0 %1499  ;;  %v1351_v31 = vadd.f32 %v2878_v4, %v2714_v38  ;;  %v1692_v7 = vld [vmem:[%s2474_s15 + $0x28] sm:$0xff] }
 0x2b7   : > { %v1593_v49 = vadd.f32 %v1500_v29, %v2945_v26  ;;  %v1629_v26 = vld [vmem:[%s2469_s13 + $0x30] sm:$0xff] }
 0x2b8   : > { %v1658_v37 = vadd.f32 %v1626_v18, %v1594_v2  ;;  %v1668_v22 = vadd.f32 %v1636_v54, %v1604_v25  ;;  %v1479_v55 = vadd.f32 %v3024_v35, %v1351_v31  ;;  %v1693_v35 = vld [vmem:[%s2474_s15 + $0x30] sm:$0xff] }
 0x2b9   : > { %v1657_v30 = vadd.f32 %v1625_v41, %v1593_v49  ;;  %v1642_v41 = vld [vmem:[%s2469_s13 + $0x98] sm:$0xff] }
 0x2ba   : > { %v1722_v3 = vadd.f32 %v1690_v62, %v1658_v37  ;;  %v1732_v44 = vadd.f32 %v1700_v5, %v1668_v22  ;;  %v1631_v62 = vld [vmem:[%s2469_s13 + $0x40] sm:$0xff]  ;;  %v1706_v49 = vld [vmem:[%s2474_s15 + $0x98] sm:$0xff] }
 0x2bb   : > { %v1721_v56 = vadd.f32 %v1689_v6, %v1657_v30  ;;  %v1695_v30 = vld [vmem:[%s2474_s15 + $0x40] sm:$0xff] }
 0x2bc   : > { %1755 = vst.msk [vmem:[%s2479_s17 + $0x18] sm:$0xff] %vm1751_vm2, %v1722_v3 }
 0x2bd   : > { %1765 = vst.msk [vmem:[%s2479_s17 + $0x68] sm:$0xff] %vm1751_vm2, %v1732_v44  ;;  %v1508_v12 = vpop.permute.xlu1 %1507  ;;  %v1528_v36 = vpop.permute.xlu2 %1527 }
 0x2be   : > { %1754 = vst.msk [vmem:[%s2479_s17 + $0x10] sm:$0xff] %vm1751_vm2, %v1721_v56  ;;  %v1597_v38 = vadd.f32 %v1508_v12, %v2921_v17  ;;  %v1607_v4 = vadd.f32 %v1528_v36, %v1479_v55  ;;  %v1506_v53 = vpop.permute.xlu0 %1505  ;;  %v1354_v17 = vadd.f32 %v2888_v13, %v2729_v47  ;;  %v1645_v12 = vld [vmem:[%s2469_s13 + $0xb0] sm:$0xff]  ;;  %v1634_v36 = vld [vmem:[%s2469_s13 + $0x58] sm:$0xff] }
 0x2bf   : > { %v1596_v58 = vadd.f32 %v1506_v53, %v2960_v15  ;;  %v1632_v15 = vld [vmem:[%s2469_s13 + $0x48] sm:$0xff] }
 0x2c0   : > { %v1661_v50 = vadd.f32 %v1629_v26, %v1597_v38  ;;  %v1671_v33 = vadd.f32 %v1639_v24, %v1607_v4  ;;  %v1482_v2 = vadd.f32 %v3040_v61, %v1354_v17  ;;  %v1696_v61 = vld [vmem:[%s2474_s15 + $0x48] sm:$0xff]  ;;  %v1709_v4 = vld [vmem:[%s2474_s15 + $0xb0] sm:$0xff] }
 0x2c1   : > { %v1660_v18 = vadd.f32 %v1628_v20, %v1596_v58 }
 0x2c2   : > { %v1725_v0 = vadd.f32 %v1693_v35, %v1661_v50  ;;  %v1735_v54 = vadd.f32 %v1703_v1, %v1671_v33  ;;  %v1698_v1 = vld [vmem:[%s2474_s15 + $0x58] sm:$0xff]  ;;  %v3274_v50 = vld [vmem:[#allocation4_spill] sm:$0xff] }
 0x2c3   : > { %v1724_v52 = vadd.f32 %v1692_v7, %v1660_v18 }
 0x2c4   : > { %1758 = vst.msk [vmem:[%s2479_s17 + $0x30] sm:$0xff] %vm1751_vm2, %v1725_v0 }
 0x2c5   : > { %1768 = vst.msk [vmem:[%s2479_s17 + $0x80] sm:$0xff] %vm1751_vm2, %v1735_v54  ;;  %v1514_v25 = vpop.permute.xlu1 %1513  ;;  %v1534_v29 = vpop.permute.xlu2 %1533  ;;  %v1648_v54 = vld [vmem:[%s2469_s13 + $0xc8] sm:$0xff] }
 0x2c6   : > { %1757 = vst.msk [vmem:[%s2479_s17 + $0x28] sm:$0xff] %vm1751_vm2, %v1724_v52  ;;  %v1600_v47 = vadd.f32 %v1514_v25, %v2932_v27  ;;  %v1610_v13 = vadd.f32 %v1534_v29, %v1482_v2  ;;  %v1512_v5 = vpop.permute.xlu0 %1511  ;;  %v1357_v27 = vadd.f32 %v2897_v16, %v2744_v57 }
 0x2c7   : > { %v1599_v37 = vadd.f32 %v1512_v5, %v2975_v43  ;;  %v1635_v43 = vld [vmem:[%s2469_s13 + $0x60] sm:$0xff] }
 0x2c8   : > { %v1664_v22 = vadd.f32 %v1632_v15, %v1600_v47  ;;  %v1674_v6 = vadd.f32 %v1642_v41, %v1610_v13  ;;  %v1485_v55 = vadd.f32 %v3050_v42, %v1357_v27  ;;  %v1699_v42 = vld [vmem:[%s2474_s15 + $0x60] sm:$0xff]  ;;  %v1637_v15 = vld [vmem:[%s2469_s13 + $0x70] sm:$0xff]  ;;  %v1712_v41 = vld [vmem:[%s2474_s15 + $0xc8] sm:$0xff] }
 0x2c9   : > { %v1663_v31 = vadd.f32 %v1631_v62, %v1599_v37  ;;  %v1701_v62 = vld [vmem:[%s2474_s15 + $0x70] sm:$0xff] }
 0x2ca   : > { %v1728_v3 = vadd.f32 %v1696_v61, %v1664_v22  ;;  %v1738_v44 = vadd.f32 %v1706_v49, %v1674_v6  ;;  %v3275_v61 = vld [vmem:[#allocation5_spill] sm:$0xff] }
 0x2cb   : > { %v1727_v56 = vadd.f32 %v1695_v30, %v1663_v31  ;;  %v1651_v31 = vld [vmem:[%s2469_s13 + $0xe0] sm:$0xff] }
 0x2cc   : > { %1761 = vst.msk [vmem:[%s2479_s17 + $0x48] sm:$0xff] %vm1751_vm2, %v1728_v3 }
 0x2cd   : > { %1771 = vst.msk [vmem:[%s2479_s17 + $0x98] sm:$0xff] %vm1751_vm2, %v1738_v44  ;;  %v1520_v26 = vpop.permute.xlu1 %1519  ;;  %v1540_v24 = vpop.permute.xlu2 %1539  ;;  %v1640_v44 = vld [vmem:[%s2469_s13 + $0x88] sm:$0xff] }
 0x2ce   : > { %1760 = vst.msk [vmem:[%s2479_s17 + $0x40] sm:$0xff] %vm1751_vm2, %v1727_v56  ;;  %v1603_v57 = vadd.f32 %v1520_v26, %v2947_v51  ;;  %v1613_v16 = vadd.f32 %v1540_v24, %v1485_v55  ;;  %v1518_v38 = vpop.permute.xlu0 %1517  ;;  %v1360_v51 = vadd.f32 %v3274_v50, %v2759_v8  ;;  %v1715_v55 = vld [vmem:[%s2474_s15 + $0xe0] sm:$0xff]  ;;  %v1704_v24 = vld [vmem:[%s2474_s15 + $0x88] sm:$0xff] }
 0x2cf   : > { %v1602_v20 = vadd.f32 %v1518_v38, %v2990_v40  ;;  %v1638_v40 = vld [vmem:[%s2469_s13 + $0x78] sm:$0xff]  ;;  %v1708_v50 = vld [vmem:[%s2474_s15 + $0xa8] sm:$0xff] }
 0x2d0   : > { %v1667_v53 = vadd.f32 %v1635_v43, %v1603_v57  ;;  %v1677_v35 = vadd.f32 %v1645_v12, %v1613_v16  ;;  %v1488_v17 = vadd.f32 %v3063_v46, %v1360_v51  ;;  %v1702_v46 = vld [vmem:[%s2474_s15 + $0x78] sm:$0xff]  ;;  %v3276_v16 = vld [vmem:[#allocation6_spill] sm:$0xff] }
 0x2d1   : > { %v1666_v58 = vadd.f32 %v1634_v36, %v1602_v20  ;;  %v1718_v51 = vld [vmem:[%s2474_s15 + $0xf8] sm:$0xff] }
 0x2d2   : > { %v1731_v33 = vadd.f32 %v1699_v42, %v1667_v53  ;;  %v1741_v7 = vadd.f32 %v1709_v4, %v1677_v35  ;;  %v1654_v53 = vld [vmem:[%s2469_s13 + $0xf8] sm:$0xff] }
 0x2d3   : > { %v1730_v18 = vadd.f32 %v1698_v1, %v1666_v58  ;;  %v1643_v58 = vld [vmem:[%s2469_s13 + $0xa0] sm:$0xff] }
 0x2d4   : > { %1764 = vst.msk [vmem:[%s2479_s17 + $0x60] sm:$0xff] %vm1751_vm2, %v1731_v33 }
 0x2d5   : > { %1774 = vst.msk [vmem:[%s2479_s17 + $0xb0] sm:$0xff] %vm1751_vm2, %v1741_v7  ;;  %v1526_v0 = vpop.permute.xlu1 %1525  ;;  %v1546_v52 = vpop.permute.xlu2 %1545 }
 0x2d6   : > { %1763 = vst.msk [vmem:[%s2479_s17 + $0x58] sm:$0xff] %vm1751_vm2, %v1730_v18  ;;  %v1606_v8 = vadd.f32 %v1526_v0, %v2962_v21  ;;  %v1616_v2 = vadd.f32 %v1546_v52, %v1488_v17  ;;  %v1524_v25 = vpop.permute.xlu0 %1523  ;;  %v1363_v21 = vadd.f32 %v3275_v61, %v2774_v23  ;;  %v1707_v17 = vld [vmem:[%s2474_s15 + $0xa0] sm:$0xff] }
 0x2d7   : > { %v1605_v29 = vadd.f32 %v1524_v25, %v3005_v39  ;;  %v1641_v39 = vld [vmem:[%s2469_s13 + $0x90] sm:$0xff]  ;;  %v1711_v25 = vld [vmem:[%s2474_s15 + $0xc0] sm:$0xff] }
 0x2d8   : > { %v1670_v47 = vadd.f32 %v1638_v40, %v1606_v8  ;;  %v1680_v13 = vadd.f32 %v1648_v54, %v1616_v2  ;;  %v1491_v6 = vadd.f32 %v3076_v11, %v1363_v21  ;;  %v1705_v11 = vld [vmem:[%s2474_s15 + $0x90] sm:$0xff]  ;;  %v1646_v2 = vld [vmem:[%s2469_s13 + $0xb8] sm:$0xff] }
 0x2d9   : > { %v1669_v5 = vadd.f32 %v1637_v15, %v1605_v29  ;;  %v1710_v29 = vld [vmem:[%s2474_s15 + $0xb8] sm:$0xff]  ;;  %v1649_v21 = vld [vmem:[%s2469_s13 + $0xd0] sm:$0xff] }
 0x2da   : > { %v1734_v49 = vadd.f32 %v1702_v46, %v1670_v47  ;;  %v1744_v37 = vadd.f32 %v1712_v41, %v1680_v13 }
 0x2db   : > { %v1733_v22 = vadd.f32 %v1701_v62, %v1669_v5 }
 0x2dc   : > { %1767 = vst.msk [vmem:[%s2479_s17 + $0x78] sm:$0xff] %vm1751_vm2, %v1734_v49  ;;  %v1714_v49 = vld [vmem:[%s2474_s15 + $0xd8] sm:$0xff] }
 0x2dd   : > { %1777 = vst.msk [vmem:[%s2479_s17 + $0xc8] sm:$0xff] %vm1751_vm2, %v1744_v37  ;;  %v1532_v30 = vpop.permute.xlu1 %1531  ;;  %v1552_v27 = vpop.permute.xlu2 %1551 }
 0x2de   : > { %1766 = vst.msk [vmem:[%s2479_s17 + $0x70] sm:$0xff] %vm1751_vm2, %v1733_v22  ;;  %v1609_v23 = vadd.f32 %v1532_v30, %v2977_v59  ;;  %v1619_v3 = vadd.f32 %v1552_v27, %v1491_v6  ;;  %v1530_v56 = vpop.permute.xlu0 %1529  ;;  %v1366_v59 = vadd.f32 %v3276_v16, %v2786_v32  ;;  %v1713_v6 = vld [vmem:[%s2474_s15 + $0xd0] sm:$0xff] }
 0x2df   : > { %v1608_v43 = vadd.f32 %v1530_v56, %v3020_v10  ;;  %v1644_v10 = vld [vmem:[%s2469_s13 + $0xa8] sm:$0xff]  ;;  %v1653_v27 = vld [vmem:[%s2469_s13 + $0xf0] sm:$0xff] }
 0x2e0   : > { %v1673_v26 = vadd.f32 %v1641_v39, %v1609_v23  ;;  %v1683_v12 = vadd.f32 %v1651_v31, %v1619_v3  ;;  %v1494_v4 = vadd.f32 %v3087_v45, %v1366_v59  ;;  %v1652_v3 = vld [vmem:[%s2469_s13 + $0xe8] sm:$0xff]  ;;  %v1717_v56 = vld [vmem:[%s2474_s15 + $0xf0] sm:$0xff] }
 0x2e1   : > { %v1672_v57 = vadd.f32 %v1640_v44, %v1608_v43 }
 0x2e2   : > { %v1737_v36 = vadd.f32 %v1705_v11, %v1673_v26  ;;  %v1747_v38 = vadd.f32 %v1715_v55, %v1683_v12  ;;  %v1716_v55 = vld [vmem:[%s2474_s15 + $0xe8] sm:$0xff] }
 0x2e3   : > { %v1736_v42 = vadd.f32 %v1704_v24, %v1672_v57 }
 0x2e4   : > { %1770 = vst.msk [vmem:[%s2479_s17 + $0x90] sm:$0xff] %vm1751_vm2, %v1737_v36 }
 0x2e5   : > { %1780 = vst.msk [vmem:[%s2479_s17 + $0xe0] sm:$0xff] %vm1751_vm2, %v1747_v38  ;;  %v1538_v20 = vpop.permute.xlu1 %1537  ;;  %v1558_v35 = vpop.permute.xlu2 %1557 }
 0x2e6   : > { %1769 = vst.msk [vmem:[%s2479_s17 + $0x88] sm:$0xff] %vm1751_vm2, %v1736_v42  ;;  %v1612_v32 = vadd.f32 %v1538_v20, %v2992_v63  ;;  %v1622_v1 = vadd.f32 %v1558_v35, %v1494_v4  ;;  %v1536_v45 = vpop.permute.xlu0 %1535  ;;  %v1647_v63 = vld [vmem:[%s2469_s13 + $0xc0] sm:$0xff] }
 0x2e7   : > { %v1611_v33 = vadd.f32 %v1536_v45, %v3036_v14 }
 0x2e8   : > { %v1676_v7 = vadd.f32 %v1644_v10, %v1612_v32  ;;  %v1686_v18 = vadd.f32 %v1654_v53, %v1622_v1 }
 0x2e9   : > { %v1675_v40 = vadd.f32 %v1643_v58, %v1611_v33 }
 0x2ea   : > { %v1740_v0 = vadd.f32 %v1708_v50, %v1676_v7  ;;  %v1750_v54 = vadd.f32 %v1718_v51, %v1686_v18 }
 0x2eb   : > { %v1739_v52 = vadd.f32 %v1707_v17, %v1675_v40 }
 0x2ec   : > { %1773 = vst.msk [vmem:[%s2479_s17 + $0xa8] sm:$0xff] %vm1751_vm2, %v1740_v0 }
 0x2ed   : > { %1783 = vst.msk [vmem:[%s2479_s17 + $0xf8] sm:$0xff] %vm1751_vm2, %v1750_v54  ;;  %v1544_v8 = vpop.permute.xlu1 %1543 }
 0x2ee   : > { %1772 = vst.msk [vmem:[%s2479_s17 + $0xa0] sm:$0xff] %vm1751_vm2, %v1739_v52  ;;  %v1615_v14 = vadd.f32 %v1544_v8, %v3007_v34  ;;  %v1542_v15 = vpop.permute.xlu0 %1541  ;;  %v1650_v34 = vld [vmem:[%s2469_s13 + $0xd8] sm:$0xff] }
 0x2ef   : > { %v1614_v46 = vadd.f32 %v1542_v15, %v3048_v28 }
 0x2f0   : > { %v1679_v41 = vadd.f32 %v1647_v63, %v1615_v14 }
 0x2f1   : > { %v1678_v47 = vadd.f32 %v1646_v2, %v1614_v46 }
 0x2f2   : > { %v1743_v13 = vadd.f32 %v1711_v25, %v1679_v41 }
 0x2f3   : > { %v1742_v62 = vadd.f32 %v1710_v29, %v1678_v47 }
 0x2f4   : > { %1776 = vst.msk [vmem:[%s2479_s17 + $0xc0] sm:$0xff] %vm1751_vm2, %v1743_v13 }
 0x2f5   : > { %1775 = vst.msk [vmem:[%s2479_s17 + $0xb8] sm:$0xff] %vm1751_vm2, %v1742_v62  ;;  %v1550_v5 = vpop.permute.xlu1 %1549 }
 0x2f6   : > { %v1618_v61 = vadd.f32 %v1550_v5, %v3022_v48  ;;  %v1548_v28 = vpop.permute.xlu0 %1547 }
 0x2f7   : > { %v1617_v37 = vadd.f32 %v1548_v28, %v3061_v60 }
 0x2f8   : > { %v1682_v22 = vadd.f32 %v1650_v34, %v1618_v61 }
 0x2f9   : > { %v1681_v39 = vadd.f32 %v1649_v21, %v1617_v37 }
 0x2fa   : > { %v1746_v30 = vadd.f32 %v1714_v49, %v1682_v22 }
 0x2fb   : > { %v1745_v31 = vadd.f32 %v1713_v6, %v1681_v39 }
 0x2fc   : > { %1779 = vst.msk [vmem:[%s2479_s17 + $0xd8] sm:$0xff] %vm1751_vm2, %v1746_v30 }
 0x2fd   : > { %1778 = vst.msk [vmem:[%s2479_s17 + $0xd0] sm:$0xff] %vm1751_vm2, %v1745_v31  ;;  %v1556_v48 = vpop.permute.xlu1 %1555 }
 0x2fe   : > { %v1621_v23 = vadd.f32 %v1556_v48, %v3038_v19  ;;  %v1554_v44 = vpop.permute.xlu0 %1553 }
 0x2ff   : > { %v1620_v60 = vadd.f32 %v1554_v44, %v3074_v9 }
 0x300   : > { %v1685_v11 = vadd.f32 %v1653_v27, %v1621_v23 }
 0x301   : > { %v1684_v43 = vadd.f32 %v1652_v3, %v1620_v60 }
 0x302   : > { %v1749_v26 = vadd.f32 %v1717_v56, %v1685_v11 }
 0x303   : > { %v1748_v12 = vadd.f32 %v1716_v55, %v1684_v43 }
 0x304   : > { %1782 = vst.msk [vmem:[%s2479_s17 + $0xf0] sm:$0xff] %vm1751_vm2, %v1749_v26 }
 0x305   : > { %1781 = vst.msk [vmem:[%s2479_s17 + $0xe8] sm:$0xff] %vm1751_vm2, %v1748_v12 }
 0x306 PF: > { %s15_s24 = sadd.s32 1, %s2292_s24   ;;  %s3277_s18 = smov %s2272_s19 }
 0x307   : > { %p12_p0 = scmp.ge.s32.totalorder %s15_s24, 14   ;;  %s3278_s19 = smov %s2379_s6 }
 0x308   : > { %s3279_s20 = smov %s2284_s22  ;;  %s3280_s21 = smov %s2288_s23 }
 0x309   : > { %s3281_s22 = smov %s3284_s25  ;;  %s3282_s23 = smov %s3288_s26 }
 0x30a   :  { %14 = sbr.rel (!%p12_p0) target bundleno = 4 (0x4), region = 130 }

// kernel: encoder_forward.9
= control target key start
LH: loop header
LB: loop body
LE: loop exit
PB: predicated region body
PF: predicated region fallthrough
CT: control target
= control target key end

     0   :  { %s702_s12 = smov 0   ;;  %s845_s0 = inlined_call_operand.vmem [shape: bf16[1024,4], index: 0, kind: input, shape index: {}]   ;;  %s846_s1 = inlined_call_operand.vmem [shape: bf16[4,2], index: 1, kind: input, shape index: {}]   ;;  %s847_s2 = inlined_call_operand.vmem [shape: f32[1,2], index: 2, kind: input, shape index: {}]   ;;  %s848_s3 = inlined_call_operand.vmem [shape: f32[1024,2], index: 3, kind: output, shape index: {}]  }
   0x1 LB: > { %s555_s13 = sadd.s32 4294967295, %s680_s12   ;;  %p559_p0 = scmp.ge.s32.totalorder %s680_s12, 1  ;;  %s680_s12 = sphi %s702_s12, %s13_s12  }
   0x2   : > { %p138_p1 = scmp.lt.s32.totalorder %s680_s12, 5 }
   0x4   : > { %p139_p2 = pnand %p559_p0, %p138_p1 }
   0x5   : > { %s560_s16 = sshll.u32 (!%p139_p2), %s555_s13, 5 }
   0x6   : > { %142 = sbr.rel (%p139_p2) target bundleno = 211 (0xd3), region = 32  ;;  %p163_p3 = scmp.lt.s32.totalorder (!%p139_p2), %s560_s16, 127 }
   0xb   : > { %v207_v0 = vld [vmem:[%s846_s1] sm:$0x3]  ;;  %vm341_vm0 = vcmask 1041408   ;;  %s850_s16 = smov (!%p163_p3, %s560_s16), 127  ;;  %vm292_vm1 = vcmask 31744   ;;  %vm466_vm2 = vcmask 15360  }
   0xc   : > { %v343_v1 = vsel %vm341_vm0, %v207_v0, 0  ;;  %s561_s17 = sshll.u32 %s850_s16, 2  ;;  %v738_v18 = vld [vmem:[%s847_s2] ss:$0 sm:$0xff]  ;;  %s563_s23 = sshll.u32 %s850_s16, 3 }
   0xd   : > { %352 = vmatpush.bf16.msra.mxu0 %v343_v1  ;;  %662 = vmatpush.bf16.msra.mxu1 %v343_v1  ;;  %s166_s20 = scalar_lea.vmem %s845_s0, %s561_s17  ;;  %s746_s26 = scalar_lea.vmem %s848_s3, %s563_s23 }
   0xe   : > { %663 = vmatpush.bf16.msra.mxu2 %v343_v1  ;;  %664 = vmatpush.bf16.msra.mxu3 %v343_v1  ;;  %v646_v2 = vld [vmem:[%s166_s20] sm:$0xff]  ;;  %v647_v6 = vld [vmem:[%s166_s20 + $0x8] sm:$0xff]  ;;  %v648_v10 = vld [vmem:[%s166_s20 + $0x10] sm:$0xff] }
   0xf   : > { %v650_v3 = vld [vmem:[%s166_s20 + $0x20] sm:$0xff]  ;;  %v651_v7 = vld [vmem:[%s166_s20 + $0x28] sm:$0xff]  ;;  %v652_v11 = vld [vmem:[%s166_s20 + $0x30] sm:$0xff] }
  0x10   : > { %v654_v4 = vld [vmem:[%s166_s20 + $0x40] sm:$0xff]  ;;  %628 = vmatmul.msk.bf16.vlgmr.msra.gmra.mxu0 %vm292_vm1, %v646_v2  ;;  %632 = vmatmul.msk.bf16.vlgmr.msra.gmra.mxu1 %vm292_vm1, %v650_v3  ;;  %v655_v8 = vld [vmem:[%s166_s20 + $0x48] sm:$0xff]  ;;  %v656_v12 = vld [vmem:[%s166_s20 + $0x50] sm:$0xff] }
  0x11   : > { %v658_v5 = vld [vmem:[%s166_s20 + $0x60] sm:$0xff]  ;;  %636 = vmatmul.msk.bf16.vlgmr.msra.gmra.mxu2 %vm292_vm1, %v654_v4  ;;  %v659_v9 = vld [vmem:[%s166_s20 + $0x68] sm:$0xff]  ;;  %v660_v13 = vld [vmem:[%s166_s20 + $0x70] sm:$0xff] }
  0x12   : > { %640 = vmatmul.msk.bf16.vlgmr.msra.gmra.mxu3 %vm292_vm1, %v658_v5  ;;  %v649_v14 = vld [vmem:[%s166_s20 + $0x18] sm:$0xff] }
  0x13   : > { %v653_v15 = vld [vmem:[%s166_s20 + $0x38] sm:$0xff] }
  0x14   : > { %v657_v16 = vld [vmem:[%s166_s20 + $0x58] sm:$0xff] }
  0x15   : > { %v661_v17 = vld [vmem:[%s166_s20 + $0x78] sm:$0xff] }
  0x20   : > { %629 = vmatmul.msk.bf16.gmra.mxu0 %vm292_vm1, %v647_v6  ;;  %633 = vmatmul.msk.bf16.gmra.mxu1 %vm292_vm1, %v651_v7 }
  0x21   : > { %637 = vmatmul.msk.bf16.gmra.mxu2 %vm292_vm1, %v655_v8 }
  0x22   : > { %641 = vmatmul.msk.bf16.gmra.mxu3 %vm292_vm1, %v659_v9 }
  0x30   : > { %630 = vmatmul.msk.bf16.gmra.mxu0 %vm292_vm1, %v648_v10  ;;  %634 = vmatmul.msk.bf16.gmra.mxu1 %vm292_vm1, %v652_v11 }
  0x31   : > { %638 = vmatmul.msk.bf16.gmra.mxu2 %vm292_vm1, %v656_v12 }
  0x32   : > { %642 = vmatmul.msk.bf16.gmra.mxu3 %vm292_vm1, %v660_v13 }
  0x40   : > { %631 = vmatmul.msk.bf16.gmra.mxu0 %vm292_vm1, %v649_v14  ;;  %635 = vmatmul.msk.bf16.gmra.mxu1 %vm292_vm1, %v653_v15 }
  0x41   : > { %639 = vmatmul.msk.bf16.gmra.mxu2 %vm292_vm1, %v657_v16 }
  0x42   : > { %643 = vmatmul.msk.bf16.gmra.mxu3 %vm292_vm1, %v661_v17 }
  0x8d   : > { %v354_v19 = vpop.f32.mrf.mxu0  ;;  %v374_v20 = vpop.f32.mrf.mxu1 }
  0x8e   : > { %v355_v21 = vadd.f32 %v738_v18, %v354_v19  ;;  %v375_v22 = vadd.f32 %v738_v18, %v374_v20 }
  0x90   : > { %v434_v23 = vmax.f32 %v355_v21, 0.0  ;;  %v442_v24 = vmax.f32 %v375_v22, 0.0 }
  0x92   : > { %467 = vst.msk [vmem:[%s746_s26] sm:$0xff] %vm466_vm2, %v434_v23 }
  0x93   : > { %475 = vst.msk [vmem:[%s746_s26 + $0x40] sm:$0xff] %vm466_vm2, %v442_v24 }
  0x94   : > { %v394_v25 = vpop.f32.mrf.mxu2 }
  0x95   : > { %v414_v26 = vpop.f32.mrf.mxu3  ;;  %v395_v27 = vadd.f32 %v738_v18, %v394_v25  ;;  %v356_v29 = vpop.f32.mrf.mxu0 }
  0x96   : > { %v415_v28 = vadd.f32 %v738_v18, %v414_v26  ;;  %v376_v30 = vpop.f32.mrf.mxu1  ;;  %v357_v31 = vadd.f32 %v738_v18, %v356_v29 }
  0x97   : > { %v377_v32 = vadd.f32 %v738_v18, %v376_v30  ;;  %v450_v33 = vmax.f32 %v395_v27, 0.0 }
  0x98   : > { %v458_v34 = vmax.f32 %v415_v28, 0.0  ;;  %v435_v35 = vmax.f32 %v357_v31, 0.0 }
  0x99   : > { %v443_v36 = vmax.f32 %v377_v32, 0.0  ;;  %483 = vst.msk [vmem:[%s746_s26 + $0x80] sm:$0xff] %vm466_vm2, %v450_v33 }
  0x9a   : > { %491 = vst.msk [vmem:[%s746_s26 + $0xc0] sm:$0xff] %vm466_vm2, %v458_v34 }
  0x9b   : > { %468 = vst.msk [vmem:[%s746_s26 + $0x8] sm:$0xff] %vm466_vm2, %v435_v35 }
  0x9c   : > { %476 = vst.msk [vmem:[%s746_s26 + $0x48] sm:$0xff] %vm466_vm2, %v443_v36  ;;  %v396_v37 = vpop.f32.mrf.mxu2 }
  0x9d   : > { %v416_v38 = vpop.f32.mrf.mxu3  ;;  %v397_v39 = vadd.f32 %v738_v18, %v396_v37  ;;  %v359_v41 = vpop.f32.mrf.mxu0 }
  0x9e   : > { %v417_v40 = vadd.f32 %v738_v18, %v416_v38  ;;  %v379_v42 = vpop.f32.mrf.mxu1  ;;  %v360_v43 = vadd.f32 %v738_v18, %v359_v41 }
  0x9f   : > { %v380_v44 = vadd.f32 %v738_v18, %v379_v42  ;;  %v451_v45 = vmax.f32 %v397_v39, 0.0 }
  0xa0   : > { %v459_v46 = vmax.f32 %v417_v40, 0.0  ;;  %v436_v47 = vmax.f32 %v360_v43, 0.0 }
  0xa1   : > { %v444_v48 = vmax.f32 %v380_v44, 0.0  ;;  %484 = vst.msk [vmem:[%s746_s26 + $0x88] sm:$0xff] %vm466_vm2, %v451_v45 }
  0xa2   : > { %492 = vst.msk [vmem:[%s746_s26 + $0xc8] sm:$0xff] %vm466_vm2, %v459_v46 }
  0xa3   : > { %469 = vst.msk [vmem:[%s746_s26 + $0x10] sm:$0xff] %vm466_vm2, %v436_v47 }
  0xa4   : > { %477 = vst.msk [vmem:[%s746_s26 + $0x50] sm:$0xff] %vm466_vm2, %v444_v48  ;;  %v399_v49 = vpop.f32.mrf.mxu2 }
  0xa5   : > { %v419_v50 = vpop.f32.mrf.mxu3  ;;  %v400_v51 = vadd.f32 %v738_v18, %v399_v49  ;;  %v361_v53 = vpop.f32.mrf.mxu0 }
  0xa6   : > { %v420_v52 = vadd.f32 %v738_v18, %v419_v50  ;;  %v381_v54 = vpop.f32.mrf.mxu1  ;;  %v362_v55 = vadd.f32 %v738_v18, %v361_v53 }
  0xa7   : > { %v382_v56 = vadd.f32 %v738_v18, %v381_v54  ;;  %v452_v57 = vmax.f32 %v400_v51, 0.0 }
  0xa8   : > { %v460_v58 = vmax.f32 %v420_v52, 0.0  ;;  %v437_v59 = vmax.f32 %v362_v55, 0.0 }
  0xa9   : > { %v445_v60 = vmax.f32 %v382_v56, 0.0  ;;  %485 = vst.msk [vmem:[%s746_s26 + $0x90] sm:$0xff] %vm466_vm2, %v452_v57 }
  0xaa   : > { %493 = vst.msk [vmem:[%s746_s26 + $0xd0] sm:$0xff] %vm466_vm2, %v460_v58 }
  0xab   : > { %470 = vst.msk [vmem:[%s746_s26 + $0x18] sm:$0xff] %vm466_vm2, %v437_v59 }
  0xac   : > { %478 = vst.msk [vmem:[%s746_s26 + $0x58] sm:$0xff] %vm466_vm2, %v445_v60  ;;  %v401_v61 = vpop.f32.mrf.mxu2 }
  0xad   : > { %v421_v62 = vpop.f32.mrf.mxu3  ;;  %v402_v63 = vadd.f32 %v738_v18, %v401_v61  ;;  %v364_v1 = vpop.f32.mrf.mxu0 }
  0xae   : > { %v422_v0 = vadd.f32 %v738_v18, %v421_v62  ;;  %v384_v2 = vpop.f32.mrf.mxu1  ;;  %v365_v3 = vadd.f32 %v738_v18, %v364_v1 }
  0xaf   : > { %v385_v4 = vadd.f32 %v738_v18, %v384_v2  ;;  %v453_v5 = vmax.f32 %v402_v63, 0.0 }
  0xb0   : > { %v461_v6 = vmax.f32 %v422_v0, 0.0  ;;  %v438_v7 = vmax.f32 %v365_v3, 0.0 }
  0xb1   : > { %v446_v8 = vmax.f32 %v385_v4, 0.0  ;;  %486 = vst.msk [vmem:[%s746_s26 + $0x98] sm:$0xff] %vm466_vm2, %v453_v5 }
  0xb2   : > { %494 = vst.msk [vmem:[%s746_s26 + $0xd8] sm:$0xff] %vm466_vm2, %v461_v6 }
  0xb3   : > { %471 = vst.msk [vmem:[%s746_s26 + $0x20] sm:$0xff] %vm466_vm2, %v438_v7 }
  0xb4   : > { %479 = vst.msk [vmem:[%s746_s26 + $0x60] sm:$0xff] %vm466_vm2, %v446_v8  ;;  %v404_v9 = vpop.f32.mrf.mxu2 }
  0xb5   : > { %v424_v10 = vpop.f32.mrf.mxu3  ;;  %v405_v11 = vadd.f32 %v738_v18, %v404_v9  ;;  %v366_v13 = vpop.f32.mrf.mxu0 }
  0xb6   : > { %v425_v12 = vadd.f32 %v738_v18, %v424_v10  ;;  %v386_v14 = vpop.f32.mrf.mxu1  ;;  %v367_v15 = vadd.f32 %v738_v18, %v366_v13 }
  0xb7   : > { %v387_v16 = vadd.f32 %v738_v18, %v386_v14  ;;  %v454_v17 = vmax.f32 %v405_v11, 0.0 }
  0xb8   : > { %v462_v19 = vmax.f32 %v425_v12, 0.0  ;;  %v439_v20 = vmax.f32 %v367_v15, 0.0 }
  0xb9   : > { %v447_v21 = vmax.f32 %v387_v16, 0.0  ;;  %487 = vst.msk [vmem:[%s746_s26 + $0xa0] sm:$0xff] %vm466_vm2, %v454_v17 }
  0xba   : > { %495 = vst.msk [vmem:[%s746_s26 + $0xe0] sm:$0xff] %vm466_vm2, %v462_v19 }
  0xbb   : > { %472 = vst.msk [vmem:[%s746_s26 + $0x28] sm:$0xff] %vm466_vm2, %v439_v20 }
  0xbc   : > { %480 = vst.msk [vmem:[%s746_s26 + $0x68] sm:$0xff] %vm466_vm2, %v447_v21  ;;  %v406_v22 = vpop.f32.mrf.mxu2 }
  0xbd   : > { %v426_v23 = vpop.f32.mrf.mxu3  ;;  %v407_v24 = vadd.f32 %v738_v18, %v406_v22  ;;  %v369_v26 = vpop.f32.mrf.mxu0 }
  0xbe   : > { %v427_v25 = vadd.f32 %v738_v18, %v426_v23  ;;  %v389_v27 = vpop.f32.mrf.mxu1  ;;  %v370_v28 = vadd.f32 %v738_v18, %v369_v26 }
  0xbf   : > { %v390_v29 = vadd.f32 %v738_v18, %v389_v27  ;;  %v455_v30 = vmax.f32 %v407_v24, 0.0 }
  0xc0   : > { %v463_v31 = vmax.f32 %v427_v25, 0.0  ;;  %v440_v32 = vmax.f32 %v370_v28, 0.0 }
  0xc1   : > { %v448_v33 = vmax.f32 %v390_v29, 0.0  ;;  %488 = vst.msk [vmem:[%s746_s26 + $0xa8] sm:$0xff] %vm466_vm2, %v455_v30 }
  0xc2   : > { %496 = vst.msk [vmem:[%s746_s26 + $0xe8] sm:$0xff] %vm466_vm2, %v463_v31 }
  0xc3   : > { %473 = vst.msk [vmem:[%s746_s26 + $0x30] sm:$0xff] %vm466_vm2, %v440_v32 }
  0xc4   : > { %481 = vst.msk [vmem:[%s746_s26 + $0x70] sm:$0xff] %vm466_vm2, %v448_v33  ;;  %v409_v34 = vpop.f32.mrf.mxu2 }
  0xc5   : > { %v429_v35 = vpop.f32.mrf.mxu3  ;;  %v410_v36 = vadd.f32 %v738_v18, %v409_v34  ;;  %v371_v38 = vpop.f32.mrf.mxu0 }
  0xc6   : > { %v430_v37 = vadd.f32 %v738_v18, %v429_v35  ;;  %v391_v39 = vpop.f32.mrf.mxu1  ;;  %v372_v40 = vadd.f32 %v738_v18, %v371_v38 }
  0xc7   : > { %v392_v41 = vadd.f32 %v738_v18, %v391_v39  ;;  %v456_v42 = vmax.f32 %v410_v36, 0.0 }
  0xc8   : > { %v464_v43 = vmax.f32 %v430_v37, 0.0  ;;  %v441_v44 = vmax.f32 %v372_v40, 0.0 }
  0xc9   : > { %v449_v45 = vmax.f32 %v392_v41, 0.0  ;;  %489 = vst.msk [vmem:[%s746_s26 + $0xb0] sm:$0xff] %vm466_vm2, %v456_v42 }
  0xca   : > { %497 = vst.msk [vmem:[%s746_s26 + $0xf0] sm:$0xff] %vm466_vm2, %v464_v43 }
  0xcb   : > { %474 = vst.msk [vmem:[%s746_s26 + $0x38] sm:$0xff] %vm466_vm2, %v441_v44 }
  0xcc   : > { %482 = vst.msk [vmem:[%s746_s26 + $0x78] sm:$0xff] %vm466_vm2, %v449_v45  ;;  %v411_v46 = vpop.f32.mrf.mxu2 }
  0xcd   : > { %v431_v47 = vpop.f32.mrf.mxu3  ;;  %v412_v48 = vadd.f32 %v738_v18, %v411_v46 }
  0xce   : > { %v432_v49 = vadd.f32 %v738_v18, %v431_v47 }
  0xcf   : > { %v457_v50 = vmax.f32 %v412_v48, 0.0 }
  0xd0   : > { %v465_v51 = vmax.f32 %v432_v49, 0.0 }
  0xd1   : > { %490 = vst.msk [vmem:[%s746_s26 + $0xb8] sm:$0xff] %vm466_vm2, %v457_v50 }
  0xd2   : > { %498 = vst.msk [vmem:[%s746_s26 + $0xf8] sm:$0xff] %vm466_vm2, %v465_v51 }
  0xd3 PF: > { %s13_s12 = sadd.s32 1, %s680_s12  }
  0xd4   : > { %p10_p4 = scmp.ge.s32.totalorder %s13_s12, 6  }
  0xd6   :  { %12 = sbr.rel (!%p10_p4) target bundleno = 1 (0x1), region = 62 }

</bundles_post_ra>
